<compile_context>
chip_gen: v5e
topology: v5e:2x2
jax: 0.10.0
libtpu: 0.0.40
codegen_flags: <defaults>
</compile_context>

<pallas_src>
import math
from functools import partial

import jax
import jax.numpy as jnp
from jax.experimental import pallas as pl
from jax.experimental.pallas import tpu as pltpu


# ----------------------------------------------------------------------------
# Kernel
# ----------------------------------------------------------------------------

def _subpixel_conv_kernel(main_ref, halo_ref, w_ref, b_ref, o_ref, win_ref, *,
                          tr, W, C, pack_taps):
    """One (batch, row-tile, cout-tile) grid point.

    main_ref : (1, tr, W+2, C)      W-padded input rows of this tile
    halo_ref : (1, 1, 2, W+2, C)    rows above/below the tile (zero at edges)
    w_ref    : (9*C, tn)            folded sub-pixel conv weights
    b_ref    : (1, tn)              folded bias (f32)
    o_ref    : (1, tr*W, tn)        sub-pixel output tile (compute dtype)
    win_ref  : (tr+2, W+2, C)       VMEM scratch: assembled row window
    """
    # Assemble the (tr + 2)-row window: [top halo, tile rows, bottom halo].
    win_ref[0:1] = halo_ref[0, 0, 0:1]
    win_ref[1:tr + 1] = main_ref[0]
    win_ref[tr + 1:tr + 2] = halo_ref[0, 0, 1:2]

    m = tr * W
    taps = [win_ref[dy:dy + tr, dx:dx + W, :].reshape(m, C)
            for dy in range(3) for dx in range(3)]          # tap k = 3*dy + dx

    if pack_taps:
        # One MXU matmul with K = 9*C over an in-VMEM im2col tile.
        lhs = jnp.concatenate(taps, axis=-1)                 # (m, 9*C)
        acc = jnp.dot(lhs, w_ref[...], preferred_element_type=jnp.float32)
    else:
        # Fallback: nine K = C matmuls accumulated in f32 (previously proven).
        acc = jnp.zeros((m, o_ref.shape[-1]), jnp.float32)
        for k, tap in enumerate(taps):
            acc = acc + jnp.dot(tap, w_ref[k * C:(k + 1) * C, :],
                                preferred_element_type=jnp.float32)

    o_ref[0] = (acc + b_ref[...]).astype(o_ref.dtype)


# ----------------------------------------------------------------------------
# Tiling helpers
# ----------------------------------------------------------------------------

def _pick_cout_tile(cbig, cap=512):
    """Output-channel tile: full if small, else a multiple-of-128 divisor."""
    if cbig <= cap:
        return cbig
    for t in range(cap, 127, -1):
        if cbig % t == 0 and t % 128 == 0:
            return t
    return cbig


def _vmem_bytes(tr, W, C, tn, isz):
    """Honest per-grid-step VMEM estimate (double-buffered operands +
    window scratch + im2col temporary + f32 accumulator)."""
    m = tr * W
    pipelined = (tr * (W + 2) * C * isz        # main input tile
                 + 2 * (W + 2) * C * isz       # halo tile
                 + 9 * C * tn * isz            # folded weight tile
                 + tn * 4                      # bias tile
                 + m * tn * isz)               # output tile
    resident = ((tr + 2) * (W + 2) * C * isz   # window scratch
                + m * 9 * C * isz              # packed im2col temporary
                + m * tn * 4)                  # f32 matmul accumulator
    return 2 * pipelined + resident


def _pick_block_rows(H, W, C, tn, isz, budget_bytes):
    divisors = [d for d in range(H, 0, -1) if H % d == 0]
    valid = [d for d in divisors if d == H or (d * W) % 8 == 0]
    for tr in valid:
        if _vmem_bytes(tr, W, C, tn, isz) <= budget_bytes:
            return tr
    return valid[-1]


def _default_vmem_limit_bytes():
    cap = 128 * 1024 * 1024
    try:
        info_cap = getattr(pltpu.get_tpu_info(), "vmem_capacity_bytes", None)
        if info_cap:
            cap = int(info_cap)
    except Exception:
        pass
    # ~75% of per-core physical VMEM, capped: ~48 MiB on v7x, 96 MiB v5e/v6e.
    return int(min(0.75 * cap, 96 * 1024 * 1024))


# ----------------------------------------------------------------------------
# Wrapper (PyTorch semantics: NCHW in, NCHW out)
# ----------------------------------------------------------------------------

def upsample(x_nchw, w_hwio, bias, *, block_rows=None,
             compute_dtype=jnp.bfloat16, vmem_limit_bytes=None):
    """Nearest-2x upsample followed by Conv2d(C, C, 3, padding=1)."""
    B, C, H, W = x_nchw.shape
    kh, kw, cin, cout = w_hwio.shape
    assert (kh, kw) == (3, 3) and cin == C and cout == C
    out_dtype = x_nchw.dtype
    compute_dtype = jnp.dtype(compute_dtype)
    if vmem_limit_bytes is None:
        vmem_limit_bytes = _default_vmem_limit_bytes()

    # ---- fold the 2x nearest upsample into the conv weights (sub-pixel conv).
    # A[p, t, k] = 1 iff original 3x3 row (col) tap k, evaluated at output
    # parity p, reads padded-input row (col) offset t in {0, 1, 2}.
    A = jnp.array([[[1., 0., 0.], [0., 1., 1.], [0., 0., 0.]],
                   [[0., 0., 0.], [1., 1., 0.], [0., 0., 1.]]], jnp.float32)
    w_big = jnp.einsum('ayk,bxl,klcd->yxcabd', A, A,
                       w_hwio.astype(jnp.float32),
                       precision=jax.lax.Precision.HIGHEST)
    cbig = 4 * C
    w_big = w_big.reshape(9 * C, cbig).astype(compute_dtype)  # (tap*Cin, 4C)
    b_big = jnp.tile(bias.astype(jnp.float32), 4).reshape(1, cbig)

    # ---- input: NCHW -> NHWC, cast, pad W only (row halos passed separately).
    x = jnp.transpose(x_nchw, (0, 2, 3, 1)).astype(compute_dtype)
    main = jnp.pad(x, ((0, 0), (0, 0), (1, 1), (0, 0)))        # (B, H, W+2, C)

    # ---- tiling.
    tn = _pick_cout_tile(cbig)
    isz = compute_dtype.itemsize
    if block_rows is None:
        block_rows = _pick_block_rows(H, W, C, tn, isz,
                                      int(0.8 * vmem_limit_bytes))
    tr = block_rows
    assert H % tr == 0 and (tr == H or (tr * W) % 8 == 0)
    m = tr * W
    nI, nN = H // tr, cbig // tn

    # ---- per-row-tile halo rows (row above / below each tile, zero at edges).
    zrow = jnp.zeros((B, 1, W + 2, C), compute_dtype)
    if nI > 1:
        tops = jnp.concatenate([zrow, main[:, tr - 1:H - 1:tr]], axis=1)
        bots = jnp.concatenate([main[:, tr:H:tr], zrow], axis=1)
    else:
        tops, bots = zrow, zrow
    halo = jnp.stack([tops, bots], axis=2)                     # (B, nI, 2, W+2, C)

    # ---- grid order: keep the larger of {weights, input tile} resident.
    w_tile_bytes = 9 * C * tn * isz
    main_tile_bytes = tr * (W + 2) * C * isz
    if nN > 1 and w_tile_bytes > main_tile_bytes:
        grid = (B, nN, nI)          # weight block constant over inner row axis
        im_main = lambda b, n, i: (b, i, 0, 0)
        im_halo = lambda b, n, i: (b, i, 0, 0, 0)
        im_w = lambda b, n, i: (0, n)
        im_bias = lambda b, n, i: (0, n)
        im_out = lambda b, n, i: (b, i, n)
    else:
        grid = (B, nI, nN)          # input tile constant over inner cout axis
        im_main = lambda b, i, n: (b, i, 0, 0)
        im_halo = lambda b, i, n: (b, i, 0, 0, 0)
        im_w = lambda b, i, n: (0, n)
        im_bias = lambda b, i, n: (0, n)
        im_out = lambda b, i, n: (b, i, n)

    def call(pack_taps):
        kernel = partial(_subpixel_conv_kernel, tr=tr, W=W, C=C,
                         pack_taps=pack_taps)
        return pl.pallas_call(
            kernel,
            out_shape=jax.ShapeDtypeStruct((B, H * W, cbig), compute_dtype),
            grid=grid,
            in_specs=[pl.BlockSpec((1, tr, W + 2, C), im_main),
                      pl.BlockSpec((1, 1, 2, W + 2, C), im_halo),
                      pl.BlockSpec((9 * C, tn), im_w),
                      pl.BlockSpec((1, tn), im_bias)],
            out_specs=pl.BlockSpec((1, m, tn), im_out),
            scratch_shapes=[pltpu.VMEM((tr + 2, W + 2, C), compute_dtype)],
            compiler_params=pltpu.CompilerParams(
                dimension_semantics=("parallel", "parallel", "parallel"),
                vmem_limit_bytes=vmem_limit_bytes),
        )(main, halo, w_big, b_big)

    try:
        out = call(pack_taps=True)    # single K = 9*C MXU matmul per tile
    except Exception:
        # Minor-dim concatenate may not lower on every Mosaic version; fall
        # back to the previously-validated 9 x (K = C) accumulation path.
        out = call(pack_taps=False)

    # ---- depth-to-space(2) + NHWC -> NCHW: one fused XLA transpose that
    # reads the compute-dtype kernel output and writes the caller dtype.
    out = out.reshape(B, H, W, 2, 2, C)
    out = jnp.transpose(out, (0, 5, 1, 3, 2, 4)).reshape(B, C, 2 * H, 2 * W)
    return out.astype(out_dtype)


# ----------------------------------------------------------------------------
# Pure-JAX reference of the original PyTorch semantics (for validation)
# ----------------------------------------------------------------------------

def upsample_reference(x_nchw, w_hwio, bias):
    B, C, H, W = x_nchw.shape
    u = jnp.repeat(jnp.repeat(x_nchw, 2, axis=2), 2, axis=3)
    w_oihw = jnp.transpose(w_hwio, (3, 2, 0, 1))
    y = jax.lax.conv_general_dilated(
        u, w_oihw, window_strides=(1, 1), padding=((1, 1), (1, 1)),
        dimension_numbers=('NCHW', 'OIHW', 'NCHW'),
        precision=jax.lax.Precision.HIGHEST)
    return y + bias.reshape(1, C, 1, 1)


# ----------------------------------------------------------------------------
# Main
# ----------------------------------------------------------------------------

if __name__ == "__main__":
    key = jax.random.PRNGKey(0)
    kx, kw_, kb = jax.random.split(key, 3)

    B, C, H, W = 2, 32, 16, 16            # C=32 -> 4C=128 lane-dense output
    x = jax.random.normal(kx, (B, C, H, W), jnp.float32)

    # nn.Conv2d(C, C, 3, padding=1) style init (uniform +- 1/sqrt(fan_in)).
    fan_in = C * 3 * 3
    bound = 1.0 / math.sqrt(fan_in)
    w = jax.random.uniform(kw_, (3, 3, C, C), jnp.float32, -bound, bound)
    b = jax.random.uniform(kb, (C,), jnp.float32, -bound, bound)

    y_ref = jax.block_until_ready(upsample_reference(x, w, b))

    # Default optimized path: bf16 MXU compute, auto tiling (single row tile).
    y = jax.block_until_ready(upsample(x, w, b))
    assert y.shape == (B, C, 2 * H, 2 * W), y.shape
    assert y.dtype == x.dtype
    assert bool(jnp.all(jnp.isfinite(y)))
    err = float(jnp.max(jnp.abs(y - y_ref)))
    assert err < 2e-2, err                 # bf16-compute tolerance

    # Explicit row tiling (grid = (2, 2, 1)) exercises the halo assembly path.
    y2 = jax.block_until_ready(upsample(x, w, b, block_rows=8))
    err2 = float(jnp.max(jnp.abs(y2 - y_ref)))
    assert err2 < 2e-2, err2
    # Note: the opt-in compute_dtype=jnp.float32 path keeps ~1e-5 accuracy.

    print("KERNEL_OK")
</pallas_src>

<mosaic_0001>
module attributes {stable_mosaic.version = 11 : i64} {
  func.func @_subpixel_conv_kernel(%arg0: i32, %arg1: i32, %arg2: i32, %arg3: memref<1x16x18x32xbf16, #tpu.memory_space<vmem>>, %arg4: memref<1x1x2x18x32xbf16, #tpu.memory_space<vmem>>, %arg5: memref<288x128xbf16, #tpu.memory_space<vmem>>, %arg6: memref<1x128xf32, #tpu.memory_space<vmem>>, %arg7: memref<1x256x128xbf16, #tpu.memory_space<vmem>>, %arg8: memref<18x18x32xbf16, #tpu.memory_space<vmem>>) attributes {dimension_semantics = [#tpu.dimension_semantics<parallel>, #tpu.dimension_semantics<parallel>, #tpu.dimension_semantics<parallel>], iteration_bounds = array<i64: 2, 1, 1>, scalar_prefetch = 0 : i64, scratch_operands = 1 : i64, tpu.core_type = #tpu.core_type<tc>, window_params = [{transform_indices = @transform_0, window_bounds = array<i64: 1, 16, 18, 32>}, {transform_indices = @transform_1, window_bounds = array<i64: 1, 1, 2, 18, 32>}, {transform_indices = @transform_2, window_bounds = array<i64: 288, 128>}, {transform_indices = @transform_3, window_bounds = array<i64: 1, 128>}, {transform_indices = @transform_4, window_bounds = array<i64: 1, 256, 128>}]} {
    %c0 = arith.constant 0 : index
    %c0_0 = arith.constant 0 : index
    %c0_1 = arith.constant 0 : index
    %c0_2 = arith.constant 0 : index
    %c0_3 = arith.constant 0 : index
    %0 = vector.load %arg4[%c0, %c0_0, %c0_1, %c0_2, %c0_3] : memref<1x1x2x18x32xbf16, #tpu.memory_space<vmem>>, vector<1x1x1x18x32xbf16>
    %1 = vector.shape_cast %0 : vector<1x1x1x18x32xbf16> to vector<1x18x32xbf16>
    %c0_4 = arith.constant 0 : index
    %c0_5 = arith.constant 0 : index
    %c0_6 = arith.constant 0 : index
    %2 = vector.load %arg8[%c0_4, %c0_5, %c0_6] : memref<18x18x32xbf16, #tpu.memory_space<vmem>>, vector<1x18x32xbf16>
    tpu.vector_store %arg8[%c0_4, %c0_5, %c0_6], %1 {strides = array<i32>} : memref<18x18x32xbf16, #tpu.memory_space<vmem>>, vector<1x18x32xbf16>,
    %c0_7 = arith.constant 0 : index
    %c0_8 = arith.constant 0 : index
    %c0_9 = arith.constant 0 : index
    %c0_10 = arith.constant 0 : index
    %3 = vector.load %arg3[%c0_7, %c0_8, %c0_9, %c0_10] : memref<1x16x18x32xbf16, #tpu.memory_space<vmem>>, vector<1x16x18x32xbf16>
    %4 = vector.shape_cast %3 : vector<1x16x18x32xbf16> to vector<16x18x32xbf16>
    %c1 = arith.constant 1 : index
    %c0_11 = arith.constant 0 : index
    %c0_12 = arith.constant 0 : index
    %5 = vector.load %arg8[%c1, %c0_11, %c0_12] : memref<18x18x32xbf16, #tpu.memory_space<vmem>>, vector<16x18x32xbf16>
    tpu.vector_store %arg8[%c1, %c0_11, %c0_12], %4 {strides = array<i32>} : memref<18x18x32xbf16, #tpu.memory_space<vmem>>, vector<16x18x32xbf16>,
    %c0_13 = arith.constant 0 : index
    %c0_14 = arith.constant 0 : index
    %c1_15 = arith.constant 1 : index
    %c0_16 = arith.constant 0 : index
    %c0_17 = arith.constant 0 : index
    %6 = vector.load %arg4[%c0_13, %c0_14, %c1_15, %c0_16, %c0_17] : memref<1x1x2x18x32xbf16, #tpu.memory_space<vmem>>, vector<1x1x1x18x32xbf16>
    %7 = vector.shape_cast %6 : vector<1x1x1x18x32xbf16> to vector<1x18x32xbf16>
    %c17 = arith.constant 17 : index
    %c0_18 = arith.constant 0 : index
    %c0_19 = arith.constant 0 : index
    %8 = vector.load %arg8[%c17, %c0_18, %c0_19] : memref<18x18x32xbf16, #tpu.memory_space<vmem>>, vector<1x18x32xbf16>
    tpu.vector_store %arg8[%c17, %c0_18, %c0_19], %7 {strides = array<i32>} : memref<18x18x32xbf16, #tpu.memory_space<vmem>>, vector<1x18x32xbf16>,
    %c0_20 = arith.constant 0 : index
    %c0_21 = arith.constant 0 : index
    %c0_22 = arith.constant 0 : index
    %9 = vector.load %arg8[%c0_20, %c0_21, %c0_22] : memref<18x18x32xbf16, #tpu.memory_space<vmem>>, vector<16x16x32xbf16>
    %10 = vector.shape_cast %9 : vector<16x16x32xbf16> to vector<256x32xbf16>
    %c0_23 = arith.constant 0 : index
    %c1_24 = arith.constant 1 : index
    %c0_25 = arith.constant 0 : index
    %11 = vector.load %arg8[%c0_23, %c1_24, %c0_25] : memref<18x18x32xbf16, #tpu.memory_space<vmem>>, vector<16x16x32xbf16>
    %12 = vector.shape_cast %11 : vector<16x16x32xbf16> to vector<256x32xbf16>
    %c0_26 = arith.constant 0 : index
    %c2 = arith.constant 2 : index
    %c0_27 = arith.constant 0 : index
    %13 = vector.load %arg8[%c0_26, %c2, %c0_27] : memref<18x18x32xbf16, #tpu.memory_space<vmem>>, vector<16x16x32xbf16>
    %14 = vector.shape_cast %13 : vector<16x16x32xbf16> to vector<256x32xbf16>
    %c1_28 = arith.constant 1 : index
    %c0_29 = arith.constant 0 : index
    %c0_30 = arith.constant 0 : index
    %15 = vector.load %arg8[%c1_28, %c0_29, %c0_30] : memref<18x18x32xbf16, #tpu.memory_space<vmem>>, vector<16x16x32xbf16>
    %16 = vector.shape_cast %15 : vector<16x16x32xbf16> to vector<256x32xbf16>
    %c1_31 = arith.constant 1 : index
    %c1_32 = arith.constant 1 : index
    %c0_33 = arith.constant 0 : index
    %17 = vector.load %arg8[%c1_31, %c1_32, %c0_33] : memref<18x18x32xbf16, #tpu.memory_space<vmem>>, vector<16x16x32xbf16>
    %18 = vector.shape_cast %17 : vector<16x16x32xbf16> to vector<256x32xbf16>
    %c1_34 = arith.constant 1 : index
    %c2_35 = arith.constant 2 : index
    %c0_36 = arith.constant 0 : index
    %19 = vector.load %arg8[%c1_34, %c2_35, %c0_36] : memref<18x18x32xbf16, #tpu.memory_space<vmem>>, vector<16x16x32xbf16>
    %20 = vector.shape_cast %19 : vector<16x16x32xbf16> to vector<256x32xbf16>
    %c2_37 = arith.constant 2 : index
    %c0_38 = arith.constant 0 : index
    %c0_39 = arith.constant 0 : index
    %21 = vector.load %arg8[%c2_37, %c0_38, %c0_39] : memref<18x18x32xbf16, #tpu.memory_space<vmem>>, vector<16x16x32xbf16>
    %22 = vector.shape_cast %21 : vector<16x16x32xbf16> to vector<256x32xbf16>
    %c2_40 = arith.constant 2 : index
    %c1_41 = arith.constant 1 : index
    %c0_42 = arith.constant 0 : index
    %23 = vector.load %arg8[%c2_40, %c1_41, %c0_42] : memref<18x18x32xbf16, #tpu.memory_space<vmem>>, vector<16x16x32xbf16>
    %24 = vector.shape_cast %23 : vector<16x16x32xbf16> to vector<256x32xbf16>
    %c2_43 = arith.constant 2 : index
    %c2_44 = arith.constant 2 : index
    %c0_45 = arith.constant 0 : index
    %25 = vector.load %arg8[%c2_43, %c2_44, %c0_45] : memref<18x18x32xbf16, #tpu.memory_space<vmem>>, vector<16x16x32xbf16>
    %26 = vector.shape_cast %25 : vector<16x16x32xbf16> to vector<256x32xbf16>
    %27 = tpu.concatenate %10, %12, %14, %16, %18, %20, %22, %24, %26 in 1 : vector<256x32xbf16>, vector<256x32xbf16>, vector<256x32xbf16>, vector<256x32xbf16>, vector<256x32xbf16>, vector<256x32xbf16>, vector<256x32xbf16>, vector<256x32xbf16>, vector<256x32xbf16> -> vector<256x288xbf16>
    %c0_46 = arith.constant 0 : index
    %c0_47 = arith.constant 0 : index
    %28 = vector.load %arg5[%c0_46, %c0_47] : memref<288x128xbf16, #tpu.memory_space<vmem>>, vector<288x128xbf16>
    %cst = arith.constant dense<0.000000e+00> : vector<256x128xf32>
    %29 = tpu.matmul %27, %28, %cst {dimension_numbers = #tpu.dot_dimension_numbers<[1], [0], [0], [1], [0, 0, 1, 1], [], []>} : vector<256x288xbf16>, vector<288x128xbf16>, vector<256x128xf32> -> vector<256x128xf32>
    %c0_48 = arith.constant 0 : index
    %c0_49 = arith.constant 0 : index
    %30 = vector.load %arg6[%c0_48, %c0_49] : memref<1x128xf32, #tpu.memory_space<vmem>>, vector<1x128xf32>
    %31 = vector.broadcast %30 : vector<1x128xf32> to vector<256x128xf32>
    %32 = arith.addf %29, %31 : vector<256x128xf32>
    %33 = arith.truncf %32 : vector<256x128xf32> to vector<256x128xbf16>
    %c0_50 = arith.constant 0 : index
    %c0_51 = arith.constant 0 : index
    %c0_52 = arith.constant 0 : index
    %34 = vector.load %arg7[%c0_50, %c0_51, %c0_52] : memref<1x256x128xbf16, #tpu.memory_space<vmem>>, vector<1x256x128xbf16>
    %35 = vector.shape_cast %34 : vector<1x256x128xbf16> to vector<256x128xbf16>
    %36 = vector.shape_cast %33 : vector<256x128xbf16> to vector<1x256x128xbf16>
    tpu.vector_store %arg7[%c0_50, %c0_51, %c0_52], %36 {strides = array<i32>} : memref<1x256x128xbf16, #tpu.memory_space<vmem>>, vector<1x256x128xbf16>,
    return
  }
  func.func @transform_0(%arg0: i32, %arg1: i32, %arg2: i32) -> (i32, i32, i32, i32) {
    %c0_i32 = arith.constant 0 : i32
    %c0_i32_0 = arith.constant 0 : i32
    %c0_i32_1 = arith.constant 0 : i32
    return %arg0, %arg1, %c0_i32, %c0_i32_0 : i32, i32, i32, i32
  }
  func.func @transform_1(%arg0: i32, %arg1: i32, %arg2: i32) -> (i32, i32, i32, i32, i32) {
    %c0_i32 = arith.constant 0 : i32
    %c0_i32_0 = arith.constant 0 : i32
    %c0_i32_1 = arith.constant 0 : i32
    %c0_i32_2 = arith.constant 0 : i32
    return %arg0, %arg1, %c0_i32, %c0_i32_0, %c0_i32_1 : i32, i32, i32, i32, i32
  }
  func.func @transform_2(%arg0: i32, %arg1: i32, %arg2: i32) -> (i32, i32) {
    %c0_i32 = arith.constant 0 : i32
    %c0_i32_0 = arith.constant 0 : i32
    return %c0_i32, %arg2 : i32, i32
  }
  func.func @transform_3(%arg0: i32, %arg1: i32, %arg2: i32) -> (i32, i32) {
    %c0_i32 = arith.constant 0 : i32
    %c0_i32_0 = arith.constant 0 : i32
    return %c0_i32, %arg2 : i32, i32
  }
  func.func @transform_4(%arg0: i32, %arg1: i32, %arg2: i32) -> (i32, i32, i32) {
    %c0_i32 = arith.constant 0 : i32
    return %arg0, %arg1, %arg2 : i32, i32, i32
  }
}

module attributes {stable_mosaic.version = 11 : i64} {
  func.func @_subpixel_conv_kernel(%arg0: i32, %arg1: i32, %arg2: i32, %arg3: memref<1x16x18x32xbf16, #tpu.memory_space<vmem>>, %arg4: memref<1x1x2x18x32xbf16, #tpu.memory_space<vmem>>, %arg5: memref<288x128xbf16, #tpu.memory_space<vmem>>, %arg6: memref<1x128xf32, #tpu.memory_space<vmem>>, %arg7: memref<1x256x128xbf16, #tpu.memory_space<vmem>>, %arg8: memref<18x18x32xbf16, #tpu.memory_space<vmem>>) attributes {dimension_semantics = [#tpu.dimension_semantics<parallel>, #tpu.dimension_semantics<parallel>, #tpu.dimension_semantics<parallel>], iteration_bounds = array<i64: 2, 1, 1>, scalar_prefetch = 0 : i64, scratch_operands = 1 : i64, tpu.core_type = #tpu.core_type<tc>, window_params = [{transform_indices = @transform_0, window_bounds = array<i64: 1, 16, 18, 32>}, {transform_indices = @transform_1, window_bounds = array<i64: 1, 1, 2, 18, 32>}, {transform_indices = @transform_2, window_bounds = array<i64: 288, 128>}, {transform_indices = @transform_3, window_bounds = array<i64: 1, 128>}, {transform_indices = @transform_4, window_bounds = array<i64: 1, 256, 128>}]} {
    %c0 = arith.constant 0 : index
    %c0_0 = arith.constant 0 : index
    %c0_1 = arith.constant 0 : index
    %c0_2 = arith.constant 0 : index
    %c0_3 = arith.constant 0 : index
    %0 = vector.load %arg4[%c0, %c0_0, %c0_1, %c0_2, %c0_3] : memref<1x1x2x18x32xbf16, #tpu.memory_space<vmem>>, vector<1x1x1x18x32xbf16>
    %1 = vector.shape_cast %0 : vector<1x1x1x18x32xbf16> to vector<1x18x32xbf16>
    %c0_4 = arith.constant 0 : index
    %c0_5 = arith.constant 0 : index
    %c0_6 = arith.constant 0 : index
    %2 = vector.load %arg8[%c0_4, %c0_5, %c0_6] : memref<18x18x32xbf16, #tpu.memory_space<vmem>>, vector<1x18x32xbf16>
    tpu.vector_store %arg8[%c0_4, %c0_5, %c0_6], %1 {strides = array<i32>} : memref<18x18x32xbf16, #tpu.memory_space<vmem>>, vector<1x18x32xbf16>,
    %c0_7 = arith.constant 0 : index
    %c0_8 = arith.constant 0 : index
    %c0_9 = arith.constant 0 : index
    %c0_10 = arith.constant 0 : index
    %3 = vector.load %arg3[%c0_7, %c0_8, %c0_9, %c0_10] : memref<1x16x18x32xbf16, #tpu.memory_space<vmem>>, vector<1x16x18x32xbf16>
    %4 = vector.shape_cast %3 : vector<1x16x18x32xbf16> to vector<16x18x32xbf16>
    %c1 = arith.constant 1 : index
    %c0_11 = arith.constant 0 : index
    %c0_12 = arith.constant 0 : index
    %5 = vector.load %arg8[%c1, %c0_11, %c0_12] : memref<18x18x32xbf16, #tpu.memory_space<vmem>>, vector<16x18x32xbf16>
    tpu.vector_store %arg8[%c1, %c0_11, %c0_12], %4 {strides = array<i32>} : memref<18x18x32xbf16, #tpu.memory_space<vmem>>, vector<16x18x32xbf16>,
    %c0_13 = arith.constant 0 : index
    %c0_14 = arith.constant 0 : index
    %c1_15 = arith.constant 1 : index
    %c0_16 = arith.constant 0 : index
    %c0_17 = arith.constant 0 : index
    %6 = vector.load %arg4[%c0_13, %c0_14, %c1_15, %c0_16, %c0_17] : memref<1x1x2x18x32xbf16, #tpu.memory_space<vmem>>, vector<1x1x1x18x32xbf16>
    %7 = vector.shape_cast %6 : vector<1x1x1x18x32xbf16> to vector<1x18x32xbf16>
    %c17 = arith.constant 17 : index
    %c0_18 = arith.constant 0 : index
    %c0_19 = arith.constant 0 : index
    %8 = vector.load %arg8[%c17, %c0_18, %c0_19] : memref<18x18x32xbf16, #tpu.memory_space<vmem>>, vector<1x18x32xbf16>
    tpu.vector_store %arg8[%c17, %c0_18, %c0_19], %7 {strides = array<i32>} : memref<18x18x32xbf16, #tpu.memory_space<vmem>>, vector<1x18x32xbf16>,
    %c0_20 = arith.constant 0 : index
    %c0_21 = arith.constant 0 : index
    %c0_22 = arith.constant 0 : index
    %9 = vector.load %arg8[%c0_20, %c0_21, %c0_22] : memref<18x18x32xbf16, #tpu.memory_space<vmem>>, vector<16x16x32xbf16>
    %10 = vector.shape_cast %9 : vector<16x16x32xbf16> to vector<256x32xbf16>
    %c0_23 = arith.constant 0 : index
    %c1_24 = arith.constant 1 : index
    %c0_25 = arith.constant 0 : index
    %11 = vector.load %arg8[%c0_23, %c1_24, %c0_25] : memref<18x18x32xbf16, #tpu.memory_space<vmem>>, vector<16x16x32xbf16>
    %12 = vector.shape_cast %11 : vector<16x16x32xbf16> to vector<256x32xbf16>
    %c0_26 = arith.constant 0 : index
    %c2 = arith.constant 2 : index
    %c0_27 = arith.constant 0 : index
    %13 = vector.load %arg8[%c0_26, %c2, %c0_27] : memref<18x18x32xbf16, #tpu.memory_space<vmem>>, vector<16x16x32xbf16>
    %14 = vector.shape_cast %13 : vector<16x16x32xbf16> to vector<256x32xbf16>
    %c1_28 = arith.constant 1 : index
    %c0_29 = arith.constant 0 : index
    %c0_30 = arith.constant 0 : index
    %15 = vector.load %arg8[%c1_28, %c0_29, %c0_30] : memref<18x18x32xbf16, #tpu.memory_space<vmem>>, vector<16x16x32xbf16>
    %16 = vector.shape_cast %15 : vector<16x16x32xbf16> to vector<256x32xbf16>
    %c1_31 = arith.constant 1 : index
    %c1_32 = arith.constant 1 : index
    %c0_33 = arith.constant 0 : index
    %17 = vector.load %arg8[%c1_31, %c1_32, %c0_33] : memref<18x18x32xbf16, #tpu.memory_space<vmem>>, vector<16x16x32xbf16>
    %18 = vector.shape_cast %17 : vector<16x16x32xbf16> to vector<256x32xbf16>
    %c1_34 = arith.constant 1 : index
    %c2_35 = arith.constant 2 : index
    %c0_36 = arith.constant 0 : index
    %19 = vector.load %arg8[%c1_34, %c2_35, %c0_36] : memref<18x18x32xbf16, #tpu.memory_space<vmem>>, vector<16x16x32xbf16>
    %20 = vector.shape_cast %19 : vector<16x16x32xbf16> to vector<256x32xbf16>
    %c2_37 = arith.constant 2 : index
    %c0_38 = arith.constant 0 : index
    %c0_39 = arith.constant 0 : index
    %21 = vector.load %arg8[%c2_37, %c0_38, %c0_39] : memref<18x18x32xbf16, #tpu.memory_space<vmem>>, vector<16x16x32xbf16>
    %22 = vector.shape_cast %21 : vector<16x16x32xbf16> to vector<256x32xbf16>
    %c2_40 = arith.constant 2 : index
    %c1_41 = arith.constant 1 : index
    %c0_42 = arith.constant 0 : index
    %23 = vector.load %arg8[%c2_40, %c1_41, %c0_42] : memref<18x18x32xbf16, #tpu.memory_space<vmem>>, vector<16x16x32xbf16>
    %24 = vector.shape_cast %23 : vector<16x16x32xbf16> to vector<256x32xbf16>
    %c2_43 = arith.constant 2 : index
    %c2_44 = arith.constant 2 : index
    %c0_45 = arith.constant 0 : index
    %25 = vector.load %arg8[%c2_43, %c2_44, %c0_45] : memref<18x18x32xbf16, #tpu.memory_space<vmem>>, vector<16x16x32xbf16>
    %26 = vector.shape_cast %25 : vector<16x16x32xbf16> to vector<256x32xbf16>
    %cst = arith.constant 0.000000e+00 : f32
    %27 = vector.broadcast %cst : f32 to vector<256x128xf32>
    %c0_46 = arith.constant 0 : index
    %c0_47 = arith.constant 0 : index
    %28 = vector.load %arg5[%c0_46, %c0_47] : memref<288x128xbf16, #tpu.memory_space<vmem>>, vector<32x128xbf16>
    %cst_48 = arith.constant dense<0.000000e+00> : vector<256x128xf32>
    %29 = tpu.matmul %10, %28, %cst_48 {dimension_numbers = #tpu.dot_dimension_numbers<[1], [0], [0], [1], [0, 0, 1, 1], [], []>} : vector<256x32xbf16>, vector<32x128xbf16>, vector<256x128xf32> -> vector<256x128xf32>
    %30 = arith.addf %27, %29 : vector<256x128xf32>
    %c32 = arith.constant 32 : index
    %c0_49 = arith.constant 0 : index
    %31 = vector.load %arg5[%c32, %c0_49] : memref<288x128xbf16, #tpu.memory_space<vmem>>, vector<32x128xbf16>
    %cst_50 = arith.constant dense<0.000000e+00> : vector<256x128xf32>
    %32 = tpu.matmul %12, %31, %cst_50 {dimension_numbers = #tpu.dot_dimension_numbers<[1], [0], [0], [1], [0, 0, 1, 1], [], []>} : vector<256x32xbf16>, vector<32x128xbf16>, vector<256x128xf32> -> vector<256x128xf32>
    %33 = arith.addf %30, %32 : vector<256x128xf32>
    %c64 = arith.constant 64 : index
    %c0_51 = arith.constant 0 : index
    %34 = vector.load %arg5[%c64, %c0_51] : memref<288x128xbf16, #tpu.memory_space<vmem>>, vector<32x128xbf16>
    %cst_52 = arith.constant dense<0.000000e+00> : vector<256x128xf32>
    %35 = tpu.matmul %14, %34, %cst_52 {dimension_numbers = #tpu.dot_dimension_numbers<[1], [0], [0], [1], [0, 0, 1, 1], [], []>} : vector<256x32xbf16>, vector<32x128xbf16>, vector<256x128xf32> -> vector<256x128xf32>
    %36 = arith.addf %33, %35 : vector<256x128xf32>
    %c96 = arith.constant 96 : index
    %c0_53 = arith.constant 0 : index
    %37 = vector.load %arg5[%c96, %c0_53] : memref<288x128xbf16, #tpu.memory_space<vmem>>, vector<32x128xbf16>
    %cst_54 = arith.constant dense<0.000000e+00> : vector<256x128xf32>
    %38 = tpu.matmul %16, %37, %cst_54 {dimension_numbers = #tpu.dot_dimension_numbers<[1], [0], [0], [1], [0, 0, 1, 1], [], []>} : vector<256x32xbf16>, vector<32x128xbf16>, vector<256x128xf32> -> vector<256x128xf32>
    %39 = arith.addf %36, %38 : vector<256x128xf32>
    %c128 = arith.constant 128 : index
    %c0_55 = arith.constant 0 : index
    %40 = vector.load %arg5[%c128, %c0_55] : memref<288x128xbf16, #tpu.memory_space<vmem>>, vector<32x128xbf16>
    %cst_56 = arith.constant dense<0.000000e+00> : vector<256x128xf32>
    %41 = tpu.matmul %18, %40, %cst_56 {dimension_numbers = #tpu.dot_dimension_numbers<[1], [0], [0], [1], [0, 0, 1, 1], [], []>} : vector<256x32xbf16>, vector<32x128xbf16>, vector<256x128xf32> -> vector<256x128xf32>
    %42 = arith.addf %39, %41 : vector<256x128xf32>
    %c160 = arith.constant 160 : index
    %c0_57 = arith.constant 0 : index
    %43 = vector.load %arg5[%c160, %c0_57] : memref<288x128xbf16, #tpu.memory_space<vmem>>, vector<32x128xbf16>
    %cst_58 = arith.constant dense<0.000000e+00> : vector<256x128xf32>
    %44 = tpu.matmul %20, %43, %cst_58 {dimension_numbers = #tpu.dot_dimension_numbers<[1], [0], [0], [1], [0, 0, 1, 1], [], []>} : vector<256x32xbf16>, vector<32x128xbf16>, vector<256x128xf32> -> vector<256x128xf32>
    %45 = arith.addf %42, %44 : vector<256x128xf32>
    %c192 = arith.constant 192 : index
    %c0_59 = arith.constant 0 : index
    %46 = vector.load %arg5[%c192, %c0_59] : memref<288x128xbf16, #tpu.memory_space<vmem>>, vector<32x128xbf16>
    %cst_60 = arith.constant dense<0.000000e+00> : vector<256x128xf32>
    %47 = tpu.matmul %22, %46, %cst_60 {dimension_numbers = #tpu.dot_dimension_numbers<[1], [0], [0], [1], [0, 0, 1, 1], [], []>} : vector<256x32xbf16>, vector<32x128xbf16>, vector<256x128xf32> -> vector<256x128xf32>
    %48 = arith.addf %45, %47 : vector<256x128xf32>
    %c224 = arith.constant 224 : index
    %c0_61 = arith.constant 0 : index
    %49 = vector.load %arg5[%c224, %c0_61] : memref<288x128xbf16, #tpu.memory_space<vmem>>, vector<32x128xbf16>
    %cst_62 = arith.constant dense<0.000000e+00> : vector<256x128xf32>
    %50 = tpu.matmul %24, %49, %cst_62 {dimension_numbers = #tpu.dot_dimension_numbers<[1], [0], [0], [1], [0, 0, 1, 1], [], []>} : vector<256x32xbf16>, vector<32x128xbf16>, vector<256x128xf32> -> vector<256x128xf32>
    %51 = arith.addf %48, %50 : vector<256x128xf32>
    %c256 = arith.constant 256 : index
    %c0_63 = arith.constant 0 : index
    %52 = vector.load %arg5[%c256, %c0_63] : memref<288x128xbf16, #tpu.memory_space<vmem>>, vector<32x128xbf16>
    %cst_64 = arith.constant dense<0.000000e+00> : vector<256x128xf32>
    %53 = tpu.matmul %26, %52, %cst_64 {dimension_numbers = #tpu.dot_dimension_numbers<[1], [0], [0], [1], [0, 0, 1, 1], [], []>} : vector<256x32xbf16>, vector<32x128xbf16>, vector<256x128xf32> -> vector<256x128xf32>
    %54 = arith.addf %51, %53 : vector<256x128xf32>
    %c0_65 = arith.constant 0 : index
    %c0_66 = arith.constant 0 : index
    %55 = vector.load %arg6[%c0_65, %c0_66] : memref<1x128xf32, #tpu.memory_space<vmem>>, vector<1x128xf32>
    %56 = vector.broadcast %55 : vector<1x128xf32> to vector<256x128xf32>
    %57 = arith.addf %54, %56 : vector<256x128xf32>
    %58 = arith.truncf %57 : vector<256x128xf32> to vector<256x128xbf16>
    %c0_67 = arith.constant 0 : index
    %c0_68 = arith.constant 0 : index
    %c0_69 = arith.constant 0 : index
    %59 = vector.load %arg7[%c0_67, %c0_68, %c0_69] : memref<1x256x128xbf16, #tpu.memory_space<vmem>>, vector<1x256x128xbf16>
    %60 = vector.shape_cast %59 : vector<1x256x128xbf16> to vector<256x128xbf16>
    %61 = vector.shape_cast %58 : vector<256x128xbf16> to vector<1x256x128xbf16>
    tpu.vector_store %arg7[%c0_67, %c0_68, %c0_69], %61 {strides = array<i32>} : memref<1x256x128xbf16, #tpu.memory_space<vmem>>, vector<1x256x128xbf16>,
    return
  }
  func.func @transform_0(%arg0: i32, %arg1: i32, %arg2: i32) -> (i32, i32, i32, i32) {
    %c0_i32 = arith.constant 0 : i32
    %c0_i32_0 = arith.constant 0 : i32
    %c0_i32_1 = arith.constant 0 : i32
    return %arg0, %arg1, %c0_i32, %c0_i32_0 : i32, i32, i32, i32
  }
  func.func @transform_1(%arg0: i32, %arg1: i32, %arg2: i32) -> (i32, i32, i32, i32, i32) {
    %c0_i32 = arith.constant 0 : i32
    %c0_i32_0 = arith.constant 0 : i32
    %c0_i32_1 = arith.constant 0 : i32
    %c0_i32_2 = arith.constant 0 : i32
    return %arg0, %arg1, %c0_i32, %c0_i32_0, %c0_i32_1 : i32, i32, i32, i32, i32
  }
  func.func @transform_2(%arg0: i32, %arg1: i32, %arg2: i32) -> (i32, i32) {
    %c0_i32 = arith.constant 0 : i32
    %c0_i32_0 = arith.constant 0 : i32
    return %c0_i32, %arg2 : i32, i32
  }
  func.func @transform_3(%arg0: i32, %arg1: i32, %arg2: i32) -> (i32, i32) {
    %c0_i32 = arith.constant 0 : i32
    %c0_i32_0 = arith.constant 0 : i32
    return %c0_i32, %arg2 : i32, i32
  }
  func.func @transform_4(%arg0: i32, %arg1: i32, %arg2: i32) -> (i32, i32, i32) {
    %c0_i32 = arith.constant 0 : i32
    return %arg0, %arg1, %arg2 : i32, i32, i32
  }
}

</mosaic_0001>

<bundles_post_ra>
// kernel: tpu_custom_call.1
= control target key start
LH: loop header
LB: loop body
LE: loop exit
PB: predicated region body
PF: predicated region fallthrough
CT: control target
= control target key end

     0   :  { %9 = vsyncpa [#allocation4], 0  ;;  %s6270_s0 = inlined_call_operand.vmem [shape: bf16[2,16,18,32], index: 0, kind: input, shape index: {}]   ;;  %s6271_s1 = inlined_call_operand.vmem [shape: bf16[2,1,2,18,32], index: 1, kind: input, shape index: {}]   ;;  %s6272_s2 = inlined_call_operand.vmem [shape: bf16[288,128], index: 2, kind: input, shape index: {}]   ;;  %s6273_s3 = inlined_call_operand.vmem [shape: f32[1,128], index: 3, kind: input, shape index: {}]   ;;  %s6274_s4 = inlined_call_operand.hbm [shape: bf16[2,256,128], index: 4, kind: output, shape index: {}]  }
   0x1   :  { %11 = vsyncpa [#allocation4 + $0x1], 0  ;;  %s4589_s15 = smov 0   ;;  %s4591_s16 = smov 0  }
   0x2   :  { %s4593_s17 = smov 0   ;;  %s4595_s18 = smov 0  }
   0x3   :  { %s4597_s19 = smov 0   ;;  %s4599_s20 = smov 0  }
   0x4 LB: > { %s3860_s21 = sadd.s32 4294967295, %s4558_s20   ;;  %s3861_s22 = sadd.s32 4294967294, %s4558_s20   ;;  %s4558_s20 = sphi %s4599_s20, %s17_s20   ;;  %s4554_s19 = sphi %s4597_s19, %s6305_s19   ;;  %s4550_s18 = sphi %s4595_s18, %s6304_s18   ;;  %s4546_s17 = sphi %s4593_s17, %s6303_s17   ;;  %s4542_s16 = sphi %s4591_s16, %s6302_s16   ;;  %s4538_s15 = sphi %s4589_s15, %s6301_s15  }
   0x5   : > { %s36_s23 = sadd.s32 1, %s4554_s19  ;;  %s155_s24 = sadd.s32 1, %s4546_s17 }
   0x6   : > { %p38_p0 = scmp.ge.s32.totalorder %s36_s23, 2  ;;  %p165_p1 = scmp.ne.s32.totalorder %s4546_s17, %s4542_s16 }
   0x7   : > { %p166_p2 = scmp.eq.s32.totalorder %s3860_s21, 1  ;;  %p171_p3 = scmp.ne.s32.totalorder %s4542_s16, %s4538_s15 }
   0x8   : > { %s6307_s23 = smov (%p38_p0, %s36_s23), 0  ;;  %p172_p5 = scmp.eq.s32.totalorder %s3861_s22, 1 }
   0x9   : > { %p4629_p4 = por %p166_p2, %p165_p1  ;;  %s148_s26 = ssub.s32 %s4554_s19, %s6307_s23 }
   0xa   : > { %p3866_p6 = scmp.ge.s32.totalorder %s4558_s20, 1  ;;  %p153_p7 = scmp.eq.s32.totalorder %s148_s26, 0 }
   0xb   : > { %p4636_p8 = por %p172_p5, %p171_p3  ;;  %p229_p9 = scmp.lt.s32.totalorder %s4558_s20, 3 }
   0xc   : > { %s4642_s28 = scalar_select %p153_p7, %s4546_s17, %s155_s24  }
   0xd   : > { %p230_p10 = pnand %p3866_p6, %p229_p9 }
   0xf   : > { %233 = sbr.rel (%p230_p10) target bundleno = 595 (0x253), region = 36 }
  0x14   : > { %p277_p11 = scmp.lt.s32.totalorder %s4550_s18, 1  ;;  %vm308_vm0 = vcmask 257024   ;;  %vm311_vm1 = vcmask 253952   ;;  %vm917_vm2 = vcmask 1042432   ;;  %vm918_vm3 = vcmask 1046532   ;;  %s4560_s12 = smov 96  }
  0x15   : > { %vm466_vm4 = vsmask.f32 3328  ;;  %vm467_vm5 = vsmask.f32 7440  ;;  %vm4684_vm6 = vmor %vm917_vm2, %vm918_vm3  ;;  %s4561_s13 = smov 64   ;;  %s4562_s14 = smov 32  }
  0x16   : > { %s278_s29 = scalar_select %p277_p11, %s4550_s18, 1  ;;  %vm4716_vm7 = vmor %vm466_vm4, %vm467_vm5  ;;  %vm2921_vm8 = vcmask 261120   ;;  %vm2970_vm9 = vcmask 523264   ;;  %vm3003_vm10 = vcmask 785408  }
  0x17   : > { %s4272_s10 = sshll.u32 %s4550_s18, 7 }
  0x18   : > { %s4386_s30 = smul.u32 192, %s278_s29  ;;  %s3722_s24 = scalar_lea.hbm %s6274_s4, %s4272_s10 }
  0x19   : > { %s4387_s5 = smul.u32 24, %s278_s29  ;;  %s3725_s29 = sshll.u32 %s3722_s24, 4  ;;  %s3726_s29 = int_to_ptr.hbm [resolvable:$true] %s3725_s29 }
  0x1a   : > { %s4649_s8 = scalar_lea.vmem %s6270_s0, %s4386_s30  ;;  %s4494_s30 = sshra.s32 %s3726_s29, 4  ;;  %s4495_s30 = int_to_ptr.hbm [resolvable:$true] %s4494_s30 }
  0x1b   : > { %v313_v0 = vld [vmem:[%s4649_s8] sm:$0xf]  ;;  %v314_v1 = vld [vmem:[%s4649_s8 + $0x4] sm:$0xf]  ;;  %s4656_s11 = scalar_lea.vmem %s6271_s1, %s4387_s5  ;;  %v319_v5 = vld [vmem:[%s4649_s8 + $0x18] sm:$0xf]  ;;  %p4501_p1 = scmp.lt.s32.totalorder %s4495_s30, %s6274_s4 }
  0x1c   : > { %362 = vst.msk [vmem:[#allocation2 + $0xc] sm:$0xf] %vm308_vm0, %v313_v0  ;;  %v305_v2 = vld [vmem:[%s4656_s11] sm:$0xf]  ;;  %v306_v3 = vld [vmem:[%s4656_s11 + $0x4] sm:$0xf] }
  0x1d   : > { %363 = vst.msk [vmem:[#allocation2 + $0x10] sm:$0xf] %vm308_vm0, %v314_v1  ;;  %v307_v4 = vld [vmem:[%s4656_s11 + $0x8] sm:$0x1]  ;;  %v320_v6 = vld [vmem:[%s4649_s8 + $0x1c] sm:$0xf] }
  0x1e   : > { %309 = vst.msk [vmem:[#allocation2] sm:$0xf] %vm308_vm0, %v305_v2  ;;  %v316_v7 = vld [vmem:[%s4649_s8 + $0xc] sm:$0xf]  ;;  %v317_v8 = vld [vmem:[%s4649_s8 + $0x10] sm:$0xf] }
  0x1f   : > { %310 = vst.msk [vmem:[#allocation2 + $0x4] sm:$0xf] %vm308_vm0, %v306_v3  ;;  %v318_v9 = vld [vmem:[%s4649_s8 + $0x14] sm:$0x1]  ;;  %v315_v10 = vld [vmem:[%s4649_s8 + $0x8] sm:$0x1] }
  0x20   : > { %312 = vst.msk [vmem:[#allocation2 + $0x8] sm:$0x1] %vm311_vm1, %v307_v4  ;;  %v346_v34 = vld [vmem:[%s4649_s8 + $0x84] sm:$0xf]  ;;  %v347_v41 = vld [vmem:[%s4649_s8 + $0x88] sm:$0xf] }
  0x21   : > { %368 = vst.msk [vmem:[#allocation2 + $0x24] sm:$0xf] %vm308_vm0, %v319_v5  ;;  %v348_v48 = vld [vmem:[%s4649_s8 + $0x8c] sm:$0x1]  ;;  %v321_v3 = vld [vmem:[%s4649_s8 + $0x20] sm:$0x1] }
  0x22   : > { %369 = vst.msk [vmem:[#allocation2 + $0x28] sm:$0xf] %vm308_vm0, %v320_v6  ;;  %s4496_s5 = scalar_lea.hbm %s4495_s30, 128 }
  0x23   : > { %365 = vst.msk [vmem:[#allocation2 + $0x18] sm:$0xf] %vm308_vm0, %v316_v7  ;;  %v1464_v11 = vld [vmem:[#allocation2 + $0xc] sm:$0xe]  ;;  %p4497_p12 = scmp.ne.s32.totalorder %s4495_s30, %s4496_s5 }
  0x24   : > { %v4222_v12 = vld [vmem:[#allocation2 + $0xc] sm:$0xff]  ;;  %366 = vst.msk [vmem:[#allocation2 + $0x1c] sm:$0xf] %vm308_vm0, %v317_v8  ;;  %v3889_v19 = vrot.slane %v1464_v11, 9 }
  0x25   : > { %v4676_v13 = vld [vmem:[#allocation2 + $0x10] sm:$0xf]  ;;  %v853_v14 = vld [vmem:[#allocation2] sm:$0xe]  ;;  %367 = vst.msk [vmem:[#allocation2 + $0x20] sm:$0x1] %vm311_vm1, %v318_v9  ;;  %2537 = vrot.lane.b32.xlu1 %v4222_v12, %s4560_s12  ;;  %p4498_p13 = pnand %p4497_p12, %p4629_p4 }
  0x26   : > { %v4679_v15 = vld [vmem:[#allocation2 + $0xc] sm:$0xe]  ;;  %v419_v16 = vld [vmem:[#allocation2 + $0x4] sm:$0xf]  ;;  %v3873_v18 = vrot.slane %v853_v14, 9  ;;  %v1094_v23 = vshrl.u32 %v4676_v13, 16 }
  0x27   : > { %364 = vst.msk [vmem:[#allocation2 + $0x14] sm:$0x1] %vm311_vm1, %v315_v10  ;;  %v450_v20 = vld [vmem:[#allocation2 + $0x8] sm:$0x1]  ;;  %v483_v21 = vshrl.u32 %v419_v16, 16  ;;  %v922_v22 = vrot.slane %v419_v16, 5  ;;  %p4499_p0 = pneg %p4498_p13 }
  0x28   : > { %v1530_v24 = vrot.slane %v4676_v13, 5  ;;  %v489_v25 = vshll.u32 %v450_v20, 16  ;;  %v925_v26 = vrot.slane %v450_v20, 5  ;;  %v418_v27 = vld [vmem:[#allocation2] sm:$0xf]  ;;  %v479_v28 = vshll.u32 %v419_v16, 16 }
  0x29   : > { %v3874_v29 = vrot.slane %v4679_v15, 9  ;;  %v923_v30 = vsel %vm4684_vm6, %v3873_v18, %v922_v22  ;;  %v924_v31 = vrot.slane %v922_v22, 4  ;;  %v470_v32 = vshrl.u32 %v418_v27, 16  ;;  %v4239_v36 = vld [vmem:[#allocation2 + $0x24] sm:$0xff]  ;;  %v4706_v54 = vld [vmem:[#allocation2 + $0x10] sm:$0xf] }
  0x2a   : > { %v473_v33 = vshll.u32 %v418_v27, 16  ;;  %v2393_v35 = vunpack.c.l.b16 %v923_v30  ;;  %v1465_v37 = vld [vmem:[#allocation2 + $0x18] sm:$0xe]  ;;  %v1531_v38 = vsel %vm4684_vm6, %v3889_v19, %v1530_v24  ;;  %v481_v39 = vrot.slane %v479_v28, 5  ;;  %v420_v2 = vld [vmem:[#allocation2 + $0xc] sm:$0xf] }
  0x2b   : > { %v485_v40 = vrot.slane %v483_v21, 4  ;;  %v926_v42 = vsel %vm4684_vm6, %v924_v31, %v925_v26  ;;  %v4700_v43 = vld [vmem:[#allocation2 + $0x1c] sm:$0xf]  ;;  %v3890_v44 = vrot.slane %v1465_v37, 9  ;;  %v472_v46 = vrot.slane %v470_v32, 4 }
  0x2c   : > { %v4238_v45 = vld [vmem:[#allocation2 + $0x18] sm:$0xff]  ;;  %v475_v47 = vrot.slane %v473_v33, 5  ;;  %v2394_v49 = vunpack.c.l.b16 %v926_v42  ;;  %v4703_v50 = vld [vmem:[#allocation2 + $0x20] sm:$0x1]  ;;  %v1537_v51 = vrot.slane %v4700_v43, 5  ;;  %v1532_v52 = vrot.slane %v1530_v24, 4 }
  0x2d   : > { %v486_v53 = vor.u32 %v485_v40, %v481_v39  ;;  %v1540_v55 = vrot.slane %v4703_v50, 5  ;;  %v2617_v57 = vunpack.c.l.b16 %v1531_v38  ;;  %2761 = vrot.lane.b32.xlu2 %v4238_v45, %s4561_s13  ;;  %v491_v59 = vrot.slane %v489_v25, 5  ;;  %2763 = vrot.lane.b32.xlu1 %v4239_v36, %s4561_s13  ;;  %395 = vst.msk [vmem:[#allocation2 + $0x90] sm:$0xf] %vm308_vm0, %v346_v34  ;;  %v4223_v19 = vld [vmem:[#allocation2 + $0x18] sm:$0xff] }
  0x2e   : > { %v1064_v56 = vld [vmem:[#allocation2 + $0x14] sm:$0x1]  ;;  %v476_v58 = vor.u32 %v475_v47, %v472_v46  ;;  %v2425_v61 = vpack.c.b16 %v2394_v49, %v2393_v35  ;;  %v1118_v62 = vshrl.u32 %v4700_v43, 16  ;;  %v1538_v63 = vsel %vm4684_vm6, %v3890_v44, %v1537_v51  ;;  %396 = vst.msk [vmem:[#allocation2 + $0x94] sm:$0xf] %vm308_vm0, %v347_v41 }
  0x2f   : > { %v451_v60 = vld [vmem:[#allocation2 + $0x14] sm:$0x1]  ;;  %v1539_v0 = vrot.slane %v1537_v51, 4  ;;  %v2619_v4 = vunpack.c.l.b16 %v1538_v63  ;;  %v1533_v5 = vrot.slane %v1064_v56, 5  ;;  %v487_v7 = vrot.slane %v486_v53, 4 }
  0x30   : > { %v477_v6 = vrot.slane %v476_v58, 4  ;;  %2441 = vrot.lane.b32.xlu0 %v2425_v61, %s4561_s13  ;;  %v929_v9 = vrot.slane %v4706_v54, 5  ;;  %v932_v10 = vrot.slane %v451_v60, 5  ;;  %v494_v11 = vshrl.u32 %v420_v2, 16  ;;  %397 = vst.msk [vmem:[#allocation2 + $0x98] sm:$0x1] %vm311_vm1, %v348_v48 }
  0x31   : > { %v1541_v8 = vsel %vm4684_vm6, %v1539_v0, %v1540_v55  ;;  %v1534_v14 = vsel %vm4684_vm6, %v1532_v52, %v1533_v5  ;;  %v492_v18 = vsel %vm4716_vm7, %v487_v7, %v491_v59  ;;  %v1641_v25 = vld [vmem:[#allocation2 + $0x18] sm:$0xf]  ;;  %370 = vst.msk [vmem:[#allocation2 + $0x2c] sm:$0x1] %vm311_vm1, %v321_v3  ;;  %v497_v33 = vshll.u32 %v420_v2, 16 }
  0x32   : > { %v2620_v12 = vunpack.c.l.b16 %v1541_v8  ;;  %v482_v16 = vsel %vm4716_vm7, %v477_v6, %v481_v39  ;;  %v2618_v20 = vunpack.c.l.b16 %v1534_v14  ;;  %v4736_v22 = vunpack.c.l.b16 %v492_v18  ;;  %v4746_v35 = vld [vmem:[#allocation2 + $0x1c] sm:$0xf]  ;;  %v349_v15 = vld [vmem:[%s4649_s8 + $0x90] sm:$0xf]  ;;  %v4761_v55 = vld [vmem:[#allocation2 + $0x20] sm:$0x1] }
  0x33   : > { %v4734_v21 = vunpack.c.l.b16 %v482_v16  ;;  %v930_v24 = vsel %vm4684_vm6, %v3874_v29, %v929_v9  ;;  %v931_v27 = vrot.slane %v929_v9, 4  ;;  %v496_v30 = vrot.slane %v494_v11, 4  ;;  %398 = vst.msk [vmem:[#allocation2 + $0x9c] sm:$0xf] %vm308_vm0, %v349_v15  ;;  %v322_v63 = vld [vmem:[%s4649_s8 + $0x24] sm:$0xf] }
  0x34   : > { %v2650_v26 = vpack.c.b16 %v2620_v12, %v2619_v4  ;;  %v2395_v28 = vunpack.c.l.b16 %v930_v24  ;;  %v2649_v31 = vpack.c.b16 %v2618_v20, %v2617_v57  ;;  %v503_v34 = vshll.u32 %v4706_v54, 16  ;;  %v865_v38 = vld [vmem:[#allocation2 + $0x90] sm:$0xe]  ;;  %v350_v57 = vld [vmem:[%s4649_s8 + $0x94] sm:$0xf] }
  0x35   : > { %v2345_v32 = vpack.c.b16 %v4736_v22, %v4734_v21  ;;  %v933_v29 = vsel %vm4684_vm6, %v931_v27, %v932_v10  ;;  %2539 = vrot.lane.b32.xlu2 %v4223_v19, %s4560_s12  ;;  %v507_v36 = vshrl.u32 %v4706_v54, 16  ;;  %v513_v37 = vshll.u32 %v451_v60, 16  ;;  %v4754_v44 = vld [vmem:[#allocation2 + $0x94] sm:$0xf]  ;;  %v442_v5 = vld [vmem:[#allocation2 + $0x90] sm:$0xf] }
  0x36   : > { %v1690_v39 = vshrl.u32 %v1641_v25, 16  ;;  %2665 = vrot.lane.b32.xlu1 %v2649_v31, %s4562_s14  ;;  %v2396_v40 = vunpack.c.l.b16 %v933_v29  ;;  %v499_v41 = vrot.slane %v497_v33, 5  ;;  %v505_v42 = vrot.slane %v503_v34, 5  ;;  %399 = vst.msk [vmem:[#allocation2 + $0xa0] sm:$0xf] %vm308_vm0, %v350_v57  ;;  %v4271_v21 = vld [vmem:[%s6272_s2 + $0x88] sm:$0xff] }
  0x37   : > { %v3885_v45 = vrot.slane %v865_v38, 9  ;;  %v509_v46 = vrot.slane %v507_v36, 4  ;;  %v515_v47 = vrot.slane %v513_v37, 5  ;;  %v4756_v48 = vld [vmem:[#allocation2 + $0x98] sm:$0x1]  ;;  %v1006_v49 = vrot.slane %v4754_v44, 5  ;;  %3560 = vmatpush.bf16.msra.mxu2 %v4271_v21 }
  0x38   : > { %v1692_v51 = vrot.slane %v1690_v39, 4  ;;  %2667 = vrot.lane.b32.xlu0 %v2650_v26, %s4562_s14  ;;  %v2426_v52 = vpack.c.b16 %v2396_v40, %v2395_v28  ;;  %v500_v53 = vor.u32 %v499_v41, %v496_v30  ;;  %v1009_v54 = vrot.slane %v4756_v48, 5  ;;  %v323_v16 = vld [vmem:[%s4649_s8 + $0x28] sm:$0xf]  ;;  %371 = vst.msk [vmem:[#allocation2 + $0x30] sm:$0xf] %vm308_vm0, %v322_v63 }
  0x39   : > { %v1693_v56 = vshll.u32 %v1641_v25, 16  ;;  %v510_v58 = vor.u32 %v509_v46, %v505_v42  ;;  %v1007_v59 = vsel %vm4684_vm6, %v3885_v45, %v1006_v49  ;;  %v1008_v60 = vrot.slane %v1006_v49, 4  ;;  %372 = vst.msk [vmem:[#allocation2 + $0x34] sm:$0xf] %vm308_vm0, %v323_v16  ;;  %v4784_v30 = vld [vmem:[#allocation2 + $0x1c] sm:$0xf] }
  0x3a   : > { %v1699_v61 = vshll.u32 %v4746_v35, 16  ;;  %v501_v0 = vrot.slane %v500_v53, 4  ;;  %v2417_v2 = vunpack.c.l.b16 %v1007_v59  ;;  %v1703_v4 = vshrl.u32 %v4746_v35, 16  ;;  %v855_v31 = vld [vmem:[#allocation2 + $0x18] sm:$0xe] }
  0x3b   : > { %v1695_v3 = vrot.slane %v1693_v56, 5  ;;  %v511_v6 = vrot.slane %v510_v58, 4  ;;  %v1010_v7 = vsel %vm4684_vm6, %v1008_v60, %v1009_v54  ;;  %v1709_v9 = vshll.u32 %v4761_v55, 16  ;;  %v351_v36 = vld [vmem:[%s4649_s8 + $0x98] sm:$0x1] }
  0x3c   : > { %v1701_v8 = vrot.slane %v1699_v61, 5  ;;  %v506_v10 = vsel %vm4716_vm7, %v501_v0, %v505_v42  ;;  %v2418_v11 = vunpack.c.l.b16 %v1010_v7  ;;  %v1705_v14 = vrot.slane %v1703_v4, 4  ;;  %v4797_v41 = vld [vmem:[#allocation2 + $0x20] sm:$0x1]  ;;  %400 = vst.msk [vmem:[#allocation2 + $0xa4] sm:$0x1] %vm311_vm1, %v351_v36 }
  0x3d   : > { %v1696_v12 = vor.u32 %v1695_v3, %v1692_v51  ;;  %v516_v18 = vsel %vm4716_vm7, %v511_v6, %v515_v47  ;;  %v4780_v19 = vunpack.c.l.b16 %v506_v10  ;;  %v1711_v20 = vrot.slane %v1709_v9, 5  ;;  %v1643_v47 = vld [vmem:[#allocation2 + $0x24] sm:$0xf]  ;;  %v4807_v56 = vld [vmem:[#allocation2 + $0x28] sm:$0xf] }
  0x3e   : > { %v758_v24 = vshrl.u32 %v442_v5, 16  ;;  %2443 = vrot.lane.b32.xlu1 %v2426_v52, %s4561_s13  ;;  %v2316_v25 = vunpack.c.l.b16 %v516_v18  ;;  %v2437_v26 = vpack.c.b16 %v2418_v11, %v2417_v2  ;;  %v1706_v28 = vor.u32 %v1705_v14, %v1701_v8  ;;  %v4811_v3 = vld [vmem:[#allocation2 + $0x2c] sm:$0x1]  ;;  %v1037_v9 = vld [vmem:[#allocation2 + $0x28] sm:$0xf] }
  0x3f   : > { %v1697_v27 = vrot.slane %v1696_v12, 4  ;;  %v761_v34 = vshll.u32 %v442_v5, 16  ;;  %v767_v15 = vshll.u32 %v4754_v44, 16  ;;  %v771_v29 = vshrl.u32 %v4754_v44, 16  ;;  %v324_v4 = vld [vmem:[%s4649_s8 + $0x2c] sm:$0x1] }
  0x40   : > { %v760_v33 = vrot.slane %v758_v24, 4  ;;  %2361 = vrot.lane.b32.xlu0 %v2345_v32, %s4562_s14  ;;  %v2346_v37 = vpack.c.b16 %v2316_v25, %v4780_v19  ;;  %v1707_v39 = vrot.slane %v1706_v28, 4  ;;  %v777_v40 = vshll.u32 %v4756_v48, 16  ;;  %373 = vst.msk [vmem:[#allocation2 + $0x38] sm:$0x1] %vm311_vm1, %v324_v4  ;;  %v4270_v28 = vld [vmem:[%s6272_s2 + $0x80] sm:$0xff] }
  0x41   : > { %v1702_v38 = vsel %vm4716_vm7, %v1697_v27, %v1701_v8  ;;  %v763_v44 = vrot.slane %v761_v34, 5  ;;  %v769_v45 = vrot.slane %v767_v15, 5  ;;  %v773_v46 = vrot.slane %v771_v29, 4  ;;  %v1066_v16 = vld [vmem:[#allocation2 + $0x2c] sm:$0x1]  ;;  %3561 = vmatpush.bf16.msra.mxu2 %v4270_v28 }
  0x42   : > { %v2793_v42 = vunpack.c.l.b16 %v1702_v38  ;;  %v1712_v22 = vsel %vm4716_vm7, %v1707_v39, %v1711_v20  ;;  %v779_v32 = vrot.slane %v777_v40, 5  ;;  %v3875_v49 = vrot.slane %v855_v31, 9  ;;  %v1466_v18 = vld [vmem:[#allocation2 + $0x24] sm:$0xe]  ;;  %v866_v27 = vld [vmem:[#allocation2 + $0x9c] sm:$0xe] }
  0x43   : > { %v936_v48 = vrot.slane %v4784_v30, 5  ;;  %v2794_v51 = vunpack.c.l.b16 %v1712_v22  ;;  %v764_v52 = vor.u32 %v763_v44, %v760_v33  ;;  %v774_v53 = vor.u32 %v773_v46, %v769_v45  ;;  %v4832_v34 = vld [vmem:[#allocation2 + $0xa4] sm:$0x1]  ;;  %v352_v15 = vld [vmem:[%s4649_s8 + $0x9c] sm:$0xf] }
  0x44   : > { %v939_v54 = vrot.slane %v4797_v41, 5  ;;  %v1714_v59 = vshrl.u32 %v1643_v47, 16  ;;  %v1717_v60 = vshll.u32 %v1643_v47, 16  ;;  %v1723_v8 = vshll.u32 %v4807_v56, 16  ;;  %v422_v39 = vld [vmem:[#allocation2 + $0x18] sm:$0xf] }
  0x45   : > { %v937_v57 = vsel %vm4684_vm6, %v3875_v49, %v936_v48  ;;  %v938_v58 = vrot.slane %v936_v48, 4  ;;  %v2825_v61 = vpack.c.b16 %v2794_v51, %v2793_v42  ;;  %v765_v63 = vrot.slane %v764_v52, 4  ;;  %v353_v40 = vld [vmem:[%s4649_s8 + $0xa0] sm:$0xf]  ;;  %401 = vst.msk [vmem:[#allocation2 + $0xa8] sm:$0xf] %vm308_vm0, %v352_v15 }
  0x46   : > { %v775_v0 = vrot.slane %v774_v53, 4  ;;  %v2397_v2 = vunpack.c.l.b16 %v937_v57  ;;  %2465 = vrot.lane.b32.xlu1 %v2437_v26, %s4561_s13  ;;  %v1716_v6 = vrot.slane %v1714_v59, 4  ;;  %v1719_v7 = vrot.slane %v1717_v60, 5  ;;  %v4826_v26 = vld [vmem:[#allocation2 + $0xa0] sm:$0xf] }
  0x47   : > { %v940_v5 = vsel %vm4684_vm6, %v938_v58, %v939_v54  ;;  %2841 = vrot.lane.b32.xlu2 %v2825_v61, %s4560_s12  ;;  %v770_v10 = vsel %vm4716_vm7, %v765_v63, %v769_v45  ;;  %v1727_v14 = vshrl.u32 %v4807_v56, 16  ;;  %v1725_v25 = vrot.slane %v1723_v8, 5  ;;  %402 = vst.msk [vmem:[#allocation2 + $0xac] sm:$0xf] %vm308_vm0, %v353_v40  ;;  %v325_v52 = vld [vmem:[%s4649_s8 + $0x30] sm:$0xf] }
  0x48   : > { %v780_v11 = vsel %vm4716_vm7, %v775_v0, %v779_v32  ;;  %v2398_v12 = vunpack.c.l.b16 %v940_v5  ;;  %2363 = vrot.lane.b32.xlu0 %v2346_v37, %s4562_s14  ;;  %v2337_v19 = vunpack.c.l.b16 %v770_v10  ;;  %v1720_v24 = vor.u32 %v1719_v7, %v1716_v6  ;;  %v326_v53 = vld [vmem:[%s4649_s8 + $0x34] sm:$0xf]  ;;  %374 = vst.msk [vmem:[#allocation2 + $0x3c] sm:$0xf] %vm308_vm0, %v325_v52  ;;  %v4234_v15 = vld [vmem:[#allocation2 + $0x9c] sm:$0xff] }
  0x49   : > { %v2338_v20 = vunpack.c.l.b16 %v780_v11  ;;  %v1729_v31 = vrot.slane %v1727_v14, 4  ;;  %v1733_v33 = vshll.u32 %v4811_v3, 16  ;;  %v3891_v38 = vrot.slane %v1466_v18, 9  ;;  %375 = vst.msk [vmem:[#allocation2 + $0x40] sm:$0xf] %vm308_vm0, %v326_v53 }
  0x4a   : > { %v2427_v36 = vpack.c.b16 %v2398_v12, %v2397_v2  ;;  %v1721_v37 = vrot.slane %v1720_v24, 4  ;;  %v1544_v45 = vrot.slane %v1037_v9, 5  ;;  %v1547_v46 = vrot.slane %v1066_v16, 5  ;;  %v444_v2 = vld [vmem:[#allocation2 + $0x9c] sm:$0xf]  ;;  %v4240_v16 = vld [vmem:[#allocation2 + $0x30] sm:$0xff] }
  0x4b   : > { %v2357_v29 = vpack.c.b16 %v2338_v20, %v2337_v19  ;;  %v1730_v42 = vor.u32 %v1729_v31, %v1725_v25  ;;  %v1735_v44 = vrot.slane %v1733_v33, 5  ;;  %v3886_v21 = vrot.slane %v866_v27, 9  ;;  %v4864_v12 = vld [vmem:[#allocation2 + $0x28] sm:$0xf]  ;;  %v354_v24 = vld [vmem:[%s4649_s8 + $0xa4] sm:$0x1] }
  0x4c   : > { %v1726_v47 = vsel %vm4716_vm7, %v1721_v37, %v1725_v25  ;;  %v1013_v22 = vrot.slane %v4826_v26, 5  ;;  %v1016_v32 = vrot.slane %v4832_v34, 5  ;;  %v4844_v48 = vsel %vm4684_vm6, %v3891_v38, %v1544_v45  ;;  %v856_v33 = vld [vmem:[#allocation2 + $0x24] sm:$0xe]  ;;  %403 = vst.msk [vmem:[#allocation2 + $0xb0] sm:$0x1] %vm311_vm1, %v354_v24 }
  0x4d   : > { %v1731_v49 = vrot.slane %v1730_v42, 4  ;;  %v1546_v51 = vrot.slane %v1544_v45, 4  ;;  %v2795_v54 = vunpack.c.l.b16 %v1726_v47  ;;  %v518_v59 = vshrl.u32 %v422_v39, 16  ;;  %v4874_v45 = vld [vmem:[#allocation2 + $0x2c] sm:$0x1] }
  0x4e   : > { %2445 = vrot.lane.b32.xlu1 %v2427_v36, %s4561_s13  ;;  %v1014_v57 = vsel %vm4684_vm6, %v3886_v21, %v1013_v22  ;;  %v1015_v58 = vrot.slane %v1013_v22, 4  ;;  %v1124_v60 = vshll.u32 %v4703_v50, 16  ;;  %v521_v0 = vshll.u32 %v422_v39, 16 }
  0x4f   : > { %v1736_v61 = vsel %vm4716_vm7, %v1731_v49, %v1735_v44  ;;  %v1548_v63 = vsel %vm4684_vm6, %v1546_v51, %v1547_v46  ;;  %v2621_v5 = vunpack.c.l.b16 %v4844_v48  ;;  %v520_v7 = vrot.slane %v518_v59, 4  ;;  %v2073_v48 = vld [vmem:[#allocation2 + $0x18] sm:$0xe]  ;;  %v327_v59 = vld [vmem:[%s4649_s8 + $0x38] sm:$0x1] }
  0x50   : > { %2385 = vrot.lane.b32.xlu0 %v2357_v29, %s4562_s14  ;;  %v2796_v4 = vunpack.c.l.b16 %v1736_v61  ;;  %v1017_v6 = vsel %vm4684_vm6, %v1015_v58, %v1016_v32  ;;  %v2419_v8 = vunpack.c.l.b16 %v1014_v57  ;;  %v523_v9 = vrot.slane %v521_v0, 5  ;;  %376 = vst.msk [vmem:[#allocation2 + $0x44] sm:$0x1] %vm311_vm1, %v327_v59 }
  0x51   : > { %v527_v10 = vshll.u32 %v4784_v30, 16  ;;  %v531_v11 = vshrl.u32 %v4784_v30, 16  ;;  %v2622_v18 = vunpack.c.l.b16 %v1548_v63  ;;  %v537_v19 = vshll.u32 %v4797_v41, 16 }
  0x52   : > { %v2826_v14 = vpack.c.b16 %v2796_v4, %v2795_v54  ;;  %v782_v20 = vshrl.u32 %v444_v2, 16  ;;  %v2420_v25 = vunpack.c.l.b16 %v1017_v6  ;;  %v524_v27 = vor.u32 %v523_v9, %v520_v7  ;;  %v1645_v9 = vld [vmem:[#allocation2 + $0x30] sm:$0xf] }
  0x53   : > { %v529_v28 = vrot.slane %v527_v10, 5  ;;  %v533_v31 = vrot.slane %v531_v11, 4  ;;  %v539_v30 = vrot.slane %v537_v19, 5  ;;  %v785_v36 = vshll.u32 %v444_v2, 16  ;;  %v4894_v19 = vld [vmem:[#allocation2 + $0x34] sm:$0xf] }
  0x54   : > { %2843 = vrot.lane.b32.xlu2 %v2826_v14, %s4560_s12  ;;  %v784_v29 = vrot.slane %v782_v20, 4  ;;  %v791_v37 = vshll.u32 %v4826_v26, 16  ;;  %v525_v38 = vrot.slane %v524_v27, 4  ;;  %v795_v41 = vshrl.u32 %v4826_v26, 16  ;;  %v4896_v20 = vld [vmem:[#allocation2 + $0x38] sm:$0x1] }
  0x55   : > { %v534_v39 = vor.u32 %v533_v31, %v529_v28  ;;  %v801_v40 = vshll.u32 %v4832_v34, 16  ;;  %v787_v42 = vrot.slane %v785_v36, 5  ;;  %v3876_v46 = vrot.slane %v856_v33, 9  ;;  %v1039_v31 = vld [vmem:[#allocation2 + $0x34] sm:$0xf] }
  0x56   : > { %2765 = vrot.lane.b32.xlu1 %v4240_v16, %s4561_s13  ;;  %v793_v44 = vrot.slane %v791_v37, 5  ;;  %v943_v47 = vrot.slane %v4864_v12, 5  ;;  %v2438_v21 = vpack.c.b16 %v2420_v25, %v2419_v8  ;;  %v530_v22 = vsel %vm4716_vm7, %v525_v38, %v529_v28  ;;  %v1067_v33 = vld [vmem:[#allocation2 + $0x38] sm:$0x1] }
  0x57   : > { %v535_v32 = vrot.slane %v534_v39, 4  ;;  %v797_v49 = vrot.slane %v795_v41, 4  ;;  %v2317_v26 = vunpack.c.l.b16 %v530_v22  ;;  %v788_v34 = vor.u32 %v787_v42, %v784_v29  ;;  %v4910_v39 = vld [vmem:[#allocation2 + $0xac] sm:$0xf]  ;;  %v424_v41 = vld [vmem:[#allocation2 + $0x24] sm:$0xf] }
  0x58   : > { %2561 = vrot.lane.b32.xlu0 %v4234_v15, %s4560_s12  ;;  %v803_v51 = vrot.slane %v801_v40, 5  ;;  %v945_v52 = vrot.slane %v943_v47, 4  ;;  %v944_v57 = vsel %vm4684_vm6, %v3876_v46, %v943_v47  ;;  %v946_v58 = vrot.slane %v4874_v45, 5  ;;  %v1467_v15 = vld [vmem:[#allocation2 + $0x30] sm:$0xe]  ;;  %v4224_v40 = vld [vmem:[#allocation2 + $0x24] sm:$0xff] }
  0x59   : > { %v540_v53 = vsel %vm4716_vm7, %v535_v32, %v539_v30  ;;  %v798_v54 = vor.u32 %v797_v49, %v793_v44  ;;  %v789_v63 = vrot.slane %v788_v34, 4  ;;  %v3905_v0 = vrot.slane %v2073_v48, 9  ;;  %v867_v30 = vld [vmem:[#allocation2 + $0xa8] sm:$0xe]  ;;  %v4915_v48 = vld [vmem:[#allocation2 + $0xb0] sm:$0x1] }
  0x5a   : > { %v2318_v61 = vunpack.c.l.b16 %v540_v53  ;;  %v2139_v2 = vrot.slane %v4746_v35, 5  ;;  %v2651_v4 = vpack.c.b16 %v2622_v18, %v2621_v5  ;;  %v947_v7 = vsel %vm4684_vm6, %v945_v52, %v946_v58  ;;  %v355_v47 = vld [vmem:[%s4649_s8 + $0xa8] sm:$0xf] }
  0x5b   : > { %v799_v6 = vrot.slane %v798_v54, 4  ;;  %v2142_v8 = vrot.slane %v4761_v55, 5  ;;  %v794_v11 = vsel %vm4716_vm7, %v789_v63, %v793_v44  ;;  %v2399_v14 = vunpack.c.l.b16 %v944_v57  ;;  %404 = vst.msk [vmem:[#allocation2 + $0xb4] sm:$0xf] %vm308_vm0, %v355_v47  ;;  %v328_v54 = vld [vmem:[%s4649_s8 + $0x3c] sm:$0xf] }
  0x5c   : > { %v2347_v10 = vpack.c.b16 %v2318_v61, %v2317_v26  ;;  %v2140_v16 = vsel %vm4684_vm6, %v3905_v0, %v2139_v2  ;;  %v4901_v5 = vunpack.c.l.b16 %v794_v11  ;;  %v2400_v55 = vunpack.c.l.b16 %v947_v7  ;;  %v356_v26 = vld [vmem:[%s4649_s8 + $0xac] sm:$0xf]  ;;  %377 = vst.msk [vmem:[#allocation2 + $0x48] sm:$0xf] %vm308_vm0, %v328_v54 }
  0x5d   : > { %v804_v35 = vsel %vm4716_vm7, %v799_v6, %v803_v51  ;;  %v2141_v18 = vrot.slane %v2139_v2, 4  ;;  %v2873_v25 = vunpack.c.l.b16 %v2140_v16  ;;  %v1738_v27 = vshrl.u32 %v1645_v9, 16  ;;  %405 = vst.msk [vmem:[#allocation2 + $0xb8] sm:$0xf] %vm308_vm0, %v356_v26  ;;  %v329_v6 = vld [vmem:[%s4649_s8 + $0x40] sm:$0xf] }
  0x5e   : > { %2467 = vrot.lane.b32.xlu1 %v2438_v21, %s4561_s13  ;;  %2365 = vrot.lane.b32.xlu2 %v2347_v10, %s4562_s14  ;;  %v2340_v24 = vunpack.c.l.b16 %v804_v35  ;;  %v1741_v28 = vshll.u32 %v1645_v9, 16  ;;  %v1747_v36 = vshll.u32 %v4894_v19, 16  ;;  %v1751_v37 = vshrl.u32 %v4894_v19, 16  ;;  %378 = vst.msk [vmem:[#allocation2 + $0x4c] sm:$0xf] %vm308_vm0, %v329_v6  ;;  %v4235_v26 = vld [vmem:[#allocation2 + $0xa8] sm:$0xff] }
  0x5f   : > { %v2143_v29 = vsel %vm4684_vm6, %v2141_v18, %v2142_v8  ;;  %v1757_v38 = vshll.u32 %v4896_v20, 16  ;;  %v1740_v44 = vrot.slane %v1738_v27, 4  ;;  %v2428_v22 = vpack.c.b16 %v2400_v55, %v2399_v14  ;;  %v857_v6 = vld [vmem:[#allocation2 + $0x30] sm:$0xe] }
  0x60   : > { %2669 = vrot.lane.b32.xlu0 %v2651_v4, %s4562_s14  ;;  %v2874_v42 = vunpack.c.l.b16 %v2143_v29  ;;  %v1743_v46 = vrot.slane %v1741_v28, 5  ;;  %v2358_v21 = vpack.c.b16 %v2340_v24, %v4901_v5  ;;  %v1749_v32 = vrot.slane %v1747_v36, 5 }
  0x61   : > { %v1753_v49 = vrot.slane %v1751_v37, 4  ;;  %v1759_v52 = vrot.slane %v1757_v38, 5  ;;  %v3892_v53 = vrot.slane %v1467_v15, 9  ;;  %v1551_v58 = vrot.slane %v1039_v31, 5  ;;  %v4945_v15 = vld [vmem:[%s6272_s2 + $0x78] sm:$0xff] }
  0x62   : > { %v2905_v34 = vpack.c.b16 %v2874_v42, %v2873_v25  ;;  %v1744_v51 = vor.u32 %v1743_v46, %v1740_v44  ;;  %v1554_v59 = vrot.slane %v1067_v33, 5  ;;  %v3887_v61 = vrot.slane %v867_v30, 9  ;;  %v2074_v25 = vld [vmem:[#allocation2 + $0x24] sm:$0xe]  ;;  %v357_v30 = vld [vmem:[%s4649_s8 + $0xb0] sm:$0x1]  ;;  %3465 = vmatpush.bf16.msra.mxu1 %v4945_v15 }
  0x63   : > { %v1754_v57 = vor.u32 %v1753_v49, %v1749_v32  ;;  %v1020_v0 = vrot.slane %v4910_v39, 5  ;;  %v1023_v2 = vrot.slane %v4915_v48, 5  ;;  %v542_v4 = vshrl.u32 %v424_v41, 16  ;;  %406 = vst.msk [vmem:[#allocation2 + $0xbc] sm:$0x1] %vm311_vm1, %v357_v30 }
  0x64   : > { %4185 = vmatmul.msk.bf16.vlgmr.msra.gmra.mxu2 %vm2921_vm8, %v2905_v34  ;;  %v1745_v63 = vrot.slane %v1744_v51, 4  ;;  %v1552_v8 = vsel %vm4684_vm6, %v3892_v53, %v1551_v58  ;;  %v1553_v9 = vrot.slane %v1551_v58, 4  ;;  %v545_v10 = vshll.u32 %v424_v41, 16  ;;  %v446_v41 = vld [vmem:[#allocation2 + $0xa8] sm:$0xf] }
  0x65   : > { %v1755_v7 = vrot.slane %v1754_v57, 4  ;;  %v2623_v14 = vunpack.c.l.b16 %v1552_v8  ;;  %v1021_v16 = vsel %vm4684_vm6, %v3887_v61, %v1020_v0  ;;  %v1022_v35 = vrot.slane %v1020_v0, 4 }
  0x66   : > { %2447 = vrot.lane.b32.xlu1 %v2428_v22, %s4561_s13  ;;  %2541 = vrot.lane.b32.xlu2 %v4224_v40, %s4560_s12  ;;  %v1750_v11 = vsel %vm4716_vm7, %v1745_v63, %v1749_v32  ;;  %v1555_v18 = vsel %vm4684_vm6, %v1553_v9, %v1554_v59  ;;  %v2421_v24 = vunpack.c.l.b16 %v1021_v16  ;;  %v544_v33 = vrot.slane %v542_v4, 4  ;;  %v4241_v40 = vld [vmem:[#allocation2 + $0x3c] sm:$0xff]  ;;  %v4967_v4 = vld [vmem:[#allocation2 + $0x34] sm:$0xf] }
  0x67   : > { %v1760_v5 = vsel %vm4716_vm7, %v1755_v7, %v1759_v52  ;;  %v2797_v55 = vunpack.c.l.b16 %v1750_v11  ;;  %v2624_v28 = vunpack.c.l.b16 %v1555_v18  ;;  %v1024_v31 = vsel %vm4684_vm6, %v1022_v35, %v1023_v2  ;;  %v4972_v11 = vld [vmem:[#allocation2 + $0x38] sm:$0x1]  ;;  %v330_v18 = vld [vmem:[%s4649_s8 + $0x44] sm:$0x1] }
  0x68   : > { %2387 = vrot.lane.b32.xlu0 %v2358_v21, %s4562_s14  ;;  %v2798_v27 = vunpack.c.l.b16 %v1760_v5  ;;  %v2422_v29 = vunpack.c.l.b16 %v1024_v31  ;;  %v547_v36 = vrot.slane %v545_v10, 5  ;;  %v551_v37 = vshll.u32 %v4864_v12, 16  ;;  %v1647_v31 = vld [vmem:[#allocation2 + $0x3c] sm:$0xf]  ;;  %379 = vst.msk [vmem:[#allocation2 + $0x50] sm:$0x1] %vm311_vm1, %v330_v18 }
  0x69   : > { %v555_v38 = vshrl.u32 %v4864_v12, 16  ;;  %v4950_v44 = vpack.c.b16 %v2624_v28, %v2623_v14  ;;  %v561_v46 = vshll.u32 %v4874_v45, 16  ;;  %v3906_v47 = vrot.slane %v2074_v25, 9  ;;  %v4261_v14 = vld [vmem:[%s6272_s2 + $0x38] sm:$0xff] }
  0x6a   : > { %v2827_v42 = vpack.c.b16 %v2798_v27, %v2797_v55  ;;  %v4954_v21 = vpack.c.b16 %v2422_v29, %v2421_v24  ;;  %v548_v22 = vor.u32 %v547_v36, %v544_v33  ;;  %v553_v32 = vrot.slane %v551_v37, 5  ;;  %3376 = vmatpush.bf16.msra.mxu0 %v4261_v14  ;;  %v4989_v37 = vld [vmem:[#allocation2 + $0x40] sm:$0xf]  ;;  %4368 = vmatpush.bf16.msra.mxu3 %v4261_v14 }
  0x6b   : > { %v557_v49 = vrot.slane %v555_v38, 4  ;;  %v563_v34 = vrot.slane %v561_v46, 5  ;;  %v2146_v12 = vrot.slane %v4807_v56, 5  ;;  %v2149_v51 = vrot.slane %v4811_v3, 5 }
  0x6c   : > { %v806_v52 = vshrl.u32 %v446_v41, 16  ;;  %v549_v53 = vrot.slane %v548_v22, 4  ;;  %v809_v45 = vshll.u32 %v446_v41, 16  ;;  %v815_v57 = vshll.u32 %v4910_v39, 16  ;;  %v5002_v22 = vld [vmem:[#allocation2 + $0x44] sm:$0x1] }
  0x6d   : > { %v558_v54 = vor.u32 %v557_v49, %v553_v32  ;;  %v2147_v58 = vsel %vm4684_vm6, %v3906_v47, %v2146_v12  ;;  %v2148_v59 = vrot.slane %v2146_v12, 4  ;;  %v819_v63 = vshrl.u32 %v4910_v39, 16  ;;  %v4977_v39 = vld [vmem:[%s6272_s2 + $0x70] sm:$0xff] }
  0x6e   : > { %2767 = vrot.lane.b32.xlu1 %v4241_v40, %s4561_s13  ;;  %2845 = vrot.lane.b32.xlu2 %v2827_v42, %s4560_s12  ;;  %v808_v61 = vrot.slane %v806_v52, 4  ;;  %v554_v56 = vsel %vm4716_vm7, %v549_v53, %v553_v32  ;;  %v2875_v0 = vunpack.c.l.b16 %v2147_v58  ;;  %v811_v2 = vrot.slane %v809_v45, 5  ;;  %v1041_v58 = vld [vmem:[#allocation2 + $0x40] sm:$0xf] }
  0x6f   : > { %v559_v3 = vrot.slane %v558_v54, 4  ;;  %v2319_v7 = vunpack.c.l.b16 %v554_v56  ;;  %v2150_v8 = vsel %vm4684_vm6, %v2148_v59, %v2149_v51  ;;  %v817_v9 = vrot.slane %v815_v57, 5  ;;  %3466 = vmatpush.bf16.msra.mxu1 %v4977_v39  ;;  %v1068_v56 = vld [vmem:[#allocation2 + $0x44] sm:$0x1] }
  0x70   : > { %2563 = vrot.lane.b32.xlu0 %v4235_v26, %s4560_s12  ;;  %v821_v10 = vrot.slane %v819_v63, 4  ;;  %v2876_v35 = vunpack.c.l.b16 %v2150_v8  ;;  %v812_v5 = vor.u32 %v811_v2, %v808_v61  ;;  %v825_v55 = vshll.u32 %v4915_v48, 16  ;;  %v4994_v48 = vld [vmem:[%s6272_s2 + $0x68] sm:$0xff]  ;;  %v2075_v26 = vld [vmem:[#allocation2 + $0x30] sm:$0xe] }
  0x71   : > { %v564_v16 = vsel %vm4716_vm7, %v559_v3, %v563_v34  ;;  %v3877_v27 = vrot.slane %v857_v6, 9  ;;  %v950_v28 = vrot.slane %v4967_v4, 5  ;;  %v953_v36 = vrot.slane %v4972_v11, 5  ;;  %v4260_v3 = vld [vmem:[%s6272_s2 + $0x30] sm:$0xff]  ;;  %v1468_v6 = vld [vmem:[#allocation2 + $0x3c] sm:$0xe] }
  0x72   : > { %v2320_v24 = vunpack.c.l.b16 %v564_v16  ;;  %v822_v25 = vor.u32 %v821_v10, %v817_v9  ;;  %v2906_v33 = vpack.c.b16 %v2876_v35, %v2875_v0  ;;  %v813_v30 = vrot.slane %v812_v5, 4  ;;  %v4225_v10 = vld [vmem:[#allocation2 + $0x30] sm:$0xff]  ;;  %v5033_v35 = vld [vmem:[#allocation2 + $0xb8] sm:$0xf]  ;;  %v5035_v5 = vld [vmem:[#allocation2 + $0xbc] sm:$0x1]  ;;  %3377 = vmatpush.bf16.msra.mxu0 %v4260_v3  ;;  %4369 = vmatpush.bf16.msra.mxu3 %v4260_v3 }
  0x73   : > { %v827_v29 = vrot.slane %v825_v55, 5  ;;  %v951_v40 = vsel %vm4684_vm6, %v3877_v27, %v950_v28  ;;  %v952_v42 = vrot.slane %v950_v28, 4  ;;  %v1762_v32 = vshrl.u32 %v1647_v31, 16  ;;  %3467 = vmatpush.bf16.msra.mxu1 %v4994_v48  ;;  %v426_v27 = vld [vmem:[#allocation2 + $0x30] sm:$0xf] }
  0x74   : > { %v2348_v38 = vpack.c.b16 %v2320_v24, %v2319_v7  ;;  %v823_v41 = vrot.slane %v822_v25, 4  ;;  %4186 = vmatmul.msk.bf16.gmra.mxu2 %vm2921_vm8, %v2906_v33  ;;  %v818_v46 = vsel %vm4716_vm7, %v813_v30, %v817_v9  ;;  %v2401_v47 = vunpack.c.l.b16 %v951_v40  ;;  %v868_v7 = vld [vmem:[#allocation2 + $0xb4] sm:$0xe] }
  0x75   : > { %v1765_v49 = vshll.u32 %v1647_v31, 16  ;;  %v5009_v12 = vunpack.c.l.b16 %v818_v46  ;;  %v954_v51 = vsel %vm4684_vm6, %v952_v42, %v953_v36  ;;  %v1771_v52 = vshll.u32 %v4989_v37, 16  ;;  %v358_v28 = vld [vmem:[%s4649_s8 + $0xb4] sm:$0xf]  ;;  %v359_v36 = vld [vmem:[%s4649_s8 + $0xb8] sm:$0xf] }
  0x76   : > { %2469 = vrot.lane.b32.xlu1 %v4954_v21, %s4561_s13  ;;  %2367 = vrot.lane.b32.xlu2 %v2348_v38, %s4562_s14  ;;  %v828_v34 = vsel %vm4716_vm7, %v823_v41, %v827_v29  ;;  %v2402_v54 = vunpack.c.l.b16 %v954_v51  ;;  %v1764_v45 = vrot.slane %v1762_v32, 4  ;;  %v1775_v59 = vshrl.u32 %v4989_v37, 16  ;;  %407 = vst.msk [vmem:[#allocation2 + $0xc0] sm:$0xf] %vm308_vm0, %v358_v28  ;;  %v331_v46 = vld [vmem:[%s4649_s8 + $0x48] sm:$0xf] }
  0x77   : > { %v5014_v53 = vunpack.c.l.b16 %v828_v34  ;;  %v1767_v57 = vrot.slane %v1765_v49, 5  ;;  %v1773_v21 = vrot.slane %v1771_v52, 5  ;;  %v1781_v61 = vshll.u32 %v5002_v22, 16  ;;  %408 = vst.msk [vmem:[#allocation2 + $0xc4] sm:$0xf] %vm308_vm0, %v359_v36 }
  0x78   : > { %2671 = vrot.lane.b32.xlu0 %v4950_v44, %s4562_s14  ;;  %v3907_v63 = vrot.slane %v2075_v26, 9  ;;  %v2153_v2 = vrot.slane %v4894_v19, 5  ;;  %v5028_v44 = vld [vmem:[%s6272_s2 + $0x60] sm:$0xff]  ;;  %v2429_v9 = vpack.c.b16 %v2402_v54, %v2401_v47  ;;  %v1777_v14 = vrot.slane %v1775_v59, 4  ;;  %v4259_v19 = vld [vmem:[%s6272_s2 + $0x28] sm:$0xff] }
  0x79   : > { %v1768_v0 = vor.u32 %v1767_v57, %v1764_v45  ;;  %v2359_v8 = vpack.c.b16 %v5014_v53, %v5009_v12  ;;  %v2156_v16 = vrot.slane %v4896_v20, 5  ;;  %v1783_v18 = vrot.slane %v1781_v61, 5  ;;  %3468 = vmatpush.bf16.msra.mxu1 %v5028_v44  ;;  %v5046_v20 = vld [vmem:[%s6272_s2 + $0x58] sm:$0xff]  ;;  %v332_v34 = vld [vmem:[%s4649_s8 + $0x4c] sm:$0xf]  ;;  %3378 = vmatpush.bf16.msra.mxu0 %v4259_v19 }
  0x7a   : > { %v2154_v24 = vsel %vm4684_vm6, %v3907_v63, %v2153_v2  ;;  %v2155_v25 = vrot.slane %v2153_v2, 4  ;;  %v1778_v31 = vor.u32 %v1777_v14, %v1773_v21  ;;  %v3893_v30 = vrot.slane %v1468_v6, 9  ;;  %380 = vst.msk [vmem:[#allocation2 + $0x54] sm:$0xf] %vm308_vm0, %v331_v46  ;;  %4370 = vmatpush.bf16.msra.mxu3 %v4259_v19  ;;  %v858_v28 = vld [vmem:[#allocation2 + $0x3c] sm:$0xe] }
  0x7b   : > { %v1769_v55 = vrot.slane %v1768_v0, 4  ;;  %v2877_v33 = vunpack.c.l.b16 %v2154_v24  ;;  %v1558_v29 = vrot.slane %v1041_v58, 5  ;;  %v1561_v40 = vrot.slane %v1068_v56, 5  ;;  %381 = vst.msk [vmem:[#allocation2 + $0x58] sm:$0xf] %vm308_vm0, %v332_v34 }
  0x7c   : > { %v2157_v41 = vsel %vm4684_vm6, %v2155_v25, %v2156_v16  ;;  %v3888_v42 = vrot.slane %v868_v7, 9  ;;  %v1779_v47 = vrot.slane %v1778_v31, 4  ;;  %v1027_v52 = vrot.slane %v5033_v35, 5  ;;  %v448_v7 = vld [vmem:[#allocation2 + $0xb4] sm:$0xf]  ;;  %v4257_v31 = vld [vmem:[%s6272_s2 + $0x18] sm:$0xff] }
  0x7d   : > { %v1774_v38 = vsel %vm4716_vm7, %v1769_v55, %v1773_v21  ;;  %v2878_v49 = vunpack.c.l.b16 %v2157_v41  ;;  %v1559_v26 = vsel %vm4684_vm6, %v3893_v30, %v1558_v29  ;;  %v1560_v12 = vrot.slane %v1558_v29, 4  ;;  %3469 = vmatpush.bf16.msra.mxu1 %v5046_v20  ;;  %v4242_v21 = vld [vmem:[#allocation2 + $0x48] sm:$0xff]  ;;  %v4236_v55 = vld [vmem:[#allocation2 + $0xb4] sm:$0xff]  ;;  %v5094_v36 = vld [vmem:[#allocation2 + $0x40] sm:$0xf] }
  0x7e   : > { %2449 = vrot.lane.b32.xlu1 %v2429_v9, %s4561_s13  ;;  %2543 = vrot.lane.b32.xlu2 %v4225_v10, %s4560_s12  ;;  %v2799_v32 = vunpack.c.l.b16 %v1774_v38  ;;  %v2625_v51 = vunpack.c.l.b16 %v1559_v26  ;;  %v1030_v53 = vrot.slane %v5035_v5, 5  ;;  %v1784_v54 = vsel %vm4716_vm7, %v1779_v47, %v1783_v18  ;;  %v5080_v9 = vld [vmem:[%s6272_s2 + $0x50] sm:$0xff]  ;;  %v5104_v46 = vld [vmem:[#allocation2 + $0x44] sm:$0x1]  ;;  %v2076_v34 = vld [vmem:[#allocation2 + $0x3c] sm:$0xe] }
  0x7f   : > { %v2907_v45 = vpack.c.b16 %v2878_v49, %v2877_v33  ;;  %v566_v57 = vshrl.u32 %v426_v27, 16  ;;  %v569_v58 = vshll.u32 %v426_v27, 16  ;;  %v2800_v59 = vunpack.c.l.b16 %v1784_v54 }
  0x80   : > { %2389 = vrot.lane.b32.xlu0 %v2359_v8, %s4562_s14  ;;  %v1562_v61 = vsel %vm4684_vm6, %v1560_v12, %v1561_v40  ;;  %v1028_v63 = vsel %vm4684_vm6, %v3888_v42, %v1027_v52  ;;  %v1029_v56 = vrot.slane %v1027_v52, 4  ;;  %v4258_v8 = vld [vmem:[%s6272_s2 + $0x20] sm:$0xff]  ;;  %v575_v16 = vshll.u32 %v4967_v4, 16 }
  0x81   : > { %v2626_v3 = vunpack.c.l.b16 %v1562_v61  ;;  %v2423_v0 = vunpack.c.l.b16 %v1028_v63  ;;  %v568_v2 = vrot.slane %v566_v57, 4  ;;  %v571_v6 = vrot.slane %v569_v58, 5  ;;  %3379 = vmatpush.bf16.msra.mxu0 %v4258_v8  ;;  %3470 = vmatpush.bf16.msra.mxu1 %v5080_v9 }
  0x82   : > { %v2828_v10 = vpack.c.b16 %v2800_v59, %v2799_v32  ;;  %v1031_v14 = vsel %vm4684_vm6, %v1029_v56, %v1030_v53  ;;  %v579_v19 = vshrl.u32 %v4967_v4, 16  ;;  %v585_v27 = vshll.u32 %v4972_v11, 16  ;;  %v5099_v11 = vld [vmem:[%s6272_s2 + $0x48] sm:$0xff]  ;;  %4371 = vmatpush.bf16.msra.mxu3 %v4258_v8 }
  0x83   : > { %v5086_v18 = vpack.c.b16 %v2626_v3, %v2625_v51  ;;  %v2424_v24 = vunpack.c.l.b16 %v1031_v14  ;;  %v572_v25 = vor.u32 %v571_v6, %v568_v2  ;;  %v577_v33 = vrot.slane %v575_v16, 5  ;;  %v5123_v2 = vld [vmem:[%s6272_s2 + $0x40] sm:$0xff]  ;;  %v1649_v14 = vld [vmem:[#allocation2 + $0x48] sm:$0xf] }
  0x84   : > { %4187 = vmatmul.msk.bf16.gmra.mxu2 %vm2921_vm8, %v2907_v45  ;;  %v581_v30 = vrot.slane %v579_v19, 4  ;;  %v830_v4 = vshrl.u32 %v448_v7, 16  ;;  %v833_v29 = vshll.u32 %v448_v7, 16  ;;  %v587_v40 = vrot.slane %v585_v27, 5 }
  0x85   : > { %v2440_v38 = vpack.c.b16 %v2424_v24, %v2423_v0  ;;  %v573_v41 = vrot.slane %v572_v25, 4  ;;  %v839_v42 = vshll.u32 %v5033_v35, 16  ;;  %v843_v26 = vshrl.u32 %v5033_v35, 16  ;;  %3380 = vmatpush.bf16.msra.mxu0 %v4257_v31  ;;  %3471 = vmatpush.bf16.msra.mxu1 %v5099_v11  ;;  %v4256_v0 = vld [vmem:[%s6272_s2 + $0x10] sm:$0xff]  ;;  %v5132_v24 = vld [vmem:[#allocation2 + $0x4c] sm:$0xf] }
  0x86   : > { %2769 = vrot.lane.b32.xlu1 %v4242_v21, %s4561_s13  ;;  %2847 = vrot.lane.b32.xlu2 %v2828_v10, %s4560_s12  ;;  %v582_v47 = vor.u32 %v581_v30, %v577_v33  ;;  %v832_v32 = vrot.slane %v830_v4, 4  ;;  %v835_v49 = vrot.slane %v833_v29, 5  ;;  %v849_v52 = vshll.u32 %v5035_v5, 16 }
  0x87   : > { %v578_v12 = vsel %vm4716_vm7, %v573_v41, %v577_v33  ;;  %v841_v51 = vrot.slane %v839_v42, 5  ;;  %v3878_v53 = vrot.slane %v858_v28, 9  ;;  %v845_v58 = vrot.slane %v843_v26, 4  ;;  %4372 = vmatpush.bf16.msra.mxu3 %v4257_v31  ;;  %v4255_v31 = vld [vmem:[%s6272_s2 + $0x8] sm:$0xff]  ;;  %v333_v33 = vld [vmem:[%s4649_s8 + $0x50] sm:$0x1] }
  0x88   : > { %2565 = vrot.lane.b32.xlu0 %v4236_v55, %s4560_s12  ;;  %v583_v54 = vrot.slane %v582_v47, 4  ;;  %v2321_v45 = vunpack.c.l.b16 %v578_v12  ;;  %v836_v57 = vor.u32 %v835_v49, %v832_v32  ;;  %v851_v21 = vrot.slane %v849_v52, 5  ;;  %v5146_v41 = vld [vmem:[#allocation2 + $0x50] sm:$0x1]  ;;  %382 = vst.msk [vmem:[#allocation2 + $0x5c] sm:$0x1] %vm311_vm1, %v333_v33 }
  0x89   : > { %v957_v35 = vrot.slane %v5094_v36, 5  ;;  %v960_v59 = vrot.slane %v5104_v46, 5  ;;  %v3908_v61 = vrot.slane %v2076_v34, 9  ;;  %v846_v5 = vor.u32 %v845_v58, %v841_v51  ;;  %3381 = vmatpush.bf16.msra.mxu0 %v4256_v0  ;;  %3472 = vmatpush.bf16.msra.mxu1 %v5123_v2  ;;  %v5155_v49 = vld [vmem:[#allocation2 + $0x4c] sm:$0xf] }
  0x8a   : > { %v588_v63 = vsel %vm4716_vm7, %v583_v54, %v587_v40  ;;  %v837_v56 = vrot.slane %v836_v57, 4  ;;  %v2160_v3 = vrot.slane %v4989_v37, 5  ;;  %v2163_v10 = vrot.slane %v5002_v22, 5  ;;  %v5157_v26 = vld [vmem:[#allocation2 + $0x50] sm:$0x1] }
  0x8b   : > { %v2322_v6 = vunpack.c.l.b16 %v588_v63  ;;  %v958_v7 = vsel %vm4684_vm6, %v3878_v53, %v957_v35  ;;  %v959_v8 = vrot.slane %v957_v35, 4  ;;  %v847_v16 = vrot.slane %v846_v5, 4  ;;  %4373 = vmatpush.bf16.msra.mxu3 %v4256_v0  ;;  %v1469_v52 = vld [vmem:[#allocation2 + $0x48] sm:$0xe]  ;;  %v5161_v53 = vpop.permute.xlu2 %2761  ;;  %v1034_v63 = vld [vmem:[#allocation2 + $0x18] sm:$0xf] }
  0x8c   : > { %v842_v37 = vsel %vm4716_vm7, %v837_v56, %v841_v51  ;;  %v2403_v19 = vunpack.c.l.b16 %v958_v7  ;;  %v2161_v55 = vsel %vm4684_vm6, %v3908_v61, %v2160_v3  ;;  %v2162_v28 = vrot.slane %v2160_v3, 4  ;;  %v428_v56 = vld [vmem:[#allocation2 + $0x3c] sm:$0xf]  ;;  %v4254_v5 = vld [vmem:[%s6272_s2] sm:$0xff] }
  0x8d   : > { %v2349_v25 = vpack.c.b16 %v2322_v6, %v2321_v45  ;;  %v5136_v27 = vunpack.c.l.b16 %v842_v37  ;;  %v961_v22 = vsel %vm4684_vm6, %v959_v8, %v960_v59  ;;  %v852_v30 = vsel %vm4716_vm7, %v847_v16, %v851_v21  ;;  %3382 = vmatpush.bf16.msra.mxu0 %v4255_v31  ;;  %v335_v21 = vld [vmem:[%s4649_s8 + $0x58] sm:$0xf]  ;;  %v4226_v3 = vld [vmem:[#allocation2 + $0x3c] sm:$0xff] }
  0x8e   : > { %2471 = vrot.lane.b32.xlu1 %v2440_v38, %s4561_s13  ;;  %v2404_v4 = vunpack.c.l.b16 %v961_v22  ;;  %v2879_v29 = vunpack.c.l.b16 %v2161_v55  ;;  %v1786_v38 = vshrl.u32 %v1649_v14, 16  ;;  %v2344_v40 = vunpack.c.l.b16 %v852_v30  ;;  %v4448_v37 = vld [vmem:[#allocation2 + $0x1c] sm:$0xf]  ;;  %384 = vst.msk [vmem:[#allocation2 + $0x64] sm:$0xf] %vm308_vm0, %v335_v21 }
  0x8f   : > { %2369 = vrot.lane.b32.xlu2 %v2349_v25, %s4562_s14  ;;  %v2164_v42 = vsel %vm4684_vm6, %v2162_v28, %v2163_v10  ;;  %v1789_v47 = vshll.u32 %v1649_v14, 16  ;;  %v1795_v32 = vshll.u32 %v5132_v24, 16  ;;  %v1799_v51 = vshrl.u32 %v5132_v24, 16  ;;  %4374 = vmatpush.bf16.msra.mxu3 %v4255_v31  ;;  %v4449_v55 = vld [vmem:[#allocation2 + $0x14] sm:$0x1] }
  0x90   : > { %2673 = vrot.lane.b32.xlu0 %v5086_v18, %s4562_s14  ;;  %v2880_v34 = vunpack.c.l.b16 %v2164_v42  ;;  %v1788_v12 = vrot.slane %v1786_v38, 4  ;;  %v334_v18 = vld [vmem:[%s4649_s8 + $0x54] sm:$0xf]  ;;  %v2430_v54 = vpack.c.b16 %v2404_v4, %v2403_v19  ;;  %v1805_v58 = vshll.u32 %v5146_v41, 16 }
  0x91   : > { %v1791_v45 = vrot.slane %v1789_v47, 5  ;;  %v1797_v57 = vrot.slane %v1795_v32, 5  ;;  %v2360_v35 = vpack.c.b16 %v2344_v40, %v5136_v27  ;;  %v1801_v61 = vrot.slane %v1799_v51, 4  ;;  %383 = vst.msk [vmem:[#allocation2 + $0x60] sm:$0xf] %vm308_vm0, %v334_v18  ;;  %3383 = vmatpush.bf16.msra.mxu0 %v4254_v5  ;;  %v4243_v47 = vld [vmem:[#allocation2 + $0x54] sm:$0xff] }
  0x92   : > { %v2908_v59 = vpack.c.b16 %v2880_v34, %v2879_v29  ;;  %v1807_v6 = vrot.slane %v1805_v58, 5  ;;  %v3894_v7 = vrot.slane %v1469_v52, 9  ;;  %v1565_v8 = vrot.slane %v5155_v49, 5  ;;  %v4237_v58 = vld [vmem:[#allocation2 + $0xc0] sm:$0xff] }
  0x93   : > { %v1792_v0 = vor.u32 %v1791_v45, %v1788_v12  ;;  %v1802_v10 = vor.u32 %v1801_v61, %v1797_v57  ;;  %v1568_v14 = vrot.slane %v5157_v26, 5  ;;  %v1114_v16 = vshll.u32 %v4448_v37, 16  ;;  %4375 = vmatpush.bf16.msra.mxu3 %v4254_v5 }
  0x94   : > { %4188 = vmatmul.msk.bf16.gmra.mxu2 %vm2921_vm8, %v2908_v59  ;;  %v1120_v19 = vrot.slane %v1118_v62, 4  ;;  %v1100_v25 = vshll.u32 %v4449_v55, 16  ;;  %v5179_v22 = vsel %vm4684_vm6, %v3894_v7, %v1565_v8  ;;  %v1567_v28 = vrot.slane %v1565_v8, 4 }
  0x95   : > { %v1793_v27 = vrot.slane %v1792_v0, 4  ;;  %v1803_v31 = vrot.slane %v1802_v10, 4  ;;  %v1116_v33 = vrot.slane %v1114_v16, 5  ;;  %v1126_v43 = vrot.slane %v1124_v60, 5  ;;  %v4450_v0 = vld [vmem:[#allocation2 + $0x10] sm:$0xf] }
  0x96   : > { %2451 = vrot.lane.b32.xlu1 %v2430_v54, %s4561_s13  ;;  %v1105_v62 = vshrl.u32 %v1034_v63, 16  ;;  %v1569_v29 = vsel %vm4684_vm6, %v1567_v28, %v1568_v14  ;;  %v1108_v38 = vshll.u32 %v1034_v63, 16  ;;  %v590_v40 = vshrl.u32 %v428_v56, 16  ;;  %v2077_v14 = vld [vmem:[#allocation2 + $0x48] sm:$0xe] }
  0x97   : > { %4376 = vmatpush.bf16.msrb.mxu3 %v4945_v15  ;;  %2545 = vrot.lane.b32.xlu2 %v4226_v3, %s4560_s12  ;;  %v5186_v30 = vpop.permute.xlu1 %2537  ;;  %v1798_v4 = vsel %vm4716_vm7, %v1793_v27, %v1797_v57  ;;  %v1808_v50 = vsel %vm4716_vm7, %v1803_v31, %v1807_v6  ;;  %v2627_v15 = vunpack.c.l.b16 %v5179_v22  ;;  %v1121_v42 = vor.u32 %v1120_v19, %v1116_v33  ;;  %v5197_v57 = vpop.permute.xlu2 %2539  ;;  %v1032_v6 = vld [vmem:[#allocation2 + $0xc] sm:$0xf] }
  0x98   : > { %2391 = vrot.lane.b32.xlu0 %v2360_v35, %s4562_s14  ;;  %v2801_v60 = vunpack.c.l.b16 %v1798_v4  ;;  %v2802_v32 = vunpack.c.l.b16 %v1808_v50  ;;  %v2628_v34 = vunpack.c.l.b16 %v1569_v29  ;;  %v1107_v12 = vrot.slane %v1105_v62, 4 }
  0x99   : > { %v1110_v51 = vrot.slane %v1108_v38, 5  ;;  %v1122_v52 = vrot.slane %v1121_v42, 4  ;;  %v592_v18 = vrot.slane %v590_v40, 4  ;;  %v593_v54 = vshll.u32 %v428_v56, 16 }
  0x9a   : > { %v599_v45 = vshll.u32 %v5094_v36, 16  ;;  %v2829_v21 = vpack.c.b16 %v2802_v32, %v2801_v60  ;;  %v603_v59 = vshrl.u32 %v5094_v36, 16  ;;  %v609_v61 = vshll.u32 %v5104_v46, 16 }
  0x9b   : > { %4377 = vmatpush.bf16.msrb.mxu3 %v4977_v39  ;;  %v1111_v35 = vor.u32 %v1110_v51, %v1107_v12  ;;  %v1127_v63 = vsel %vm4716_vm7, %v1122_v52, %v1126_v43  ;;  %v595_v5 = vrot.slane %v593_v54, 5  ;;  %v1090_v56 = vshll.u32 %v4450_v0, 16  ;;  %v5228_v51 = vld [vmem:[#allocation2 + $0xa0] sm:$0xf]  ;;  %v1476_v52 = vld [vmem:[#allocation2 + $0x9c] sm:$0xe] }
  0x9c   : > { %v601_v3 = vrot.slane %v599_v45, 5  ;;  %v5204_v39 = vunpack.c.l.b16 %v1127_v63  ;;  %v605_v8 = vrot.slane %v603_v59, 4  ;;  %v611_v10 = vrot.slane %v609_v61, 5  ;;  %v859_v59 = vld [vmem:[#allocation2 + $0x48] sm:$0xe] }
  0x9d   : > { %v1112_v7 = vrot.slane %v1111_v35, 4  ;;  %v596_v37 = vor.u32 %v595_v5, %v592_v18  ;;  %v1092_v36 = vrot.slane %v1090_v56, 5  ;;  %v1096_v46 = vrot.slane %v1094_v23, 4  ;;  %v5232_v18 = vld [vmem:[#allocation2 + $0x4c] sm:$0xf] }
  0x9e   : > { %2771 = vrot.lane.b32.xlu1 %v4243_v47, %s4561_s13  ;;  %v1102_v16 = vrot.slane %v1100_v25, 5  ;;  %v606_v27 = vor.u32 %v605_v8, %v601_v3  ;;  %v1081_v22 = vshrl.u32 %v1032_v6, 16  ;;  %v1084_v28 = vshll.u32 %v1032_v6, 16  ;;  %v5240_v35 = vld [vmem:[#allocation2 + $0xa4] sm:$0x1] }
  0x9f   : > { %4378 = vmatpush.bf16.msrb.mxu3 %v4994_v48  ;;  %2849 = vrot.lane.b32.xlu2 %v2829_v21, %s4560_s12  ;;  %v5211_v19 = vpop.permute.xlu1 %2763  ;;  %v1117_v55 = vsel %vm4716_vm7, %v1112_v7, %v1116_v33  ;;  %v597_v43 = vrot.slane %v596_v37, 4  ;;  %v1097_v13 = vor.u32 %v1096_v46, %v1092_v36  ;;  %v3909_v23 = vrot.slane %v2077_v14, 9  ;;  %v4250_v48 = vld [vmem:[#allocation2 + $0xa8] sm:$0xff] }
  0xa0   : > { %2567 = vrot.lane.b32.xlu0 %v4237_v58, %s4560_s12  ;;  %v5215_v31 = vunpack.c.l.b16 %v1117_v55  ;;  %v607_v62 = vrot.slane %v606_v27, 4  ;;  %v1083_v4 = vrot.slane %v1081_v22, 4  ;;  %v1086_v29 = vrot.slane %v1084_v28, 5  ;;  %v1665_v46 = vld [vmem:[#allocation2 + $0xa8] sm:$0xf] }
  0xa1   : > { %v2167_v38 = vrot.slane %v5132_v24, 5  ;;  %v2654_v40 = vpack.c.b16 %v2628_v34, %v2627_v15  ;;  %v602_v33 = vsel %vm4716_vm7, %v597_v43, %v601_v3  ;;  %v1098_v50 = vrot.slane %v1097_v13, 4  ;;  %v2842_v54 = vpop.permute.xlu2 %2841  ;;  %v5244_v3 = vld [vmem:[#allocation2 + $0x50] sm:$0x1]  ;;  %v1666_v22 = vld [vmem:[#allocation2 + $0xac] sm:$0xf] }
  0xa2   : > { %v5217_v25 = vpop.permute.xlu0 %2441  ;;  %v2170_v60 = vrot.slane %v5146_v41, 5  ;;  %v612_v42 = vsel %vm4716_vm7, %v607_v62, %v611_v10  ;;  %v2323_v47 = vunpack.c.l.b16 %v602_v33  ;;  %v1087_v32 = vor.u32 %v1086_v29, %v1083_v4  ;;  %v5234_v41 = vld [vmem:[#allocation2 + $0x28] sm:$0xf] }
  0xa3   : > { %4379 = vmatpush.bf16.msrb.mxu3 %v5028_v44  ;;  %v2168_v12 = vsel %vm4684_vm6, %v3909_v23, %v2167_v38  ;;  %v2324_v24 = vunpack.c.l.b16 %v612_v42  ;;  %v1103_v15 = vsel %vm4716_vm7, %v1098_v50, %v1102_v16  ;;  %v2169_v34 = vrot.slane %v2167_v38, 4  ;;  %v4227_v38 = vld [vmem:[#allocation2 + $0x48] sm:$0xff] }
  0xa4   : > { %v1142_v44 = vshrl.u32 %v5234_v41, 16  ;;  %v2602_v45 = vpack.c.b16 %v5204_v39, %v5215_v31  ;;  %v1088_v58 = vrot.slane %v1087_v32, 4  ;;  %v2881_v21 = vunpack.c.l.b16 %v2168_v12  ;;  %v1651_v32 = vld [vmem:[#allocation2 + $0x54] sm:$0xf]  ;;  %v336_v12 = vld [vmem:[%s4649_s8 + $0x5c] sm:$0x1] }
  0xa5   : > { %v2350_v61 = vpack.c.b16 %v2324_v24, %v2323_v47  ;;  %v2570_v63 = vunpack.c.l.b16 %v1103_v15  ;;  %v2171_v5 = vsel %vm4684_vm6, %v2169_v34, %v2170_v60  ;;  %v3901_v39 = vrot.slane %v1476_v52, 9  ;;  %v4206_v52 = vld [vmem:[#allocation2] sm:$0xff]  ;;  %385 = vst.msk [vmem:[#allocation2 + $0x68] sm:$0x1] %vm311_vm1, %v336_v12 }
  0xa6   : > { %2785 = vrot.lane.b32.xlu1 %v4250_v48, %s4561_s13  ;;  %v1093_v56 = vsel %vm4716_vm7, %v1088_v58, %v1092_v36  ;;  %v2882_v6 = vunpack.c.l.b16 %v2171_v5  ;;  %v1614_v7 = vrot.slane %v5228_v51, 5  ;;  %v1617_v10 = vrot.slane %v5240_v35, 5 }
  0xa7   : > { %4380 = vmatpush.bf16.msrb.mxu3 %v5046_v20  ;;  %2371 = vrot.lane.b32.xlu2 %v2350_v61, %s4562_s14  ;;  %v2569_v8 = vunpack.c.l.b16 %v1093_v56  ;;  %v3879_v14 = vrot.slane %v859_v59, 9  ;;  %v964_v37 = vrot.slane %v5232_v18, 5  ;;  %v967_v36 = vrot.slane %v5244_v3, 5 }
  0xa8   : > { %2675 = vrot.lane.b32.xlu0 %v2654_v40, %s4562_s14  ;;  %v2666_v0 = vpop.permute.xlu1 %2665  ;;  %v2909_v16 = vpack.c.b16 %v2882_v6, %v2881_v21  ;;  %v1615_v55 = vsel %vm4684_vm6, %v3901_v39, %v1614_v7  ;;  %v1616_v27 = vrot.slane %v1614_v7, 4  ;;  %v1978_v62 = vshrl.u32 %v1665_v46, 16  ;;  %v5264_v40 = vld [vmem:[#allocation2 + $0xb0] sm:$0x1]  ;;  %v5272_v21 = vld [vmem:[#allocation2 + $0x58] sm:$0xf] }
  0xa9   : > { %v2601_v28 = vpack.c.b16 %v2570_v63, %v2569_v8  ;;  %v2641_v31 = vunpack.c.l.b16 %v1615_v55  ;;  %v965_v43 = vsel %vm4684_vm6, %v3879_v14, %v964_v37  ;;  %v966_v23 = vrot.slane %v964_v37, 4  ;;  %v1678_v8 = vld [vmem:[#allocation2 + $0x5c] sm:$0x1]  ;;  %v2078_v55 = vld [vmem:[#allocation2 + $0x54] sm:$0xe] }
  0xaa   : > { %v2668_v20 = vpop.permute.xlu0 %2667  ;;  %4189 = vmatmul.msk.bf16.gmra.mxu2 %vm2921_vm8, %v2909_v16  ;;  %v1618_v13 = vsel %vm4684_vm6, %v1616_v27, %v1617_v10  ;;  %v2405_v48 = vunpack.c.l.b16 %v965_v43  ;;  %v1981_v33 = vshll.u32 %v1665_v46, 16  ;;  %v1987_v50 = vshll.u32 %v1666_v22, 16 }
  0xab   : > { %4381 = vmatpush.bf16.msrb.mxu3 %v5080_v9  ;;  %v3054_v4 = vsel %vm2921_vm8, %v2601_v28, %v2666_v0  ;;  %v2642_v29 = vunpack.c.l.b16 %v1618_v13  ;;  %v968_v60 = vsel %vm4684_vm6, %v966_v23, %v967_v36  ;;  %v1980_v42 = vrot.slane %v1978_v62, 4  ;;  %v338_v62 = vld [vmem:[%s4649_s8 + $0x64] sm:$0xf] }
  0xac   : > { %v3101_v9 = vsel %vm2970_vm9, %v3054_v4, %v5161_v53  ;;  %v1991_v47 = vshrl.u32 %v1666_v22, 16  ;;  %v2406_v34 = vunpack.c.l.b16 %v968_v60  ;;  %v1983_v58 = vrot.slane %v1981_v33, 5  ;;  %387 = vst.msk [vmem:[#allocation2 + $0x70] sm:$0xf] %vm308_vm0, %v338_v62 }
  0xad   : > { %v3133_v24 = vsel %vm3003_vm10, %v3101_v9, %v2842_v54  ;;  %v2661_v15 = vpack.c.b16 %v2642_v29, %v2641_v31  ;;  %v3057_v53 = vsel %vm2921_vm8, %v2602_v45, %v2668_v20  ;;  %v1989_v63 = vrot.slane %v1987_v50, 5  ;;  %v4244_v29 = vld [vmem:[#allocation2 + $0x60] sm:$0xff]  ;;  %v4207_v9 = vld [vmem:[#allocation2 + $0xc] sm:$0xff] }
  0xae   : > { %v5277_v59 = vpop.permute.xlu2 %2843  ;;  %3473 = vmatmul.bf16.vlgmr.msra.gmra.mxu1 %v3133_v24  ;;  %v1993_v5 = vrot.slane %v1991_v47, 4  ;;  %v1997_v54 = vshll.u32 %v5264_v40, 16  ;;  %v2431_v0 = vpack.c.b16 %v2406_v34, %v2405_v48  ;;  %v1984_v56 = vor.u32 %v1983_v58, %v1980_v42  ;;  %v337_v48 = vld [vmem:[%s4649_s8 + $0x60] sm:$0xf]  ;;  %v5302_v42 = vld [vmem:[#allocation2 + $0x2c] sm:$0x1] }
  0xaf   : > { %4382 = vmatpush.bf16.msrb.mxu3 %v5099_v11  ;;  %2547 = vrot.lane.b32.xlu2 %v4227_v38, %s4560_s12  ;;  %v1810_v6 = vshrl.u32 %v1651_v32, 16  ;;  %v1813_v39 = vshll.u32 %v1651_v32, 16  ;;  %v1819_v10 = vshll.u32 %v5272_v21, 16  ;;  %v1823_v14 = vshrl.u32 %v5272_v21, 16  ;;  %386 = vst.msk [vmem:[#allocation2 + $0x6c] sm:$0xf] %vm308_vm0, %v337_v48 }
  0xb0   : > { %v5279_v61 = vpop.permute.xlu1 %2443  ;;  %2689 = vrot.lane.b32.xlu0 %v2661_v15, %s4562_s14  ;;  %v1994_v7 = vor.u32 %v1993_v5, %v1989_v63  ;;  %v1999_v45 = vrot.slane %v1997_v54, 5  ;;  %2453 = vrot.lane.b32.xlu1 %v2431_v0, %s4561_s13  ;;  %v1985_v46 = vrot.slane %v1984_v56, 4  ;;  %v1829_v23 = vshll.u32 %v1678_v8, 16  ;;  %v5315_v5 = vld [vmem:[#allocation2 + $0x5c] sm:$0x1] }
  0xb1   : > { %v1812_v20 = vrot.slane %v1810_v6, 4  ;;  %v1815_v16 = vrot.slane %v1813_v39, 5  ;;  %v1821_v22 = vrot.slane %v1819_v10, 5  ;;  %v1825_v28 = vrot.slane %v1823_v14, 4  ;;  %v1470_v54 = vld [vmem:[#allocation2 + $0x54] sm:$0xe] }
  0xb2   : > { %v2362_v11 = vpop.permute.xlu0 %2361  ;;  %v1995_v36 = vrot.slane %v1994_v7, 4  ;;  %v1990_v43 = vsel %vm4716_vm7, %v1985_v46, %v1989_v63  ;;  %v3910_v38 = vrot.slane %v2078_v55, 9  ;;  %v2174_v60 = vrot.slane %v5272_v21, 5  ;;  %v5313_v63 = vld [vmem:[#allocation2 + $0x58] sm:$0xf] }
  0xb3   : > { %v2924_v37 = vsel %vm2921_vm8, %v4206_v52, %v2362_v11  ;;  %4383 = vmatpush.bf16.msrb.mxu3 %v5123_v2  ;;  %v1816_v13 = vor.u32 %v1815_v16, %v1812_v20  ;;  %v2817_v4 = vunpack.c.l.b16 %v1990_v43  ;;  %v1148_v47 = vshll.u32 %v5302_v42, 16  ;;  %v5317_v0 = vld [vmem:[#allocation2 + $0x34] sm:$0xf]  ;;  %v430_v11 = vld [vmem:[#allocation2 + $0x48] sm:$0xf] }
  0xb4   : > { %v2972_v27 = vsel %vm2970_vm9, %v2924_v37, %v5217_v25  ;;  %v2000_v2 = vsel %vm4716_vm7, %v1995_v36, %v1999_v45  ;;  %v1826_v25 = vor.u32 %v1825_v28, %v1821_v22  ;;  %v2177_v15 = vrot.slane %v1678_v8, 5  ;;  %v4251_v43 = vld [vmem:[#allocation2 + $0xb4] sm:$0xff] }
  0xb5   : > { %v3005_v31 = vsel %vm3003_vm10, %v2972_v27, %v5186_v30  ;;  %v2818_v33 = vunpack.c.l.b16 %v2000_v2  ;;  %v1817_v50 = vrot.slane %v1816_v13, 4  ;;  %v1831_v30 = vrot.slane %v1829_v23, 5  ;;  %v4218_v23 = vld [vmem:[#allocation2 + $0x90] sm:$0xff] }
  0xb6   : > { %3384 = vmatmul.bf16.vlgmr.msra.gmra.mxu0 %v3005_v31  ;;  %v1827_v32 = vrot.slane %v1826_v25, 4  ;;  %v3103_v34 = vsel %vm2970_vm9, %v3057_v53, %v5211_v19  ;;  %v2175_v21 = vsel %vm4684_vm6, %v3910_v38, %v2174_v60  ;;  %v1166_v56 = vshrl.u32 %v5317_v0, 16  ;;  %v5338_v25 = vld [vmem:[#allocation2 + $0xb0] sm:$0x1] }
  0xb7   : > { %v2837_v52 = vpack.c.b16 %v2818_v33, %v2817_v4  ;;  %v1822_v58 = vsel %vm4716_vm7, %v1817_v50, %v1821_v22  ;;  %v2176_v39 = vrot.slane %v2174_v60, 4  ;;  %v2883_v8 = vunpack.c.l.b16 %v2175_v21  ;;  %v4208_v22 = vld [vmem:[#allocation2 + $0x18] sm:$0xff]  ;;  %v1477_v60 = vld [vmem:[#allocation2 + $0xa8] sm:$0xe]  ;;  %v339_v21 = vld [vmem:[%s4649_s8 + $0x68] sm:$0x1] }
  0xb8   : > { %v5305_v12 = vpop.permute.xlu1 %2465  ;;  %v2366_v24 = vpop.permute.xlu2 %2365  ;;  %v1832_v6 = vsel %vm4716_vm7, %v1827_v32, %v1831_v30  ;;  %v2803_v19 = vunpack.c.l.b16 %v1822_v58  ;;  %2773 = vrot.lane.b32.xlu1 %v4244_v29, %s4561_s13  ;;  %v3136_v10 = vsel %vm3003_vm10, %v3103_v34, %v5277_v59  ;;  %v3895_v37 = vrot.slane %v1470_v54, 9  ;;  %v5336_v29 = vld [vmem:[#allocation2 + $0xac] sm:$0xf]  ;;  %v5352_v58 = vld [vmem:[#allocation2 + $0x5c] sm:$0x1] }
  0xb9   : > { %2865 = vrot.lane.b32.xlu0 %v2837_v52, %s4560_s12  ;;  %v2804_v7 = vunpack.c.l.b16 %v1832_v6  ;;  %v2178_v14 = vsel %vm4684_vm6, %v2176_v39, %v2177_v15  ;;  %v1572_v46 = vrot.slane %v5313_v63, 5  ;;  %v1575_v20 = vrot.slane %v5315_v5, 5  ;;  %v5350_v52 = vld [vmem:[#allocation2 + $0x58] sm:$0xf]  ;;  %388 = vst.msk [vmem:[#allocation2 + $0x74] sm:$0x1] %vm311_vm1, %v339_v21 }
  0xba   : > { %v2364_v53 = vpop.permute.xlu0 %2363  ;;  %v2884_v55 = vunpack.c.l.b16 %v2178_v14  ;;  %v614_v27 = vshrl.u32 %v430_v11, 16  ;;  %v617_v36 = vshll.u32 %v430_v11, 16  ;;  %v623_v59 = vshll.u32 %v5232_v18, 16  ;;  %v5355_v54 = vld [vmem:[#allocation2 + $0x38] sm:$0x1] }
  0xbb   : > { %v2927_v45 = vsel %vm2921_vm8, %v4207_v9, %v2364_v53  ;;  %v2830_v16 = vpack.c.b16 %v2804_v7, %v2803_v19  ;;  %v1573_v28 = vsel %vm4684_vm6, %v3895_v37, %v1572_v46  ;;  %v1574_v31 = vrot.slane %v1572_v46, 4  ;;  %v860_v11 = vld [vmem:[#allocation2 + $0x54] sm:$0xe]  ;;  %v1668_v21 = vld [vmem:[#allocation2 + $0xb8] sm:$0xf] }
  0xbc   : > { %v627_v13 = vshrl.u32 %v5232_v18, 16  ;;  %v2910_v48 = vpack.c.b16 %v2884_v55, %v2883_v8  ;;  %v2629_v62 = vunpack.c.l.b16 %v1573_v28  ;;  %v616_v2 = vrot.slane %v614_v27, 4  ;;  %v2079_v27 = vld [vmem:[#allocation2 + $0x60] sm:$0xe] }
  0xbd   : > { %2851 = vrot.lane.b32.xlu2 %v2830_v16, %s4560_s12  ;;  %v619_v4 = vrot.slane %v617_v36, 5  ;;  %v1576_v38 = vsel %vm4684_vm6, %v1574_v31, %v1575_v20  ;;  %v625_v33 = vrot.slane %v623_v59, 5  ;;  %v633_v18 = vshll.u32 %v5244_v3, 16  ;;  %v5377_v31 = vld [vmem:[#allocation2 + $0x64] sm:$0xf] }
  0xbe   : > { %3478 = vmatmul.bf16.gmra.mxu1 %v3136_v10  ;;  %v629_v50 = vrot.slane %v627_v13, 4  ;;  %4190 = vmatmul.msk.bf16.gmra.mxu2 %vm2921_vm8, %v2910_v48  ;;  %v2630_v32 = vunpack.c.l.b16 %v1576_v38  ;;  %v2974_v34 = vsel %vm2970_vm9, %v2927_v45, %v5279_v61  ;;  %v1172_v3 = vshll.u32 %v5355_v54, 16  ;;  %v5381_v48 = vld [vmem:[#allocation2 + $0x68] sm:$0x1] }
  0xbf   : > { %v620_v15 = vor.u32 %v619_v4, %v616_v2  ;;  %v5359_v6 = vsel %vm2921_vm8, %v4208_v22, %v2366_v24  ;;  %v635_v53 = vrot.slane %v633_v18, 5  ;;  %v3008_v8 = vsel %vm3003_vm10, %v2974_v34, %v5197_v57 }
  0xc0   : > { %v5343_v30 = vpop.permute.xlu1 %2445  ;;  %v5345_v9 = vpop.permute.xlu2 %2541  ;;  %v630_v19 = vor.u32 %v629_v50, %v625_v33  ;;  %v2655_v7 = vpack.c.b16 %v2630_v32, %v2629_v62  ;;  %2787 = vrot.lane.b32.xlu1 %v4251_v43, %s4561_s13  ;;  %v3902_v14 = vrot.slane %v1477_v60, 9  ;;  %v1621_v24 = vrot.slane %v5336_v29, 5  ;;  %v1667_v62 = vld [vmem:[#allocation2 + $0xb4] sm:$0xf] }
  0xc1   : > { %v621_v61 = vrot.slane %v620_v15, 4  ;;  %v1624_v37 = vrot.slane %v5338_v25, 5  ;;  %v3880_v20 = vrot.slane %v860_v11, 9  ;;  %v971_v16 = vrot.slane %v5350_v52, 5  ;;  %v5395_v11 = vld [vmem:[#allocation2 + $0xbc] sm:$0x1] }
  0xc2   : > { %v2386_v39 = vpop.permute.xlu0 %2385  ;;  %v631_v10 = vrot.slane %v630_v19, 4  ;;  %2677 = vrot.lane.b32.xlu0 %v2655_v7, %s4562_s14  ;;  %v974_v55 = vrot.slane %v5352_v58, 5  ;;  %v1622_v22 = vsel %vm4684_vm6, %v3902_v14, %v1621_v24  ;;  %v1623_v28 = vrot.slane %v1621_v24, 4  ;;  %v1653_v14 = vld [vmem:[#allocation2 + $0x60] sm:$0xf] }
  0xc3   : > { %v2960_v45 = vsel %vm2921_vm8, %v4218_v23, %v2386_v39  ;;  %v626_v46 = vsel %vm4716_vm7, %v621_v61, %v625_v33  ;;  %v2643_v59 = vunpack.c.l.b16 %v1622_v22  ;;  %v972_v13 = vsel %vm4684_vm6, %v3880_v20, %v971_v16  ;;  %v4455_v22 = vld [vmem:[%s6272_s2 + $0x88] sm:$0xff] }
  0xc4   : > { %v636_v57 = vsel %vm4716_vm7, %v631_v10, %v635_v53  ;;  %v2325_v36 = vunpack.c.l.b16 %v626_v46  ;;  %v973_v23 = vrot.slane %v971_v16, 4  ;;  %v1625_v2 = vsel %vm4684_vm6, %v1623_v28, %v1624_v37  ;;  %v360_v16 = vld [vmem:[%s4649_s8 + $0xbc] sm:$0x1] }
  0xc5   : > { %v2326_v43 = vunpack.c.l.b16 %v636_v57  ;;  %v2407_v4 = vunpack.c.l.b16 %v972_v13  ;;  %v2996_v50 = vsel %vm2970_vm9, %v2960_v45, %v5305_v12  ;;  %v3911_v18 = vrot.slane %v2079_v27, 9  ;;  %409 = vst.msk [vmem:[#allocation2 + $0xc8] sm:$0x1] %vm311_vm1, %v360_v16 }
  0xc6   : > { %3389 = vmatmul.bf16.gmra.mxu0 %v3008_v8  ;;  %v2644_v32 = vunpack.c.l.b16 %v1625_v2  ;;  %v975_v15 = vsel %vm4684_vm6, %v973_v23, %v974_v55  ;;  %v2181_v34 = vrot.slane %v5377_v31, 5  ;;  %v2184_v39 = vrot.slane %v5381_v48, 5 }
  0xc7   : > { %v2351_v60 = vpack.c.b16 %v2326_v43, %v2325_v36  ;;  %v2408_v19 = vunpack.c.l.b16 %v975_v15  ;;  %v2002_v7 = vshrl.u32 %v1667_v62, 16  ;;  %v2005_v61 = vshll.u32 %v1667_v62, 16  ;;  %v4228_v43 = vld [vmem:[#allocation2 + $0x54] sm:$0xff] }
  0xc8   : > { %v5385_v38 = vpop.permute.xlu1 %2765  ;;  %v5387_v33 = vpop.permute.xlu2 %2845  ;;  %v2662_v12 = vpack.c.b16 %v2644_v32, %v2643_v59  ;;  %v2182_v8 = vsel %vm4684_vm6, %v3911_v18, %v2181_v34  ;;  %v2183_v10 = vrot.slane %v2181_v34, 4  ;;  %v2011_v27 = vshll.u32 %v1668_v21, 16  ;;  %v1036_v18 = vld [vmem:[#allocation2 + $0x24] sm:$0xf] }
  0xc9   : > { %2373 = vrot.lane.b32.xlu2 %v2351_v60, %s4562_s14  ;;  %v2432_v24 = vpack.c.b16 %v2408_v19, %v2407_v4  ;;  %v2885_v37 = vunpack.c.l.b16 %v2182_v8  ;;  %v2004_v46 = vrot.slane %v2002_v7, 4  ;;  %v2007_v20 = vrot.slane %v2005_v61, 5  ;;  %v341_v61 = vld [vmem:[%s4649_s8 + $0x70] sm:$0xf] }
  0xca   : > { %v2562_v53 = vpop.permute.xlu0 %2561  ;;  %2691 = vrot.lane.b32.xlu0 %v2662_v12, %s4562_s14  ;;  %v2185_v55 = vsel %vm4684_vm6, %v2183_v10, %v2184_v39  ;;  %v2015_v57 = vshrl.u32 %v1668_v21, 16  ;;  %v2021_v36 = vshll.u32 %v5395_v11, 16  ;;  %v2976_v28 = vsel %vm2970_vm9, %v5359_v6, %v5343_v30  ;;  %v340_v30 = vld [vmem:[%s4649_s8 + $0x6c] sm:$0xf]  ;;  %v4456_v12 = vld [vmem:[%s6272_s2 + $0x80] sm:$0xff] }
  0xcb   : > { %v3041_v45 = vsel %vm3003_vm10, %v2996_v50, %v2562_v53  ;;  %2455 = vrot.lane.b32.xlu1 %v2432_v24, %s4561_s13  ;;  %v2886_v59 = vunpack.c.l.b16 %v2185_v55  ;;  %v2008_v13 = vor.u32 %v2007_v20, %v2004_v46  ;;  %v1834_v23 = vshrl.u32 %v1653_v14, 16  ;;  %v4245_v8 = vld [vmem:[#allocation2 + $0x6c] sm:$0xff]  ;;  %389 = vst.msk [vmem:[#allocation2 + $0x78] sm:$0xf] %vm308_vm0, %v340_v30 }
  0xcc   : > { %3444 = vmatmul.bf16.vlgmr.msra.gmra.mxu3 %v3041_v45  ;;  %v2013_v62 = vrot.slane %v2011_v27, 5  ;;  %v2017_v2 = vrot.slane %v2015_v57, 4  ;;  %v2023_v4 = vrot.slane %v2021_v36, 5  ;;  %v1837_v50 = vshll.u32 %v1653_v14, 16  ;;  %390 = vst.msk [vmem:[#allocation2 + $0x7c] sm:$0xf] %vm308_vm0, %v341_v61 }
  0xcd   : > { %4384 = vmatpush.bf16.msra.mxu3 %v4455_v22  ;;  %v2911_v60 = vpack.c.b16 %v2886_v59, %v2885_v37  ;;  %v2009_v32 = vrot.slane %v2008_v13, 4  ;;  %v1836_v15 = vrot.slane %v1834_v23, 4  ;;  %v1843_v34 = vshll.u32 %v5377_v31, 16  ;;  %v5440_v23 = vld [vmem:[#allocation2 + $0x40] sm:$0xf] }
  0xce   : > { %v2018_v6 = vor.u32 %v2017_v2, %v2013_v62  ;;  %v1839_v19 = vrot.slane %v1837_v50, 5  ;;  %v1847_v53 = vshrl.u32 %v5377_v31, 16  ;;  %v1853_v39 = vshll.u32 %v5381_v48, 16 }
  0xcf   : > { %4191 = vmatmul.msk.bf16.gmra.mxu2 %vm2921_vm8, %v2911_v60  ;;  %v2014_v45 = vsel %vm4716_vm7, %v2009_v32, %v2013_v62  ;;  %v1845_v10 = vrot.slane %v1843_v34, 5  ;;  %v1129_v14 = vshrl.u32 %v1036_v18, 16  ;;  %v1132_v24 = vshll.u32 %v1036_v18, 16  ;;  %v1471_v60 = vld [vmem:[#allocation2 + $0x60] sm:$0xe] }
  0xd0   : > { %v5415_v21 = vpop.permute.xlu1 %2467  ;;  %v5420_v7 = vpop.permute.xlu2 %2367  ;;  %v2019_v48 = vrot.slane %v2018_v6, 4  ;;  %v2819_v37 = vunpack.c.l.b16 %v2014_v45  ;;  %v1840_v46 = vor.u32 %v1839_v19, %v1836_v15  ;;  %v1849_v20 = vrot.slane %v1847_v53, 4  ;;  %v5451_v15 = vld [vmem:[#allocation2 + $0x64] sm:$0xf]  ;;  %v5453_v53 = vld [vmem:[#allocation2 + $0x68] sm:$0x1] }
  0xd1   : > { %4385 = vmatpush.bf16.msra.mxu3 %v4456_v12  ;;  %2549 = vrot.lane.b32.xlu2 %v4228_v43, %s4560_s12  ;;  %v1855_v16 = vrot.slane %v1853_v39, 5  ;;  %v1131_v55 = vrot.slane %v1129_v14, 4  ;;  %v1134_v27 = vrot.slane %v1132_v24, 5  ;;  %v1138_v57 = vshll.u32 %v5234_v41, 16  ;;  %v342_v43 = vld [vmem:[%s4649_s8 + $0x74] sm:$0x1] }
  0xd2   : > { %v5429_v31 = vpop.permute.xlu0 %2669  ;;  %v2024_v36 = vsel %vm4716_vm7, %v2019_v48, %v2023_v4  ;;  %v1841_v22 = vrot.slane %v1840_v46, 4  ;;  %v1850_v59 = vor.u32 %v1849_v20, %v1845_v10  ;;  %v1144_v13 = vrot.slane %v1142_v44, 4  ;;  %391 = vst.msk [vmem:[#allocation2 + $0x80] sm:$0x1] %vm311_vm1, %v342_v43  ;;  %v432_v39 = vld [vmem:[#allocation2 + $0x54] sm:$0xf] }
  0xd3   : > { %v1190_v62 = vshrl.u32 %v5440_v23, 16  ;;  %v2820_v2 = vunpack.c.l.b16 %v2024_v36  ;;  %2775 = vrot.lane.b32.xlu1 %v4245_v8, %s4561_s13  ;;  %v1135_v50 = vor.u32 %v1134_v27, %v1131_v55  ;;  %v1140_v18 = vrot.slane %v1138_v57, 5  ;;  %v5457_v12 = vld [vmem:[#allocation2 + $0x44] sm:$0x1] }
  0xd4   : > { %v1846_v4 = vsel %vm4716_vm7, %v1841_v22, %v1845_v10  ;;  %v1851_v32 = vrot.slane %v1850_v59, 4  ;;  %v1150_v41 = vrot.slane %v1148_v47, 5  ;;  %v3011_v44 = vsel %vm3003_vm10, %v2976_v28, %v5345_v9  ;;  %v4252_v24 = vld [vmem:[#allocation2 + $0xc0] sm:$0xff] }
  0xd5   : > { %v2838_v34 = vpack.c.b16 %v2820_v2, %v2819_v37  ;;  %v2805_v30 = vunpack.c.l.b16 %v1846_v4  ;;  %v1136_v6 = vrot.slane %v1135_v50, 4  ;;  %v1145_v19 = vor.u32 %v1144_v13, %v1140_v18  ;;  %v4209_v36 = vld [vmem:[#allocation2 + $0x24] sm:$0xff]  ;;  %v3870_v4 = vld [vmem:[%s4656_s11 + $0xc] sm:$0xf] }
  0xd6   : > { %3394 = vmatmul.bf16.gmra.mxu0 %v3011_v44  ;;  %v1196_v42 = vshll.u32 %v5457_v12, 16  ;;  %v1214_v47 = vshrl.u32 %v5155_v49, 16  ;;  %v1856_v9 = vsel %vm4716_vm7, %v1851_v32, %v1855_v16  ;;  %v3896_v28 = vrot.slane %v1471_v60, 9  ;;  %v2080_v60 = vld [vmem:[#allocation2 + $0x6c] sm:$0xe] }
  0xd7   : > { %2867 = vrot.lane.b32.xlu0 %v2838_v34, %s4560_s12  ;;  %v2806_v45 = vunpack.c.l.b16 %v1856_v9  ;;  %v1141_v8 = vsel %vm4716_vm7, %v1136_v6, %v1140_v18  ;;  %v1146_v10 = vrot.slane %v1145_v19, 4  ;;  %v1579_v14 = vrot.slane %v5451_v15, 5  ;;  %v5474_v18 = vld [vmem:[#allocation2 + $0x70] sm:$0xf]  ;;  %415 = vst.msk [vmem:[#allocation2 + $0xcc] sm:$0xf] %vm308_vm0, %v3870_v4 }
  0xd8   : > { %v5455_v61 = vpop.permute.xlu1 %2447  ;;  %v2573_v37 = vunpack.c.l.b16 %v1141_v8  ;;  %v1582_v46 = vrot.slane %v5453_v53, 5  ;;  %v638_v20 = vshrl.u32 %v432_v39, 16  ;;  %v641_v55 = vshll.u32 %v432_v39, 16  ;;  %v5468_v27 = vpop.permute.xlu2 %2543 }
  0xd9   : > { %v2831_v16 = vpack.c.b16 %v2806_v45, %v2805_v30  ;;  %v1151_v57 = vsel %vm4716_vm7, %v1146_v10, %v1150_v41  ;;  %v1580_v22 = vsel %vm4684_vm6, %v3896_v28, %v1579_v14  ;;  %v1581_v59 = vrot.slane %v1579_v14, 4  ;;  %v5484_v30 = vld [vmem:[#allocation2 + $0x74] sm:$0x1]  ;;  %v4219_v28 = vld [vmem:[#allocation2 + $0x9c] sm:$0xff]  ;;  %v3871_v45 = vld [vmem:[%s4656_s11 + $0x10] sm:$0xf] }
  0xda   : > { %v2388_v48 = vpop.permute.xlu0 %2387  ;;  %v2574_v13 = vunpack.c.l.b16 %v1151_v57  ;;  %v2631_v43 = vunpack.c.l.b16 %v1580_v22  ;;  %v640_v2 = vrot.slane %v638_v20, 4  ;;  %v643_v50 = vrot.slane %v641_v55, 5  ;;  %416 = vst.msk [vmem:[#allocation2 + $0xd0] sm:$0xf] %vm308_vm0, %v3871_v45  ;;  %v1061_v55 = vld [vmem:[#allocation2 + $0xb8] sm:$0xf] }
  0xdb   : > { %2853 = vrot.lane.b32.xlu2 %v2831_v16, %s4560_s12  ;;  %v1583_v32 = vsel %vm4684_vm6, %v1581_v59, %v1582_v46  ;;  %2789 = vrot.lane.b32.xlu1 %v4252_v24, %s4561_s13  ;;  %v647_v41 = vshll.u32 %v5350_v52, 16  ;;  %v651_v44 = vshrl.u32 %v5350_v52, 16  ;;  %v657_v34 = vshll.u32 %v5352_v58, 16  ;;  %v1078_v22 = vld [vmem:[#allocation2 + $0xbc] sm:$0x1] }
  0xdc   : > { %v1220_v6 = vshll.u32 %v5157_v26, 16  ;;  %v2603_v19 = vpack.c.b16 %v2574_v13, %v2573_v37  ;;  %v2632_v39 = vunpack.c.l.b16 %v1583_v32  ;;  %v644_v9 = vor.u32 %v643_v50, %v640_v2  ;;  %v1478_v59 = vld [vmem:[#allocation2 + $0xb4] sm:$0xe]  ;;  %v5508_v50 = vld [vmem:[#allocation2 + $0x64] sm:$0xf] }
  0xdd   : > { %v2933_v8 = vsel %vm2921_vm8, %v4209_v36, %v5420_v7  ;;  %v649_v10 = vrot.slane %v647_v41, 5  ;;  %v653_v14 = vrot.slane %v651_v44, 4  ;;  %v659_v24 = vrot.slane %v657_v34, 5 }
  0xde   : > { %v3060_v58 = vsel %vm2921_vm8, %v2603_v19, %v5429_v31  ;;  %v2656_v37 = vpack.c.b16 %v2632_v39, %v2631_v43  ;;  %v645_v46 = vrot.slane %v644_v9, 4  ;;  %v3912_v20 = vrot.slane %v2080_v60, 9  ;;  %v861_v60 = vld [vmem:[#allocation2 + $0x60] sm:$0xe]  ;;  %v5512_v9 = vld [vmem:[#allocation2 + $0x68] sm:$0x1] }
  0xdf   : > { %v3105_v16 = vsel %vm2970_vm9, %v3060_v58, %v5385_v38  ;;  %v654_v57 = vor.u32 %v653_v14, %v649_v10  ;;  %v2188_v7 = vrot.slane %v5474_v18, 5  ;;  %v2191_v36 = vrot.slane %v5484_v30, 5 }
  0xe0   : > { %v5491_v52 = vpop.permute.xlu1 %2767  ;;  %v3139_v2 = vsel %vm3003_vm10, %v3105_v16, %v5387_v33  ;;  %2679 = vrot.lane.b32.xlu0 %v2656_v37, %s4562_s14  ;;  %v650_v31 = vsel %vm4716_vm7, %v645_v46, %v649_v10  ;;  %v2963_v43 = vsel %vm2921_vm8, %v4219_v28, %v2388_v48  ;;  %v2978_v38 = vsel %vm2970_vm9, %v2933_v8, %v5455_v61  ;;  %v5514_v48 = vpop.permute.xlu2 %2847 }
  0xe1   : > { %3483 = vmatmul.bf16.gmra.mxu1 %v3139_v2  ;;  %v655_v4 = vrot.slane %v654_v57, 4  ;;  %v2327_v32 = vunpack.c.l.b16 %v650_v31  ;;  %v2189_v41 = vsel %vm4684_vm6, %v3912_v20, %v2188_v7  ;;  %v2190_v33 = vrot.slane %v2188_v7, 4  ;;  %v344_v57 = vld [vmem:[%s4649_s8 + $0x7c] sm:$0xf]  ;;  %v1670_v2 = vld [vmem:[#allocation2 + $0xc4] sm:$0xf] }
  0xe2   : > { %v2564_v13 = vpop.permute.xlu0 %2563  ;;  %v2887_v44 = vunpack.c.l.b16 %v2189_v41  ;;  %v3903_v34 = vrot.slane %v1478_v59, 9  ;;  %v1628_v19 = vrot.slane %v1061_v55, 5  ;;  %v1631_v39 = vrot.slane %v1078_v22, 5  ;;  %v1687_v31 = vld [vmem:[#allocation2 + $0xc8] sm:$0x1] }
  0xe3   : > { %v660_v61 = vsel %vm4716_vm7, %v655_v4, %v659_v24  ;;  %v2192_v28 = vsel %vm4684_vm6, %v2190_v33, %v2191_v36  ;;  %v3881_v45 = vrot.slane %v861_v60, 9  ;;  %v978_v8 = vrot.slane %v5508_v50, 5  ;;  %v1669_v24 = vld [vmem:[#allocation2 + $0xc0] sm:$0xf]  ;;  %393 = vst.msk [vmem:[#allocation2 + $0x88] sm:$0xf] %vm308_vm0, %v344_v57 }
  0xe4   : > { %v2328_v10 = vunpack.c.l.b16 %v660_v61  ;;  %v2888_v14 = vunpack.c.l.b16 %v2192_v28  ;;  %v1629_v58 = vsel %vm4684_vm6, %v3903_v34, %v1628_v19  ;;  %v1630_v37 = vrot.slane %v1628_v19, 4  ;;  %v343_v34 = vld [vmem:[%s4649_s8 + $0x78] sm:$0xf]  ;;  %v4229_v57 = vld [vmem:[#allocation2 + $0x60] sm:$0xff] }
  0xe5   : > { %v2645_v46 = vunpack.c.l.b16 %v1629_v58  ;;  %v979_v20 = vsel %vm4684_vm6, %v3881_v45, %v978_v8  ;;  %v980_v55 = vrot.slane %v978_v8, 4  ;;  %v981_v16 = vrot.slane %v5512_v9, 5  ;;  %392 = vst.msk [vmem:[#allocation2 + $0x84] sm:$0xf] %vm308_vm0, %v343_v34 }
  0xe6   : > { %v2352_v7 = vpack.c.b16 %v2328_v10, %v2327_v32  ;;  %v2912_v36 = vpack.c.b16 %v2888_v14, %v2887_v44  ;;  %v1632_v22 = vsel %vm4684_vm6, %v1630_v37, %v1631_v39  ;;  %v2409_v59 = vunpack.c.l.b16 %v979_v20 }
  0xe7   : > { %v2646_v4 = vunpack.c.l.b16 %v1632_v22  ;;  %v982_v41 = vsel %vm4684_vm6, %v980_v55, %v981_v16  ;;  %v2998_v33 = vsel %vm2970_vm9, %v2963_v43, %v5415_v21  ;;  %v3014_v32 = vsel %vm3003_vm10, %v2978_v38, %v5468_v27  ;;  %v1655_v38 = vld [vmem:[#allocation2 + $0x6c] sm:$0xf]  ;;  %v5545_v8 = vpop.f32.mrf.mxu2 }
  0xe8   : > { %v5529_v60 = vpop.permute.xlu1 %2469  ;;  %2375 = vrot.lane.b32.xlu2 %v2352_v7, %s4562_s14  ;;  %4192 = vmatmul.msk.bf16.gmra.mxu2 %vm2921_vm8, %v2912_v36  ;;  %v2410_v19 = vunpack.c.l.b16 %v982_v41  ;;  %v3044_v39 = vsel %vm3003_vm10, %v2998_v33, %v2564_v13  ;;  %v2026_v61 = vshrl.u32 %v1669_v24, 16  ;;  %v2029_v28 = vshll.u32 %v1669_v24, 16  ;;  %v345_v13 = vld [vmem:[%s4649_s8 + $0x80] sm:$0x1]  ;;  %v1038_v24 = vld [vmem:[#allocation2 + $0x30] sm:$0xf] }
  0xe9   : > { %v2663_v45 = vpack.c.b16 %v2646_v4, %v2645_v46  ;;  %3449 = vmatmul.bf16.gmra.mxu3 %v3044_v39  ;;  %3399 = vmatmul.bf16.gmra.mxu0 %v3014_v32  ;;  %v2035_v21 = vshll.u32 %v1670_v2, 16  ;;  %v2039_v27 = vshrl.u32 %v1670_v2, 16  ;;  %v2045_v43 = vshll.u32 %v1687_v31, 16  ;;  %394 = vst.msk [vmem:[#allocation2 + $0x8c] sm:$0x1] %vm311_vm1, %v345_v13 }
  0xea   : > { %v5538_v44 = vpop.permute.xlu0 %2671  ;;  %v2433_v14 = vpack.c.b16 %v2410_v19, %v2409_v59  ;;  %v2028_v58 = vrot.slane %v2026_v61, 4  ;;  %v2031_v37 = vrot.slane %v2029_v28, 5  ;;  %v1858_v22 = vshrl.u32 %v1655_v38, 16  ;;  %v2370_v59 = vpop.permute.xlu2 %2369 }
  0xeb   : > { %2693 = vrot.lane.b32.xlu0 %v2663_v45, %s4562_s14  ;;  %v2037_v46 = vrot.slane %v2035_v21, 5  ;;  %v2041_v16 = vrot.slane %v2039_v27, 4  ;;  %v2047_v36 = vrot.slane %v2045_v43, 5  ;;  %v1861_v2 = vshll.u32 %v1655_v38, 16  ;;  %v4246_v43 = vld [vmem:[#allocation2 + $0x78] sm:$0xff] }
  0xec   : > { %2457 = vrot.lane.b32.xlu1 %v2433_v14, %s4561_s13  ;;  %v2032_v7 = vor.u32 %v2031_v37, %v2028_v58  ;;  %v1867_v4 = vshll.u32 %v5474_v18, 16  ;;  %v1871_v41 = vshrl.u32 %v5474_v18, 16  ;;  %v1877_v33 = vshll.u32 %v5484_v30, 16  ;;  %v3872_v37 = vld [vmem:[%s4656_s11 + $0x14] sm:$0x1] }
  0xed   : > { %v2042_v31 = vor.u32 %v2041_v16, %v2037_v46  ;;  %v1860_v34 = vrot.slane %v1858_v22, 4  ;;  %v1863_v19 = vrot.slane %v1861_v2, 5  ;;  %v1153_v39 = vshrl.u32 %v1038_v24, 16  ;;  %v2081_v2 = vld [vmem:[#allocation2 + $0x78] sm:$0xe] }
  0xee   : > { %v2033_v32 = vrot.slane %v2032_v7, 4  ;;  %v1869_v28 = vrot.slane %v1867_v4, 5  ;;  %v1873_v45 = vrot.slane %v1871_v41, 4  ;;  %v1879_v21 = vrot.slane %v1877_v33, 5  ;;  %417 = vst.msk [vmem:[#allocation2 + $0xd4] sm:$0x1] %vm311_vm1, %v3872_v37 }
  0xef   : > { %v2043_v61 = vrot.slane %v2042_v31, 4  ;;  %v1864_v30 = vor.u32 %v1863_v19, %v1860_v34  ;;  %v1155_v38 = vrot.slane %v1153_v39, 4  ;;  %v1156_v14 = vshll.u32 %v1038_v24, 16  ;;  %v5571_v24 = vld [vmem:[#allocation2 + $0x7c] sm:$0xf]  ;;  %v5577_v19 = vpop.f32.mrf.mxu2 }
  0xf0   : > { %2551 = vrot.lane.b32.xlu2 %v4229_v57, %s4560_s12  ;;  %v2038_v18 = vsel %vm4716_vm7, %v2033_v32, %v2037_v46  ;;  %v5562_v58 = vpop.permute.xlu1 %2449  ;;  %v1874_v7 = vor.u32 %v1873_v45, %v1869_v28  ;;  %v1162_v22 = vshll.u32 %v5317_v0, 16  ;;  %v1168_v4 = vrot.slane %v1166_v56, 4  ;;  %v4210_v32 = vld [vmem:[#allocation2 + $0x30] sm:$0xff]  ;;  %v5575_v34 = vld [vmem:[#allocation2 + $0x80] sm:$0x1] }
  0xf1   : > { %v2048_v13 = vsel %vm4716_vm7, %v2043_v61, %v2047_v36  ;;  %v2821_v16 = vunpack.c.l.b16 %v2038_v18  ;;  %v1865_v31 = vrot.slane %v1864_v30, 4  ;;  %v1158_v46 = vrot.slane %v1156_v14, 5 }
  0xf2   : > { %v5557_v27 = vpop.permute.xlu0 %2389  ;;  %v2822_v57 = vunpack.c.l.b16 %v2048_v13  ;;  %v1875_v41 = vrot.slane %v1874_v7, 4  ;;  %v1164_v33 = vrot.slane %v1162_v22, 5  ;;  %v1174_v36 = vrot.slane %v1172_v3, 5  ;;  %v1472_v3 = vld [vmem:[#allocation2 + $0x6c] sm:$0xe] }
  0xf3   : > { %v1870_v61 = vsel %vm4716_vm7, %v1865_v31, %v1869_v28  ;;  %v1159_v0 = vor.u32 %v1158_v46, %v1155_v38  ;;  %v3913_v56 = vrot.slane %v2081_v2, 9  ;;  %v2195_v54 = vrot.slane %v5571_v24, 5  ;;  %v2546_v28 = vpop.permute.xlu2 %2545  ;;  %v1072_v2 = vld [vmem:[#allocation2 + $0x74] sm:$0x1] }
  0xf4   : > { %v2839_v39 = vpack.c.b16 %v2822_v57, %v2821_v16  ;;  %2777 = vrot.lane.b32.xlu1 %v4246_v43, %s4561_s13  ;;  %v1880_v45 = vsel %vm4716_vm7, %v1875_v41, %v1879_v21  ;;  %v2807_v18 = vunpack.c.l.b16 %v1870_v61  ;;  %v1169_v30 = vor.u32 %v1168_v4, %v1164_v33  ;;  %v1049_v16 = vld [vmem:[#allocation2 + $0x70] sm:$0xf]  ;;  %v434_v57 = vld [vmem:[#allocation2 + $0x60] sm:$0xf] }
  0xf5   : > { %v2808_v37 = vunpack.c.l.b16 %v1880_v45  ;;  %v1160_v13 = vrot.slane %v1159_v0, 4  ;;  %v2198_v43 = vrot.slane %v5575_v34, 5  ;;  %v2936_v7 = vsel %vm2921_vm8, %v4210_v32, %v2370_v59 }
  0xf6   : > { %2869 = vrot.lane.b32.xlu0 %v2839_v39, %s4560_s12  ;;  %v1170_v38 = vrot.slane %v1169_v30, 4  ;;  %v2196_v21 = vsel %vm4684_vm6, %v3913_v56, %v2195_v54  ;;  %v2197_v22 = vrot.slane %v2195_v54, 4  ;;  %v3897_v41 = vrot.slane %v1472_v3, 9  ;;  %v4253_v39 = vld [vmem:[#allocation2 + $0xcc] sm:$0xff] }
  0xf7   : > { %v2832_v31 = vpack.c.b16 %v2808_v37, %v2807_v18  ;;  %v1165_v46 = vsel %vm4716_vm7, %v1160_v13, %v1164_v33  ;;  %v2889_v4 = vunpack.c.l.b16 %v2196_v21  ;;  %v1586_v32 = vrot.slane %v1049_v16, 5 }
  0xf8   : > { %v1175_v61 = vsel %vm4716_vm7, %v1170_v38, %v1174_v36  ;;  %v2575_v0 = vunpack.c.l.b16 %v1165_v46  ;;  %v2199_v59 = vsel %vm4684_vm6, %v2197_v22, %v2198_v43  ;;  %v1589_v30 = vrot.slane %v1072_v2, 5  ;;  %v5600_v33 = vpop.permute.xlu1 %2769 }
  0xf9   : > { %2855 = vrot.lane.b32.xlu2 %v2832_v31, %s4560_s12  ;;  %v2576_v56 = vunpack.c.l.b16 %v1175_v61  ;;  %v2890_v18 = vunpack.c.l.b16 %v2199_v59  ;;  %v662_v54 = vshrl.u32 %v434_v57, 16  ;;  %v1587_v3 = vsel %vm4684_vm6, %v3897_v41, %v1586_v32  ;;  %v4220_v61 = vld [vmem:[#allocation2 + $0xa8] sm:$0xff]  ;;  %v5609_v59 = vpop.f32.mrf.mxu2 }
  0xfa   : > { %v5597_v45 = vpop.permute.xlu0 %2565  ;;  %v1588_v37 = vrot.slane %v1586_v32, 4  ;;  %v665_v36 = vshll.u32 %v434_v57, 16  ;;  %v671_v13 = vshll.u32 %v5508_v50, 16  ;;  %v2633_v16 = vunpack.c.l.b16 %v1587_v3  ;;  %v1079_v32 = vld [vmem:[#allocation2 + $0xc8] sm:$0x1] }
  0xfb   : > { %v2604_v38 = vpack.c.b16 %v2576_v56, %v2575_v0  ;;  %v2913_v43 = vpack.c.b16 %v2890_v18, %v2889_v4  ;;  %v664_v21 = vrot.slane %v662_v54, 4  ;;  %v675_v46 = vshrl.u32 %v5508_v50, 16  ;;  %v1063_v0 = vld [vmem:[#allocation2 + $0xc4] sm:$0xf]  ;;  %v1479_v54 = vld [vmem:[#allocation2 + $0xc0] sm:$0xe] }
  0xfc   : > { %2791 = vrot.lane.b32.xlu1 %v4253_v39, %s4561_s13  ;;  %v1590_v22 = vsel %vm4684_vm6, %v1588_v37, %v1589_v30  ;;  %v667_v2 = vrot.slane %v665_v36, 5  ;;  %v673_v31 = vrot.slane %v671_v13, 5  ;;  %v681_v39 = vshll.u32 %v5512_v9, 16  ;;  %v862_v3 = vld [vmem:[#allocation2 + $0x6c] sm:$0xe] }
  0xfd   : > { %v3063_v41 = vsel %vm2921_vm8, %v2604_v38, %v5538_v44  ;;  %4193 = vmatmul.msk.bf16.gmra.mxu2 %vm2921_vm8, %v2913_v43  ;;  %v2634_v4 = vunpack.c.l.b16 %v1590_v22  ;;  %v677_v50 = vrot.slane %v675_v46, 4  ;;  %v2980_v30 = vsel %vm2970_vm9, %v2936_v7, %v5562_v58  ;;  %v5624_v13 = vld [vmem:[#allocation2 + $0x70] sm:$0xf]  ;;  %v5626_v38 = vld [vmem:[#allocation2 + $0x74] sm:$0x1] }
  0xfe   : > { %v3107_v56 = vsel %vm2970_vm9, %v3063_v41, %v5491_v52  ;;  %v668_v18 = vor.u32 %v667_v2, %v664_v21  ;;  %v3017_v9 = vsel %vm3003_vm10, %v2980_v30, %v2546_v28  ;;  %v5628_v52 = vpop.permute.xlu2 %2849  ;;  %v683_v58 = vrot.slane %v681_v39, 5 }
  0xff   : > { %v3142_v44 = vsel %vm3003_vm10, %v3107_v56, %v5514_v48  ;;  %v2657_v36 = vpack.c.b16 %v2634_v4, %v2633_v16  ;;  %v678_v21 = vor.u32 %v677_v50, %v673_v31  ;;  %v2966_v7 = vsel %vm2921_vm8, %v4220_v61, %v5557_v27  ;;  %3404 = vmatmul.bf16.gmra.mxu0 %v3017_v9 }
 0x100   : > { %3488 = vmatmul.bf16.gmra.mxu1 %v3142_v44  ;;  %v669_v43 = vrot.slane %v668_v18, 4  ;;  %v3904_v48 = vrot.slane %v1479_v54, 9  ;;  %v1635_v16 = vrot.slane %v1063_v0, 5  ;;  %v1638_v22 = vrot.slane %v1079_v32, 5  ;;  %v5643_v32 = vld [vmem:[#allocation2 + $0x88] sm:$0xf]  ;;  %v5645_v50 = vpop.permute.xlu1 %2471 }
 0x101   : > { %2681 = vrot.lane.b32.xlu0 %v2657_v36, %s4562_s14  ;;  %v3882_v28 = vrot.slane %v862_v3, 9  ;;  %v679_v46 = vrot.slane %v678_v21, 4  ;;  %v985_v41 = vrot.slane %v5624_v13, 5  ;;  %v988_v4 = vrot.slane %v5626_v38, 5  ;;  %v2082_v18 = vld [vmem:[#allocation2 + $0x84] sm:$0xe] }
 0x102   : > { %v674_v2 = vsel %vm4716_vm7, %v669_v43, %v673_v31  ;;  %v5637_v56 = vpop.permute.xlu0 %2673  ;;  %v1636_v27 = vsel %vm4684_vm6, %v3904_v48, %v1635_v16  ;;  %v1637_v61 = vrot.slane %v1635_v16, 4  ;;  %v3000_v0 = vsel %vm2970_vm9, %v2966_v7, %v5529_v60  ;;  %v5651_v44 = vld [vmem:[#allocation2 + $0x8c] sm:$0x1] }
 0x103   : > { %v2329_v39 = vunpack.c.l.b16 %v674_v2  ;;  %v684_v31 = vsel %vm4716_vm7, %v679_v46, %v683_v58  ;;  %v2647_v30 = vunpack.c.l.b16 %v1636_v27  ;;  %v986_v54 = vsel %vm4684_vm6, %v3882_v28, %v985_v41  ;;  %v1671_v36 = vld [vmem:[#allocation2 + $0xcc] sm:$0xf]  ;;  %v1672_v28 = vld [vmem:[#allocation2 + $0xd0] sm:$0xf]  ;;  %v5660_v2 = vpop.f32.mrf.mxu2 }
 0x104   : > { %v987_v3 = vrot.slane %v985_v41, 4  ;;  %v2330_v9 = vunpack.c.l.b16 %v684_v31  ;;  %v1639_v60 = vsel %vm4684_vm6, %v1637_v61, %v1638_v22  ;;  %v2411_v43 = vunpack.c.l.b16 %v986_v54  ;;  %v1688_v22 = vld [vmem:[#allocation2 + $0xd4] sm:$0x1] }
 0x105   : > { %v3047_v21 = vsel %vm3003_vm10, %v3000_v0, %v5597_v45  ;;  %v2648_v7 = vunpack.c.l.b16 %v1639_v60  ;;  %v3914_v48 = vrot.slane %v2082_v18, 9  ;;  %v2202_v16 = vrot.slane %v5643_v32, 5 }
 0x106   : > { %v989_v58 = vsel %vm4684_vm6, %v987_v3, %v988_v4  ;;  %3454 = vmatmul.bf16.gmra.mxu3 %v3047_v21  ;;  %v2353_v46 = vpack.c.b16 %v2330_v9, %v2329_v39  ;;  %v2205_v27 = vrot.slane %v5651_v44, 5  ;;  %v2050_v61 = vshrl.u32 %v1671_v36, 16  ;;  %v1657_v4 = vld [vmem:[#allocation2 + $0x78] sm:$0xf]  ;;  %v5666_v37 = vpop.permute.xlu2 %2371 }
 0x107   : > { %v2412_v41 = vunpack.c.l.b16 %v989_v58  ;;  %v2664_v31 = vpack.c.b16 %v2648_v7, %v2647_v30  ;;  %v2203_v45 = vsel %vm4684_vm6, %v3914_v48, %v2202_v16  ;;  %v2204_v0 = vrot.slane %v2202_v16, 4 }
 0x108   : > { %v2053_v54 = vshll.u32 %v1671_v36, 16  ;;  %2377 = vrot.lane.b32.xlu2 %v2353_v46, %s4562_s14  ;;  %v2891_v3 = vunpack.c.l.b16 %v2203_v45  ;;  %v2052_v60 = vrot.slane %v2050_v61, 4  ;;  %v2059_v21 = vshll.u32 %v1672_v28, 16  ;;  %v1040_v45 = vld [vmem:[#allocation2 + $0x3c] sm:$0xf] }
 0x109   : > { %v2434_v18 = vpack.c.b16 %v2412_v41, %v2411_v43  ;;  %2695 = vrot.lane.b32.xlu0 %v2664_v31, %s4562_s14  ;;  %v2206_v39 = vsel %vm4684_vm6, %v2204_v0, %v2205_v27  ;;  %v2063_v9 = vshrl.u32 %v1672_v28, 16  ;;  %v2069_v7 = vshll.u32 %v1688_v22, 16  ;;  %v4230_v31 = vld [vmem:[#allocation2 + $0x6c] sm:$0xff]  ;;  %v5676_v22 = vpop.permute.xlu1 %2451 }
 0x10a   : > { %v2055_v30 = vrot.slane %v2053_v54, 5  ;;  %v2892_v36 = vunpack.c.l.b16 %v2206_v39  ;;  %v2061_v58 = vrot.slane %v2059_v21, 5  ;;  %v1882_v48 = vshrl.u32 %v1657_v4, 16  ;;  %v5673_v57 = vpop.permute.xlu0 %2391 }
 0x10b   : > { %2459 = vrot.lane.b32.xlu1 %v2434_v18, %s4561_s13  ;;  %v1885_v16 = vshll.u32 %v1657_v4, 16  ;;  %v2065_v46 = vrot.slane %v2063_v9, 4  ;;  %v2071_v41 = vrot.slane %v2069_v7, 5  ;;  %v1891_v61 = vshll.u32 %v5571_v24, 16  ;;  %v4247_v7 = vld [vmem:[#allocation2 + $0x84] sm:$0xff] }
 0x10c   : > { %v2056_v43 = vor.u32 %v2055_v30, %v2052_v60  ;;  %v2914_v14 = vpack.c.b16 %v2892_v36, %v2891_v3  ;;  %v1884_v27 = vrot.slane %v1882_v48, 4  ;;  %v1895_v28 = vshrl.u32 %v5571_v24, 16 }
 0x10d   : > { %v1887_v0 = vrot.slane %v1885_v16, 5  ;;  %v2066_v18 = vor.u32 %v2065_v46, %v2061_v58  ;;  %v1893_v21 = vrot.slane %v1891_v61, 5  ;;  %v1901_v4 = vshll.u32 %v5575_v34, 16  ;;  %v5683_v16 = vpop.f32.mrf.mxu2  ;;  %v4211_v61 = vld [vmem:[#allocation2 + $0x3c] sm:$0xff] }
 0x10e   : > { %v2057_v54 = vrot.slane %v2056_v43, 4  ;;  %4194 = vmatmul.msk.bf16.gmra.mxu2 %vm2921_vm8, %v2914_v14  ;;  %v1897_v39 = vrot.slane %v1895_v28, 4  ;;  %v1177_v30 = vshrl.u32 %v1040_v45, 16  ;;  %v1180_v9 = vshll.u32 %v1040_v45, 16 }
 0x10f   : > { %v1888_v60 = vor.u32 %v1887_v0, %v1884_v27  ;;  %v2067_v36 = vrot.slane %v2066_v18, 4  ;;  %v1903_v48 = vrot.slane %v1901_v4, 5  ;;  %v1186_v24 = vshll.u32 %v5440_v23, 16  ;;  %v1473_v4 = vld [vmem:[#allocation2 + $0x78] sm:$0xe] }
 0x110   : > { %v2062_v3 = vsel %vm4716_vm7, %v2057_v54, %v2061_v58  ;;  %2553 = vrot.lane.b32.xlu2 %v4230_v31, %s4560_s12  ;;  %v1898_v46 = vor.u32 %v1897_v39, %v1893_v21  ;;  %v1179_v14 = vrot.slane %v1177_v30, 4  ;;  %v1182_v27 = vrot.slane %v1180_v9, 5  ;;  %v2548_v39 = vpop.permute.xlu2 %2547  ;;  %v1051_v23 = vld [vmem:[#allocation2 + $0x7c] sm:$0xf] }
 0x111   : > { %v2823_v43 = vunpack.c.l.b16 %v2062_v3  ;;  %v1889_v34 = vrot.slane %v1888_v60, 4  ;;  %v2072_v45 = vsel %vm4716_vm7, %v2067_v36, %v2071_v41  ;;  %v1188_v0 = vrot.slane %v1186_v24, 5  ;;  %v436_v60 = vld [vmem:[#allocation2 + $0x6c] sm:$0xf]  ;;  %v5704_v36 = vpop.permute.xlu1 %2771 }
 0x112   : > { %v1192_v58 = vrot.slane %v1190_v62, 4  ;;  %v2824_v54 = vunpack.c.l.b16 %v2072_v45  ;;  %v1899_v31 = vrot.slane %v1898_v46, 4  ;;  %v1183_v3 = vor.u32 %v1182_v27, %v1179_v14  ;;  %v1073_v62 = vld [vmem:[#allocation2 + $0x80] sm:$0x1]  ;;  %v5701_v14 = vpop.permute.xlu0 %2567 }
 0x113   : > { %v1894_v18 = vsel %vm4716_vm7, %v1889_v34, %v1893_v21  ;;  %2779 = vrot.lane.b32.xlu1 %v4247_v7, %s4561_s13  ;;  %v1198_v9 = vrot.slane %v1196_v42, 5  ;;  %v2939_v34 = vsel %vm2921_vm8, %v4211_v61, %v5666_v37  ;;  %v1593_v12 = vrot.slane %v1051_v23, 5 }
 0x114   : > { %v2809_v30 = vunpack.c.l.b16 %v1894_v18  ;;  %v1193_v41 = vor.u32 %v1192_v58, %v1188_v0  ;;  %v2840_v24 = vpack.c.b16 %v2824_v54, %v2823_v43  ;;  %v1904_v21 = vsel %vm4716_vm7, %v1899_v31, %v1903_v48  ;;  %v4221_v54 = vld [vmem:[#allocation2 + $0xb4] sm:$0xff] }
 0x115   : > { %v2810_v7 = vunpack.c.l.b16 %v1904_v21  ;;  %v1184_v46 = vrot.slane %v1183_v3, 4  ;;  %v3898_v18 = vrot.slane %v1473_v4, 9  ;;  %v1596_v42 = vrot.slane %v1073_v62, 5  ;;  %v5713_v23 = vpop.f32.mrf.mxu2 }
 0x116   : > { %v1194_v45 = vrot.slane %v1193_v41, 4  ;;  %2871 = vrot.lane.b32.xlu0 %v2840_v24, %s4560_s12  ;;  %v686_v27 = vshrl.u32 %v436_v60, 16  ;;  %v689_v58 = vshll.u32 %v436_v60, 16  ;;  %v695_v61 = vshll.u32 %v5624_v13, 16 }
 0x117   : > { %v2833_v43 = vpack.c.b16 %v2810_v7, %v2809_v30  ;;  %v1189_v48 = vsel %vm4716_vm7, %v1184_v46, %v1188_v0  ;;  %v1594_v3 = vsel %vm4684_vm6, %v3898_v18, %v1593_v12  ;;  %v1595_v41 = vrot.slane %v1593_v12, 4  ;;  %v2083_v46 = vld [vmem:[#allocation2 + $0x90] sm:$0xe] }
 0x118   : > { %v1199_v37 = vsel %vm4716_vm7, %v1194_v45, %v1198_v9  ;;  %v2577_v31 = vunpack.c.l.b16 %v1189_v48  ;;  %v2635_v60 = vunpack.c.l.b16 %v1594_v3  ;;  %v688_v30 = vrot.slane %v686_v27, 4  ;;  %v5724_v27 = vld [vmem:[#allocation2 + $0x94] sm:$0xf] }
 0x119   : > { %v2578_v4 = vunpack.c.l.b16 %v1199_v37  ;;  %2857 = vrot.lane.b32.xlu2 %v2833_v43, %s4560_s12  ;;  %v691_v62 = vrot.slane %v689_v58, 5  ;;  %v697_v0 = vrot.slane %v695_v61, 5  ;;  %v1597_v9 = vsel %vm4684_vm6, %v1595_v41, %v1596_v42  ;;  %v5726_v58 = vld [vmem:[#allocation2 + $0x98] sm:$0x1]  ;;  %v439_v61 = vld [vmem:[#allocation2 + $0x7c] sm:$0xf] }
 0x11a   : > { %v699_v21 = vshrl.u32 %v5624_v13, 16  ;;  %v705_v7 = vshll.u32 %v5626_v38, 16  ;;  %v2636_v45 = vunpack.c.l.b16 %v1597_v9  ;;  %v2969_v12 = vsel %vm2921_vm8, %v4221_v54, %v5673_v57  ;;  %v438_v37 = vld [vmem:[#allocation2 + $0x78] sm:$0xf] }
 0x11b   : > { %v2605_v24 = vpack.c.b16 %v2578_v4, %v2577_v31  ;;  %v692_v18 = vor.u32 %v691_v62, %v688_v30  ;;  %v2982_v43 = vsel %vm2970_vm9, %v2939_v34, %v5676_v22  ;;  %v5731_v31 = vpop.permute.xlu2 %2851  ;;  %v3915_v34 = vrot.slane %v2083_v46, 9  ;;  %v460_v30 = vld [vmem:[#allocation2 + $0x80] sm:$0x1]  ;;  %v863_v46 = vld [vmem:[#allocation2 + $0x78] sm:$0xe] }
 0x11c   : > { %v701_v48 = vrot.slane %v699_v21, 4  ;;  %v707_v13 = vrot.slane %v705_v7, 5  ;;  %v3020_v38 = vsel %vm3003_vm10, %v2982_v43, %v2548_v39  ;;  %v2658_v54 = vpack.c.b16 %v2636_v45, %v2635_v60  ;;  %v5746_v45 = vpop.permute.xlu1 %2785 }
 0x11d   : > { %v3066_v42 = vsel %vm2921_vm8, %v2605_v24, %v5637_v56  ;;  %v693_v22 = vrot.slane %v692_v18, 4  ;;  %3409 = vmatmul.bf16.gmra.mxu0 %v3020_v38  ;;  %v2209_v56 = vrot.slane %v5724_v27, 5  ;;  %v2212_v41 = vrot.slane %v5726_v58, 5  ;;  %v5742_v24 = vpop.permute.xlu0 %2675 }
 0x11e   : > { %v3109_v57 = vsel %vm2970_vm9, %v3066_v42, %v5600_v33  ;;  %v702_v3 = vor.u32 %v701_v48, %v697_v0  ;;  %2683 = vrot.lane.b32.xlu0 %v2658_v54, %s4562_s14  ;;  %v710_v33 = vshrl.u32 %v438_v37, 16  ;;  %v713_v60 = vshll.u32 %v438_v37, 16  ;;  %v5752_v54 = vpop.f32.mrf.mxu2 }
 0x11f   : > { %v3145_v4 = vsel %vm3003_vm10, %v3109_v57, %v5628_v52  ;;  %v698_v39 = vsel %vm4716_vm7, %v693_v22, %v697_v0  ;;  %v719_v62 = vshll.u32 %v439_v61, 16  ;;  %v2210_v52 = vsel %vm4684_vm6, %v3915_v34, %v2209_v56 }
 0x120   : > { %3493 = vmatmul.bf16.gmra.mxu1 %v3145_v4  ;;  %v703_v9 = vrot.slane %v702_v3, 4  ;;  %v2331_v21 = vunpack.c.l.b16 %v698_v39  ;;  %v2211_v7 = vrot.slane %v2209_v56, 4  ;;  %v2893_v18 = vunpack.c.l.b16 %v2210_v52 }
 0x121   : > { %v712_v43 = vrot.slane %v710_v33, 4  ;;  %v715_v42 = vrot.slane %v713_v60, 5  ;;  %v721_v48 = vrot.slane %v719_v62, 5  ;;  %v723_v37 = vshrl.u32 %v439_v61, 16 }
 0x122   : > { %v708_v0 = vsel %vm4716_vm7, %v703_v9, %v707_v13  ;;  %v2213_v38 = vsel %vm4684_vm6, %v2211_v7, %v2212_v41  ;;  %v729_v57 = vshll.u32 %v460_v30, 16  ;;  %v3883_v3 = vrot.slane %v863_v46, 9  ;;  %v1474_v9 = vld [vmem:[#allocation2 + $0x84] sm:$0xe]  ;;  %v1042_v41 = vld [vmem:[#allocation2 + $0x48] sm:$0xf] }
 0x123   : > { %v2332_v22 = vunpack.c.l.b16 %v708_v0  ;;  %v2894_v34 = vunpack.c.l.b16 %v2213_v38  ;;  %v716_v4 = vor.u32 %v715_v42, %v712_v43  ;;  %v725_v56 = vrot.slane %v723_v37, 4  ;;  %v5760_v43 = vld [vmem:[#allocation2 + $0x88] sm:$0xf] }
 0x124   : > { %v731_v39 = vrot.slane %v729_v57, 5  ;;  %v992_v52 = vrot.slane %v439_v61, 5  ;;  %v995_v33 = vrot.slane %v460_v30, 5  ;;  %v3002_v13 = vsel %vm2970_vm9, %v2969_v12, %v5645_v50  ;;  %6283 = vst [vmem:[#allocation6_spill] sm:$0xff] %v5760_v43  ;;  %v1074_v61 = vld [vmem:[#allocation2 + $0x8c] sm:$0x1]  ;;  %v2374_v30 = vpop.permute.xlu2 %2373 }
 0x125   : > { %v2354_v60 = vpack.c.b16 %v2332_v22, %v2331_v21  ;;  %v2915_v62 = vpack.c.b16 %v2894_v34, %v2893_v18  ;;  %v717_v28 = vrot.slane %v716_v4, 4  ;;  %v726_v7 = vor.u32 %v725_v56, %v721_v48  ;;  %v5771_v56 = vpop.permute.xlu0 %2689 }
 0x126   : > { %v993_v55 = vsel %vm4684_vm6, %v3883_v3, %v992_v52  ;;  %v994_v0 = vrot.slane %v992_v52, 4  ;;  %v3050_v46 = vsel %vm3003_vm10, %v3002_v13, %v5701_v14  ;;  %v3899_v37 = vrot.slane %v1474_v9, 9  ;;  %v4212_v3 = vld [vmem:[#allocation2 + $0x48] sm:$0xff]  ;;  %v5785_v49 = vpop.f32.mrf.mxu2 }
 0x127   : > { %2379 = vrot.lane.b32.xlu2 %v2354_v60, %s4562_s14  ;;  %4195 = vmatmul.msk.bf16.gmra.mxu2 %vm2921_vm8, %v2915_v62  ;;  %v722_v50 = vsel %vm4716_vm7, %v717_v28, %v721_v48  ;;  %v2413_v12 = vunpack.c.l.b16 %v993_v55  ;;  %v727_v42 = vrot.slane %v726_v7, 4  ;;  %v1600_v22 = vrot.slane %v5760_v43, 5  ;;  %v4459_v55 = vld [vmem:[#allocation2 + $0x4c] sm:$0xf]  ;;  %v5777_v62 = vpop.permute.xlu1 %2453  ;;  %v4231_v7 = vld [vmem:[#allocation2 + $0x78] sm:$0xff]  ;;  %6284 = vst [vmem:[#allocation7_spill] sm:$0xff] %v5785_v49 }
 0x128   : > { %v2333_v38 = vunpack.c.l.b16 %v722_v50  ;;  %v996_v14 = vsel %vm4684_vm6, %v994_v0, %v995_v33  ;;  %3459 = vmatmul.bf16.gmra.mxu3 %v3050_v46  ;;  %v1603_v34 = vrot.slane %v1074_v61, 5  ;;  %v1201_v4 = vshrl.u32 %v1042_v41, 16  ;;  %v440_v33 = vld [vmem:[#allocation2 + $0x84] sm:$0xf]  ;;  %v5781_v61 = vld [vmem:[#allocation2 + $0xa0] sm:$0xf] }
 0x129   : > { %v2414_v57 = vunpack.c.l.b16 %v996_v14  ;;  %v732_v52 = vsel %vm4716_vm7, %v727_v42, %v731_v39  ;;  %v1204_v28 = vshll.u32 %v1042_v41, 16  ;;  %v1210_v48 = vshll.u32 %v4459_v55, 16  ;;  %v2084_v50 = vld [vmem:[#allocation2 + $0x9c] sm:$0xe]  ;;  %v5783_v55 = vld [vmem:[#allocation2 + $0xa4] sm:$0x1] }
 0x12a   : > { %v1216_v60 = vrot.slane %v1214_v47, 4  ;;  %v2334_v13 = vunpack.c.l.b16 %v732_v52  ;;  %v1601_v0 = vsel %vm4684_vm6, %v3899_v37, %v1600_v22  ;;  %v1602_v46 = vrot.slane %v1600_v22, 4  ;;  %v441_v22 = vld [vmem:[#allocation2 + $0x88] sm:$0xf] }
 0x12b   : > { %v2435_v9 = vpack.c.b16 %v2414_v57, %v2413_v12  ;;  %v2637_v39 = vunpack.c.l.b16 %v1601_v0  ;;  %v1203_v41 = vrot.slane %v1201_v4, 4  ;;  %v1206_v42 = vrot.slane %v1204_v28, 5 }
 0x12c   : > { %v1212_v14 = vrot.slane %v1210_v48, 5  ;;  %v2355_v47 = vpack.c.b16 %v2334_v13, %v2333_v38  ;;  %v1604_v12 = vsel %vm4684_vm6, %v1602_v46, %v1603_v34  ;;  %v1222_v37 = vrot.slane %v1220_v6, 5  ;;  %v5799_v46 = vpop.permute.xlu2 %2549 }
 0x12d   : > { %2461 = vrot.lane.b32.xlu1 %v2435_v9, %s4561_s13  ;;  %v5793_v57 = vsel %vm2921_vm8, %v4212_v3, %v2374_v30  ;;  %v2638_v4 = vunpack.c.l.b16 %v1604_v12  ;;  %v1207_v52 = vor.u32 %v1206_v42, %v1203_v41  ;;  %v3916_v48 = vrot.slane %v2084_v50, 9  ;;  %v461_v30 = vld [vmem:[#allocation2 + $0x8c] sm:$0x1]  ;;  %v4248_v41 = vld [vmem:[#allocation2 + $0x90] sm:$0xff]  ;;  %v5803_v12 = vpop.permute.xlu0 %2865 }
 0x12e   : > { %v1217_v28 = vor.u32 %v1216_v60, %v1212_v14  ;;  %2381 = vrot.lane.b32.xlu0 %v2355_v47, %s4562_s14  ;;  %v2216_v38 = vrot.slane %v5781_v61, 5  ;;  %v2219_v13 = vrot.slane %v5783_v55, 5  ;;  %v734_v34 = vshrl.u32 %v440_v33, 16  ;;  %v864_v47 = vld [vmem:[#allocation2 + $0x84] sm:$0xe]  ;;  %v5813_v49 = vpop.f32.mrf.mxu2 }
 0x12f   : > { %2555 = vrot.lane.b32.xlu2 %v4231_v7, %s4560_s12  ;;  %v737_v9 = vshll.u32 %v440_v33, 16  ;;  %v2659_v26 = vpack.c.b16 %v2638_v4, %v2637_v39  ;;  %v1208_v6 = vrot.slane %v1207_v52, 4  ;;  %v743_v3 = vshll.u32 %v441_v22, 16 }
 0x130   : > { %v1218_v0 = vrot.slane %v1217_v28, 4  ;;  %v2217_v60 = vsel %vm4684_vm6, %v3916_v48, %v2216_v38  ;;  %v2218_v50 = vrot.slane %v2216_v38, 4  ;;  %v736_v42 = vrot.slane %v734_v34, 4  ;;  %v1659_v38 = vld [vmem:[#allocation2 + $0x84] sm:$0xf]  ;;  %v5811_v34 = vpop.permute.xlu1 %2773 }
 0x131   : > { %v739_v7 = vrot.slane %v737_v9, 5  ;;  %v1213_v33 = vsel %vm4716_vm7, %v1208_v6, %v1212_v14  ;;  %v2895_v4 = vunpack.c.l.b16 %v2217_v60  ;;  %v745_v52 = vrot.slane %v743_v3, 5 }
 0x132   : > { %v1223_v39 = vsel %vm4716_vm7, %v1218_v0, %v1222_v37  ;;  %v2579_v28 = vunpack.c.l.b16 %v1213_v33  ;;  %v2220_v21 = vsel %vm4684_vm6, %v2218_v50, %v2219_v13  ;;  %v747_v20 = vshrl.u32 %v441_v22, 16 }
 0x133   : > { %v2580_v18 = vunpack.c.l.b16 %v1223_v39  ;;  %v740_v48 = vor.u32 %v739_v7, %v736_v42  ;;  %v2896_v9 = vunpack.c.l.b16 %v2220_v21  ;;  %v753_v10 = vshll.u32 %v461_v30, 16 }
 0x134   : > { %v3884_v43 = vrot.slane %v864_v47, 9  ;;  %v999_v6 = vrot.slane %v441_v22, 5  ;;  %v1002_v0 = vrot.slane %v461_v30, 5  ;;  %v749_v60 = vrot.slane %v747_v20, 4  ;;  %v1056_v30 = vld [vmem:[#allocation2 + $0x9c] sm:$0xf] }
 0x135   : > { %2781 = vrot.lane.b32.xlu1 %v4248_v41, %s4561_s13  ;;  %v2606_v14 = vpack.c.b16 %v2580_v18, %v2579_v28  ;;  %v741_v37 = vrot.slane %v740_v48, 4  ;;  %v2916_v3 = vpack.c.b16 %v2896_v9, %v2895_v4  ;;  %v755_v33 = vrot.slane %v753_v10, 5  ;;  %v5830_v39 = vpop.permute.xlu0 %2677  ;;  %v5834_v28 = vpop.permute.xlu2 %2853 }
 0x136   : > { %v1906_v13 = vshrl.u32 %v1659_v38, 16  ;;  %2685 = vrot.lane.b32.xlu0 %v2659_v26, %s4562_s14  ;;  %v1000_v42 = vsel %vm4684_vm6, %v3884_v43, %v999_v6  ;;  %v1001_v41 = vrot.slane %v999_v6, 4  ;;  %v750_v20 = vor.u32 %v749_v60, %v745_v52  ;;  %v5836_v48 = vpop.f32.mrf.mxu0  ;;  %v5839_v6 = vpop.f32.mrf.mxu1 }
 0x137   : > { %v3069_v21 = vsel %vm2921_vm8, %v2606_v14, %v5742_v24  ;;  %v746_v50 = vsel %vm4716_vm7, %v741_v37, %v745_v52  ;;  %4196 = vmatmul.msk.bf16.gmra.mxu2 %vm2921_vm8, %v2916_v3  ;;  %v2415_v22 = vunpack.c.l.b16 %v1000_v42  ;;  %v1909_v47 = vshll.u32 %v1659_v38, 16 }
 0x138   : > { %v3111_v18 = vsel %vm2970_vm9, %v3069_v21, %v5704_v36  ;;  %v2335_v10 = vunpack.c.l.b16 %v746_v50  ;;  %v1003_v24 = vsel %vm4684_vm6, %v1001_v41, %v1002_v0  ;;  %v1908_v7 = vrot.slane %v1906_v13, 4  ;;  %v5843_v42 = vpop.permute.xlu1 %2787  ;;  %v5845_v41 = vpop.f32.mrf.mxu2 }
 0x139   : > { %v3148_v26 = vsel %vm3003_vm10, %v3111_v18, %v5731_v31  ;;  %v751_v43 = vrot.slane %v750_v20, 4  ;;  %v2416_v4 = vunpack.c.l.b16 %v1003_v24  ;;  %v1915_v36 = vshll.u32 %v5643_v32, 16  ;;  %v4460_v20 = vld [vmem:[#allocation2 + $0xa0] sm:$0xf]  ;;  %v5850_v24 = vld [vmem:[#allocation2 + $0xb8] sm:$0xf] }
 0x13a   : > { %3498 = vmatmul.bf16.gmra.mxu1 %v3148_v26  ;;  %v1919_v52 = vshrl.u32 %v5643_v32, 16  ;;  %v1911_v9 = vrot.slane %v1909_v47, 5  ;;  %v1925_v31 = vshll.u32 %v5651_v44, 16  ;;  %v1369_v14 = vshrl.u32 %v1056_v30, 16 }
 0x13b   : > { %v1372_v37 = vshll.u32 %v1056_v30, 16  ;;  %v756_v38 = vsel %vm4716_vm7, %v751_v43, %v755_v33  ;;  %v2436_v0 = vpack.c.b16 %v2416_v4, %v2415_v22  ;;  %v1917_v3 = vrot.slane %v1915_v36, 5  ;;  %v1475_v22 = vld [vmem:[#allocation2 + $0x90] sm:$0xe]  ;;  %v5856_v36 = vld [vmem:[#allocation2 + $0x94] sm:$0xf] }
 0x13c   : > { %v1921_v60 = vrot.slane %v1919_v52, 4  ;;  %v2336_v13 = vunpack.c.l.b16 %v756_v38  ;;  %v1912_v21 = vor.u32 %v1911_v9, %v1908_v7  ;;  %v1927_v32 = vrot.slane %v1925_v31, 5  ;;  %v5862_v38 = vld [vmem:[#allocation2 + $0xbc] sm:$0x1] }
 0x13d   : > { %v1371_v50 = vrot.slane %v1369_v14, 4  ;;  %2463 = vrot.lane.b32.xlu1 %v2436_v0, %s4561_s13  ;;  %v1374_v18 = vrot.slane %v1372_v37, 5  ;;  %v1378_v30 = vshll.u32 %v4460_v20, 16  ;;  %v6285_v26 = vshrl.u32 %v5228_v51, 16  ;;  %v5860_v14 = vld [vmem:[#allocation2 + $0x98] sm:$0x1]  ;;  %v5872_v20 = vpop.permute.xlu0 %2691 }
 0x13e   : > { %v1922_v44 = vor.u32 %v1921_v60, %v1917_v3  ;;  %v2356_v47 = vpack.c.b16 %v2336_v13, %v2335_v10  ;;  %v1913_v43 = vrot.slane %v1912_v21, 4  ;;  %v2984_v4 = vsel %vm2970_vm9, %v5793_v57, %v5777_v62  ;;  %v2085_v37 = vld [vmem:[#allocation2 + $0xa8] sm:$0xe]  ;;  %v1661_v13 = vld [vmem:[#allocation2 + $0x90] sm:$0xf] }
 0x13f   : > { %v1384_v33 = vrot.slane %v6285_v26, 4  ;;  %v1375_v9 = vor.u32 %v1374_v18, %v1371_v50  ;;  %v1380_v31 = vrot.slane %v1378_v30, 5  ;;  %v3023_v51 = vsel %vm3003_vm10, %v2984_v4, %v5799_v46  ;;  %v4249_v18 = vld [vmem:[#allocation2 + $0x9c] sm:$0xff]  ;;  %v5874_v30 = vpop.f32.mrf.mxu0  ;;  %v4463_v4 = vld [vmem:[#allocation2 + $0xac] sm:$0xf] }
 0x140   : > { %v1923_v52 = vrot.slane %v1922_v44, 4  ;;  %2383 = vrot.lane.b32.xlu0 %v2356_v47, %s4562_s14  ;;  %v1918_v62 = vsel %vm4716_vm7, %v1913_v43, %v1917_v3  ;;  %v6286_v57 = vshll.u32 %v5240_v35, 16  ;;  %3414 = vmatmul.bf16.gmra.mxu0 %v3023_v51  ;;  %v3900_v60 = vrot.slane %v1475_v22, 9 }
 0x141   : > { %v2811_v21 = vunpack.c.l.b16 %v1918_v62  ;;  %v1376_v50 = vrot.slane %v1375_v9, 4  ;;  %v1385_v44 = vor.u32 %v1384_v33, %v1380_v31  ;;  %v1607_v3 = vrot.slane %v5856_v36, 5 }
 0x142   : > { %v1390_v0 = vrot.slane %v6286_v57, 5  ;;  %v1928_v46 = vsel %vm4716_vm7, %v1923_v52, %v1927_v32  ;;  %v1610_v35 = vrot.slane %v5860_v14, 5  ;;  %v3917_v47 = vrot.slane %v2085_v37, 9  ;;  %v2376_v9 = vpop.permute.xlu2 %2375 }
 0x143   : > { %v2812_v26 = vunpack.c.l.b16 %v1928_v46  ;;  %v1381_v22 = vsel %vm4716_vm7, %v1376_v50, %v1380_v31  ;;  %v1386_v43 = vrot.slane %v1385_v44, 4  ;;  %v2223_v32 = vrot.slane %v4463_v4, 5  ;;  %v5882_v46 = vpop.f32.mrf.mxu1  ;;  %v5889_v44 = vpop.f32.mrf.mxu2 }
 0x144   : > { %v1930_v52 = vshrl.u32 %v1661_v13, 16  ;;  %v2593_v51 = vunpack.c.l.b16 %v1381_v22  ;;  %v1608_v62 = vsel %vm4684_vm6, %v3900_v60, %v1607_v3  ;;  %v1609_v57 = vrot.slane %v1607_v3, 4  ;;  %6287 = vst [vmem:[#allocation8_spill] sm:$0xff] %v5889_v44  ;;  %v1044_v22 = vld [vmem:[#allocation2 + $0x54] sm:$0xf]  ;;  %v5894_v4 = vpop.permute.xlu1 %2455 }
 0x145   : > { %v2834_v33 = vpack.c.b16 %v2812_v26, %v2811_v21  ;;  %v1391_v10 = vsel %vm4716_vm7, %v1386_v43, %v1390_v0  ;;  %v2639_v37 = vunpack.c.l.b16 %v1608_v62  ;;  %2783 = vrot.lane.b32.xlu1 %v4249_v18, %s4561_s13  ;;  %v2224_v31 = vsel %vm4684_vm6, %v3917_v47, %v2223_v32 }
 0x146   : > { %v2225_v50 = vrot.slane %v2223_v32, 4  ;;  %v2594_v21 = vunpack.c.l.b16 %v1391_v10  ;;  %v1611_v60 = vsel %vm4684_vm6, %v1609_v57, %v1610_v35  ;;  %v2897_v26 = vunpack.c.l.b16 %v2224_v31 }
 0x147   : > { %2859 = vrot.lane.b32.xlu2 %v2834_v33, %s4560_s12  ;;  %v1932_v3 = vrot.slane %v1930_v52, 4  ;;  %v2640_v0 = vunpack.c.l.b16 %v1611_v60  ;;  %v6288_v18 = vrot.slane %v5264_v40, 5  ;;  %v1933_v43 = vshll.u32 %v1661_v13, 16  ;;  %v5906_v40 = vld [vmem:[%s6273_s3] ss:$0 sm:$0xff]  ;;  %v5908_v60 = vpop.f32.mrf.mxu0 }
 0x148   : > { %v1939_v32 = vshll.u32 %v5724_v27, 16  ;;  %v2613_v62 = vpack.c.b16 %v2594_v21, %v2593_v51  ;;  %v1943_v10 = vshrl.u32 %v5724_v27, 16  ;;  %v1949_v35 = vshll.u32 %v5726_v58, 16  ;;  %v4232_v51 = vld [vmem:[#allocation2 + $0x84] sm:$0xff] }
 0x149   : > { %v2227_v47 = vsel %vm4684_vm6, %v2225_v50, %v6288_v18  ;;  %v2660_v57 = vpack.c.b16 %v2640_v0, %v2639_v37  ;;  %v1935_v52 = vrot.slane %v1933_v43, 5  ;;  %v1225_v7 = vshrl.u32 %v1044_v22, 16  ;;  %v4213_v18 = vld [vmem:[#allocation2 + $0x54] sm:$0xff]  ;;  %v1058_v43 = vld [vmem:[#allocation2 + $0xa8] sm:$0xf] }
 0x14a   : > { %v2898_v33 = vunpack.c.l.b16 %v2227_v47  ;;  %v1941_v31 = vrot.slane %v1939_v32, 5  ;;  %v3090_v13 = vsel %vm2921_vm8, %v2613_v62, %v5771_v56  ;;  %v1945_v21 = vrot.slane %v1943_v10, 4  ;;  %v5915_v32 = vpop.permute.xlu0 %2867 }
 0x14b   : > { %v1951_v27 = vrot.slane %v1949_v35, 5  ;;  %2687 = vrot.lane.b32.xlu0 %v2660_v57, %s4562_s14  ;;  %v3125_v58 = vsel %vm2970_vm9, %v3090_v13, %v5746_v45  ;;  %v1936_v37 = vor.u32 %v1935_v52, %v1932_v3  ;;  %v1227_v0 = vrot.slane %v1225_v7, 4  ;;  %v2552_v57 = vpop.permute.xlu2 %2551  ;;  %s273_s14 = sand.u32 1, %s4542_s16  }
 0x14c   : > { %v2917_v50 = vpack.c.b16 %v2898_v33, %v2897_v26  ;;  %v1228_v47 = vshll.u32 %v1044_v22, 16  ;;  %v3169_v44 = vsel %vm3003_vm10, %v3125_v58, %v5803_v12  ;;  %v1946_v56 = vor.u32 %v1945_v21, %v1941_v31  ;;  %v4464_v26 = vld [vmem:[#allocation2 + $0x58] sm:$0xf]  ;;  %v5928_v21 = vpop.f32.mrf.mxu1  ;;  %s5957_s6 = sshll.u32 %s273_s14, 7  ;;  %s3708_s18 = scalar_lea.sflag [#allocation4], %s273_s14 }
 0x14d   : > { %v1234_v62 = vshll.u32 %v4464_v26, 16  ;;  %v6289_v33 = vshrl.u32 %v5313_v63, 16  ;;  %3533 = vmatmul.bf16.vlgmr.msrb.gmra.mxu3 %v3169_v44  ;;  %v1937_v35 = vrot.slane %v1936_v37, 4  ;;  %v6290_v7 = vshll.u32 %v5315_v5, 16  ;;  %v5933_v37 = vpop.f32.mrf.mxu2  ;;  %s5987_s7 = scalar_lea.vmem [#allocation3], %s5957_s6  ;;  %s4500_s6 = scalar_lea.hbm %s6274_s4, 256 }
 0x14e   : > { %4197 = vmatmul.msk.bf16.gmra.mxu2 %vm2921_vm8, %v2917_v50  ;;  %v1230_v45 = vrot.slane %v1228_v47, 5  ;;  %v3386_v22 = vadd.f32 %v5906_v40, %v5836_v48  ;;  %v1947_v12 = vrot.slane %v1946_v56, 4  ;;  %v2945_v13 = vsel %vm2921_vm8, %v4213_v18, %v2376_v9  ;;  %v5937_v9 = vpop.permute.xlu1 %2775  ;;  %s3723_s26 = sshll.u32 %s5987_s7, 4  ;;  %p4502_p2 = scmp.lt.s32.totalorder %s4500_s6, %s4496_s5  ;;  %s3724_s26 = int_to_ptr.vmem [resolvable:$true] %s3723_s26 }
 0x14f   : > { %v1240_v10 = vrot.slane %v6289_v33, 4  ;;  %v1246_v3 = vrot.slane %v6290_v7, 5  ;;  %2557 = vrot.lane.b32.xlu2 %v4232_v51, %s4560_s12  ;;  %v1236_v52 = vrot.slane %v1234_v62, 5  ;;  %v1393_v50 = vshrl.u32 %v1058_v43, 16  ;;  %v4465_v33 = vld [vmem:[#allocation2 + $0xac] sm:$0xf] }
 0x150   : > { %v1942_v63 = vsel %vm4716_vm7, %v1937_v35, %v1941_v31  ;;  %v1231_v44 = vor.u32 %v1230_v45, %v1227_v0  ;;  %v3475_v5 = vadd.f32 %v5839_v6, %v3386_v22  ;;  %v1396_v58 = vshll.u32 %v1058_v43, 16  ;;  %p4503_p3 = por %p4502_p2, %p4501_p1 }
 0x151   : > { %v1952_v48 = vsel %vm4716_vm7, %v1947_v12, %v1951_v27  ;;  %v2813_v51 = vunpack.c.l.b16 %v1942_v63  ;;  %v1241_v47 = vor.u32 %v1240_v10, %v1236_v52  ;;  %v1395_v56 = vrot.slane %v1393_v50, 4  ;;  %v5945_v10 = vpop.f32.mrf.mxu0  ;;  %v1663_v50 = vld [vmem:[#allocation2 + $0x9c] sm:$0xf] }
 0x152   : > { %v2814_v18 = vunpack.c.l.b16 %v1952_v48  ;;  %v1232_v26 = vrot.slane %v1231_v44, 4  ;;  %v3564_v62 = vadd.f32 %v5545_v8, %v3475_v5  ;;  %v1398_v31 = vrot.slane %v1396_v58, 5  ;;  %p4504_p5 = pnand %p4503_p3, %p4499_p0 }
 0x153   : > { %v1242_v0 = vrot.slane %v1241_v47, 4  ;;  %v1402_v6 = vshll.u32 %v4465_v33, 16  ;;  %v6291_v43 = vshrl.u32 %v5336_v29, 16  ;;  %v6292_v45 = vshll.u32 %v5338_v25, 16 }
 0x154   : > { %v2835_v7 = vpack.c.b16 %v2814_v18, %v2813_v51  ;;  %v1237_v22 = vsel %vm4716_vm7, %v1232_v26, %v1236_v52  ;;  %v1399_v12 = vor.u32 %v1398_v31, %v1395_v56  ;;  %v3388_v8 = vadd.f32 %v5906_v40, %v5874_v30  ;;  %v5961_v51 = vpop.permute.xlu0 %2679  ;;  %v5969_v26 = vpop.permute.xlu2 %2855 }
 0x155   : > { %v1408_v35 = vrot.slane %v6291_v43, 4  ;;  %v1414_v27 = vrot.slane %v6292_v45, 5  ;;  %v1247_v29 = vsel %vm4716_vm7, %v1242_v0, %v1246_v3  ;;  %v2581_v63 = vunpack.c.l.b16 %v1237_v22  ;;  %v2086_v22 = vld [vmem:[#allocation2 + $0xb4] sm:$0xe] }
 0x156   : > { %v1404_v44 = vrot.slane %v1402_v6, 5  ;;  %v2986_v25 = vsel %vm2970_vm9, %v2945_v13, %v5894_v4  ;;  %v2582_v5 = vunpack.c.l.b16 %v1247_v29  ;;  %v1400_v58 = vrot.slane %v1399_v12, 4  ;;  %v5971_v6 = vpop.f32.mrf.mxu1  ;;  %v5975_v12 = vpop.f32.mrf.mxu2 }
 0x157   : > { %v3477_v52 = vadd.f32 %v5882_v46, %v3388_v8  ;;  %v3026_v48 = vsel %vm3003_vm10, %v2986_v25, %v2552_v57  ;;  %2861 = vrot.lane.b32.xlu2 %v2835_v7, %s4560_s12  ;;  %v1954_v3 = vshrl.u32 %v1663_v50, 16  ;;  %v1957_v47 = vshll.u32 %v1663_v50, 16 }
 0x158   : > { %v1409_v30 = vor.u32 %v1408_v35, %v1404_v44  ;;  %3419 = vmatmul.bf16.gmra.mxu0 %v3026_v48  ;;  %v1963_v56 = vshll.u32 %v5781_v61, 16  ;;  %v2607_v4 = vpack.c.b16 %v2582_v5, %v2581_v63  ;;  %v1405_v13 = vsel %vm4716_vm7, %v1400_v58, %v1404_v44  ;;  %v1046_v63 = vld [vmem:[#allocation2 + $0x60] sm:$0xf]  ;;  %v5982_v44 = vpop.permute.xlu1 %2789 }
 0x159   : > { %v3566_v18 = vadd.f32 %v5577_v19, %v3477_v52  ;;  %v1967_v46 = vshrl.u32 %v5781_v61, 16  ;;  %v2595_v31 = vunpack.c.l.b16 %v1405_v13  ;;  %v1956_v0 = vrot.slane %v1954_v3, 4  ;;  %v4233_v61 = vld [vmem:[#allocation2 + $0x90] sm:$0xff]  ;;  %v5992_v48 = vpop.f32.mrf.mxu0 }
 0x15a   : > { %v1410_v57 = vrot.slane %v1409_v30, 4  ;;  %v1959_v33 = vrot.slane %v1957_v47, 5  ;;  %v3072_v43 = vsel %vm2921_vm8, %v2607_v4, %v5830_v39  ;;  %v1965_v45 = vrot.slane %v1963_v56, 5  ;;  %v5994_v30 = vld [vmem:[#allocation2 + $0x70] sm:$0xf] }
 0x15b   : > { %v4276_v35 = vpack.c.bf16 %v3566_v18, %v3564_v62  ;;  %v1969_v7 = vrot.slane %v1967_v46, 4  ;;  %v3113_v19 = vsel %vm2970_vm9, %v3072_v43, %v5811_v34  ;;  %v1973_v29 = vshll.u32 %v5783_v55, 16  ;;  %v4466_v55 = vld [vmem:[#allocation2 + $0xb8] sm:$0xf] }
 0x15c   : > { %v1415_v8 = vsel %vm4716_vm7, %v1410_v57, %v1414_v27  ;;  %v1960_v50 = vor.u32 %v1959_v33, %v1956_v0  ;;  %v3151_v39 = vsel %vm3003_vm10, %v3113_v19, %v5834_v28  ;;  %v3391_v34 = vadd.f32 %v5906_v40, %v5908_v60  ;;  %v4214_v19 = vld [vmem:[#allocation2 + $0x60] sm:$0xff] }
 0x15d   : > { %v2596_v62 = vunpack.c.l.b16 %v1415_v8  ;;  %4277 = vst [vmem:[%s5987_s7] sm:$0xff] %v4276_v35   ;;  %v1970_v25 = vor.u32 %v1969_v7, %v1965_v45  ;;  %3503 = vmatmul.bf16.gmra.mxu1 %v3151_v39  ;;  %v1975_v5 = vrot.slane %v1973_v29, 5  ;;  %v3918_v58 = vrot.slane %v2086_v22, 9  ;;  %v6007_v33 = vpop.permute.xlu0 %2693  ;;  %v6017_v39 = vld [vmem:[#allocation2 + $0x74] sm:$0x1] }
 0x15e   : > { %v1961_v27 = vrot.slane %v1960_v50, 4  ;;  %v2230_v52 = vrot.slane %v4466_v55, 5  ;;  %v1286_v28 = vshrl.u32 %v5994_v30, 16  ;;  %v1249_v56 = vshrl.u32 %v1046_v63, 16 }
 0x15f   : > { %v2614_v3 = vpack.c.b16 %v2596_v62, %v2595_v31  ;;  %v1971_v47 = vrot.slane %v1970_v25, 4  ;;  %2559 = vrot.lane.b32.xlu2 %v4233_v61, %s4560_s12  ;;  %v1252_v18 = vshll.u32 %v1046_v63, 16  ;;  %v3480_v31 = vadd.f32 %v5928_v21, %v3391_v34  ;;  %v1060_v63 = vld [vmem:[#allocation2 + $0xb4] sm:$0xf] }
 0x160   : > { %v1966_v60 = vsel %vm4716_vm7, %v1961_v27, %v1965_v45  ;;  %v2231_v4 = vsel %vm4684_vm6, %v3918_v58, %v2230_v52  ;;  %v2232_v13 = vrot.slane %v2230_v52, 4  ;;  %v6293_v45 = vrot.slane %v5395_v11, 5  ;;  %v4469_v11 = vld [vmem:[#allocation2 + $0x64] sm:$0xf]  ;;  %v6025_v52 = vpop.f32.mrf.mxu2 }
 0x161   : > { %v3093_v46 = vsel %vm2921_vm8, %v2614_v3, %v5872_v20  ;;  %v1976_v57 = vsel %vm4716_vm7, %v1971_v47, %v1975_v5  ;;  %v2815_v0 = vunpack.c.l.b16 %v1966_v60  ;;  %v2899_v22 = vunpack.c.l.b16 %v2231_v4  ;;  %v3484_v20 = vpop.f32.mrf.mxu1  ;;  %v2458_v4 = vpop.permute.xlu1 %2457 }
 0x162   : > { %v2816_v43 = vunpack.c.l.b16 %v1976_v57  ;;  %v3127_v35 = vsel %vm2970_vm9, %v3093_v46, %v5843_v42  ;;  %v2234_v7 = vsel %vm4684_vm6, %v2232_v13, %v6293_v45  ;;  %v1251_v50 = vrot.slane %v1249_v56, 4  ;;  %v2378_v29 = vpop.permute.xlu2 %2377 }
 0x163   : > { %v3172_v61 = vsel %vm3003_vm10, %v3127_v35, %v5915_v32  ;;  %v2900_v8 = vunpack.c.l.b16 %v2234_v7  ;;  %v1254_v21 = vrot.slane %v1252_v18, 5  ;;  %v1292_v42 = vshll.u32 %v6017_v39, 16  ;;  %v3397_v35 = vpop.f32.mrf.mxu0 }
 0x164   : > { %v2836_v62 = vpack.c.b16 %v2816_v43, %v2815_v0  ;;  %3538 = vmatmul.bf16.gmra.mxu3 %v3172_v61  ;;  %v1258_v25 = vshll.u32 %v4469_v11, 16  ;;  %v6294_v34 = vshrl.u32 %v5451_v15, 16  ;;  %v3569_v5 = vadd.f32 %v5609_v59, %v3480_v31 }
 0x165   : > { %v2918_v58 = vpack.c.b16 %v2900_v8, %v2899_v22  ;;  %v1255_v32 = vor.u32 %v1254_v21, %v1251_v50  ;;  %v3393_v55 = vadd.f32 %v5906_v40, %v5945_v10  ;;  %v2948_v47 = vsel %vm2921_vm8, %v4214_v19, %v2378_v29  ;;  %v1048_v50 = vld [vmem:[#allocation2 + $0x6c] sm:$0xf] }
 0x166   : > { %v1264_v27 = vrot.slane %v6294_v34, 4  ;;  %v1260_v3 = vrot.slane %v1258_v25, 5  ;;  %v1417_v56 = vshrl.u32 %v1060_v63, 16  ;;  %v1420_v60 = vshll.u32 %v1060_v63, 16 }
 0x167   : > { %4198 = vmatmul.msk.bf16.gmra.mxu2 %vm2921_vm8, %v2918_v58  ;;  %v1256_v13 = vrot.slane %v1255_v32, 4  ;;  %v3482_v15 = vadd.f32 %v5971_v6, %v3393_v55  ;;  %v1426_v59 = vshll.u32 %v5850_v24, 16  ;;  %v6295_v18 = vshrl.u32 %v5850_v24, 16  ;;  %2863 = vrot.lane.b32.xlu2 %v2836_v62, %s4560_s12 }
 0x168   : > { %v1265_v10 = vor.u32 %v1264_v27, %v1260_v3  ;;  %v6296_v57 = vshll.u32 %v5453_v53, 16  ;;  %v1419_v31 = vrot.slane %v1417_v56, 4  ;;  %v1422_v43 = vrot.slane %v1420_v60, 5  ;;  %v2870_v11 = vpop.permute.xlu0 %2869 }
 0x169   : > { %v1432_v46 = vrot.slane %v6295_v18, 4  ;;  %v1261_v45 = vsel %vm4716_vm7, %v1256_v13, %v1260_v3  ;;  %v3571_v7 = vadd.f32 %v5660_v2, %v3482_v15  ;;  %v1428_v6 = vrot.slane %v1426_v59, 5  ;;  %v3486_v58 = vpop.f32.mrf.mxu1 }
 0x16a   : > { %v1270_v0 = vrot.slane %v6296_v57, 5  ;;  %v2988_v22 = vsel %vm2970_vm9, %v2948_v47, %v2458_v4  ;;  %v1266_v19 = vrot.slane %v1265_v10, 4  ;;  %v1423_v24 = vor.u32 %v1422_v43, %v1419_v31  ;;  %v2554_v62 = vpop.permute.xlu2 %2553  ;;  %v4470_v31 = vld [vmem:[#allocation2 + $0xc4] sm:$0xf] }
 0x16b   : > { %v6297_v61 = vshll.u32 %v5862_v38, 16  ;;  %v3396_v53 = vadd.f32 %v5906_v40, %v5992_v48  ;;  %v2583_v21 = vunpack.c.l.b16 %v1261_v45  ;;  %v4281_v29 = vpack.c.bf16 %v3571_v7, %v3569_v5  ;;  %v6056_v59 = vpop.f32.mrf.mxu2 }
 0x16c   : > { %v1433_v63 = vor.u32 %v1432_v46, %v1428_v6  ;;  %v3398_v2 = vadd.f32 %v5906_v40, %v3397_v35  ;;  %v1271_v25 = vsel %vm4716_vm7, %v1266_v19, %v1270_v0  ;;  %v1424_v34 = vrot.slane %v1423_v24, 4  ;;  %v1062_v0 = vld [vmem:[#allocation2 + $0xc0] sm:$0xf]  ;;  %v2778_v35 = vpop.permute.xlu1 %2777 }
 0x16d   : > { %v1438_v8 = vrot.slane %v6297_v61, 5  ;;  %v3485_v27 = vadd.f32 %v3484_v20, %v3396_v53  ;;  %v3029_v38 = vsel %vm3003_vm10, %v2988_v22, %v2554_v62  ;;  %v2584_v32 = vunpack.c.l.b16 %v1271_v25  ;;  %4353 = vst [vmem:[%s5987_s7 + $0x8] sm:$0xff] %v4281_v29  }
 0x16e   : > { %v1434_v55 = vrot.slane %v1433_v63, 4  ;;  %3424 = vmatmul.bf16.gmra.mxu0 %v3029_v38  ;;  %v3487_v48 = vadd.f32 %v3486_v58, %v3398_v2  ;;  %v1273_v3 = vshrl.u32 %v1048_v50, 16  ;;  %v1429_v5 = vsel %vm4716_vm7, %v1424_v34, %v1428_v6  ;;  %v4471_v6 = vld [vmem:[#allocation2 + $0xc8] sm:$0x1] }
 0x16f   : > { %v3574_v47 = vadd.f32 %v5683_v16, %v3485_v27  ;;  %v1276_v56 = vshll.u32 %v1048_v50, 16  ;;  %v1282_v60 = vshll.u32 %v5994_v30, 16  ;;  %v2608_v4 = vpack.c.b16 %v2584_v32, %v2583_v21  ;;  %v3400_v27 = vpop.f32.mrf.mxu0 }
 0x170   : > { %v1439_v20 = vsel %vm4716_vm7, %v1434_v55, %v1438_v8  ;;  %v2597_v13 = vunpack.c.l.b16 %v1429_v5  ;;  %v3576_v15 = vadd.f32 %v5713_v23, %v3487_v48  ;;  %v1275_v46 = vrot.slane %v1273_v3, 4 }
 0x171   : > { %v2598_v18 = vunpack.c.l.b16 %v1439_v20  ;;  %v1278_v10 = vrot.slane %v1276_v56, 5  ;;  %v1284_v57 = vrot.slane %v1282_v60, 5  ;;  %v1454_v16 = vshrl.u32 %v4470_v31, 16  ;;  %v1050_v20 = vld [vmem:[#allocation2 + $0x78] sm:$0xf] }
 0x172   : > { %v3075_v43 = vsel %vm2921_vm8, %v2608_v4, %v5961_v51  ;;  %v4286_v45 = vpack.c.bf16 %v3576_v15, %v3574_v47  ;;  %v1288_v7 = vrot.slane %v1286_v28, 4  ;;  %v1460_v23 = vshll.u32 %v4471_v6, 16  ;;  %v4215_v6 = vld [vmem:[#allocation2 + $0x6c] sm:$0xff] }
 0x173   : > { %v3115_v22 = vsel %vm2970_vm9, %v3075_v43, %v5937_v9  ;;  %v2615_v19 = vpack.c.b16 %v2598_v18, %v2597_v13  ;;  %v1279_v24 = vor.u32 %v1278_v10, %v1275_v46  ;;  %v1294_v51 = vrot.slane %v1292_v42, 5  ;;  %v2682_v63 = vpop.permute.xlu0 %2681  ;;  %v2858_v38 = vpop.permute.xlu2 %2857  ;;  %v4473_v43 = vld [vmem:[#allocation2 + $0x7c] sm:$0xf] }
 0x174   : > { %v3154_v61 = vsel %vm3003_vm10, %v3115_v22, %v5969_v26  ;;  %4354 = vst [vmem:[%s5987_s7 + $0x10] sm:$0xff] %v4286_v45   ;;  %v1289_v8 = vor.u32 %v1288_v7, %v1284_v57  ;;  %v1441_v53 = vshrl.u32 %v1062_v0, 16  ;;  %v1444_v50 = vshll.u32 %v1062_v0, 16  ;;  %v6078_v48 = vpop.f32.mrf.mxu2  ;;  %v2792_v47 = vpop.permute.xlu1 %2791 }
 0x175   : > { %3508 = vmatmul.bf16.gmra.mxu1 %v3154_v61  ;;  %v3096_v30 = vsel %vm2921_vm8, %v2615_v19, %v6007_v33  ;;  %v1280_v28 = vrot.slane %v1279_v24, 4  ;;  %v1450_v21 = vshll.u32 %v4470_v31, 16  ;;  %v1456_v26 = vrot.slane %v1454_v16, 4  ;;  %v4472_v31 = vld [vmem:[#allocation2 + $0xc4] sm:$0xf] }
 0x176   : > { %v3129_v9 = vsel %vm2970_vm9, %v3096_v30, %v5982_v44  ;;  %v1290_v29 = vrot.slane %v1289_v8, 4  ;;  %v1443_v62 = vrot.slane %v1441_v53, 4  ;;  %v1446_v42 = vrot.slane %v1444_v50, 5 }
 0x177   : > { %v3175_v2 = vsel %vm3003_vm10, %v3129_v9, %v2870_v11  ;;  %v1285_v39 = vsel %vm4716_vm7, %v1280_v28, %v1284_v57  ;;  %v1452_v25 = vrot.slane %v1450_v21, 5  ;;  %v1462_v55 = vrot.slane %v1460_v23, 5  ;;  %v3402_v22 = vpop.f32.mrf.mxu0  ;;  %v4474_v28 = vld [vmem:[#allocation2 + $0xc8] sm:$0x1] }
 0x178   : > { %3543 = vmatmul.bf16.gmra.mxu3 %v3175_v2  ;;  %v1295_v33 = vsel %vm4716_vm7, %v1290_v29, %v1294_v51  ;;  %v2585_v34 = vunpack.c.l.b16 %v1285_v39  ;;  %v1447_v44 = vor.u32 %v1446_v42, %v1443_v62  ;;  %v1297_v57 = vshrl.u32 %v1050_v20, 16  ;;  %v2087_v2 = vld [vmem:[#allocation2 + $0xc0] sm:$0xe] }
 0x179   : > { %v2586_v58 = vunpack.c.l.b16 %v1295_v33  ;;  %v1457_v32 = vor.u32 %v1456_v26, %v1452_v25  ;;  %v1300_v0 = vshll.u32 %v1050_v20, 16  ;;  %v2237_v16 = vrot.slane %v4472_v31, 5  ;;  %v4475_v33 = vld [vmem:[#allocation2 + $0x80] sm:$0x1]  ;;  %v6101_v20 = vpop.f32.mrf.mxu3  ;;  %v1052_v31 = vld [vmem:[#allocation2 + $0x84] sm:$0xf] }
 0x17a   : > { %v1448_v11 = vrot.slane %v1447_v44, 4  ;;  %v1310_v45 = vshrl.u32 %v4473_v43, 16  ;;  %v3401_v7 = vadd.f32 %v5906_v40, %v3400_v27  ;;  %v1306_v19 = vshll.u32 %v4473_v43, 16  ;;  %v6298_v44 = vld [vmem:[#allocation7_spill] sm:$0xff] }
 0x17b   : > { %v2609_v3 = vpack.c.b16 %v2586_v58, %v2585_v34  ;;  %v1458_v5 = vrot.slane %v1457_v32, 4  ;;  %v2696_v10 = vpop.permute.xlu0 %2695  ;;  %v1299_v51 = vrot.slane %v1297_v57, 4  ;;  %v1302_v53 = vrot.slane %v1300_v0, 5 }
 0x17c   : > { %v1453_v60 = vsel %vm4716_vm7, %v1448_v11, %v1452_v25  ;;  %v2239_v30 = vrot.slane %v2237_v16, 4  ;;  %v2240_v50 = vrot.slane %v4474_v28, 5  ;;  %v3403_v21 = vadd.f32 %v5906_v40, %v3402_v22 }
 0x17d   : > { %v3078_v56 = vsel %vm2921_vm8, %v2609_v3, %v2682_v63  ;;  %v1463_v4 = vsel %vm4716_vm7, %v1458_v5, %v1462_v55  ;;  %v3489_v13 = vpop.f32.mrf.mxu1  ;;  %v2599_v18 = vunpack.c.l.b16 %v1453_v60  ;;  %v2460_v29 = vpop.permute.xlu1 %2459  ;;  %v1308_v62 = vrot.slane %v1306_v19, 5 }
 0x17e   : > { %v3117_v15 = vsel %vm2970_vm9, %v3078_v56, %v2778_v35  ;;  %v2600_v46 = vunpack.c.l.b16 %v1463_v4  ;;  %v3490_v8 = vadd.f32 %v3489_v13, %v3401_v7  ;;  %v1312_v26 = vrot.slane %v1310_v45, 4 }
 0x17f   : > { %v3157_v23 = vsel %vm3003_vm10, %v3117_v15, %v2858_v38  ;;  %v3919_v25 = vrot.slane %v2087_v2, 9  ;;  %v1316_v34 = vshll.u32 %v4475_v33, 16  ;;  %v1303_v38 = vor.u32 %v1302_v53, %v1299_v51 }
 0x180   : > { %v2616_v61 = vpack.c.b16 %v2600_v46, %v2599_v18  ;;  %v6088_v35 = vpop.f32.mrf.mxu2  ;;  %v3579_v27 = vadd.f32 %v5752_v54, %v3490_v8  ;;  %v2241_v3 = vsel %vm4684_vm6, %v2239_v30, %v2240_v50  ;;  %v1313_v56 = vor.u32 %v1312_v26, %v1308_v62  ;;  %v3405_v50 = vpop.f32.mrf.mxu0 }
 0x181   : > { %v2380_v24 = vpop.permute.xlu2 %2379  ;;  %v2238_v55 = vsel %vm4684_vm6, %v3919_v25, %v2237_v16  ;;  %v2902_v4 = vunpack.c.l.b16 %v2241_v3  ;;  %v6299_v16 = vld [vmem:[#allocation6_spill] sm:$0xff]  ;;  %v6114_v19 = vpop.f32.mrf.mxu3  ;;  %v2088_v25 = vld [vmem:[#allocation2 + $0xcc] sm:$0xe] }
 0x182   : > { %v2951_v9 = vsel %vm2921_vm8, %v4215_v6, %v2380_v24  ;;  %v3099_v39 = vsel %vm2921_vm8, %v2616_v61, %v2696_v10  ;;  %v2901_v60 = vunpack.c.l.b16 %v2238_v55  ;;  %v1304_v10 = vrot.slane %v1303_v38, 4  ;;  %v4478_v38 = vld [vmem:[#allocation2 + $0xd4] sm:$0x1] }
 0x183   : > { %v2990_v58 = vsel %vm2970_vm9, %v2951_v9, %v2460_v29  ;;  %v3131_v5 = vsel %vm2970_vm9, %v3099_v39, %v2792_v47  ;;  %v1314_v0 = vrot.slane %v1313_v56, 4  ;;  %v1318_v47 = vrot.slane %v1316_v34, 5  ;;  %v4476_v29 = vld [vmem:[#allocation2 + $0xd0] sm:$0xf] }
 0x184   : > { %v2919_v46 = vpack.c.b16 %v2902_v4, %v2901_v60  ;;  %v1334_v43 = vshrl.u32 %v6299_v16, 16  ;;  %v1309_v45 = vsel %vm4716_vm7, %v1304_v10, %v1308_v62  ;;  %v1321_v6 = vshrl.u32 %v1052_v31, 16  ;;  %v4477_v62 = vld [vmem:[#allocation2 + $0x8c] sm:$0x1] }
 0x185   : > { %3513 = vmatmul.bf16.gmra.mxu1 %v3157_v23  ;;  %v3491_v63 = vpop.f32.mrf.mxu1  ;;  %v1319_v7 = vsel %vm4716_vm7, %v1314_v0, %v1318_v47  ;;  %v1324_v23 = vshll.u32 %v1052_v31, 16  ;;  %v1330_v22 = vshll.u32 %v6299_v16, 16  ;;  %v2587_v24 = vunpack.c.l.b16 %v1309_v45  ;;  %v2780_v28 = vpop.permute.xlu1 %2779  ;;  %v1054_v31 = vld [vmem:[#allocation2 + $0x90] sm:$0xf] }
 0x186   : > { %v3492_v42 = vadd.f32 %v3491_v63, %v3403_v21  ;;  %v2588_v61 = vunpack.c.l.b16 %v1319_v7  ;;  %v1323_v8 = vrot.slane %v1321_v6, 4  ;;  %v1336_v30 = vrot.slane %v1334_v43, 4 }
 0x187   : > { %v1326_v51 = vrot.slane %v1324_v23, 5  ;;  %v1332_v53 = vrot.slane %v1330_v22, 5  ;;  %v2244_v63 = vrot.slane %v4476_v29, 5  ;;  %v1340_v26 = vshll.u32 %v4477_v62, 16 }
 0x188   : > { %v3581_v32 = vadd.f32 %v6298_v44, %v3492_v42  ;;  %v2872_v11 = vpop.permute.xlu0 %2871  ;;  %v6106_v57 = vpop.f32.mrf.mxu2  ;;  %v2610_v2 = vpack.c.b16 %v2588_v61, %v2587_v24  ;;  %v3920_v34 = vrot.slane %v2088_v25, 9  ;;  %v3406_v10 = vadd.f32 %v5906_v40, %v3405_v50 }
 0x189   : > { %v2556_v54 = vpop.permute.xlu2 %2555  ;;  %v3178_v15 = vsel %vm3003_vm10, %v3131_v5, %v2872_v11  ;;  %v1327_v39 = vor.u32 %v1326_v51, %v1323_v8  ;;  %v1337_v42 = vor.u32 %v1336_v30, %v1332_v53  ;;  %v6119_v33 = vpop.f32.mrf.mxu3  ;;  %v1342_v11 = vrot.slane %v1340_v26, 5 }
 0x18a   : > { %v4291_v13 = vpack.c.bf16 %v3581_v32, %v3579_v27  ;;  %v3032_v18 = vsel %vm3003_vm10, %v2990_v58, %v2556_v54  ;;  %3548 = vmatmul.bf16.gmra.mxu3 %v3178_v15  ;;  %v2246_v27 = vrot.slane %v2244_v63, 4  ;;  %v2247_v58 = vrot.slane %v4478_v38, 5  ;;  %v3407_v54 = vpop.f32.mrf.mxu0 }
 0x18b   : > { %3429 = vmatmul.bf16.gmra.mxu0 %v3032_v18  ;;  %v1328_v55 = vrot.slane %v1327_v39, 4  ;;  %v1338_v3 = vrot.slane %v1337_v42, 4  ;;  %v2245_v60 = vsel %vm4684_vm6, %v3920_v34, %v2244_v63  ;;  %v1358_v16 = vshrl.u32 %v5856_v36, 16 }
 0x18c   : > { %4355 = vst [vmem:[%s5987_s7 + $0x18] sm:$0xff] %v4291_v13   ;;  %v2248_v4 = vsel %vm4684_vm6, %v2246_v27, %v2247_v58  ;;  %v4216_v13 = vld [vmem:[#allocation2 + $0x78] sm:$0xff]  ;;  %v2903_v43 = vunpack.c.l.b16 %v2245_v60  ;;  %v3408_v7 = vadd.f32 %v5906_v40, %v3407_v54  ;;  %v1345_v8 = vshrl.u32 %v1054_v31, 16 }
 0x18d   : > { %v1333_v18 = vsel %vm4716_vm7, %v1328_v55, %v1332_v53  ;;  %v2904_v45 = vunpack.c.l.b16 %v2248_v4  ;;  %v1348_v51 = vshll.u32 %v1054_v31, 16  ;;  %v1354_v53 = vshll.u32 %v5856_v36, 16 }
 0x18e   : > { %v2589_v23 = vunpack.c.l.b16 %v1333_v18  ;;  %v1360_v25 = vrot.slane %v1358_v16, 4 }
 0x18f   : > { %v2920_v50 = vpack.c.b16 %v2904_v45, %v2903_v43  ;;  %v1350_v39 = vrot.slane %v1348_v51, 5  ;;  %v1356_v42 = vrot.slane %v1354_v53, 5 }
 0x190   : > { %v2684_v9 = vpop.permute.xlu0 %2683 }
 0x191   : > { %v6116_v21 = vpop.f32.mrf.mxu2  ;;  %v3081_v44 = vsel %vm2921_vm8, %v2610_v2, %v2684_v9  ;;  %v6139_v30 = vpop.f32.mrf.mxu3  ;;  %v1347_v2 = vrot.slane %v1345_v8, 4 }
 0x192   : > { %v3119_v5 = vsel %vm2970_vm9, %v3081_v44, %v2780_v28 }
 0x193   : > { %v1351_v44 = vor.u32 %v1350_v39, %v1347_v2 }
 0x199   : > { %v6127_v15 = vpop.f32.mrf.mxu2  ;;  %v6151_v55 = vpop.f32.mrf.mxu3 }
 0x19a   : > { %4199 = vmatmul.msk.bf16.vlgmr.msra.gmra.mxu3 %vm2921_vm8, %v2919_v46  ;;  %v1343_v46 = vsel %vm4716_vm7, %v1338_v3, %v1342_v11  ;;  %v4217_v11 = vld [vmem:[#allocation2 + $0x84] sm:$0xff]  ;;  %v3410_v4 = vpop.f32.mrf.mxu0 }
 0x19b   : > { %v2590_v22 = vunpack.c.l.b16 %v1343_v46 }
 0x19d   : > { %v3494_v32 = vpop.f32.mrf.mxu1  ;;  %v2611_v63 = vpack.c.b16 %v2590_v22, %v2589_v23 }
 0x19e   : > { %v3495_v6 = vadd.f32 %v3494_v32, %v3406_v10  ;;  %v1361_v32 = vor.u32 %v1360_v25, %v1356_v42 }
 0x19f   : > { %v2462_v56 = vpop.permute.xlu1 %2461 }
 0x1a0   : > { %v2382_v47 = vpop.permute.xlu0 %2381  ;;  %v3584_v29 = vadd.f32 %v5813_v49, %v3495_v6  ;;  %v1364_v49 = vshll.u32 %v5860_v14, 16 }
 0x1a1   : > { %v2860_v0 = vpop.permute.xlu2 %2859  ;;  %v2954_v24 = vsel %vm2921_vm8, %v4216_v13, %v2382_v47  ;;  %v6162_v31 = vpop.f32.mrf.mxu3 }
 0x1a2   : > { %v3160_v17 = vsel %vm3003_vm10, %v3119_v5, %v2860_v0  ;;  %v2992_v9 = vsel %vm2970_vm9, %v2954_v24, %v2462_v56  ;;  %v1352_v5 = vrot.slane %v1351_v44, 4  ;;  %v1362_v56 = vrot.slane %v1361_v32, 4  ;;  %v3412_v23 = vpop.f32.mrf.mxu0 }
 0x1a3   : > { %3518 = vmatmul.bf16.gmra.mxu1 %v3160_v17  ;;  %v1366_v60 = vrot.slane %v1364_v49, 5  ;;  %v3411_v24 = vadd.f32 %v5906_v40, %v3410_v4  ;;  %v3413_v8 = vadd.f32 %v5906_v40, %v3412_v23  ;;  %v3448_v44 = vadd.f32 %v5906_v40, %v6114_v19 }
 0x1a4   : > { %v1357_v0 = vsel %vm4716_vm7, %v1352_v5, %v1356_v42 }
 0x1a5   : > { %v3496_v61 = vpop.f32.mrf.mxu1  ;;  %v1367_v47 = vsel %vm4716_vm7, %v1362_v56, %v1366_v60  ;;  %v2591_v17 = vunpack.c.l.b16 %v1357_v0 }
 0x1a6   : > { %v3497_v28 = vadd.f32 %v3496_v61, %v3408_v7  ;;  %v2592_v43 = vunpack.c.l.b16 %v1367_v47 }
 0x1a7   : > { %v2782_v26 = vpop.permute.xlu1 %2781 }
 0x1a8   : > { %v3586_v62 = vadd.f32 %v5845_v41, %v3497_v28  ;;  %v2686_v27 = vpop.permute.xlu0 %2685  ;;  %v2612_v22 = vpack.c.b16 %v2592_v43, %v2591_v17 }
 0x1a9   : > { %v2558_v34 = vpop.permute.xlu2 %2557  ;;  %v3084_v41 = vsel %vm2921_vm8, %v2611_v63, %v2686_v27 }
 0x1aa   : > { %v4296_v36 = vpack.c.bf16 %v3586_v62, %v3584_v29  ;;  %v3035_v38 = vsel %vm3003_vm10, %v2992_v9, %v2558_v34  ;;  %v6145_v58 = vpop.f32.mrf.mxu2  ;;  %4200 = vmatmul.msk.bf16.gmra.mxu3 %vm2921_vm8, %v2920_v50  ;;  %v3121_v3 = vsel %vm2970_vm9, %v3084_v41, %v2782_v26  ;;  %v6300_v26 = vld [vmem:[#allocation8_spill] sm:$0xff]  ;;  %v3446_v41 = vadd.f32 %v5906_v40, %v6101_v20 }
 0x1ab   : > { %3434 = vmatmul.bf16.gmra.mxu0 %v3035_v38  ;;  %v6170_v28 = vpop.f32.mrf.mxu3 }
 0x1ac   : > { %4356 = vst [vmem:[%s5987_s7 + $0x20] sm:$0xff] %v4296_v36  }
 0x1af   : > { %v2464_v46 = vpop.permute.xlu1 %2463 }
 0x1b1   : > { %v2862_v54 = vpop.permute.xlu2 %2861 }
 0x1b2   : > { %v3163_v13 = vsel %vm3003_vm10, %v3121_v3, %v2862_v54  ;;  %v6155_v18 = vpop.f32.mrf.mxu2  ;;  %v2384_v14 = vpop.permute.xlu0 %2383 }
 0x1b3   : > { %3523 = vmatmul.bf16.gmra.mxu1 %v3163_v13  ;;  %v2957_v10 = vsel %vm2921_vm8, %v4217_v11, %v2384_v14  ;;  %v6180_v27 = vpop.f32.mrf.mxu3 }
 0x1b4   : > { %v2994_v16 = vsel %vm2970_vm9, %v2957_v10, %v2464_v46 }
 0x1b7   : > { %v3499_v45 = vpop.f32.mrf.mxu1  ;;  %v2784_v1 = vpop.permute.xlu1 %2783 }
 0x1b8   : > { %v3500_v53 = vadd.f32 %v3499_v45, %v3411_v24  ;;  %v3451_v45 = vadd.f32 %v5906_v40, %v6119_v33 }
 0x1b9   : > { %v2560_v7 = vpop.permute.xlu2 %2559 }
 0x1ba   : > { %v3038_v6 = vsel %vm3003_vm10, %v2994_v16, %v2560_v7  ;;  %v6167_v61 = vpop.f32.mrf.mxu2  ;;  %v3589_v2 = vadd.f32 %v6300_v26, %v3500_v53  ;;  %v3453_v7 = vadd.f32 %v5906_v40, %v6139_v30 }
 0x1bb   : > { %3439 = vmatmul.bf16.gmra.mxu0 %v3038_v6 }
 0x1bd   : > { %v2688_v51 = vpop.permute.xlu0 %2687  ;;  %v3415_v49 = vpop.f32.mrf.mxu0 }
 0x1be   : > { %v3087_v50 = vsel %vm2921_vm8, %v2612_v22, %v2688_v51  ;;  %v3416_v13 = vadd.f32 %v5906_v40, %v3415_v49 }
 0x1bf   : > { %v3501_v9 = vpop.f32.mrf.mxu1  ;;  %v3123_v29 = vsel %vm2970_vm9, %v3087_v50, %v2784_v1 }
 0x1c0   : > { %v3502_v63 = vadd.f32 %v3501_v9, %v3413_v8 }
 0x1c1   : > { %v2864_v62 = vpop.permute.xlu2 %2863 }
 0x1c2   : > { %v3166_v39 = vsel %vm3003_vm10, %v3123_v29, %v2864_v62  ;;  %v3591_v42 = vadd.f32 %v5933_v37, %v3502_v63  ;;  %v6178_v34 = vpop.f32.mrf.mxu2 }
 0x1c3   : > { %3528 = vmatmul.bf16.gmra.mxu1 %v3166_v39 }
 0x1c4   : > { %v4301_v25 = vpack.c.bf16 %v3591_v42, %v3589_v2 }
 0x1c5   : > { %v3417_v4 = vpop.f32.mrf.mxu0 }
 0x1c6   : > { %4357 = vst [vmem:[%s5987_s7 + $0x28] sm:$0xff] %v4301_v25   ;;  %v3418_v14 = vadd.f32 %v5906_v40, %v3417_v4  ;;  %v3456_v4 = vadd.f32 %v5906_v40, %v6151_v55 }
 0x1d0   : > { %v3534_v38 = vpop.f32.mrf.mxu3 }
 0x1d1   : > { %v3623_v36 = vpop.f32.mrf.mxu2  ;;  %v3535_v32 = vadd.f32 %v3534_v38, %v3446_v41 }
 0x1d3   : > { %v3624_v56 = vadd.f32 %v3623_v36, %v3535_v32 }
 0x1d5   : > { %v3420_v17 = vpop.f32.mrf.mxu0 }
 0x1d6   : > { %v3421_v53 = vadd.f32 %v5906_v40, %v3420_v17 }
 0x1d8   : > { %v3536_v3 = vpop.f32.mrf.mxu3 }
 0x1d9   : > { %v3625_v37 = vpop.f32.mrf.mxu2  ;;  %v3537_v5 = vadd.f32 %v3536_v3, %v3448_v44 }
 0x1da   : > { %v3504_v11 = vpop.f32.mrf.mxu1 }
 0x1db   : > { %v3626_v60 = vadd.f32 %v3625_v37, %v3537_v5  ;;  %v3505_v46 = vadd.f32 %v3504_v11, %v3416_v13 }
 0x1dd   : > { %v4336_v54 = vpack.c.bf16 %v3626_v60, %v3624_v56  ;;  %v3594_v19 = vadd.f32 %v5975_v12, %v3505_v46  ;;  %v3422_v12 = vpop.f32.mrf.mxu0 }
 0x1de   : > { %v3423_v50 = vadd.f32 %v5906_v40, %v3422_v12 }
 0x1df   : > { %4364 = vst [vmem:[%s5987_s7 + $0x60] sm:$0xff] %v4336_v54   ;;  %v3458_v54 = vadd.f32 %v5906_v40, %v6162_v31 }
 0x1e2   : > { %v3506_v20 = vpop.f32.mrf.mxu1 }
 0x1e3   : > { %v3507_v10 = vadd.f32 %v3506_v20, %v3418_v14 }
 0x1e5   : > { %v3596_v0 = vadd.f32 %v6025_v52, %v3507_v10 }
 0x1e7   : > { %v3539_v47 = vpop.f32.mrf.mxu3  ;;  %v4306_v16 = vpack.c.bf16 %v3596_v0, %v3594_v19 }
 0x1e8   : > { %v3540_v6 = vadd.f32 %v3539_v47, %v3451_v45 }
 0x1e9   : > { %4358 = vst [vmem:[%s5987_s7 + $0x30] sm:$0xff] %v4306_v16  }
 0x1ea   : > { %v3628_v43 = vpop.f32.mrf.mxu2 }
 0x1eb   : > { %v3629_v52 = vadd.f32 %v3628_v43, %v3540_v6  ;;  %v3425_v63 = vpop.f32.mrf.mxu0 }
 0x1ec   : > { %v3426_v25 = vadd.f32 %v5906_v40, %v3425_v63 }
 0x1ef   : > { %v3541_v23 = vpop.f32.mrf.mxu3 }
 0x1f0   : > { %v3542_v22 = vadd.f32 %v3541_v23, %v3453_v7 }
 0x1f2   : > { %v3509_v24 = vpop.f32.mrf.mxu1  ;;  %v3630_v1 = vpop.f32.mrf.mxu2 }
 0x1f3   : > { %v3631_v8 = vadd.f32 %v3630_v1, %v3542_v22  ;;  %v3510_v9 = vadd.f32 %v3509_v24, %v3421_v53  ;;  %v3427_v42 = vpop.f32.mrf.mxu0 }
 0x1f4   : > { %v3428_v38 = vadd.f32 %v5906_v40, %v3427_v42 }
 0x1f5   : > { %v4341_v51 = vpack.c.bf16 %v3631_v8, %v3629_v52  ;;  %v3599_v30 = vadd.f32 %v6056_v59, %v3510_v9 }
 0x1f7   : > { %4365 = vst [vmem:[%s5987_s7 + $0x68] sm:$0xff] %v4341_v51  }
 0x1fa   : > { %v3511_v33 = vpop.f32.mrf.mxu1 }
 0x1fb   : > { %v3512_v29 = vadd.f32 %v3511_v33, %v3423_v50  ;;  %v3544_v26 = vpop.f32.mrf.mxu3 }
 0x1fc   : > { %v3545_v13 = vadd.f32 %v3544_v26, %v3456_v4 }
 0x1fd   : > { %v3601_v62 = vadd.f32 %v6078_v48, %v3512_v29 }
 0x1ff   : > { %v4311_v2 = vpack.c.bf16 %v3601_v62, %v3599_v30 }
 0x201   : > { %4359 = vst [vmem:[%s5987_s7 + $0x38] sm:$0xff] %v4311_v2  }
 0x202   : > { %v3514_v39 = vpop.f32.mrf.mxu1 }
 0x203   : > { %v3546_v36 = vpop.f32.mrf.mxu3  ;;  %v3515_v49 = vadd.f32 %v3514_v39, %v3426_v25 }
 0x204   : > { %v3547_v14 = vadd.f32 %v3546_v36, %v3458_v54 }
 0x205   : > { %v3604_v32 = vadd.f32 %v6088_v35, %v3515_v49 }
 0x208   : > { %v3430_v11 = vpop.f32.mrf.mxu0 }
 0x209   : > { %v3431_v35 = vadd.f32 %v5906_v40, %v3430_v11 }
 0x20a   : > { %v3516_v41 = vpop.f32.mrf.mxu1 }
 0x20b   : > { %v3517_v44 = vadd.f32 %v3516_v41, %v3428_v38 }
 0x20d   : > { %v3606_v59 = vadd.f32 %v6106_v57, %v3517_v44  ;;  %v3549_v48 = vpop.f32.mrf.mxu3 }
 0x20f   : > { %v4316_v3 = vpack.c.bf16 %v3606_v59, %v3604_v32 }
 0x210   : > { %v3432_v56 = vpop.f32.mrf.mxu0 }
 0x211   : > { %4360 = vst [vmem:[%s5987_s7 + $0x40] sm:$0xff] %v4316_v3   ;;  %v3433_v10 = vadd.f32 %v5906_v40, %v3432_v56  ;;  %v4479_v40 = vld [vmem:[%s6273_s3] ss:$0 sm:$0xff] }
 0x212   : > { %v3461_v23 = vadd.f32 %v4479_v40, %v6170_v28  ;;  %v3463_v22 = vadd.f32 %v4479_v40, %v6180_v27 }
 0x214   : > { %v3550_v24 = vadd.f32 %v3549_v48, %v3461_v23 }
 0x215   : > { %v3551_v37 = vpop.f32.mrf.mxu3 }
 0x216   : > { %v3552_v1 = vadd.f32 %v3551_v37, %v3463_v22 }
 0x21d   : > { %v3633_v5 = vpop.f32.mrf.mxu3 }
 0x21e   : > { %v3634_v46 = vadd.f32 %v3633_v5, %v3545_v13 }
 0x220   : > { %v3519_v60 = vpop.f32.mrf.mxu1 }
 0x221   : > { %v3520_v19 = vadd.f32 %v3519_v60, %v3431_v35 }
 0x223   : > { %v3609_v55 = vadd.f32 %v6116_v21, %v3520_v19 }
 0x225   : > { %v3635_v57 = vpop.f32.mrf.mxu3 }
 0x226   : > { %v3636_v20 = vadd.f32 %v3635_v57, %v3547_v14 }
 0x228   : > { %v3435_v0 = vpop.f32.mrf.mxu0  ;;  %v3521_v47 = vpop.f32.mrf.mxu1  ;;  %v4346_v16 = vpack.c.bf16 %v3636_v20, %v3634_v46 }
 0x229   : > { %v3522_v17 = vadd.f32 %v3521_v47, %v3433_v10  ;;  %v3436_v21 = vadd.f32 %v4479_v40, %v3435_v0 }
 0x22a   : > { %4366 = vst [vmem:[%s5987_s7 + $0x70] sm:$0xff] %v4346_v16  }
 0x22b   : > { %v3611_v31 = vadd.f32 %v6127_v15, %v3522_v17 }
 0x22d   : > { %v4321_v43 = vpack.c.bf16 %v3611_v31, %v3609_v55  ;;  %v3638_v45 = vpop.f32.mrf.mxu3 }
 0x22e   : > { %v3639_v15 = vadd.f32 %v3638_v45, %v3550_v24 }
 0x22f   : > { %4361 = vst [vmem:[%s5987_s7 + $0x48] sm:$0xff] %v4321_v43  }
 0x230   : > { %v3437_v7 = vpop.f32.mrf.mxu0  ;;  %v3524_v6 = vpop.f32.mrf.mxu1 }
 0x231   : > { %v3438_v8 = vadd.f32 %v4479_v40, %v3437_v7  ;;  %v3525_v51 = vadd.f32 %v3524_v6, %v3436_v21 }
 0x233   : > { %v3614_v28 = vadd.f32 %v6145_v58, %v3525_v51 }
 0x235   : > { %v3640_v12 = vpop.f32.mrf.mxu3 }
 0x236   : > { %v3641_v52 = vadd.f32 %v3640_v12, %v3552_v1 }
 0x238   : > { %v3526_v53 = vpop.f32.mrf.mxu1  ;;  %v4351_v50 = vpack.c.bf16 %v3641_v52, %v3639_v15  ;;  %v3440_v33 = vpop.f32.mrf.mxu0 }
 0x239   : > { %v3527_v9 = vadd.f32 %v3526_v53, %v3438_v8  ;;  %v3441_v62 = vadd.f32 %v4479_v40, %v3440_v33 }
 0x23a   : > { %4367 = vst [vmem:[%s5987_s7 + $0x78] sm:$0xff] %v4351_v50  }
 0x23b   : > { %v3616_v27 = vadd.f32 %v6155_v18, %v3527_v9 }
 0x23d   : > { %v4326_v29 = vpack.c.bf16 %v3616_v27, %v3614_v28 }
 0x23f   : > { %4362 = vst [vmem:[%s5987_s7 + $0x50] sm:$0xff] %v4326_v29  }
 0x240   : > { %v3529_v63 = vpop.f32.mrf.mxu1  ;;  %v3442_v30 = vpop.f32.mrf.mxu0 }
 0x241   : > { %v3443_v26 = vadd.f32 %v4479_v40, %v3442_v30  ;;  %v3530_v2 = vadd.f32 %v3529_v63, %v3441_v62 }
 0x243   : > { %v3619_v58 = vadd.f32 %v6167_v61, %v3530_v2 }
 0x248   : > { %v3531_v39 = vpop.f32.mrf.mxu1 }
 0x249   : > { %v3532_v42 = vadd.f32 %v3531_v39, %v3443_v26 }
 0x24b   : > { %v3621_v18 = vadd.f32 %v6178_v34, %v3532_v42 }
 0x24d   : > { %v4331_v25 = vpack.c.bf16 %v3621_v18, %v3619_v58 }
 0x24f   : > { %4363 = vst [vmem:[%s5987_s7 + $0x58] sm:$0xff] %v4331_v25  }
 0x250   : > { %4507 = shalt.err (!%p4504_p5)
}
 0x251   : > { %s4563_s14 = smov 4  }
 0x252   : > { %4388 = dma.vmem_to_hbm [thread:$0]  (%p4629_p4), %s3724_s26, 2048, %s3726_s29, %s3708_s18, %s4561_s13, %s4561_s13, %s4563_s14  }
 0x253 PF: > { %p4394_p6 = scmp.ge.s32.totalorder %s4558_s20, 2  ;;  %s3740_s7 = sand.u32 1, %s4538_s15  }
 0x254   : > { %s3741_s10 = scalar_lea.sflag [#allocation4], %s3740_s7 }
 0x255   : > { %p4391_p7 = pnand %p4394_p6, %p4636_p8 }
 0x257   : > { %p4392_p9 = pneg %p4391_p7 }
 0x259   : > { %4533 = dma.done.wait (%p4392_p9), %s3741_s10, 2048  }
 0x25a   : > { %4535 = vsyncadd (%p4392_p9), %s3741_s10, 4294965248  ;;  %s17_s20 = sadd.s32 1, %s4558_s20   ;;  %s6301_s15 = smov %s4542_s16 }
 0x25b   : > { %p14_p10 = scmp.ge.s32.totalorder %s17_s20, 4   ;;  %s6302_s16 = smov %s4546_s17 }
 0x25c   : > { %s6303_s17 = smov %s4642_s28  ;;  %s6304_s18 = smov %s4554_s19 }
 0x25d   : > { %s6305_s19 = smov %s6307_s23  ;;  %16 = sbr.rel (!%p14_p10) target bundleno = 4 (0x4), region = 84 }
 0x262   :  { %3747 = vsyncpa [#allocation4], 1 }
 0x263   :  { %3749 = vsyncpa [#allocation4 + $0x1], 1 }

// kernel: tpu_custom_call.1
= control target key start
LH: loop header
LB: loop body
LE: loop exit
PB: predicated region body
PF: predicated region fallthrough
CT: control target
= control target key end

     0   :  { %9 = vsyncpa [#allocation4], 0  ;;  %s6757_s0 = inlined_call_operand.vmem [shape: bf16[2,16,18,32], index: 0, kind: input, shape index: {}]   ;;  %s6758_s1 = inlined_call_operand.vmem [shape: bf16[2,1,2,18,32], index: 1, kind: input, shape index: {}]   ;;  %s6759_s2 = inlined_call_operand.vmem [shape: bf16[288,128], index: 2, kind: input, shape index: {}]   ;;  %s6760_s3 = inlined_call_operand.vmem [shape: f32[1,128], index: 3, kind: input, shape index: {}]   ;;  %s6761_s4 = inlined_call_operand.hbm [shape: bf16[2,256,128], index: 4, kind: output, shape index: {}]  }
   0x1   :  { %11 = vsyncpa [#allocation4 + $0x1], 0  ;;  %s5446_s15 = smov 0   ;;  %s5448_s16 = smov 0  }
   0x2   :  { %s5450_s17 = smov 0   ;;  %s5452_s18 = smov 0  }
   0x3   :  { %s5454_s19 = smov 0   ;;  %s5456_s20 = smov 0  }
   0x4 LB: > { %s4584_s21 = sadd.s32 4294967295, %s5417_s20   ;;  %s4585_s22 = sadd.s32 4294967294, %s5417_s20   ;;  %s5417_s20 = sphi %s5456_s20, %s17_s20   ;;  %s5413_s19 = sphi %s5454_s19, %s6780_s19   ;;  %s5409_s18 = sphi %s5452_s18, %s6779_s18   ;;  %s5405_s17 = sphi %s5450_s17, %s6778_s17   ;;  %s5401_s16 = sphi %s5448_s16, %s6777_s16   ;;  %s5397_s15 = sphi %s5446_s15, %s6776_s15  }
   0x5   : > { %s36_s23 = sadd.s32 1, %s5413_s19  ;;  %s155_s24 = sadd.s32 1, %s5405_s17 }
   0x6   : > { %p38_p0 = scmp.ge.s32.totalorder %s36_s23, 2  ;;  %p165_p1 = scmp.ne.s32.totalorder %s5405_s17, %s5401_s16 }
   0x7   : > { %p166_p2 = scmp.eq.s32.totalorder %s4584_s21, 1  ;;  %p171_p3 = scmp.ne.s32.totalorder %s5401_s16, %s5397_s15 }
   0x8   : > { %s6782_s23 = smov (%p38_p0, %s36_s23), 0  ;;  %p172_p5 = scmp.eq.s32.totalorder %s4585_s22, 1 }
   0x9   : > { %p5486_p4 = por %p166_p2, %p165_p1  ;;  %s148_s26 = ssub.s32 %s5413_s19, %s6782_s23 }
   0xa   : > { %p4590_p6 = scmp.ge.s32.totalorder %s5417_s20, 1  ;;  %p153_p7 = scmp.eq.s32.totalorder %s148_s26, 0 }
   0xb   : > { %p5493_p8 = por %p172_p5, %p171_p3  ;;  %p229_p9 = scmp.lt.s32.totalorder %s5417_s20, 3 }
   0xc   : > { %s5499_s28 = scalar_select %p153_p7, %s5405_s17, %s155_s24  }
   0xd   : > { %p230_p10 = pnand %p4590_p6, %p229_p9 }
   0xf   : > { %233 = sbr.rel (%p230_p10) target bundleno = 786 (0x312), region = 36 }
  0x14   : > { %v5109_v0 = vld [vmem:[%s6759_s2 + $0x18] sm:$0xff]  ;;  %p277_p11 = scmp.lt.s32.totalorder %s5409_s18, 1  ;;  %v5108_v1 = vld [vmem:[%s6759_s2 + $0x10] sm:$0xff]  ;;  %vm308_vm0 = vcmask 257024   ;;  %vm311_vm1 = vcmask 253952   ;;  %v5111_v9 = vld [vmem:[%s6759_s2 + $0x28] sm:$0xff] }
  0x15   : > { %5220 = vmatpush.bf16.msra.mxu1 %v5109_v0  ;;  %5221 = vmatpush.bf16.msra.mxu2 %v5109_v0  ;;  %v5113_v12 = vld [vmem:[%s6759_s2 + $0x38] sm:$0xff]  ;;  %v5107_v13 = vld [vmem:[%s6759_s2 + $0x8] sm:$0xff]  ;;  %vm466_vm2 = vsmask.f32 3328  ;;  %vm467_vm3 = vsmask.f32 7440 }
  0x16   : > { %s278_s7 = scalar_select %p277_p11, %s5409_s18, 1  ;;  %5222 = vmatpush.bf16.msra.mxu3 %v5109_v0  ;;  %2372 = vmatpush.bf16.msra.mxu0 %v5109_v0  ;;  %v5115_v14 = vld [vmem:[%s6759_s2 + $0x48] sm:$0xff]  ;;  %vm5555_vm4 = vmor %vm466_vm2, %vm467_vm3  ;;  %vm2317_vm5 = vcmask 261120   ;;  %vm917_vm6 = vcmask 1042432   ;;  %vm918_vm7 = vcmask 1046532  }
  0x17   : > { %vm5750_vm8 = vmor %vm917_vm6, %vm918_vm7  ;;  %s5124_s9 = sshll.u32 %s5409_s18, 7  ;;  %s5359_s5 = scalar_lea.hbm %s6761_s4, 256 }
  0x18   : > { %s5226_s8 = smul.u32 192, %s278_s7  ;;  %s4446_s13 = scalar_lea.hbm %s6761_s4, %s5124_s9 }
  0x19   : > { %5223 = vmatpush.bf16.msra.mxu1 %v5108_v1  ;;  %5224 = vmatpush.bf16.msra.mxu2 %v5108_v1  ;;  %s5227_s12 = smul.u32 24, %s278_s7  ;;  %s4449_s21 = sshll.u32 %s4446_s13, 4  ;;  %s4450_s21 = int_to_ptr.hbm [resolvable:$true] %s4449_s21 }
  0x1a   : > { %s5512_s11 = scalar_lea.vmem %s6757_s0, %s5226_s8  ;;  %5225 = vmatpush.bf16.msra.mxu3 %v5108_v1  ;;  %2373 = vmatpush.bf16.msra.mxu0 %v5108_v1  ;;  %s5353_s22 = sshra.s32 %s4450_s21, 4  ;;  %s5354_s22 = int_to_ptr.hbm [resolvable:$true] %s5353_s22 }
  0x1b   : > { %v322_v2 = vld [vmem:[%s5512_s11 + $0x24] sm:$0xf]  ;;  %v323_v3 = vld [vmem:[%s5512_s11 + $0x28] sm:$0xf]  ;;  %v324_v4 = vld [vmem:[%s5512_s11 + $0x2c] sm:$0x1]  ;;  %s5531_s24 = scalar_lea.vmem %s6758_s1, %s5227_s12  ;;  %p5360_p1 = scmp.lt.s32.totalorder %s5354_s22, %s6761_s4 }
  0x1c   : > { %371 = vst.msk [vmem:[#allocation2 + $0x30] sm:$0xf] %vm308_vm0, %v322_v2  ;;  %v334_v5 = vld [vmem:[%s5512_s11 + $0x54] sm:$0xf]  ;;  %v335_v6 = vld [vmem:[%s5512_s11 + $0x58] sm:$0xf] }
  0x1d   : > { %372 = vst.msk [vmem:[#allocation2 + $0x34] sm:$0xf] %vm308_vm0, %v323_v3  ;;  %v336_v7 = vld [vmem:[%s5512_s11 + $0x5c] sm:$0x1]  ;;  %v346_v8 = vld [vmem:[%s5512_s11 + $0x84] sm:$0xf]  ;;  %2786 = vmatpush.bf16.msrb.mxu2 %v5111_v9  ;;  %2585 = vmatpush.bf16.msrb.mxu1 %v5107_v13 }
  0x1e   : > { %373 = vst.msk [vmem:[#allocation2 + $0x38] sm:$0x1] %vm311_vm1, %v324_v4  ;;  %v347_v10 = vld [vmem:[%s5512_s11 + $0x88] sm:$0xf]  ;;  %v348_v11 = vld [vmem:[%s5512_s11 + $0x8c] sm:$0x1]  ;;  %3035 = vmatpush.bf16.msrb.mxu3 %v5113_v12  ;;  %3268 = vmatpush.bf16.msrb.mxu0 %v5115_v14 }
  0x1f   : > { %383 = vst.msk [vmem:[#allocation2 + $0x60] sm:$0xf] %vm308_vm0, %v334_v5  ;;  %v305_v15 = vld [vmem:[%s5531_s24] sm:$0xf]  ;;  %v306_v32 = vld [vmem:[%s5531_s24 + $0x4] sm:$0xf] }
  0x20   : > { %384 = vst.msk [vmem:[#allocation2 + $0x64] sm:$0xf] %vm308_vm0, %v335_v6  ;;  %v307_v38 = vld [vmem:[%s5531_s24 + $0x8] sm:$0x1]  ;;  %v325_v45 = vld [vmem:[%s5512_s11 + $0x30] sm:$0xf] }
  0x21   : > { %385 = vst.msk [vmem:[#allocation2 + $0x68] sm:$0x1] %vm311_vm1, %v336_v7  ;;  %v326_v50 = vld [vmem:[%s5512_s11 + $0x34] sm:$0xf]  ;;  %v327_v55 = vld [vmem:[%s5512_s11 + $0x38] sm:$0x1] }
  0x22   : > { %395 = vst.msk [vmem:[#allocation2 + $0x90] sm:$0xf] %vm308_vm0, %v346_v8  ;;  %v337_v5 = vld [vmem:[%s5512_s11 + $0x60] sm:$0xf]  ;;  %v338_v14 = vld [vmem:[%s5512_s11 + $0x64] sm:$0xf] }
  0x23   : > { %v426_v16 = vld [vmem:[#allocation2 + $0x30] sm:$0xf]  ;;  %396 = vst.msk [vmem:[#allocation2 + $0x94] sm:$0xf] %vm308_vm0, %v347_v10  ;;  %s5355_s26 = scalar_lea.hbm %s5354_s22, 128 }
  0x24   : > { %v427_v17 = vld [vmem:[#allocation2 + $0x34] sm:$0xf]  ;;  %v566_v18 = vshrl.u32 %v426_v16, 16  ;;  %v569_v19 = vshll.u32 %v426_v16, 16  ;;  %397 = vst.msk [vmem:[#allocation2 + $0x98] sm:$0x1] %vm311_vm1, %v348_v11  ;;  %p5356_p12 = scmp.ne.s32.totalorder %s5354_s22, %s5355_s26  ;;  %p5361_p2 = scmp.lt.s32.totalorder %s5359_s5, %s5355_s26 }
  0x25   : > { %v454_v20 = vld [vmem:[#allocation2 + $0x38] sm:$0x1]  ;;  %v575_v21 = vshll.u32 %v427_v17, 16  ;;  %v579_v22 = vshrl.u32 %v427_v17, 16  ;;  %309 = vst.msk [vmem:[#allocation2] sm:$0xf] %vm308_vm0, %v305_v15 }
  0x26   : > { %v568_v23 = vrot.slane %v566_v18, 4  ;;  %v571_v24 = vrot.slane %v569_v19, 5  ;;  %v585_v25 = vshll.u32 %v454_v20, 16  ;;  %v434_v26 = vld [vmem:[#allocation2 + $0x60] sm:$0xf]  ;;  %p5357_p13 = pnand %p5356_p12, %p5486_p4  ;;  %p5362_p3 = por %p5361_p2, %p5360_p1 }
  0x27   : > { %v577_v27 = vrot.slane %v575_v21, 5  ;;  %v581_v28 = vrot.slane %v579_v22, 4  ;;  %v435_v29 = vld [vmem:[#allocation2 + $0x64] sm:$0xf]  ;;  %v662_v30 = vshrl.u32 %v434_v26, 16  ;;  %v665_v31 = vshll.u32 %v434_v26, 16 }
  0x28   : > { %v572_v33 = vor.u32 %v571_v24, %v568_v23  ;;  %v587_v34 = vrot.slane %v585_v25, 5  ;;  %v458_v35 = vld [vmem:[#allocation2 + $0x68] sm:$0x1]  ;;  %v671_v36 = vshll.u32 %v435_v29, 16  ;;  %v675_v37 = vshrl.u32 %v435_v29, 16  ;;  %p5358_p0 = pneg %p5357_p13 }
  0x29   : > { %v582_v40 = vor.u32 %v581_v28, %v577_v27  ;;  %v664_v41 = vrot.slane %v662_v30, 4  ;;  %v667_v42 = vrot.slane %v665_v31, 5  ;;  %v681_v43 = vshll.u32 %v458_v35, 16  ;;  %v442_v44 = vld [vmem:[#allocation2 + $0x90] sm:$0xf] }
  0x2a   : > { %v573_v46 = vrot.slane %v572_v33, 4  ;;  %v673_v47 = vrot.slane %v671_v36, 5  ;;  %v677_v48 = vrot.slane %v675_v37, 4  ;;  %v443_v49 = vld [vmem:[#allocation2 + $0x94] sm:$0xf]  ;;  %v758_v54 = vshrl.u32 %v442_v44, 16  ;;  %p5363_p5 = pnand %p5362_p3, %p5358_p0 }
  0x2b   : > { %v583_v51 = vrot.slane %v582_v40, 4  ;;  %v668_v52 = vor.u32 %v667_v42, %v664_v41  ;;  %v683_v53 = vrot.slane %v681_v43, 5  ;;  %v462_v58 = vld [vmem:[#allocation2 + $0x98] sm:$0x1]  ;;  %v761_v59 = vshll.u32 %v442_v44, 16 }
  0x2c   : > { %v578_v56 = vsel %vm5555_vm4, %v573_v46, %v577_v27  ;;  %v678_v57 = vor.u32 %v677_v48, %v673_v47  ;;  %v767_v60 = vshll.u32 %v443_v49, 16  ;;  %310 = vst.msk [vmem:[#allocation2 + $0x4] sm:$0xf] %vm308_vm0, %v306_v32  ;;  %v760_v0 = vrot.slane %v758_v54, 4  ;;  %v418_v1 = vld [vmem:[#allocation2] sm:$0xf] }
  0x2d   : > { %v588_v61 = vsel %vm5555_vm4, %v583_v51, %v587_v34  ;;  %v2265_v62 = vunpack.c.l.b16 %v578_v56  ;;  %v669_v63 = vrot.slane %v668_v52, 4  ;;  %312 = vst.msk [vmem:[#allocation2 + $0x8] sm:$0x1] %vm311_vm1, %v307_v38  ;;  %v763_v4 = vrot.slane %v761_v59, 5  ;;  %v339_v15 = vld [vmem:[%s5512_s11 + $0x68] sm:$0x1] }
  0x2e   : > { %v2266_v2 = vunpack.c.l.b16 %v588_v61  ;;  %v679_v3 = vrot.slane %v678_v57, 4  ;;  %374 = vst.msk [vmem:[#allocation2 + $0x3c] sm:$0xf] %vm308_vm0, %v325_v45  ;;  %v769_v7 = vrot.slane %v767_v60, 5  ;;  %v771_v8 = vshrl.u32 %v443_v49, 16 }
  0x2f   : > { %v674_v6 = vsel %vm5555_vm4, %v669_v63, %v673_v47  ;;  %v777_v9 = vshll.u32 %v462_v58, 16  ;;  %375 = vst.msk [vmem:[#allocation2 + $0x40] sm:$0xf] %vm308_vm0, %v326_v50  ;;  %v764_v13 = vor.u32 %v763_v4, %v760_v0  ;;  %v470_v18 = vshrl.u32 %v418_v1, 16  ;;  %v349_v41 = vld [vmem:[%s5512_s11 + $0x90] sm:$0xf] }
  0x30   : > { %v2293_v10 = vpack.c.b16 %v2266_v2, %v2265_v62  ;;  %v684_v11 = vsel %vm5555_vm4, %v679_v3, %v683_v53  ;;  %v2273_v12 = vunpack.c.l.b16 %v674_v6  ;;  %376 = vst.msk [vmem:[#allocation2 + $0x44] sm:$0x1] %vm311_vm1, %v327_v55  ;;  %v773_v17 = vrot.slane %v771_v8, 4  ;;  %v350_v52 = vld [vmem:[%s5512_s11 + $0x94] sm:$0xf] }
  0x31   : > { %v2274_v16 = vunpack.c.l.b16 %v684_v11  ;;  %386 = vst.msk [vmem:[#allocation2 + $0x6c] sm:$0xf] %vm308_vm0, %v337_v5  ;;  %v765_v19 = vrot.slane %v764_v13, 4  ;;  %v473_v20 = vshll.u32 %v418_v1, 16  ;;  %v779_v23 = vrot.slane %v777_v9, 5 }
  0x32   : > { %4657 = vmatmul.msk.bf16.vlgmr.msra.gmra.mxu1 %vm2317_vm5, %v2293_v10  ;;  %387 = vst.msk [vmem:[#allocation2 + $0x70] sm:$0xf] %vm308_vm0, %v338_v14  ;;  %v774_v22 = vor.u32 %v773_v17, %v769_v7  ;;  %v472_v25 = vrot.slane %v470_v18, 4  ;;  %v351_v63 = vld [vmem:[%s5512_s11 + $0x98] sm:$0x1] }
  0x33   : > { %v2297_v21 = vpack.c.b16 %v2274_v16, %v2273_v12  ;;  %v5581_v24 = vld [vmem:[#allocation2 + $0x4] sm:$0xf]  ;;  %388 = vst.msk [vmem:[#allocation2 + $0x74] sm:$0x1] %vm311_vm1, %v339_v15  ;;  %v770_v26 = vsel %vm5555_vm4, %v765_v19, %v769_v7  ;;  %v475_v28 = vrot.slane %v473_v20, 5 }
  0x34   : > { %v5586_v27 = vld [vmem:[#allocation2 + $0x8] sm:$0x1]  ;;  %v479_v29 = vshll.u32 %v5581_v24, 16  ;;  %v483_v30 = vshrl.u32 %v5581_v24, 16  ;;  %v775_v31 = vrot.slane %v774_v22, 4  ;;  %v2281_v32 = vunpack.c.l.b16 %v770_v26 }
  0x35   : > { %4661 = vmatmul.msk.bf16.vlgmr.msra.gmra.mxu2 %vm2317_vm5, %v2297_v21  ;;  %v489_v33 = vshll.u32 %v5586_v27, 16  ;;  %v428_v34 = vld [vmem:[#allocation2 + $0x3c] sm:$0xf]  ;;  %v476_v35 = vor.u32 %v475_v28, %v472_v25  ;;  %398 = vst.msk [vmem:[#allocation2 + $0x9c] sm:$0xf] %vm308_vm0, %v349_v41 }
  0x36   : > { %v481_v36 = vrot.slane %v479_v29, 5  ;;  %v485_v37 = vrot.slane %v483_v30, 4  ;;  %v429_v38 = vld [vmem:[#allocation2 + $0x40] sm:$0xf]  ;;  %v590_v40 = vshrl.u32 %v428_v34, 16  ;;  %v780_v42 = vsel %vm5555_vm4, %v775_v31, %v779_v23 }
  0x37   : > { %v491_v43 = vrot.slane %v489_v33, 5  ;;  %v455_v44 = vld [vmem:[#allocation2 + $0x44] sm:$0x1]  ;;  %v593_v45 = vshll.u32 %v428_v34, 16  ;;  %v599_v46 = vshll.u32 %v429_v38, 16  ;;  %v2282_v47 = vunpack.c.l.b16 %v780_v42 }
  0x38   : > { %v477_v48 = vrot.slane %v476_v35, 4  ;;  %v486_v49 = vor.u32 %v485_v37, %v481_v36  ;;  %v592_v50 = vrot.slane %v590_v40, 4  ;;  %v436_v51 = vld [vmem:[#allocation2 + $0x6c] sm:$0xf]  ;;  %v603_v55 = vshrl.u32 %v429_v38, 16 }
  0x39   : > { %v595_v53 = vrot.slane %v593_v45, 5  ;;  %v601_v54 = vrot.slane %v599_v46, 5  ;;  %v609_v56 = vshll.u32 %v455_v44, 16  ;;  %v437_v57 = vld [vmem:[#allocation2 + $0x70] sm:$0xf]  ;;  %v2301_v58 = vpack.c.b16 %v2282_v47, %v2281_v32 }
  0x3a   : > { %v482_v59 = vsel %vm5555_vm4, %v477_v48, %v481_v36  ;;  %v487_v60 = vrot.slane %v486_v49, 4  ;;  %v459_v61 = vld [vmem:[#allocation2 + $0x74] sm:$0x1]  ;;  %v686_v62 = vshrl.u32 %v436_v51, 16  ;;  %v605_v2 = vrot.slane %v603_v55, 4  ;;  %v5110_v55 = vld [vmem:[%s6759_s2 + $0x20] sm:$0xff] }
  0x3b   : > { %v2257_v0 = vunpack.c.l.b16 %v482_v59  ;;  %v596_v1 = vor.u32 %v595_v53, %v592_v50  ;;  %v611_v3 = vrot.slane %v609_v56, 5  ;;  %v313_v4 = vld [vmem:[%s5512_s11] sm:$0xf]  ;;  %4665 = vmatmul.msk.bf16.vlgmr.msra.gmra.mxu3 %vm2317_vm5, %v2301_v58  ;;  %v689_v7 = vshll.u32 %v436_v51, 16  ;;  %399 = vst.msk [vmem:[#allocation2 + $0xa0] sm:$0xf] %vm308_vm0, %v350_v52  ;;  %2787 = vmatpush.bf16.msrb.mxu2 %v5110_v55 }
  0x3c   : > { %v492_v5 = vsel %vm5555_vm4, %v487_v60, %v491_v43  ;;  %v688_v6 = vrot.slane %v686_v62, 4  ;;  %v695_v8 = vshll.u32 %v437_v57, 16  ;;  %v606_v11 = vor.u32 %v605_v2, %v601_v54  ;;  %400 = vst.msk [vmem:[#allocation2 + $0xa4] sm:$0x1] %vm311_vm1, %v351_v63  ;;  %v314_v13 = vld [vmem:[%s5512_s11 + $0x4] sm:$0xf] }
  0x3d   : > { %v2258_v9 = vunpack.c.l.b16 %v492_v5  ;;  %v597_v10 = vrot.slane %v596_v1, 4  ;;  %v699_v12 = vshrl.u32 %v437_v57, 16  ;;  %v691_v14 = vrot.slane %v689_v7, 5  ;;  %v315_v17 = vld [vmem:[%s5512_s11 + $0x8] sm:$0x1] }
  0x3e   : > { %v697_v15 = vrot.slane %v695_v8, 5  ;;  %v705_v16 = vshll.u32 %v459_v61, 16  ;;  %v607_v20 = vrot.slane %v606_v11, 4  ;;  %362 = vst.msk [vmem:[#allocation2 + $0xc] sm:$0xf] %vm308_vm0, %v313_v4 }
  0x3f   : > { %v2289_v18 = vpack.c.b16 %v2258_v9, %v2257_v0  ;;  %v602_v19 = vsel %vm5555_vm4, %v597_v10, %v601_v54  ;;  %v701_v21 = vrot.slane %v699_v12, 4  ;;  %v328_v22 = vld [vmem:[%s5512_s11 + $0x3c] sm:$0xf]  ;;  %v692_v25 = vor.u32 %v691_v14, %v688_v6  ;;  %363 = vst.msk [vmem:[#allocation2 + $0x10] sm:$0xf] %vm308_vm0, %v314_v13 }
  0x40   : > { %v2267_v23 = vunpack.c.l.b16 %v602_v19  ;;  %v707_v26 = vrot.slane %v705_v16, 5  ;;  %v612_v28 = vsel %vm5555_vm4, %v607_v20, %v611_v3  ;;  %364 = vst.msk [vmem:[#allocation2 + $0x14] sm:$0x1] %vm311_vm1, %v315_v17  ;;  %v329_v30 = vld [vmem:[%s5512_s11 + $0x40] sm:$0xf] }
  0x41   : > { %4653 = vmatmul.msk.bf16.vlgmr.msra.gmra.mxu0 %vm2317_vm5, %v2289_v18  ;;  %v702_v29 = vor.u32 %v701_v21, %v697_v15  ;;  %v330_v31 = vld [vmem:[%s5512_s11 + $0x44] sm:$0x1]  ;;  %v2268_v32 = vunpack.c.l.b16 %v612_v28  ;;  %v693_v33 = vrot.slane %v692_v25, 4  ;;  %v444_v34 = vld [vmem:[#allocation2 + $0x9c] sm:$0xf] }
  0x42   : > { %377 = vst.msk [vmem:[#allocation2 + $0x48] sm:$0xf] %vm308_vm0, %v328_v22  ;;  %v445_v36 = vld [vmem:[#allocation2 + $0xa0] sm:$0xf]  ;;  %v782_v37 = vshrl.u32 %v444_v34, 16  ;;  %v785_v38 = vshll.u32 %v444_v34, 16 }
  0x43   : > { %v703_v35 = vrot.slane %v702_v29, 4  ;;  %v2294_v40 = vpack.c.b16 %v2268_v32, %v2267_v23  ;;  %v698_v41 = vsel %vm5555_vm4, %v693_v33, %v697_v15  ;;  %v463_v42 = vld [vmem:[#allocation2 + $0xa4] sm:$0x1]  ;;  %v791_v43 = vshll.u32 %v445_v36, 16  ;;  %378 = vst.msk [vmem:[#allocation2 + $0x4c] sm:$0xf] %vm308_vm0, %v329_v30 }
  0x44   : > { %v795_v44 = vshrl.u32 %v445_v36, 16  ;;  %v2275_v46 = vunpack.c.l.b16 %v698_v41  ;;  %v784_v47 = vrot.slane %v782_v37, 4  ;;  %v787_v48 = vrot.slane %v785_v38, 5  ;;  %379 = vst.msk [vmem:[#allocation2 + $0x50] sm:$0x1] %vm311_vm1, %v330_v31  ;;  %v5112_v34 = vld [vmem:[%s6759_s2 + $0x30] sm:$0xff] }
  0x45   : > { %v708_v45 = vsel %vm5555_vm4, %v703_v35, %v707_v26  ;;  %v340_v49 = vld [vmem:[%s5512_s11 + $0x6c] sm:$0xf]  ;;  %4658 = vmatmul.msk.bf16.gmra.mxu1 %vm2317_vm5, %v2294_v40  ;;  %v793_v51 = vrot.slane %v791_v43, 5  ;;  %v801_v53 = vshll.u32 %v463_v42, 16  ;;  %v341_v60 = vld [vmem:[%s5512_s11 + $0x70] sm:$0xf]  ;;  %3036 = vmatpush.bf16.msrb.mxu3 %v5112_v34 }
  0x46   : > { %v2276_v50 = vunpack.c.l.b16 %v708_v45  ;;  %v797_v52 = vrot.slane %v795_v44, 4  ;;  %v420_v54 = vld [vmem:[#allocation2 + $0xc] sm:$0xf]  ;;  %v788_v56 = vor.u32 %v787_v48, %v784_v47  ;;  %v5631_v57 = vld [vmem:[#allocation2 + $0x10] sm:$0xf]  ;;  %v5106_v41 = vld [vmem:[%s6759_s2] sm:$0xff] }
  0x47   : > { %v494_v58 = vshrl.u32 %v420_v54, 16  ;;  %v497_v59 = vshll.u32 %v420_v54, 16  ;;  %v803_v63 = vrot.slane %v801_v53, 5  ;;  %v5634_v0 = vld [vmem:[#allocation2 + $0x14] sm:$0x1]  ;;  %v503_v1 = vshll.u32 %v5631_v57, 16  ;;  %2586 = vmatpush.bf16.msrb.mxu1 %v5106_v41 }
  0x48   : > { %v2298_v61 = vpack.c.b16 %v2276_v50, %v2275_v46  ;;  %v798_v62 = vor.u32 %v797_v52, %v793_v51  ;;  %v342_v2 = vld [vmem:[%s5512_s11 + $0x74] sm:$0x1]  ;;  %v789_v3 = vrot.slane %v788_v56, 4  ;;  %v507_v6 = vshrl.u32 %v5631_v57, 16  ;;  %389 = vst.msk [vmem:[#allocation2 + $0x78] sm:$0xf] %vm308_vm0, %v340_v49 }
  0x49   : > { %v496_v4 = vrot.slane %v494_v58, 4  ;;  %v499_v5 = vrot.slane %v497_v59, 5  ;;  %v430_v7 = vld [vmem:[#allocation2 + $0x48] sm:$0xf]  ;;  %v505_v9 = vrot.slane %v503_v1, 5  ;;  %v513_v10 = vshll.u32 %v5634_v0, 16 }
  0x4a   : > { %4662 = vmatmul.msk.bf16.gmra.mxu2 %vm2317_vm5, %v2298_v61  ;;  %v799_v8 = vrot.slane %v798_v62, 4  ;;  %v614_v11 = vshrl.u32 %v430_v7, 16  ;;  %v794_v12 = vsel %vm5555_vm4, %v789_v3, %v793_v51  ;;  %v509_v14 = vrot.slane %v507_v6, 4  ;;  %v5644_v15 = vld [vmem:[#allocation2 + $0x4c] sm:$0xf]  ;;  %v5114_v45 = vld [vmem:[%s6759_s2 + $0x40] sm:$0xff] }
  0x4b   : > { %v500_v13 = vor.u32 %v499_v5, %v496_v4  ;;  %v617_v16 = vshll.u32 %v430_v7, 16  ;;  %390 = vst.msk [vmem:[#allocation2 + $0x7c] sm:$0xf] %vm308_vm0, %v341_v60  ;;  %v2283_v18 = vunpack.c.l.b16 %v794_v12  ;;  %v515_v19 = vrot.slane %v513_v10, 5  ;;  %v5649_v20 = vld [vmem:[#allocation2 + $0x50] sm:$0x1]  ;;  %3269 = vmatpush.bf16.msrb.mxu0 %v5114_v45 }
  0x4c   : > { %v804_v17 = vsel %vm5555_vm4, %v799_v8, %v803_v63  ;;  %v616_v21 = vrot.slane %v614_v11, 4  ;;  %391 = vst.msk [vmem:[#allocation2 + $0x80] sm:$0x1] %vm311_vm1, %v342_v2  ;;  %v510_v25 = vor.u32 %v509_v14, %v505_v9  ;;  %v352_v28 = vld [vmem:[%s5512_s11 + $0x9c] sm:$0xf]  ;;  %v623_v30 = vshll.u32 %v5644_v15, 16 }
  0x4d   : > { %v2284_v22 = vunpack.c.l.b16 %v804_v17  ;;  %v501_v23 = vrot.slane %v500_v13, 4  ;;  %v619_v26 = vrot.slane %v617_v16, 5  ;;  %v353_v29 = vld [vmem:[%s5512_s11 + $0xa0] sm:$0xf]  ;;  %v627_v31 = vshrl.u32 %v5644_v15, 16 }
  0x4e   : > { %v633_v32 = vshll.u32 %v5649_v20, 16  ;;  %v354_v33 = vld [vmem:[%s5512_s11 + $0xa4] sm:$0x1]  ;;  %v511_v37 = vrot.slane %v510_v25, 4  ;;  %401 = vst.msk [vmem:[#allocation2 + $0xa8] sm:$0xf] %vm308_vm0, %v352_v28 }
  0x4f   : > { %v2302_v35 = vpack.c.b16 %v2284_v22, %v2283_v18  ;;  %v506_v36 = vsel %vm5555_vm4, %v501_v23, %v505_v9  ;;  %v620_v38 = vor.u32 %v619_v26, %v616_v21  ;;  %v316_v40 = vld [vmem:[%s5512_s11 + $0xc] sm:$0xf]  ;;  %v625_v43 = vrot.slane %v623_v30, 5  ;;  %402 = vst.msk [vmem:[#allocation2 + $0xac] sm:$0xf] %vm308_vm0, %v353_v29 }
  0x50   : > { %v2259_v42 = vunpack.c.l.b16 %v506_v36  ;;  %v629_v44 = vrot.slane %v627_v31, 4  ;;  %v516_v46 = vsel %vm5555_vm4, %v511_v37, %v515_v19  ;;  %v635_v48 = vrot.slane %v633_v32, 5  ;;  %v438_v49 = vld [vmem:[#allocation2 + $0x78] sm:$0xf]  ;;  %403 = vst.msk [vmem:[#allocation2 + $0xb0] sm:$0x1] %vm311_vm1, %v354_v33 }
  0x51   : > { %4666 = vmatmul.msk.bf16.gmra.mxu3 %vm2317_vm5, %v2302_v35  ;;  %v621_v47 = vrot.slane %v620_v38, 4  ;;  %v2260_v50 = vunpack.c.l.b16 %v516_v46  ;;  %v710_v53 = vshrl.u32 %v438_v49, 16  ;;  %v713_v54 = vshll.u32 %v438_v49, 16  ;;  %v317_v55 = vld [vmem:[%s5512_s11 + $0x10] sm:$0xf] }
  0x52   : > { %v630_v51 = vor.u32 %v629_v44, %v625_v43  ;;  %v439_v52 = vld [vmem:[#allocation2 + $0x7c] sm:$0xf]  ;;  %v318_v61 = vld [vmem:[%s5512_s11 + $0x14] sm:$0x1]  ;;  %365 = vst.msk [vmem:[#allocation2 + $0x18] sm:$0xf] %vm308_vm0, %v316_v40 }
  0x53   : > { %v626_v56 = vsel %vm5555_vm4, %v621_v47, %v625_v43  ;;  %v460_v58 = vld [vmem:[#allocation2 + $0x80] sm:$0x1]  ;;  %v719_v59 = vshll.u32 %v439_v52, 16  ;;  %v723_v60 = vshrl.u32 %v439_v52, 16  ;;  %v2290_v62 = vpack.c.b16 %v2260_v50, %v2259_v42  ;;  %366 = vst.msk [vmem:[#allocation2 + $0x1c] sm:$0xf] %vm308_vm0, %v317_v55 }
  0x54   : > { %v631_v63 = vrot.slane %v630_v51, 4  ;;  %v2269_v1 = vunpack.c.l.b16 %v626_v56  ;;  %v712_v2 = vrot.slane %v710_v53, 4  ;;  %v715_v3 = vrot.slane %v713_v54, 5  ;;  %367 = vst.msk [vmem:[#allocation2 + $0x20] sm:$0x1] %vm311_vm1, %v318_v61 }
  0x55   : > { %v721_v4 = vrot.slane %v719_v59, 5  ;;  %v725_v5 = vrot.slane %v723_v60, 4  ;;  %v729_v6 = vshll.u32 %v460_v58, 16  ;;  %4654 = vmatmul.msk.bf16.gmra.mxu0 %vm2317_vm5, %v2290_v62  ;;  %v446_v8 = vld [vmem:[#allocation2 + $0xa8] sm:$0xf] }
  0x56   : > { %v636_v7 = vsel %vm5555_vm4, %v631_v63, %v635_v48  ;;  %v331_v9 = vld [vmem:[%s5512_s11 + $0x48] sm:$0xf]  ;;  %v716_v11 = vor.u32 %v715_v3, %v712_v2  ;;  %v447_v14 = vld [vmem:[#allocation2 + $0xac] sm:$0xf]  ;;  %v806_v18 = vshrl.u32 %v446_v8, 16  ;;  %v809_v19 = vshll.u32 %v446_v8, 16 }
  0x57   : > { %v2270_v10 = vunpack.c.l.b16 %v636_v7  ;;  %v726_v12 = vor.u32 %v725_v5, %v721_v4  ;;  %v731_v13 = vrot.slane %v729_v6, 5  ;;  %v332_v16 = vld [vmem:[%s5512_s11 + $0x4c] sm:$0xf]  ;;  %v464_v17 = vld [vmem:[#allocation2 + $0xb0] sm:$0x1]  ;;  %v815_v21 = vshll.u32 %v447_v14, 16 }
  0x58   : > { %v819_v22 = vshrl.u32 %v447_v14, 16  ;;  %v717_v25 = vrot.slane %v716_v11, 4  ;;  %v825_v28 = vshll.u32 %v464_v17, 16  ;;  %v333_v29 = vld [vmem:[%s5512_s11 + $0x50] sm:$0x1]  ;;  %v808_v30 = vrot.slane %v806_v18, 4 }
  0x59   : > { %v2295_v23 = vpack.c.b16 %v2270_v10, %v2269_v1  ;;  %v727_v26 = vrot.slane %v726_v12, 4  ;;  %v811_v31 = vrot.slane %v809_v19, 5  ;;  %v817_v32 = vrot.slane %v815_v21, 5  ;;  %380 = vst.msk [vmem:[#allocation2 + $0x54] sm:$0xf] %vm308_vm0, %v331_v9 }
  0x5a   : > { %v821_v33 = vrot.slane %v819_v22, 4  ;;  %v722_v34 = vsel %vm5555_vm4, %v717_v25, %v721_v4  ;;  %v827_v36 = vrot.slane %v825_v28, 5  ;;  %v422_v37 = vld [vmem:[#allocation2 + $0x18] sm:$0xf]  ;;  %381 = vst.msk [vmem:[#allocation2 + $0x58] sm:$0xf] %vm308_vm0, %v332_v16 }
  0x5b   : > { %4659 = vmatmul.msk.bf16.gmra.mxu1 %vm2317_vm5, %v2295_v23  ;;  %v732_v35 = vsel %vm5555_vm4, %v727_v26, %v731_v13  ;;  %v2277_v38 = vunpack.c.l.b16 %v722_v34  ;;  %v812_v41 = vor.u32 %v811_v31, %v808_v30  ;;  %v5696_v43 = vld [vmem:[#allocation2 + $0x1c] sm:$0xf]  ;;  %382 = vst.msk [vmem:[#allocation2 + $0x5c] sm:$0x1] %vm311_vm1, %v333_v29  ;;  %v343_v44 = vld [vmem:[%s5512_s11 + $0x78] sm:$0xf] }
  0x5c   : > { %v2278_v40 = vunpack.c.l.b16 %v732_v35  ;;  %v822_v42 = vor.u32 %v821_v33, %v817_v32  ;;  %v5700_v45 = vld [vmem:[#allocation2 + $0x20] sm:$0x1]  ;;  %v518_v46 = vshrl.u32 %v422_v37, 16  ;;  %v521_v47 = vshll.u32 %v422_v37, 16  ;;  %v344_v54 = vld [vmem:[%s5512_s11 + $0x7c] sm:$0xf] }
  0x5d   : > { %v527_v48 = vshll.u32 %v5696_v43, 16  ;;  %v531_v49 = vshrl.u32 %v5696_v43, 16  ;;  %v813_v51 = vrot.slane %v812_v41, 4  ;;  %v537_v53 = vshll.u32 %v5700_v45, 16  ;;  %v345_v60 = vld [vmem:[%s5512_s11 + $0x80] sm:$0x1] }
  0x5e   : > { %v2299_v50 = vpack.c.b16 %v2278_v40, %v2277_v38  ;;  %v823_v52 = vrot.slane %v822_v42, 4  ;;  %v520_v55 = vrot.slane %v518_v46, 4  ;;  %v523_v56 = vrot.slane %v521_v47, 5  ;;  %392 = vst.msk [vmem:[#allocation2 + $0x84] sm:$0xf] %vm308_vm0, %v343_v44 }
  0x5f   : > { %v529_v58 = vrot.slane %v527_v48, 5  ;;  %v533_v59 = vrot.slane %v531_v49, 4  ;;  %v818_v61 = vsel %vm5555_vm4, %v813_v51, %v817_v32  ;;  %v539_v63 = vrot.slane %v537_v53, 5  ;;  %v355_v1 = vld [vmem:[%s5512_s11 + $0xa8] sm:$0xf] }
  0x60   : > { %4663 = vmatmul.msk.bf16.gmra.mxu2 %vm2317_vm5, %v2299_v50  ;;  %v828_v62 = vsel %vm5555_vm4, %v823_v52, %v827_v36  ;;  %v2285_v2 = vunpack.c.l.b16 %v818_v61  ;;  %v524_v4 = vor.u32 %v523_v56, %v520_v55  ;;  %v432_v6 = vld [vmem:[#allocation2 + $0x54] sm:$0xf]  ;;  %393 = vst.msk [vmem:[#allocation2 + $0x88] sm:$0xf] %vm308_vm0, %v344_v54  ;;  %v356_v7 = vld [vmem:[%s5512_s11 + $0xac] sm:$0xf] }
  0x61   : > { %v2286_v3 = vunpack.c.l.b16 %v828_v62  ;;  %v534_v5 = vor.u32 %v533_v59, %v529_v58  ;;  %v5716_v8 = vld [vmem:[#allocation2 + $0x58] sm:$0xf]  ;;  %v638_v9 = vshrl.u32 %v432_v6, 16  ;;  %v641_v10 = vshll.u32 %v432_v6, 16  ;;  %394 = vst.msk [vmem:[#allocation2 + $0x8c] sm:$0x1] %vm311_vm1, %v345_v60 }
  0x62   : > { %v525_v12 = vrot.slane %v524_v4, 4  ;;  %v5719_v14 = vld [vmem:[#allocation2 + $0x5c] sm:$0x1]  ;;  %v647_v16 = vshll.u32 %v5716_v8, 16  ;;  %v651_v19 = vshrl.u32 %v5716_v8, 16  ;;  %v922_v62 = vrot.slane %v5581_v24, 5 }
  0x63   : > { %v2303_v11 = vpack.c.b16 %v2286_v3, %v2285_v2  ;;  %v535_v13 = vrot.slane %v534_v5, 4  ;;  %v640_v17 = vrot.slane %v638_v9, 4  ;;  %v643_v18 = vrot.slane %v641_v10, 5  ;;  %v357_v22 = vld [vmem:[%s5512_s11 + $0xb0] sm:$0x1] }
  0x64   : > { %v657_v21 = vshll.u32 %v5719_v14, 16  ;;  %v530_v23 = vsel %vm5555_vm4, %v525_v12, %v529_v58  ;;  %v649_v26 = vrot.slane %v647_v16, 5  ;;  %404 = vst.msk [vmem:[#allocation2 + $0xb4] sm:$0xf] %vm308_vm0, %v355_v1  ;;  %v319_v28 = vld [vmem:[%s5512_s11 + $0x18] sm:$0xf] }
  0x65   : > { %4667 = vmatmul.msk.bf16.gmra.mxu3 %vm2317_vm5, %v2303_v11  ;;  %v540_v25 = vsel %vm5555_vm4, %v535_v13, %v539_v63  ;;  %v2261_v29 = vunpack.c.l.b16 %v530_v23  ;;  %v644_v31 = vor.u32 %v643_v18, %v640_v17  ;;  %v653_v32 = vrot.slane %v651_v19, 4  ;;  %405 = vst.msk [vmem:[#allocation2 + $0xb8] sm:$0xf] %vm308_vm0, %v356_v7  ;;  %v320_v33 = vld [vmem:[%s5512_s11 + $0x1c] sm:$0xf]  ;;  %v5119_v58 = vld [vmem:[%s6759_s2 + $0x68] sm:$0xff] }
  0x66   : > { %v2262_v30 = vunpack.c.l.b16 %v540_v25  ;;  %v659_v34 = vrot.slane %v657_v21, 5  ;;  %v440_v35 = vld [vmem:[#allocation2 + $0x84] sm:$0xf]  ;;  %406 = vst.msk [vmem:[#allocation2 + $0xbc] sm:$0x1] %vm311_vm1, %v357_v22  ;;  %3750 = vmatpush.bf16.msra.mxu2 %v5119_v58  ;;  %v925_v23 = vrot.slane %v5586_v27, 5 }
  0x67   : > { %v645_v37 = vrot.slane %v644_v31, 4  ;;  %v654_v38 = vor.u32 %v653_v32, %v649_v26  ;;  %v441_v40 = vld [vmem:[#allocation2 + $0x88] sm:$0xf]  ;;  %v734_v41 = vshrl.u32 %v440_v35, 16  ;;  %v321_v42 = vld [vmem:[%s5512_s11 + $0x20] sm:$0x1] }
  0x68   : > { %v2291_v36 = vpack.c.b16 %v2262_v30, %v2261_v29  ;;  %v461_v44 = vld [vmem:[#allocation2 + $0x8c] sm:$0x1]  ;;  %v737_v46 = vshll.u32 %v440_v35, 16  ;;  %v743_v47 = vshll.u32 %v441_v40, 16  ;;  %v747_v48 = vshrl.u32 %v441_v40, 16  ;;  %v5121_v30 = vld [vmem:[%s6759_s2 + $0x78] sm:$0xff] }
  0x69   : > { %v650_v49 = vsel %vm5555_vm4, %v645_v37, %v649_v26  ;;  %v655_v50 = vrot.slane %v654_v38, 4  ;;  %v736_v51 = vrot.slane %v734_v41, 4  ;;  %v753_v52 = vshll.u32 %v461_v44, 16  ;;  %368 = vst.msk [vmem:[#allocation2 + $0x24] sm:$0xf] %vm308_vm0, %v319_v28  ;;  %v5117_v35 = vld [vmem:[%s6759_s2 + $0x58] sm:$0xff]  ;;  %3983 = vmatpush.bf16.msra.mxu3 %v5121_v30 }
  0x6a   : > { %4655 = vmatmul.msk.bf16.gmra.mxu0 %vm2317_vm5, %v2291_v36  ;;  %v2271_v53 = vunpack.c.l.b16 %v650_v49  ;;  %v739_v54 = vrot.slane %v737_v46, 5  ;;  %v745_v55 = vrot.slane %v743_v47, 5  ;;  %v749_v56 = vrot.slane %v747_v48, 4  ;;  %369 = vst.msk [vmem:[#allocation2 + $0x28] sm:$0xf] %vm308_vm0, %v320_v33  ;;  %v5123_v36 = vld [vmem:[%s6759_s2 + $0x88] sm:$0xff]  ;;  %3501 = vmatpush.bf16.msra.mxu1 %v5117_v35 }
  0x6b   : > { %v660_v59 = vsel %vm5555_vm4, %v655_v50, %v659_v34  ;;  %v755_v60 = vrot.slane %v753_v52, 5  ;;  %v448_v61 = vld [vmem:[#allocation2 + $0xb4] sm:$0xf]  ;;  %370 = vst.msk [vmem:[#allocation2 + $0x2c] sm:$0x1] %vm311_vm1, %v321_v42  ;;  %4216 = vmatpush.bf16.msra.mxu0 %v5123_v36  ;;  %v924_v58 = vrot.slane %v922_v62, 4 }
  0x6c   : > { %v2272_v63 = vunpack.c.l.b16 %v660_v59  ;;  %v740_v1 = vor.u32 %v739_v54, %v736_v51  ;;  %v750_v2 = vor.u32 %v749_v56, %v745_v55  ;;  %v449_v3 = vld [vmem:[#allocation2 + $0xb8] sm:$0xf]  ;;  %v830_v4 = vshrl.u32 %v448_v61, 16  ;;  %v853_v5 = vld [vmem:[#allocation2] sm:$0xe] }
  0x6d   : > { %v465_v6 = vld [vmem:[#allocation2 + $0xbc] sm:$0x1]  ;;  %v833_v7 = vshll.u32 %v448_v61, 16  ;;  %v839_v9 = vshll.u32 %v449_v3, 16  ;;  %v843_v10 = vshrl.u32 %v449_v3, 16  ;;  %v4597_v12 = vrot.slane %v853_v5, 9 }
  0x6e   : > { %v2296_v13 = vpack.c.b16 %v2272_v63, %v2271_v53  ;;  %v741_v24 = vrot.slane %v740_v1, 4  ;;  %v751_v16 = vrot.slane %v750_v2, 4  ;;  %v832_v17 = vrot.slane %v830_v4, 4  ;;  %v1032_v53 = vld [vmem:[#allocation2 + $0xc] sm:$0xf] }
  0x6f   : > { %v835_v18 = vrot.slane %v833_v7, 5  ;;  %v841_v19 = vrot.slane %v839_v9, 5  ;;  %v845_v21 = vrot.slane %v843_v10, 4  ;;  %v849_v22 = vshll.u32 %v465_v6, 16  ;;  %v1033_v1 = vld [vmem:[#allocation2 + $0x10] sm:$0xf] }
  0x70   : > { %4660 = vmatmul.msk.bf16.gmra.mxu1 %vm2317_vm5, %v2296_v13  ;;  %v746_v25 = vsel %vm5555_vm4, %v741_v24, %v745_v55  ;;  %v756_v26 = vsel %vm5555_vm4, %v751_v16, %v755_v60  ;;  %v424_v28 = vld [vmem:[#allocation2 + $0x24] sm:$0xf]  ;;  %v923_v29 = vsel %vm5750_vm8, %v4597_v12, %v922_v62  ;;  %v926_v3 = vsel %vm5750_vm8, %v924_v58, %v925_v23 }
  0x71   : > { %v2279_v31 = vunpack.c.l.b16 %v746_v25  ;;  %v2280_v32 = vunpack.c.l.b16 %v756_v26  ;;  %v836_v33 = vor.u32 %v835_v18, %v832_v17  ;;  %v846_v27 = vor.u32 %v845_v21, %v841_v19  ;;  %v5765_v34 = vld [vmem:[#allocation2 + $0x28] sm:$0xf]  ;;  %v1064_v18 = vld [vmem:[#allocation2 + $0x14] sm:$0x1]  ;;  %v854_v21 = vld [vmem:[#allocation2 + $0xc] sm:$0xe] }
  0x72   : > { %v851_v37 = vrot.slane %v849_v22, 5  ;;  %v5773_v38 = vld [vmem:[#allocation2 + $0x2c] sm:$0x1]  ;;  %v542_v40 = vshrl.u32 %v424_v28, 16  ;;  %v545_v41 = vshll.u32 %v424_v28, 16  ;;  %v551_v42 = vshll.u32 %v5765_v34, 16 }
  0x73   : > { %v2300_v44 = vpack.c.b16 %v2280_v32, %v2279_v31  ;;  %v837_v46 = vrot.slane %v836_v33, 4  ;;  %v847_v47 = vrot.slane %v846_v27, 4  ;;  %v555_v48 = vshrl.u32 %v5765_v34, 16 }
  0x74   : > { %v544_v49 = vrot.slane %v542_v40, 4  ;;  %v547_v50 = vrot.slane %v545_v41, 5  ;;  %v553_v51 = vrot.slane %v551_v42, 5  ;;  %v561_v52 = vshll.u32 %v5773_v38, 16 }
  0x75   : > { %4664 = vmatmul.msk.bf16.gmra.mxu2 %vm2317_vm5, %v2300_v44  ;;  %v842_v54 = vsel %vm5555_vm4, %v837_v46, %v841_v19  ;;  %v852_v55 = vsel %vm5555_vm4, %v847_v47, %v851_v37  ;;  %v557_v56 = vrot.slane %v555_v48, 4  ;;  %v2672_v4 = vunpack.c.l.b16 %v923_v29  ;;  %v5058_v29 = vld [vmem:[#allocation2] sm:$0xff]  ;;  %v1034_v48 = vld [vmem:[#allocation2 + $0x18] sm:$0xf] }
  0x76   : > { %v2287_v59 = vunpack.c.l.b16 %v842_v54  ;;  %v2288_v60 = vunpack.c.l.b16 %v852_v55  ;;  %v548_v61 = vor.u32 %v547_v50, %v544_v49  ;;  %v563_v63 = vrot.slane %v561_v52, 5  ;;  %v1035_v49 = vld [vmem:[#allocation2 + $0x1c] sm:$0xf] }
  0x77   : > { %v558_v2 = vor.u32 %v557_v56, %v553_v51  ;;  %v1081_v5 = vshrl.u32 %v1032_v53, 16  ;;  %v2673_v9 = vunpack.c.l.b16 %v926_v3  ;;  %v1084_v10 = vshll.u32 %v1032_v53, 16  ;;  %v5074_v56 = vld [vmem:[#allocation2 + $0xc] sm:$0xff] }
  0x78   : > { %v2304_v6 = vpack.c.b16 %v2288_v60, %v2287_v59  ;;  %v549_v7 = vrot.slane %v548_v61, 4  ;;  %v1090_v24 = vshll.u32 %v1033_v1, 16  ;;  %v1094_v16 = vshrl.u32 %v1033_v1, 16 }
  0x79   : > { %v559_v12 = vrot.slane %v558_v2, 4  ;;  %v1083_v13 = vrot.slane %v1081_v5, 4  ;;  %v2704_v17 = vpack.c.b16 %v2673_v9, %v2672_v4  ;;  %v1086_v19 = vrot.slane %v1084_v10, 5  ;;  %v1065_v2 = vld [vmem:[#allocation2 + $0x20] sm:$0x1]  ;;  %v5059_v4 = vld [vmem:[#allocation2 + $0xc] sm:$0xff] }
  0x7a   : > { %4668 = vmatmul.msk.bf16.gmra.mxu3 %vm2317_vm5, %v2304_v6  ;;  %v554_v62 = vsel %vm5555_vm4, %v549_v7, %v553_v51  ;;  %v1092_v25 = vrot.slane %v1090_v24, 5  ;;  %v1096_v26 = vrot.slane %v1094_v16, 4  ;;  %v1100_v32 = vshll.u32 %v1064_v18, 16  ;;  %v855_v9 = vld [vmem:[#allocation2 + $0x18] sm:$0xe] }
  0x7b   : > { %v564_v22 = vsel %vm5555_vm4, %v559_v12, %v563_v63  ;;  %v2263_v23 = vunpack.c.l.b16 %v554_v62  ;;  %v1087_v30 = vor.u32 %v1086_v19, %v1083_v13  ;;  %v4598_v33 = vrot.slane %v854_v21, 9  ;;  %v1036_v24 = vld [vmem:[#allocation2 + $0x24] sm:$0xf]  ;;  %v1037_v62 = vld [vmem:[#allocation2 + $0x28] sm:$0xf] }
  0x7c   : > { %v2264_v28 = vunpack.c.l.b16 %v564_v22  ;;  %v1097_v31 = vor.u32 %v1096_v26, %v1092_v25  ;;  %v929_v27 = vrot.slane %v5631_v57, 5  ;;  %v932_v36 = vrot.slane %v5634_v0, 5  ;;  %v5075_v26 = vld [vmem:[#allocation2 + $0x18] sm:$0xff] }
  0x7d   : > { %v1088_v41 = vrot.slane %v1087_v30, 4  ;;  %v1102_v46 = vrot.slane %v1100_v32, 5  ;;  %v1105_v51 = vshrl.u32 %v1034_v48, 16  ;;  %v1108_v53 = vshll.u32 %v1034_v48, 16  ;;  %v1038_v48 = vld [vmem:[#allocation2 + $0x30] sm:$0xf] }
  0x7e   : > { %v2292_v35 = vpack.c.b16 %v2264_v28, %v2263_v23  ;;  %v930_v37 = vsel %vm5750_vm8, %v4598_v33, %v929_v27  ;;  %v931_v40 = vrot.slane %v929_v27, 4  ;;  %v1098_v44 = vrot.slane %v1097_v31, 4 }
  0x7f   : > { %v2674_v42 = vunpack.c.l.b16 %v930_v37  ;;  %v1093_v0 = vsel %vm5555_vm4, %v1088_v41, %v1092_v25  ;;  %v1114_v54 = vshll.u32 %v1035_v49, 16  ;;  %v1118_v55 = vshrl.u32 %v1035_v49, 16  ;;  %v1066_v37 = vld [vmem:[#allocation2 + $0x2c] sm:$0x1]  ;;  %v5060_v41 = vld [vmem:[#allocation2 + $0x18] sm:$0xff] }
  0x80   : > { %4656 = vmatmul.msk.bf16.gmra.mxu0 %vm2317_vm5, %v2292_v35  ;;  %4741 = vmatmul.msk.bf16.vlgmr.msrb.gmra.mxu1 %vm2317_vm5, %v5058_v29  ;;  %v933_v47 = vsel %vm5750_vm8, %v931_v40, %v932_v36  ;;  %v1103_v52 = vsel %vm5555_vm4, %v1098_v44, %v1102_v46  ;;  %v3154_v58 = vunpack.c.l.b16 %v1093_v0  ;;  %v1107_v60 = vrot.slane %v1105_v51, 4 }
  0x81   : > { %v2675_v57 = vunpack.c.l.b16 %v933_v47  ;;  %v3155_v59 = vunpack.c.l.b16 %v1103_v52  ;;  %v1110_v61 = vrot.slane %v1108_v53, 5  ;;  %v1116_v63 = vrot.slane %v1114_v54, 5  ;;  %v856_v53 = vld [vmem:[#allocation2 + $0x24] sm:$0xe] }
  0x82   : > { %v1120_v1 = vrot.slane %v1118_v55, 4  ;;  %v1124_v7 = vshll.u32 %v1065_v2, 16  ;;  %v936_v16 = vrot.slane %v5696_v43, 5  ;;  %v1129_v18 = vshrl.u32 %v1036_v24, 16 }
  0x83   : > { %v2705_v50 = vpack.c.b16 %v2675_v57, %v2674_v42  ;;  %v3186_v3 = vpack.c.b16 %v3155_v59, %v3154_v58  ;;  %v1111_v5 = vor.u32 %v1110_v61, %v1107_v60  ;;  %v1132_v19 = vshll.u32 %v1036_v24, 16  ;;  %v1039_v57 = vld [vmem:[#allocation2 + $0x34] sm:$0xf]  ;;  %v5076_v61 = vld [vmem:[#allocation2 + $0x24] sm:$0xff] }
  0x84   : > { %v1121_v6 = vor.u32 %v1120_v1, %v1116_v63  ;;  %v1126_v13 = vrot.slane %v1124_v7, 5  ;;  %v1138_v23 = vshll.u32 %v1037_v62, 16  ;;  %v1142_v25 = vshrl.u32 %v1037_v62, 16 }
  0x85   : > { %4765 = vmatmul.msk.bf16.vlgmr.msrb.gmra.mxu2 %vm2317_vm5, %v2704_v17  ;;  %v1112_v10 = vrot.slane %v1111_v5, 4  ;;  %v4599_v17 = vrot.slane %v855_v9, 9  ;;  %v938_v28 = vrot.slane %v936_v16, 4  ;;  %v939_v29 = vrot.slane %v5700_v45, 5  ;;  %v1067_v9 = vld [vmem:[#allocation2 + $0x38] sm:$0x1] }
  0x86   : > { %v1122_v12 = vrot.slane %v1121_v6, 4  ;;  %v1131_v32 = vrot.slane %v1129_v18, 4  ;;  %v1134_v33 = vrot.slane %v1132_v19, 5  ;;  %v1140_v27 = vrot.slane %v1138_v23, 5 }
  0x87   : > { %v1117_v21 = vsel %vm5555_vm4, %v1112_v10, %v1116_v63  ;;  %v937_v31 = vsel %vm5750_vm8, %v4599_v17, %v936_v16  ;;  %v1144_v35 = vrot.slane %v1142_v25, 4  ;;  %v940_v36 = vsel %vm5750_vm8, %v938_v28, %v939_v29  ;;  %v1041_v28 = vld [vmem:[#allocation2 + $0x40] sm:$0xf]  ;;  %v5286_v29 = vld [vmem:[#allocation2 + $0x34] sm:$0xf] }
  0x88   : > { %v1127_v22 = vsel %vm5555_vm4, %v1122_v12, %v1126_v13  ;;  %v3156_v30 = vunpack.c.l.b16 %v1117_v21  ;;  %v2676_v42 = vunpack.c.l.b16 %v937_v31  ;;  %v2677_v44 = vunpack.c.l.b16 %v940_v36 }
  0x89   : > { %v3157_v43 = vunpack.c.l.b16 %v1127_v22  ;;  %v1135_v45 = vor.u32 %v1134_v33, %v1131_v32  ;;  %v1145_v46 = vor.u32 %v1144_v35, %v1140_v27  ;;  %v1148_v47 = vshll.u32 %v1066_v37, 16  ;;  %v857_v32 = vld [vmem:[#allocation2 + $0x30] sm:$0xe] }
  0x8a   : > { %4853 = vmatmul.msk.bf16.vlgmr.msrb.gmra.mxu3 %vm2317_vm5, %v5074_v56  ;;  %v2706_v49 = vpack.c.b16 %v2677_v44, %v2676_v42  ;;  %v943_v52 = vrot.slane %v5765_v34, 5  ;;  %v1153_v54 = vshrl.u32 %v1038_v48, 16  ;;  %v1156_v55 = vshll.u32 %v1038_v48, 16  ;;  %v5077_v37 = vld [vmem:[#allocation2 + $0x30] sm:$0xff]  ;;  %v5287_v42 = vld [vmem:[#allocation2 + $0x38] sm:$0x1] }
  0x8b   : > { %v3187_v40 = vpack.c.b16 %v3157_v43, %v3156_v30  ;;  %v1136_v0 = vrot.slane %v1135_v45, 4  ;;  %v1150_v51 = vrot.slane %v1148_v47, 5  ;;  %v1162_v56 = vshll.u32 %v1039_v57, 16 }
  0x8c   : > { %v1166_v58 = vshrl.u32 %v1039_v57, 16  ;;  %v4600_v63 = vrot.slane %v856_v53, 9  ;;  %v945_v1 = vrot.slane %v943_v52, 4  ;;  %v946_v2 = vrot.slane %v5773_v38, 5  ;;  %v5061_v38 = vld [vmem:[#allocation2 + $0x24] sm:$0xff] }
  0x8d   : > { %v1141_v59 = vsel %vm5555_vm4, %v1136_v0, %v1140_v27  ;;  %v1158_v34 = vrot.slane %v1156_v55, 5  ;;  %v1172_v16 = vshll.u32 %v1067_v9, 16  ;;  %v950_v30 = vrot.slane %v5286_v29, 5  ;;  %v1068_v0 = vld [vmem:[#allocation2 + $0x44] sm:$0x1] }
  0x8e   : > { %v1168_v5 = vrot.slane %v1166_v58, 4  ;;  %v3158_v6 = vunpack.c.l.b16 %v1141_v59  ;;  %v944_v10 = vsel %vm5750_vm8, %v4600_v63, %v943_v52  ;;  %v947_v12 = vsel %vm5750_vm8, %v945_v1, %v946_v2  ;;  %v1042_v9 = vld [vmem:[#allocation2 + $0x48] sm:$0xf] }
  0x8f   : > { %v2678_v17 = vunpack.c.l.b16 %v944_v10  ;;  %v2679_v18 = vunpack.c.l.b16 %v947_v12  ;;  %v1174_v22 = vrot.slane %v1172_v16, 5  ;;  %v1186_v35 = vshll.u32 %v1041_v28, 16  ;;  %v1043_v10 = vld [vmem:[#allocation2 + $0x4c] sm:$0xf] }
  0x90   : > { %4877 = vmatmul.msk.bf16.vlgmr.msrb.gmra.mxu0 %vm2317_vm5, %v3186_v3  ;;  %4742 = vmatmul.msk.bf16.gmra.mxu1 %vm2317_vm5, %v5059_v4  ;;  %v1155_v3 = vrot.slane %v1153_v54, 4  ;;  %v1164_v4 = vrot.slane %v1162_v56, 5  ;;  %v1190_v36 = vshrl.u32 %v1041_v28, 16  ;;  %v953_v44 = vrot.slane %v5287_v42, 5  ;;  %v5062_v54 = vld [vmem:[#allocation2 + $0x30] sm:$0xff] }
  0x91   : > { %v2707_v23 = vpack.c.b16 %v2679_v18, %v2678_v17  ;;  %v1188_v57 = vrot.slane %v1186_v35, 5  ;;  %v1196_v58 = vshll.u32 %v1068_v0, 16  ;;  %v1210_v17 = vshll.u32 %v1043_v10, 16  ;;  %v1069_v35 = vld [vmem:[#allocation2 + $0x50] sm:$0x1] }
  0x92   : > { %v1159_v13 = vor.u32 %v1158_v34, %v1155_v3  ;;  %v1169_v24 = vor.u32 %v1168_v5, %v1164_v4  ;;  %v858_v5 = vld [vmem:[#allocation2 + $0x3c] sm:$0xe]  ;;  %v1214_v18 = vshrl.u32 %v1043_v10, 16 }
  0x93   : > { %v1198_v2 = vrot.slane %v1196_v58, 5 }
  0x94   : > { %v1160_v19 = vrot.slane %v1159_v13, 4  ;;  %v1170_v21 = vrot.slane %v1169_v24, 4  ;;  %v4602_v24 = vrot.slane %v858_v5, 9 }
  0x95   : > { %4766 = vmatmul.msk.bf16.gmra.mxu2 %vm2317_vm5, %v2705_v50  ;;  %v1146_v50 = vrot.slane %v1145_v46, 4 }
  0x96   : > { %v1165_v43 = vsel %vm5555_vm4, %v1160_v19, %v1164_v4  ;;  %v1175_v31 = vsel %vm5555_vm4, %v1170_v21, %v1174_v22  ;;  %v5078_v19 = vld [vmem:[#allocation2 + $0x3c] sm:$0xff] }
  0x97   : > { %v1151_v60 = vsel %vm5555_vm4, %v1146_v50, %v1150_v51  ;;  %v3160_v45 = vunpack.c.l.b16 %v1165_v43  ;;  %v3161_v46 = vunpack.c.l.b16 %v1175_v31 }
  0x98   : > { %v3159_v7 = vunpack.c.l.b16 %v1151_v60 }
  0x99   : > { %v3189_v53 = vpack.c.b16 %v3161_v46, %v3160_v45 }
  0x9a   : > { %4854 = vmatmul.msk.bf16.gmra.mxu3 %vm2317_vm5, %v5075_v26  ;;  %v3188_v62 = vpack.c.b16 %v3159_v7, %v3158_v6  ;;  %v1040_v26 = vld [vmem:[#allocation2 + $0x3c] sm:$0xf]  ;;  %v5288_v6 = vld [vmem:[#allocation2 + $0x40] sm:$0xf] }
  0x9b   : > { %v1177_v33 = vshrl.u32 %v1040_v26, 16  ;;  %v1180_v27 = vshll.u32 %v1040_v26, 16  ;;  %v957_v7 = vrot.slane %v5288_v6, 5  ;;  %v5079_v6 = vld [vmem:[#allocation2 + $0x48] sm:$0xff] }
  0x9d   : > { %v1179_v47 = vrot.slane %v1177_v33, 4  ;;  %v1182_v48 = vrot.slane %v1180_v27, 5  ;;  %v959_v22 = vrot.slane %v957_v7, 4  ;;  %v1216_v33 = vrot.slane %v1214_v18, 4 }
  0x9f   : > { %v1183_v55 = vor.u32 %v1182_v48, %v1179_v47  ;;  %v1220_v47 = vshll.u32 %v1069_v35, 16 }
  0xa0   : > { %4878 = vmatmul.msk.bf16.gmra.mxu0 %vm2317_vm5, %v3187_v40  ;;  %4743 = vmatmul.msk.bf16.gmra.mxu1 %vm2317_vm5, %v5060_v41  ;;  %v4601_v40 = vrot.slane %v857_v32, 9  ;;  %v952_v41 = vrot.slane %v950_v30, 4  ;;  %v1212_v32 = vrot.slane %v1210_v17, 5 }
  0xa1   : > { %v1184_v63 = vrot.slane %v1183_v55, 4  ;;  %v1045_v55 = vld [vmem:[#allocation2 + $0x58] sm:$0xf] }
  0xa2   : > { %v951_v50 = vsel %vm5750_vm8, %v4601_v40, %v950_v30  ;;  %v954_v51 = vsel %vm5750_vm8, %v952_v41, %v953_v44  ;;  %v958_v30 = vsel %vm5750_vm8, %v4602_v24, %v957_v7  ;;  %v5063_v41 = vld [vmem:[#allocation2 + $0x3c] sm:$0xff]  ;;  %v1217_v46 = vor.u32 %v1216_v33, %v1212_v32 }
  0xa3   : > { %v2680_v60 = vunpack.c.l.b16 %v951_v50  ;;  %v1189_v12 = vsel %vm5555_vm4, %v1184_v63, %v1188_v57  ;;  %v2682_v42 = vunpack.c.l.b16 %v958_v30  ;;  %v1238_v5 = vshrl.u32 %v1045_v55, 16 }
  0xa4   : > { %v3162_v28 = vunpack.c.l.b16 %v1189_v12  ;;  %v1218_v50 = vrot.slane %v1217_v46, 4 }
  0xa5   : > { %4767 = vmatmul.msk.bf16.gmra.mxu2 %vm2317_vm5, %v2706_v49  ;;  %v1192_v49 = vrot.slane %v1190_v36, 4  ;;  %v1240_v17 = vrot.slane %v1238_v5, 4 }
  0xa7   : > { %v1193_v56 = vor.u32 %v1192_v49, %v1188_v57 }
  0xa9   : > { %v1194_v1 = vrot.slane %v1193_v56, 4  ;;  %v859_v56 = vld [vmem:[#allocation2 + $0x48] sm:$0xe] }
  0xaa   : > { %4855 = vmatmul.msk.bf16.gmra.mxu3 %vm2317_vm5, %v5076_v61  ;;  %v2681_v61 = vunpack.c.l.b16 %v954_v51  ;;  %v1222_v51 = vrot.slane %v1220_v47, 5  ;;  %v860_v47 = vld [vmem:[#allocation2 + $0x54] sm:$0xe] }
  0xab   : > { %v1199_v13 = vsel %vm5555_vm4, %v1194_v1, %v1198_v2 }
  0xac   : > { %v2708_v34 = vpack.c.b16 %v2681_v61, %v2680_v60  ;;  %v3163_v29 = vunpack.c.l.b16 %v1199_v13  ;;  %v1223_v1 = vsel %vm5555_vm4, %v1218_v50, %v1222_v51 }
  0xad   : > { %v3165_v12 = vunpack.c.l.b16 %v1223_v1 }
  0xae   : > { %v3190_v40 = vpack.c.b16 %v3163_v29, %v3162_v28 }
  0xaf   : > { %v5834_v25 = vpop.f32.mrf.mxu1 }
  0xb0   : > { %4879 = vmatmul.msk.bf16.gmra.mxu0 %vm2317_vm5, %v3188_v62  ;;  %4744 = vmatmul.msk.bf16.gmra.mxu1 %vm2317_vm5, %v5061_v38  ;;  %v1201_v62 = vshrl.u32 %v1042_v9, 16  ;;  %v1204_v38 = vshll.u32 %v1042_v9, 16  ;;  %v967_v9 = vrot.slane %v5649_v20, 5 }
  0xb2   : > { %v1203_v43 = vrot.slane %v1201_v62, 4  ;;  %v1206_v31 = vrot.slane %v1204_v38, 5 }
  0xb4   : > { %v1207_v45 = vor.u32 %v1206_v31, %v1203_v43 }
  0xb5   : > { %4768 = vmatmul.msk.bf16.gmra.mxu2 %vm2317_vm5, %v2707_v23  ;;  %v5289_v23 = vld [vmem:[#allocation2 + $0x44] sm:$0x1] }
  0xb6   : > { %v960_v26 = vrot.slane %v5289_v23, 5  ;;  %v1208_v0 = vrot.slane %v1207_v45, 4  ;;  %v1070_v23 = vld [vmem:[#allocation2 + $0x5c] sm:$0x1]  ;;  %v1047_v45 = vld [vmem:[#allocation2 + $0x64] sm:$0xf] }
  0xb7   : > { %v5846_v52 = vpop.f32.mrf.mxu1  ;;  %v1244_v31 = vshll.u32 %v1070_v23, 16 }
  0xb8   : > { %v5848_v59 = vpop.f32.mrf.mxu2  ;;  %v961_v27 = vsel %vm5750_vm8, %v959_v22, %v960_v26  ;;  %v1213_v63 = vsel %vm5555_vm4, %v1208_v0, %v1212_v32  ;;  %v5064_v26 = vld [vmem:[#allocation2 + $0x48] sm:$0xff] }
  0xb9   : > { %v2683_v44 = vunpack.c.l.b16 %v961_v27  ;;  %v3164_v10 = vunpack.c.l.b16 %v1213_v63 }
  0xba   : > { %4856 = vmatmul.msk.bf16.gmra.mxu3 %vm2317_vm5, %v5077_v37 }
  0xbb   : > { %v2709_v49 = vpack.c.b16 %v2683_v44, %v2682_v42  ;;  %v3191_v20 = vpack.c.b16 %v3165_v12, %v3164_v10  ;;  %v1046_v42 = vld [vmem:[#allocation2 + $0x60] sm:$0xf]  ;;  %v971_v44 = vrot.slane %v5716_v8, 5  ;;  %v4604_v8 = vrot.slane %v860_v47, 9 }
  0xbc   : > { %v1249_v0 = vshrl.u32 %v1046_v42, 16  ;;  %v1252_v50 = vshll.u32 %v1046_v42, 16 }
  0xbd   : > { %v972_v10 = vsel %vm5750_vm8, %v4604_v8, %v971_v44 }
  0xbe   : > { %v5852_v3 = vpop.f32.mrf.mxu0  ;;  %v5854_v4 = vpop.f32.mrf.mxu3  ;;  %v1254_v5 = vrot.slane %v1252_v50, 5 }
  0xc0   : > { %4880 = vmatmul.msk.bf16.gmra.mxu0 %vm2317_vm5, %v3189_v53  ;;  %4745 = vmatmul.msk.bf16.gmra.mxu1 %vm2317_vm5, %v5062_v54  ;;  %v5863_v21 = vpop.f32.mrf.mxu2  ;;  %v1044_v53 = vld [vmem:[#allocation2 + $0x54] sm:$0xf]  ;;  %v964_v54 = vrot.slane %v5644_v15, 5  ;;  %v4603_v15 = vrot.slane %v859_v56, 9 }
  0xc1   : > { %v1225_v58 = vshrl.u32 %v1044_v53, 16  ;;  %v1228_v60 = vshll.u32 %v1044_v53, 16  ;;  %v5080_v56 = vld [vmem:[#allocation2 + $0x54] sm:$0xff] }
  0xc2   : > { %v5861_v16 = vpop.f32.mrf.mxu1  ;;  %v966_v7 = vrot.slane %v964_v54, 4 }
  0xc3   : > { %v1227_v13 = vrot.slane %v1225_v58, 4  ;;  %v1230_v24 = vrot.slane %v1228_v60, 5  ;;  %v973_v58 = vrot.slane %v971_v44, 4  ;;  %v974_v60 = vrot.slane %v5719_v14, 5  ;;  %v1049_v44 = vld [vmem:[#allocation2 + $0x70] sm:$0xf] }
  0xc4   : > { %v968_v22 = vsel %vm5750_vm8, %v966_v7, %v967_v9  ;;  %v1286_v8 = vshrl.u32 %v1049_v44, 16 }
  0xc5   : > { %4769 = vmatmul.msk.bf16.gmra.mxu2 %vm2317_vm5, %v2708_v34  ;;  %v1234_v34 = vshll.u32 %v1045_v55, 16  ;;  %v1231_v28 = vor.u32 %v1230_v24, %v1227_v13  ;;  %v2685_v30 = vunpack.c.l.b16 %v968_v22  ;;  %v1262_v55 = vshrl.u32 %v1047_v45, 16  ;;  %v1071_v13 = vld [vmem:[#allocation2 + $0x68] sm:$0x1]  ;;  %v5065_v24 = vld [vmem:[#allocation2 + $0x54] sm:$0xff] }
  0xc6   : > { %v5870_v36 = vpop.f32.mrf.mxu0  ;;  %v5872_v37 = vpop.f32.mrf.mxu3  ;;  %v975_v12 = vsel %vm5750_vm8, %v973_v58, %v974_v60  ;;  %v5122_v58 = vld [vmem:[%s6759_s2 + $0x80] sm:$0xff]  ;;  %v5291_v60 = vld [vmem:[#allocation2 + $0x68] sm:$0x1] }
  0xc7   : > { %v1236_v38 = vrot.slane %v1234_v34, 5  ;;  %v1232_v35 = vrot.slane %v1231_v28, 4  ;;  %v1251_v34 = vrot.slane %v1249_v0, 4  ;;  %v1264_v9 = vrot.slane %v1262_v55, 4  ;;  %v861_v0 = vld [vmem:[#allocation2 + $0x60] sm:$0xe]  ;;  %4217 = vmatpush.bf16.msra.mxu0 %v5122_v58 }
  0xc8   : > { %v2687_v22 = vunpack.c.l.b16 %v975_v12  ;;  %v862_v58 = vld [vmem:[#allocation2 + $0x6c] sm:$0xe] }
  0xc9   : > { %v1241_v43 = vor.u32 %v1240_v17, %v1236_v38  ;;  %v1237_v51 = vsel %vm5555_vm4, %v1232_v35, %v1236_v38  ;;  %v1255_v38 = vor.u32 %v1254_v5, %v1251_v34  ;;  %v4605_v34 = vrot.slane %v861_v0, 9 }
  0xca   : > { %4857 = vmatmul.msk.bf16.gmra.mxu3 %vm2317_vm5, %v5078_v19  ;;  %v5874_v48 = vpop.f32.mrf.mxu1  ;;  %v965_v19 = vsel %vm5750_vm8, %v4603_v15, %v964_v54  ;;  %v1258_v54 = vshll.u32 %v1047_v45, 16  ;;  %v3166_v63 = vunpack.c.l.b16 %v1237_v51 }
  0xcb   : > { %v2684_v29 = vunpack.c.l.b16 %v965_v19  ;;  %v2686_v19 = vunpack.c.l.b16 %v972_v10 }
  0xcc   : > { %v1260_v7 = vrot.slane %v1258_v54, 5 }
  0xcd   : > { %v5878_v57 = vpop.f32.mrf.mxu2  ;;  %v2710_v27 = vpack.c.b16 %v2685_v30, %v2684_v29  ;;  %v5120_v29 = vld [vmem:[%s6759_s2 + $0x70] sm:$0xff] }
  0xce   : > { %v1265_v23 = vor.u32 %v1264_v9, %v1260_v7  ;;  %v5116_v30 = vld [vmem:[%s6759_s2 + $0x50] sm:$0xff]  ;;  %3984 = vmatpush.bf16.msra.mxu3 %v5120_v29 }
  0xcf   : > { %3502 = vmatpush.bf16.msra.mxu1 %v5116_v30 }
  0xd0   : > { %4881 = vmatmul.msk.bf16.gmra.mxu0 %vm2317_vm5, %v3190_v40  ;;  %4746 = vmatmul.msk.bf16.gmra.mxu1 %vm2317_vm5, %v5063_v41  ;;  %v1242_v40 = vrot.slane %v1241_v43, 4  ;;  %v1246_v41 = vrot.slane %v1244_v31, 5  ;;  %v2711_v43 = vpack.c.b16 %v2687_v22, %v2686_v19  ;;  %v1256_v31 = vrot.slane %v1255_v38, 4  ;;  %v1072_v22 = vld [vmem:[#allocation2 + $0x74] sm:$0x1] }
  0xd2   : > { %v5881_v61 = vpop.f32.mrf.mxu0  ;;  %v1247_v53 = vsel %vm5555_vm4, %v1242_v40, %v1246_v41  ;;  %v1048_v40 = vld [vmem:[#allocation2 + $0x6c] sm:$0xf]  ;;  %v5290_v41 = vld [vmem:[#allocation2 + $0x64] sm:$0xf] }
  0xd3   : > { %v3167_v1 = vunpack.c.l.b16 %v1247_v53  ;;  %v978_v42 = vrot.slane %v5290_v41, 5  ;;  %v1273_v50 = vshrl.u32 %v1048_v40, 16  ;;  %v1276_v51 = vshll.u32 %v1048_v40, 16 }
  0xd4   : > { %v5888_v2 = vpop.f32.mrf.mxu3  ;;  %v1261_v53 = vsel %vm5555_vm4, %v1256_v31, %v1260_v7 }
  0xd5   : > { %4770 = vmatmul.msk.bf16.gmra.mxu2 %vm2317_vm5, %v2709_v49  ;;  %v5894_v18 = vpop.f32.mrf.mxu2  ;;  %v3192_v14 = vpack.c.b16 %v3167_v1, %v3166_v63  ;;  %v981_v63 = vrot.slane %v5291_v60, 5  ;;  %v5081_v1 = vld [vmem:[#allocation2 + $0x60] sm:$0xff]  ;;  %v980_v5 = vrot.slane %v978_v42, 4  ;;  %v3168_v9 = vunpack.c.l.b16 %v1261_v53  ;;  %v1050_v53 = vld [vmem:[#allocation2 + $0x78] sm:$0xf] }
  0xd6   : > { %v1275_v12 = vrot.slane %v1273_v50, 4  ;;  %v979_v38 = vsel %vm5750_vm8, %v4605_v34, %v978_v42  ;;  %v1297_v60 = vshrl.u32 %v1050_v53, 16 }
  0xd7   : > { %v982_v19 = vsel %vm5750_vm8, %v980_v5, %v981_v63  ;;  %v1300_v63 = vshll.u32 %v1050_v53, 16  ;;  %v5067_v53 = vld [vmem:[#allocation2 + $0x6c] sm:$0xff] }
  0xd8   : > { %v5891_v62 = vpop.f32.mrf.mxu1  ;;  %v2689_v31 = vunpack.c.l.b16 %v982_v19  ;;  %v4606_v19 = vrot.slane %v862_v58, 9 }
  0xda   : > { %4858 = vmatmul.msk.bf16.gmra.mxu3 %vm2317_vm5, %v5079_v6  ;;  %v5900_v32 = vpop.f32.mrf.mxu0 }
  0xdc   : > { %v5902_v33 = vpop.f32.mrf.mxu3 }
  0xe0   : > { %4882 = vmatmul.msk.bf16.gmra.mxu0 %vm2317_vm5, %v3191_v20  ;;  %4747 = vmatmul.msk.bf16.gmra.mxu1 %vm2317_vm5, %v5064_v26  ;;  %v5907_v46 = vpop.f32.mrf.mxu1  ;;  %v1268_v20 = vshll.u32 %v1071_v13, 16  ;;  %v5118_v26 = vld [vmem:[%s6759_s2 + $0x60] sm:$0xff]  ;;  %v1278_v13 = vrot.slane %v1276_v51, 5 }
  0xe1   : > { %3751 = vmatpush.bf16.msra.mxu2 %v5118_v26 }
  0xe2   : > { %v1270_v35 = vrot.slane %v1268_v20, 5  ;;  %v5066_v20 = vld [vmem:[#allocation2 + $0x60] sm:$0xff]  ;;  %v1279_v26 = vor.u32 %v1278_v13, %v1275_v12  ;;  %v5293_v12 = vld [vmem:[#allocation2 + $0x74] sm:$0x1] }
  0xe3   : > { %v5909_v49 = vpop.f32.mrf.mxu2  ;;  %v988_v13 = vrot.slane %v5293_v12, 5 }
  0xe4   : > { %v1280_v0 = vrot.slane %v1279_v26, 4 }
  0xe5   : > { %4771 = vmatmul.msk.bf16.gmra.mxu2 %vm2317_vm5, %v2710_v27  ;;  %v1266_v27 = vrot.slane %v1265_v23, 4 }
  0xe7   : > { %v5917_v6 = vpop.f32.mrf.mxu0  ;;  %v1271_v54 = vsel %vm5555_vm4, %v1266_v27, %v1270_v35  ;;  %v1292_v35 = vshll.u32 %v1072_v22, 16 }
  0xe8   : > { %v5919_v15 = vpop.f32.mrf.mxu3  ;;  %v3169_v10 = vunpack.c.l.b16 %v1271_v54  ;;  %v5292_v54 = vld [vmem:[#allocation2 + $0x70] sm:$0xf] }
  0xe9   : > { %v1294_v51 = vrot.slane %v1292_v35, 5 }
  0xea   : > { %4859 = vmatmul.msk.bf16.gmra.mxu3 %vm2317_vm5, %v5080_v56  ;;  %v1282_v56 = vshll.u32 %v1049_v44, 16  ;;  %v3193_v23 = vpack.c.b16 %v3169_v10, %v3168_v9 }
  0xeb   : > { %v5931_v28 = vpop.f32.mrf.mxu2 }
  0xed   : > { %v5926_v17 = vpop.f32.mrf.mxu1 }
  0xef   : > { %v5941_v45 = vpop.f32.mrf.mxu0 }
  0xf0   : > { %4883 = vmatmul.msk.bf16.gmra.mxu0 %vm2317_vm5, %v3192_v14  ;;  %4748 = vmatmul.msk.bf16.gmra.mxu1 %vm2317_vm5, %v5065_v24  ;;  %v5943_v47 = vpop.f32.mrf.mxu3  ;;  %v1284_v14 = vrot.slane %v1282_v56, 5  ;;  %v1288_v24 = vrot.slane %v1286_v8, 4  ;;  %v985_v56 = vrot.slane %v5292_v54, 5  ;;  %v1051_v8 = vld [vmem:[#allocation2 + $0x7c] sm:$0xf] }
  0xf1   : > { %v1306_v9 = vshll.u32 %v1051_v8, 16  ;;  %v1310_v10 = vshrl.u32 %v1051_v8, 16 }
  0xf2   : > { %v1289_v27 = vor.u32 %v1288_v24, %v1284_v14  ;;  %v1285_v34 = vsel %vm5555_vm4, %v1280_v0, %v1284_v14  ;;  %v5082_v24 = vld [vmem:[#allocation2 + $0x6c] sm:$0xff]  ;;  %v987_v22 = vrot.slane %v985_v56, 4 }
  0xf3   : > { %v1308_v14 = vrot.slane %v1306_v9, 5 }
  0xf4   : > { %v1290_v50 = vrot.slane %v1289_v27, 4  ;;  %v1302_v27 = vrot.slane %v1300_v63, 5  ;;  %v989_v0 = vsel %vm5750_vm8, %v987_v22, %v988_v13  ;;  %v1052_v22 = vld [vmem:[#allocation2 + $0x84] sm:$0xf] }
  0xf5   : > { %4772 = vmatmul.msk.bf16.gmra.mxu2 %vm2317_vm5, %v2711_v43  ;;  %v5950_v55 = vpop.f32.mrf.mxu1  ;;  %v2688_v43 = vunpack.c.l.b16 %v979_v38 }
  0xf6   : > { %v1295_v5 = vsel %vm5555_vm4, %v1290_v50, %v1294_v51  ;;  %v1073_v50 = vld [vmem:[#allocation2 + $0x80] sm:$0x1] }
  0xf7   : > { %v2712_v44 = vpack.c.b16 %v2689_v31, %v2688_v43  ;;  %v3171_v26 = vunpack.c.l.b16 %v1295_v5  ;;  %v1299_v31 = vrot.slane %v1297_v60, 4  ;;  %v2691_v60 = vunpack.c.l.b16 %v989_v0 }
  0xf8   : > { %v5955_v7 = vpop.f32.mrf.mxu2 }
  0xfa   : > { %4860 = vmatmul.msk.bf16.gmra.mxu3 %vm2317_vm5, %v5081_v1 }
  0xfd   : > { %v5962_v29 = vpop.f32.mrf.mxu0  ;;  %v5964_v30 = vpop.f32.mrf.mxu3 }
  0xfe   : > { %v2588_v40 = vpop.f32.mrf.mxu1 }
  0xff   : > { %v2589_v41 = vadd.f32 %v2588_v40, %v5852_v3  ;;  %v1312_v40 = vrot.slane %v1310_v10, 4 }
 0x100   : > { %4884 = vmatmul.msk.bf16.gmra.mxu0 %vm2317_vm5, %v3193_v23  ;;  %v5968_v42 = vpop.f32.mrf.mxu2  ;;  %4749 = vmatmul.msk.bf16.gmra.mxu1 %vm2317_vm5, %v5066_v20  ;;  %v3170_v20 = vunpack.c.l.b16 %v1285_v34 }
 0x101   : > { %v1313_v63 = vor.u32 %v1312_v40, %v1308_v14 }
 0x102   : > { %v3194_v51 = vpack.c.b16 %v3171_v26, %v3170_v20  ;;  %v5294_v20 = vld [vmem:[#allocation2 + $0x7c] sm:$0xf] }
 0x103   : > { %v992_v26 = vrot.slane %v5294_v20, 5  ;;  %v1074_v20 = vld [vmem:[#allocation2 + $0x8c] sm:$0x1] }
 0x105   : > { %v5971_v1 = vpop.f32.mrf.mxu0  ;;  %v5973_v3 = vpop.f32.mrf.mxu3  ;;  %4773 = vmatmul.msk.bf16.gmra.mxu2 %vm2317_vm5, %v2712_v44  ;;  %v986_v44 = vsel %vm5750_vm8, %v4606_v19, %v985_v56 }
 0x106   : > { %v2590_v38 = vpop.f32.mrf.mxu1  ;;  %v2690_v58 = vunpack.c.l.b16 %v986_v44 }
 0x107   : > { %v2591_v23 = vadd.f32 %v2590_v38, %v5870_v36  ;;  %v1303_v36 = vor.u32 %v1302_v27, %v1299_v31  ;;  %v1314_v38 = vrot.slane %v1313_v63, 4  ;;  %v863_v31 = vld [vmem:[#allocation2 + $0x78] sm:$0xe]  ;;  %v1321_v27 = vshrl.u32 %v1052_v22, 16 }
 0x108   : > { %v2789_v43 = vpop.f32.mrf.mxu2 }
 0x109   : > { %v2869_v35 = vadd.f32 %v2789_v43, %v2589_v41  ;;  %v1316_v41 = vshll.u32 %v1073_v50, 16  ;;  %v1304_v10 = vrot.slane %v1303_v36, 4  ;;  %v1053_v43 = vld [vmem:[#allocation2 + $0x88] sm:$0xf] }
 0x10a   : > { %4861 = vmatmul.msk.bf16.gmra.mxu3 %vm2317_vm5, %v5082_v24  ;;  %v2713_v24 = vpack.c.b16 %v2691_v60, %v2690_v58  ;;  %v1330_v0 = vshll.u32 %v1053_v43, 16  ;;  %v1334_v50 = vshrl.u32 %v1053_v43, 16  ;;  %v4607_v58 = vrot.slane %v863_v31, 9 }
 0x10b   : > { %v1318_v19 = vrot.slane %v1316_v41, 5  ;;  %v994_v60 = vrot.slane %v992_v26, 4 }
 0x10d   : > { %v3271_v54 = vpop.f32.mrf.mxu0  ;;  %v3038_v8 = vpop.f32.mrf.mxu3 }
 0x10e   : > { %v3118_v34 = vadd.f32 %v3038_v8, %v2869_v35  ;;  %v2593_v5 = vpop.f32.mrf.mxu1  ;;  %v1324_v35 = vshll.u32 %v1052_v22, 16 }
 0x10f   : > { %v2594_v9 = vadd.f32 %v2593_v5, %v5881_v61  ;;  %v1309_v61 = vsel %vm5555_vm4, %v1304_v10, %v1308_v14  ;;  %v1323_v5 = vrot.slane %v1321_v27, 4 }
 0x110   : > { %4885 = vmatmul.msk.bf16.gmra.mxu0 %vm2317_vm5, %v3194_v51  ;;  %v2791_v56 = vpop.f32.mrf.mxu2  ;;  %4750 = vmatmul.msk.bf16.gmra.mxu1 %vm2317_vm5, %v5067_v53  ;;  %v5989_v12 = vadd.f32 %v3271_v54, %v3118_v34  ;;  %v5295_v51 = vld [vmem:[#allocation2 + $0x80] sm:$0x1]  ;;  %v5083_v54 = vld [vmem:[#allocation2 + $0x78] sm:$0xff]  ;;  %v3172_v63 = vunpack.c.l.b16 %v1309_v61 }
 0x111   : > { %v2870_v13 = vadd.f32 %v2791_v56, %v2591_v23  ;;  %v1319_v23 = vsel %vm5555_vm4, %v1314_v38, %v1318_v19  ;;  %v995_v53 = vrot.slane %v5295_v51, 5  ;;  %v1326_v56 = vrot.slane %v1324_v35, 5 }
 0x112   : > { %v3173_v41 = vunpack.c.l.b16 %v1319_v23  ;;  %v1332_v38 = vrot.slane %v1330_v0, 5  ;;  %v1336_v19 = vrot.slane %v1334_v50, 4 }
 0x113   : > { %v996_v22 = vsel %vm5750_vm8, %v994_v60, %v995_v53  ;;  %v1327_v31 = vor.u32 %v1326_v56, %v1323_v5  ;;  %v1054_v60 = vld [vmem:[#allocation2 + $0x90] sm:$0xf]  ;;  %v864_v5 = vld [vmem:[#allocation2 + $0x84] sm:$0xe] }
 0x114   : > { %v3195_v43 = vpack.c.b16 %v3173_v41, %v3172_v63  ;;  %v5296_v63 = vld [vmem:[#allocation2 + $0x88] sm:$0xf]  ;;  %v1345_v56 = vshrl.u32 %v1054_v60, 16 }
 0x115   : > { %v3273_v40 = vpop.f32.mrf.mxu0  ;;  %v3040_v44 = vpop.f32.mrf.mxu3  ;;  %4774 = vmatmul.msk.bf16.gmra.mxu2 %vm2317_vm5, %v2713_v24  ;;  %v1328_v51 = vrot.slane %v1327_v31, 4  ;;  %v999_v41 = vrot.slane %v5296_v63, 5  ;;  %v1075_v63 = vld [vmem:[#allocation2 + $0x98] sm:$0x1] }
 0x116   : > { %v3119_v36 = vadd.f32 %v3040_v44, %v2870_v13  ;;  %v2595_v8 = vpop.f32.mrf.mxu1  ;;  %v993_v13 = vsel %vm5750_vm8, %v4607_v58, %v992_v26  ;;  %v1337_v44 = vor.u32 %v1336_v19, %v1332_v38 }
 0x117   : > { %v2596_v14 = vadd.f32 %v2595_v8, %v5900_v32  ;;  %v5068_v32 = vld [vmem:[#allocation2 + $0x78] sm:$0xff]  ;;  %v2692_v35 = vunpack.c.l.b16 %v993_v13 }
 0x118   : > { %v2794_v34 = vpop.f32.mrf.mxu2  ;;  %v5997_v10 = vadd.f32 %v3273_v40, %v3119_v36  ;;  %v2693_v40 = vunpack.c.l.b16 %v996_v22  ;;  %v1338_v8 = vrot.slane %v1337_v44, 4 }
 0x119   : > { %v2871_v24 = vadd.f32 %v2794_v34, %v2594_v9  ;;  %v1340_v9 = vshll.u32 %v1074_v20, 16  ;;  %v1055_v34 = vld [vmem:[#allocation2 + $0x94] sm:$0xf] }
 0x11a   : > { %4862 = vmatmul.msk.bf16.gmra.mxu3 %vm2317_vm5, %v5083_v54  ;;  %v2714_v54 = vpack.c.b16 %v2693_v40, %v2692_v35  ;;  %v1354_v22 = vshll.u32 %v1055_v34, 16  ;;  %v1358_v20 = vshrl.u32 %v1055_v34, 16  ;;  %v4608_v35 = vrot.slane %v864_v5, 9 }
 0x11b   : > { %v1342_v58 = vrot.slane %v1340_v9, 5  ;;  %v1001_v40 = vrot.slane %v999_v41, 4 }
 0x11d   : > { %v3276_v61 = vpop.f32.mrf.mxu0  ;;  %v3043_v27 = vpop.f32.mrf.mxu3 }
 0x11e   : > { %v3120_v23 = vadd.f32 %v3043_v27, %v2871_v24  ;;  %v2598_v0 = vpop.f32.mrf.mxu1  ;;  %v1348_v24 = vshll.u32 %v1054_v60, 16 }
 0x11f   : > { %v2599_v50 = vadd.f32 %v2598_v0, %v5917_v6  ;;  %v1333_v6 = vsel %vm5555_vm4, %v1328_v51, %v1332_v38  ;;  %v1347_v0 = vrot.slane %v1345_v56, 4 }
 0x120   : > { %4886 = vmatmul.msk.bf16.gmra.mxu0 %vm2317_vm5, %v3195_v43  ;;  %v2796_v26 = vpop.f32.mrf.mxu2  ;;  %4751 = vmatmul.msk.bf16.gmra.mxu1 %vm2317_vm5, %v5068_v32  ;;  %v6007_v53 = vadd.f32 %v3276_v61, %v3120_v23  ;;  %v5297_v43 = vld [vmem:[#allocation2 + $0x8c] sm:$0x1]  ;;  %v5084_v61 = vld [vmem:[#allocation2 + $0x84] sm:$0xff]  ;;  %v3174_v44 = vunpack.c.l.b16 %v1333_v6 }
 0x121   : > { %v2872_v36 = vadd.f32 %v2796_v26, %v2596_v14  ;;  %v1343_v14 = vsel %vm5555_vm4, %v1338_v8, %v1342_v58  ;;  %v1002_v32 = vrot.slane %v5297_v43, 5  ;;  %v1350_v26 = vrot.slane %v1348_v24, 5 }
 0x122   : > { %v3175_v9 = vunpack.c.l.b16 %v1343_v14  ;;  %v1356_v8 = vrot.slane %v1354_v22, 5  ;;  %v1360_v58 = vrot.slane %v1358_v20, 4 }
 0x123   : > { %v1003_v60 = vsel %vm5750_vm8, %v1001_v40, %v1002_v32  ;;  %v1351_v5 = vor.u32 %v1350_v26, %v1347_v0  ;;  %v1056_v32 = vld [vmem:[#allocation2 + $0x9c] sm:$0xf]  ;;  %v865_v0 = vld [vmem:[#allocation2 + $0x90] sm:$0xe] }
 0x124   : > { %v3196_v34 = vpack.c.b16 %v3175_v9, %v3174_v44  ;;  %v1057_v44 = vld [vmem:[#allocation2 + $0xa0] sm:$0xf]  ;;  %v5298_v9 = vld [vmem:[#allocation2 + $0x94] sm:$0xf]  ;;  %v1369_v26 = vshrl.u32 %v1056_v32, 16 }
 0x125   : > { %v3278_v19 = vpop.f32.mrf.mxu0  ;;  %v3045_v13 = vpop.f32.mrf.mxu3  ;;  %4775 = vmatmul.msk.bf16.gmra.mxu2 %vm2317_vm5, %v2714_v54  ;;  %v1352_v43 = vrot.slane %v1351_v5, 4 }
 0x126   : > { %v3121_v31 = vadd.f32 %v3045_v13, %v2872_v36  ;;  %v2600_v27 = vpop.f32.mrf.mxu1  ;;  %v1000_v36 = vsel %vm5750_vm8, %v4608_v35, %v999_v41  ;;  %v1361_v13 = vor.u32 %v1360_v58, %v1356_v8  ;;  %v1378_v58 = vshll.u32 %v1057_v44, 16 }
 0x127   : > { %v2601_v38 = vadd.f32 %v2600_v27, %v5941_v45  ;;  %v5069_v45 = vld [vmem:[#allocation2 + $0x84] sm:$0xff]  ;;  %v2694_v24 = vunpack.c.l.b16 %v1000_v36  ;;  %v1382_v36 = vshrl.u32 %v1057_v44, 16 }
 0x128   : > { %v2799_v23 = vpop.f32.mrf.mxu2  ;;  %v6015_v51 = vadd.f32 %v3278_v19, %v3121_v31  ;;  %v2695_v19 = vunpack.c.l.b16 %v1003_v60  ;;  %v1362_v35 = vrot.slane %v1361_v13, 4 }
 0x129   : > { %v2873_v54 = vadd.f32 %v2799_v23, %v2599_v50  ;;  %v1364_v50 = vshll.u32 %v1075_v63, 16  ;;  %v1006_v23 = vrot.slane %v5298_v9, 5 }
 0x12a   : > { %4863 = vmatmul.msk.bf16.gmra.mxu3 %vm2317_vm5, %v5084_v61  ;;  %v2715_v27 = vpack.c.b16 %v2695_v19, %v2694_v24  ;;  %v4609_v24 = vrot.slane %v865_v0, 9  ;;  %v5070_v0 = vld [vmem:[#allocation2 + $0x90] sm:$0xff] }
 0x12b   : > { %v1366_v40 = vrot.slane %v1364_v50, 5  ;;  %v1008_v19 = vrot.slane %v1006_v23, 4 }
 0x12d   : > { %v3281_v6 = vpop.f32.mrf.mxu0  ;;  %v3048_v56 = vpop.f32.mrf.mxu3 }
 0x12e   : > { %v3122_v14 = vadd.f32 %v3048_v56, %v2873_v54  ;;  %v2603_v22 = vpop.f32.mrf.mxu1  ;;  %v1372_v54 = vshll.u32 %v1056_v32, 16  ;;  %v1384_v32 = vrot.slane %v1382_v36, 4 }
 0x12f   : > { %v2604_v20 = vadd.f32 %v2603_v22, %v5962_v29  ;;  %v1357_v29 = vsel %vm5555_vm4, %v1352_v43, %v1356_v8  ;;  %v1371_v8 = vrot.slane %v1369_v26, 4  ;;  %v1380_v43 = vrot.slane %v1378_v58, 5 }
 0x130   : > { %4887 = vmatmul.msk.bf16.gmra.mxu0 %vm2317_vm5, %v3196_v34  ;;  %v2801_v41 = vpop.f32.mrf.mxu2  ;;  %4752 = vmatmul.msk.bf16.gmra.mxu1 %vm2317_vm5, %v5069_v45  ;;  %v6025_v31 = vadd.f32 %v3281_v6, %v3122_v14  ;;  %v5299_v34 = vld [vmem:[#allocation2 + $0x98] sm:$0x1]  ;;  %v5085_v6 = vld [vmem:[#allocation2 + $0x90] sm:$0xff]  ;;  %v3176_v13 = vunpack.c.l.b16 %v1357_v29  ;;  %v1374_v14 = vrot.slane %v1372_v54, 5 }
 0x131   : > { %v2874_v61 = vadd.f32 %v2801_v41, %v2601_v38  ;;  %v1367_v38 = vsel %vm5555_vm4, %v1362_v35, %v1366_v40  ;;  %v1009_v45 = vrot.slane %v5299_v34, 5  ;;  %v1076_v35 = vld [vmem:[#allocation2 + $0xa4] sm:$0x1]  ;;  %v1385_v26 = vor.u32 %v1384_v32, %v1380_v43 }
 0x132   : > { %v3177_v22 = vunpack.c.l.b16 %v1367_v38  ;;  %v1375_v9 = vor.u32 %v1374_v14, %v1371_v8  ;;  %v1388_v54 = vshll.u32 %v1076_v35, 16  ;;  %v1059_v8 = vld [vmem:[#allocation2 + $0xac] sm:$0xf]  ;;  %v866_v14 = vld [vmem:[#allocation2 + $0x9c] sm:$0xe] }
 0x133   : > { %v1010_v40 = vsel %vm5750_vm8, %v1008_v19, %v1009_v45  ;;  %v1058_v45 = vld [vmem:[#allocation2 + $0xa8] sm:$0xf]  ;;  %v5300_v19 = vld [vmem:[#allocation2 + $0xa0] sm:$0xf]  ;;  %v1402_v35 = vshll.u32 %v1059_v8, 16 }
 0x134   : > { %v1376_v38 = vrot.slane %v1375_v9, 4  ;;  %v1396_v32 = vshll.u32 %v1058_v45, 16 }
 0x135   : > { %v3283_v60 = vpop.f32.mrf.mxu0  ;;  %v3050_v63 = vpop.f32.mrf.mxu3  ;;  %4776 = vmatmul.msk.bf16.gmra.mxu2 %vm2317_vm5, %v2715_v27 }
 0x136   : > { %v3123_v5 = vadd.f32 %v3050_v63, %v2874_v61  ;;  %v2605_v56 = vpop.f32.mrf.mxu1  ;;  %v1007_v61 = vsel %vm5750_vm8, %v4609_v24, %v1006_v23  ;;  %v1386_v23 = vrot.slane %v1385_v26, 4 }
 0x137   : > { %v2606_v50 = vadd.f32 %v2605_v56, %v5971_v1  ;;  %v3197_v1 = vpack.c.b16 %v3177_v22, %v3176_v13  ;;  %v2696_v36 = vunpack.c.l.b16 %v1007_v61  ;;  %v1013_v13 = vrot.slane %v5300_v19, 5 }
 0x138   : > { %v2804_v41 = vpop.f32.mrf.mxu2  ;;  %v6033_v27 = vadd.f32 %v3283_v60, %v3123_v5  ;;  %v2697_v60 = vunpack.c.l.b16 %v1010_v40  ;;  %v1390_v5 = vrot.slane %v1388_v54, 5  ;;  %v1381_v22 = vsel %vm5555_vm4, %v1376_v38, %v1380_v43  ;;  %v5301_v40 = vld [vmem:[#allocation2 + $0xa4] sm:$0x1] }
 0x139   : > { %v2875_v44 = vadd.f32 %v2804_v41, %v2604_v20  ;;  %v1393_v41 = vshrl.u32 %v1058_v45, 16  ;;  %v1406_v61 = vshrl.u32 %v1059_v8, 16  ;;  %v1016_v9 = vrot.slane %v5301_v40, 5  ;;  %v1077_v8 = vld [vmem:[#allocation2 + $0xb0] sm:$0x1] }
 0x13a   : > { %4864 = vmatmul.msk.bf16.gmra.mxu3 %vm2317_vm5, %v5085_v6  ;;  %v2716_v24 = vpack.c.b16 %v2697_v60, %v2696_v36  ;;  %v1015_v26 = vrot.slane %v1013_v13, 4  ;;  %v1398_v38 = vrot.slane %v1396_v32, 5 }
 0x13d   : > { %v3286_v29 = vpop.f32.mrf.mxu0  ;;  %v3053_v58 = vpop.f32.mrf.mxu3 }
 0x13e   : > { %v3124_v63 = vadd.f32 %v3053_v58, %v2875_v44  ;;  %v2608_v20 = vpop.f32.mrf.mxu1  ;;  %v1391_v44 = vsel %vm5555_vm4, %v1386_v23, %v1390_v5  ;;  %v3178_v58 = vunpack.c.l.b16 %v1381_v22  ;;  %v1404_v23 = vrot.slane %v1402_v35, 5 }
 0x13f   : > { %v2609_v36 = vadd.f32 %v2608_v20, %v5834_v25  ;;  %v3179_v60 = vunpack.c.l.b16 %v1391_v44  ;;  %v1408_v5 = vrot.slane %v1406_v61, 4  ;;  %v359_v25 = vld [vmem:[%s5512_s11 + $0xb8] sm:$0xf]  ;;  %v1412_v61 = vshll.u32 %v1077_v8, 16 }
 0x140   : > { %4888 = vmatmul.msk.bf16.gmra.mxu0 %vm2317_vm5, %v3197_v1  ;;  %v2806_v34 = vpop.f32.mrf.mxu2  ;;  %4753 = vmatmul.msk.bf16.gmra.mxu1 %vm2317_vm5, %v5070_v0  ;;  %v6042_v6 = vadd.f32 %v3286_v29, %v3124_v63  ;;  %v5086_v29 = vld [vmem:[#allocation2 + $0x9c] sm:$0xff]  ;;  %v1395_v63 = vrot.slane %v1393_v41, 4  ;;  %408 = vst.msk [vmem:[#allocation2 + $0xc4] sm:$0xf] %vm308_vm0, %v359_v25 }
 0x141   : > { %v2876_v56 = vadd.f32 %v2806_v34, %v2606_v50  ;;  %v4610_v50 = vrot.slane %v866_v14, 9  ;;  %v358_v14 = vld [vmem:[%s5512_s11 + $0xb4] sm:$0xf]  ;;  %v3198_v20 = vpack.c.b16 %v3179_v60, %v3178_v58  ;;  %v5071_v41 = vld [vmem:[#allocation2 + $0x9c] sm:$0xff]  ;;  %v1409_v35 = vor.u32 %v1408_v5, %v1404_v23 }
 0x142   : > { %v1399_v22 = vor.u32 %v1398_v38, %v1395_v63  ;;  %407 = vst.msk [vmem:[#allocation2 + $0xc0] sm:$0xf] %vm308_vm0, %v358_v14  ;;  %v1414_v63 = vrot.slane %v1412_v61, 5  ;;  %v5303_v14 = vld [vmem:[#allocation2 + $0xb0] sm:$0x1] }
 0x143   : > { %v1410_v60 = vrot.slane %v1409_v35, 4  ;;  %v1023_v25 = vrot.slane %v5303_v14, 5 }
 0x145   : > { %v3288_v1 = vpop.f32.mrf.mxu0  ;;  %v3055_v0 = vpop.f32.mrf.mxu3  ;;  %4777 = vmatmul.msk.bf16.gmra.mxu2 %vm2317_vm5, %v2716_v24  ;;  %v1014_v24 = vsel %vm5750_vm8, %v4610_v50, %v1013_v13  ;;  %v1061_v50 = vld [vmem:[#allocation2 + $0xb8] sm:$0xf] }
 0x146   : > { %v3125_v54 = vadd.f32 %v3055_v0, %v2876_v56  ;;  %v2610_v43 = vpop.f32.mrf.mxu1  ;;  %v1017_v56 = vsel %vm5750_vm8, %v1015_v26, %v1016_v9  ;;  %v2698_v32 = vunpack.c.l.b16 %v1014_v24  ;;  %v1060_v0 = vld [vmem:[#allocation2 + $0xb4] sm:$0xf]  ;;  %v360_v26 = vld [vmem:[%s5512_s11 + $0xbc] sm:$0x1]  ;;  %v1426_v24 = vshll.u32 %v1061_v50, 16  ;;  %s273_s11 = sand.u32 1, %s5401_s16  }
 0x147   : > { %v2699_v44 = vunpack.c.l.b16 %v1017_v56  ;;  %409 = vst.msk [vmem:[#allocation2 + $0xc8] sm:$0x1] %vm311_vm1, %v360_v26  ;;  %v1417_v5 = vshrl.u32 %v1060_v0, 16  ;;  %v5302_v56 = vld [vmem:[#allocation2 + $0xac] sm:$0xf]  ;;  %s4591_s6 = sshll.u32 %s273_s11, 7 }
 0x148   : > { %v2809_v34 = vpop.f32.mrf.mxu2  ;;  %v6050_v45 = vadd.f32 %v3288_v1, %v3125_v54  ;;  %v2611_v54 = vadd.f32 %v2610_v43, %v5846_v52  ;;  %v1020_v8 = vrot.slane %v5302_v56, 5  ;;  %v1430_v52 = vshrl.u32 %v1061_v50, 16  ;;  %v867_v43 = vld [vmem:[#allocation2 + $0xa8] sm:$0xe]  ;;  %s6485_s7 = scalar_lea.vmem [#allocation3], %s4591_s6  ;;  %s4432_s18 = scalar_lea.sflag [#allocation4], %s273_s11 }
 0x149   : > { %v2877_v19 = vadd.f32 %v2809_v34, %v2609_v36  ;;  %v2717_v36 = vpack.c.b16 %v2699_v44, %v2698_v32  ;;  %v1415_v32 = vsel %vm5555_vm4, %v1410_v60, %v1414_v63  ;;  %v1419_v44 = vrot.slane %v1417_v5, 4  ;;  %s4447_s14 = sshll.u32 %s6485_s7, 4  ;;  %s4448_s14 = int_to_ptr.vmem [resolvable:$true] %s4447_s14 }
 0x14a   : > { %4865 = vmatmul.msk.bf16.gmra.mxu3 %vm2317_vm5, %v5086_v29  ;;  %v1400_v29 = vrot.slane %v1399_v22, 4  ;;  %v1428_v61 = vrot.slane %v1426_v24, 5  ;;  %v1022_v50 = vrot.slane %v1020_v8, 4  ;;  %v1432_v26 = vrot.slane %v1430_v52, 4 }
 0x14c   : > { %v1024_v63 = vsel %vm5750_vm8, %v1022_v50, %v1023_v25  ;;  %v1063_v25 = vld [vmem:[#allocation2 + $0xc4] sm:$0xf] }
 0x14d   : > { %v3291_v13 = vpop.f32.mrf.mxu0  ;;  %v3058_v40 = vpop.f32.mrf.mxu3 }
 0x14e   : > { %v3126_v9 = vadd.f32 %v3058_v40, %v2877_v19  ;;  %v2613_v1 = vpop.f32.mrf.mxu1  ;;  %v1420_v19 = vshll.u32 %v1060_v0, 16  ;;  %v5087_v40 = vld [vmem:[#allocation2 + $0xa8] sm:$0xff]  ;;  %v4611_v0 = vrot.slane %v867_v43, 9  ;;  %v2701_v43 = vunpack.c.l.b16 %v1024_v63  ;;  %v5306_v63 = vld [vmem:[#allocation2 + $0xbc] sm:$0x1] }
 0x150   : > { %4889 = vmatmul.msk.bf16.gmra.mxu0 %vm2317_vm5, %v3198_v20  ;;  %v2811_v58 = vpop.f32.mrf.mxu2  ;;  %4754 = vmatmul.msk.bf16.gmra.mxu1 %vm2317_vm5, %v5071_v41  ;;  %v6066_v38 = vadd.f32 %v3291_v13, %v3126_v9  ;;  %v1405_v20 = vsel %vm5555_vm4, %v1400_v29, %v1404_v23  ;;  %v1422_v35 = vrot.slane %v1420_v19, 5  ;;  %v3181_v29 = vunpack.c.l.b16 %v1415_v32 }
 0x151   : > { %v2878_v34 = vadd.f32 %v2811_v58, %v2611_v54  ;;  %v2614_v54 = vadd.f32 %v2613_v1, %v5861_v16  ;;  %v1078_v58 = vld [vmem:[#allocation2 + $0xbc] sm:$0x1]  ;;  %v3180_v23 = vunpack.c.l.b16 %v1405_v20  ;;  %v1021_v60 = vsel %vm5750_vm8, %v4611_v0, %v1020_v8  ;;  %v5072_v16 = vld [vmem:[#allocation2 + $0xa8] sm:$0xff]  ;;  %v5304_v0 = vld [vmem:[#allocation2 + $0x10] sm:$0xf] }
 0x152   : > { %6768 = vst [vmem:[#allocation6_spill] sm:$0xff] %v6066_v38  ;;  %v1423_v38 = vor.u32 %v1422_v35, %v1419_v44  ;;  %v1436_v5 = vshll.u32 %v1078_v58, 16  ;;  %v2700_v52 = vunpack.c.l.b16 %v1021_v60  ;;  %v1062_v35 = vld [vmem:[#allocation2 + $0xc0] sm:$0xf]  ;;  %v1530_v50 = vrot.slane %v5304_v0, 5 }
 0x153   : > { %v3199_v19 = vpack.c.b16 %v3181_v29, %v3180_v23  ;;  %v1441_v58 = vshrl.u32 %v1062_v35, 16  ;;  %v1444_v29 = vshll.u32 %v1062_v35, 16  ;;  %v1454_v60 = vshrl.u32 %v1063_v25, 16 }
 0x154   : > { %v1438_v44 = vrot.slane %v1436_v5, 5  ;;  %v5307_v5 = vld [vmem:[#allocation2 + $0x14] sm:$0x1] }
 0x155   : > { %v3293_v22 = vpop.f32.mrf.mxu0  ;;  %v3060_v41 = vpop.f32.mrf.mxu3  ;;  %4778 = vmatmul.msk.bf16.gmra.mxu2 %vm2317_vm5, %v2717_v36 }
 0x156   : > { %v3127_v13 = vadd.f32 %v3060_v41, %v2878_v34  ;;  %v2615_v9 = vpop.f32.mrf.mxu1  ;;  %v1433_v34 = vor.u32 %v1432_v26, %v1428_v61  ;;  %v1424_v41 = vrot.slane %v1423_v38, 4 }
 0x158   : > { %v2814_v56 = vpop.f32.mrf.mxu2  ;;  %v6074_v14 = vadd.f32 %v3293_v22, %v3127_v13  ;;  %v1434_v32 = vrot.slane %v1433_v34, 4  ;;  %v2616_v13 = vadd.f32 %v2615_v9, %v5874_v48  ;;  %v1429_v38 = vsel %vm5555_vm4, %v1424_v41, %v1428_v61  ;;  %v5305_v48 = vld [vmem:[#allocation2 + $0xb8] sm:$0xf] }
 0x159   : > { %v2879_v36 = vadd.f32 %v2814_v56, %v2614_v54  ;;  %v2718_v54 = vpack.c.b16 %v2701_v43, %v2700_v52  ;;  %v1027_v9 = vrot.slane %v5305_v48, 5  ;;  %v868_v56 = vld [vmem:[#allocation2 + $0xb4] sm:$0xe]  ;;  %v1030_v34 = vrot.slane %v5306_v63, 5 }
 0x15a   : > { %6769 = vst [vmem:[#allocation7_spill] sm:$0xff] %v6074_v14  ;;  %4866 = vmatmul.msk.bf16.gmra.mxu3 %vm2317_vm5, %v5087_v40  ;;  %v1439_v23 = vsel %vm5555_vm4, %v1434_v32, %v1438_v44  ;;  %v3182_v52 = vunpack.c.l.b16 %v1429_v38  ;;  %v1443_v43 = vrot.slane %v1441_v58, 4  ;;  %v5088_v41 = vld [vmem:[#allocation2 + $0xb4] sm:$0xff]  ;;  %v4612_v44 = vrot.slane %v868_v56, 9  ;;  %v6103_v56 = vld [vmem:[#allocation2 + $0x1c] sm:$0xf] }
 0x15b   : > { %v3183_v61 = vunpack.c.l.b16 %v1439_v23  ;;  %v1029_v35 = vrot.slane %v1027_v9, 4  ;;  %v1456_v48 = vrot.slane %v1454_v60, 4  ;;  %v1641_v38 = vld [vmem:[#allocation2 + $0x18] sm:$0xf] }
 0x15d   : > { %v3296_v1 = vpop.f32.mrf.mxu0  ;;  %v3063_v24 = vpop.f32.mrf.mxu3 }
 0x15e   : > { %v3128_v20 = vadd.f32 %v3063_v24, %v2879_v36  ;;  %v2618_v22 = vpop.f32.mrf.mxu1  ;;  %v1450_v36 = vshll.u32 %v1063_v25, 16 }
 0x15f   : > { %v2619_v25 = vadd.f32 %v2618_v22, %v5891_v62  ;;  %v1028_v62 = vsel %vm5750_vm8, %v4612_v44, %v1027_v9  ;;  %v1031_v22 = vsel %vm5750_vm8, %v1029_v35, %v1030_v34  ;;  %v1699_v44 = vshll.u32 %v6103_v56, 16 }
 0x160   : > { %4890 = vmatmul.msk.bf16.gmra.mxu0 %vm2317_vm5, %v3199_v19  ;;  %v2816_v8 = vpop.f32.mrf.mxu2  ;;  %4755 = vmatmul.msk.bf16.gmra.mxu1 %vm2317_vm5, %v5072_v16  ;;  %v6084_v40 = vadd.f32 %v3296_v1, %v3128_v20  ;;  %v1533_v19 = vrot.slane %v5307_v5, 5  ;;  %v1532_v16 = vrot.slane %v1530_v50, 4  ;;  %v1452_v0 = vrot.slane %v1450_v36, 5 }
 0x161   : > { %v2880_v26 = vadd.f32 %v2816_v8, %v2616_v13  ;;  %v1446_v13 = vrot.slane %v1444_v29, 5  ;;  %v1464_v8 = vld [vmem:[#allocation2 + $0xc] sm:$0xe]  ;;  %v3200_v36 = vpack.c.b16 %v3183_v61, %v3182_v52  ;;  %v2703_v9 = vunpack.c.l.b16 %v1031_v22 }
 0x162   : > { %6770 = vst [vmem:[#allocation8_spill] sm:$0xff] %v6084_v40  ;;  %v4613_v63 = vrot.slane %v1464_v8, 9  ;;  %v1703_v34 = vshrl.u32 %v6103_v56, 16 }
 0x163   : > { %v1447_v60 = vor.u32 %v1446_v13, %v1443_v43 }
 0x164   : > { %v1531_v58 = vsel %vm5750_vm8, %v4613_v63, %v1530_v50  ;;  %v5073_v50 = vld [vmem:[#allocation2 + $0xb4] sm:$0xff]  ;;  %v1705_v22 = vrot.slane %v1703_v34, 4 }
 0x165   : > { %v3298_v1 = vpop.f32.mrf.mxu0  ;;  %v3065_v24 = vpop.f32.mrf.mxu3  ;;  %4779 = vmatmul.msk.bf16.gmra.mxu2 %vm2317_vm5, %v2718_v54  ;;  %v1079_v54 = vld [vmem:[#allocation2 + $0xc8] sm:$0x1]  ;;  %v3387_v23 = vunpack.c.l.b16 %v1531_v58  ;;  %v1448_v61 = vrot.slane %v1447_v60, 4 }
 0x166   : > { %v3129_v20 = vadd.f32 %v3065_v24, %v2880_v26  ;;  %v2620_v32 = vpop.f32.mrf.mxu1  ;;  %v1534_v26 = vsel %vm5750_vm8, %v1532_v16, %v1533_v19  ;;  %v1460_v24 = vshll.u32 %v1079_v54, 16  ;;  %v1690_v19 = vshrl.u32 %v1641_v38, 16 }
 0x167   : > { %v3388_v29 = vunpack.c.l.b16 %v1534_v26  ;;  %v1693_v16 = vshll.u32 %v1641_v38, 16  ;;  %v2621_v52 = vadd.f32 %v2620_v32, %v5907_v46 }
 0x168   : > { %v2819_v5 = vpop.f32.mrf.mxu2  ;;  %v6092_v40 = vadd.f32 %v3298_v1, %v3129_v20  ;;  %v1457_v1 = vor.u32 %v1456_v48, %v1452_v0  ;;  %v1462_v48 = vrot.slane %v1460_v24, 5  ;;  %v5089_v24 = vld [vmem:[#allocation2 + $0xc0] sm:$0xff] }
 0x169   : > { %v2881_v14 = vadd.f32 %v2819_v5, %v2619_v25  ;;  %v6105_v20 = vpack.c.b16 %v3388_v29, %v3387_v23  ;;  %v2702_v25 = vunpack.c.l.b16 %v1028_v62  ;;  %v1692_v5 = vrot.slane %v1690_v19, 4 }
 0x16a   : > { %4867 = vmatmul.msk.bf16.gmra.mxu3 %vm2317_vm5, %v5088_v41  ;;  %v1458_v43 = vrot.slane %v1457_v1, 4  ;;  %v1695_v54 = vrot.slane %v1693_v16, 5  ;;  %v1701_v62 = vrot.slane %v1699_v44, 5  ;;  %v1453_v29 = vsel %vm5555_vm4, %v1448_v61, %v1452_v0  ;;  %v6126_v61 = vld [vmem:[#allocation2 + $0x28] sm:$0xf] }
 0x16b   : > { %v2719_v38 = vpack.c.b16 %v2703_v9, %v2702_v25 }
 0x16c   : > { %v1696_v23 = vor.u32 %v1695_v54, %v1692_v5  ;;  %v1706_v60 = vor.u32 %v1705_v22, %v1701_v62  ;;  %v2073_v54 = vld [vmem:[#allocation2 + $0x18] sm:$0xe] }
 0x16d   : > { %v3301_v41 = vpop.f32.mrf.mxu0  ;;  %v3068_v8 = vpop.f32.mrf.mxu3 }
 0x16e   : > { %v3130_v35 = vadd.f32 %v3068_v8, %v2881_v14  ;;  %v2623_v63 = vpop.f32.mrf.mxu1  ;;  %v6114_v14 = vld [vmem:[#allocation2 + $0x20] sm:$0x1]  ;;  %v1697_v9 = vrot.slane %v1696_v23, 4 }
 0x16f   : > { %v1709_v1 = vshll.u32 %v6114_v14, 16  ;;  %v2624_v16 = vadd.f32 %v2623_v63, %v5926_v17  ;;  %v2139_v17 = vrot.slane %v6103_v56, 5 }
 0x170   : > { %4891 = vmatmul.msk.bf16.gmra.mxu0 %vm2317_vm5, %v3200_v36  ;;  %v2821_v13 = vpop.f32.mrf.mxu2  ;;  %4756 = vmatmul.msk.bf16.gmra.mxu1 %vm2317_vm5, %v5073_v50  ;;  %v6112_v58 = vadd.f32 %v3301_v41, %v3130_v35  ;;  %v1463_v36 = vsel %vm5555_vm4, %v1458_v43, %v1462_v48  ;;  %v3184_v41 = vunpack.c.l.b16 %v1453_v29  ;;  %v1707_v35 = vrot.slane %v1706_v60, 4 }
 0x171   : > { %v2882_v26 = vadd.f32 %v2821_v13, %v2621_v52  ;;  %v3185_v8 = vunpack.c.l.b16 %v1463_v36  ;;  %v1711_v0 = vrot.slane %v1709_v1, 5  ;;  %v1643_v52 = vld [vmem:[#allocation2 + $0x24] sm:$0xf]  ;;  %v1702_v13 = vsel %vm5555_vm4, %v1697_v9, %v1701_v62  ;;  %v5309_v62 = vld [vmem:[#allocation2 + $0x20] sm:$0x1] }
 0x172   : > { %v1714_v22 = vshrl.u32 %v1643_v52, 16  ;;  %v1717_v29 = vshll.u32 %v1643_v52, 16  ;;  %v1723_v36 = vshll.u32 %v6126_v61, 16  ;;  %v1727_v60 = vshrl.u32 %v6126_v61, 16 }
 0x173   : > { %v3201_v43 = vpack.c.b16 %v3185_v8, %v3184_v41  ;;  %v1712_v5 = vsel %vm5555_vm4, %v1707_v35, %v1711_v0  ;;  %v1540_v1 = vrot.slane %v5309_v62, 5  ;;  %v2141_v41 = vrot.slane %v2139_v17, 4 }
 0x174   : > { %v2142_v8 = vrot.slane %v6114_v14, 5  ;;  %v3870_v35 = vunpack.c.l.b16 %v1712_v5 }
 0x175   : > { %v3303_v46 = vpop.f32.mrf.mxu0  ;;  %v3070_v32 = vpop.f32.mrf.mxu3  ;;  %4780 = vmatmul.msk.bf16.gmra.mxu2 %vm2317_vm5, %v2719_v38 }
 0x176   : > { %v3131_v50 = vadd.f32 %v3070_v32, %v2882_v26  ;;  %v2625_v19 = vpop.f32.mrf.mxu1  ;;  %v5308_v26 = vld [vmem:[#allocation2 + $0x1c] sm:$0xf]  ;;  %v1465_v32 = vld [vmem:[#allocation2 + $0x18] sm:$0xe]  ;;  %v2143_v14 = vsel %vm5750_vm8, %v2141_v41, %v2142_v8  ;;  %v1645_v8 = vld [vmem:[#allocation2 + $0x30] sm:$0xf] }
 0x177   : > { %v1537_v38 = vrot.slane %v5308_v26, 5  ;;  %v2626_v56 = vadd.f32 %v2625_v19, %v5950_v55  ;;  %v4614_v0 = vrot.slane %v1465_v32, 9  ;;  %v1719_v55 = vrot.slane %v1717_v29, 5 }
 0x178   : > { %v2824_v25 = vpop.f32.mrf.mxu2  ;;  %v6123_v44 = vadd.f32 %v3303_v46, %v3131_v50  ;;  %v3869_v50 = vunpack.c.l.b16 %v1702_v13  ;;  %v6142_v19 = vrot.slane %v1723_v36, 5  ;;  %v6144_v13 = vld [vmem:[#allocation2 + $0x2c] sm:$0x1] }
 0x179   : > { %v2883_v34 = vadd.f32 %v2824_v25, %v2624_v16  ;;  %v4629_v16 = vrot.slane %v2073_v54, 9  ;;  %v1539_v52 = vrot.slane %v1537_v38, 4  ;;  %v1538_v26 = vsel %vm5750_vm8, %v4614_v0, %v1537_v38 }
 0x17a   : > { %4868 = vmatmul.msk.bf16.gmra.mxu3 %vm2317_vm5, %v5089_v24  ;;  %v3901_v5 = vpack.c.b16 %v3870_v35, %v3869_v50 }
 0x17d   : > { %v3306_v63 = vpop.f32.mrf.mxu0  ;;  %v3073_v48 = vpop.f32.mrf.mxu3 }
 0x17e   : > { %v3132_v23 = vadd.f32 %v3073_v48, %v2883_v34  ;;  %v2628_v46 = vpop.f32.mrf.mxu1  ;;  %v5090_v34 = vld [vmem:[#allocation2 + $0x18] sm:$0xff]  ;;  %v1716_v48 = vrot.slane %v1714_v22, 4  ;;  %v1541_v22 = vsel %vm5750_vm8, %v1539_v52, %v1540_v1  ;;  %v2146_v52 = vrot.slane %v6126_v61, 5 }
 0x17f   : > { %v3390_v50 = vunpack.c.l.b16 %v1541_v22  ;;  %v5311_v22 = vld [vmem:[#allocation2 + $0x2c] sm:$0x1] }
 0x180   : > { %4892 = vmatmul.msk.bf16.gmra.mxu0 %vm2317_vm5, %v3201_v43  ;;  %v2826_v24 = vpop.f32.mrf.mxu2  ;;  %4901 = vmatmul.msk.bf16.vlgmr.msra.gmra.mxu1 %vm2317_vm5, %v6105_v20  ;;  %v6140_v25 = vadd.f32 %v3306_v63, %v3132_v23  ;;  %v1729_v43 = vrot.slane %v1727_v60, 4  ;;  %v2140_v20 = vsel %vm5750_vm8, %v4629_v16, %v2139_v17  ;;  %v1720_v29 = vor.u32 %v1719_v55, %v1716_v48 }
 0x181   : > { %v2884_v9 = vadd.f32 %v2826_v24, %v2626_v56  ;;  %v1733_v17 = vshll.u32 %v6144_v13, 16  ;;  %v2629_v60 = vadd.f32 %v2628_v46, %v5848_v59  ;;  %v4102_v62 = vunpack.c.l.b16 %v2140_v20  ;;  %v2074_v46 = vld [vmem:[#allocation2 + $0x24] sm:$0xe] }
 0x182   : > { %v1730_v36 = vor.u32 %v1729_v43, %v6142_v19  ;;  %v4103_v56 = vunpack.c.l.b16 %v2143_v14  ;;  %v3389_v16 = vunpack.c.l.b16 %v1538_v26  ;;  %v1721_v1 = vrot.slane %v1720_v29, 4 }
 0x183   : > { %v1735_v35 = vrot.slane %v1733_v17, 5  ;;  %v1738_v48 = vshrl.u32 %v1645_v8, 16  ;;  %v1741_v55 = vshll.u32 %v1645_v8, 16  ;;  %v1466_v17 = vld [vmem:[#allocation2 + $0x24] sm:$0xe] }
 0x184   : > { %v4134_v0 = vpack.c.b16 %v4103_v56, %v4102_v62  ;;  %v3420_v59 = vpack.c.b16 %v3390_v50, %v3389_v16  ;;  %v1726_v61 = vsel %vm5555_vm4, %v1721_v1, %v6142_v19  ;;  %v4630_v62 = vrot.slane %v2074_v46, 9  ;;  %v5091_v1 = vld [vmem:[#allocation2 + $0x24] sm:$0xff]  ;;  %v6177_v46 = vld [vmem:[#allocation2 + $0x38] sm:$0x1] }
 0x185   : > { %v3308_v63 = vpop.f32.mrf.mxu0  ;;  %v3075_v54 = vpop.f32.mrf.mxu3  ;;  %4989 = vmatmul.msk.bf16.vlgmr.msra.gmra.mxu2 %vm2317_vm5, %v5090_v34  ;;  %v6160_v34 = vld [vmem:[#allocation2 + $0x34] sm:$0xf]  ;;  %v2148_v56 = vrot.slane %v2146_v52, 4  ;;  %v1740_v50 = vrot.slane %v1738_v48, 4 }
 0x186   : > { %v3133_v23 = vadd.f32 %v3075_v54, %v2884_v9  ;;  %v2630_v32 = vpop.f32.mrf.mxu1  ;;  %v1731_v9 = vrot.slane %v1730_v36, 4  ;;  %v1747_v43 = vshll.u32 %v6160_v34, 16  ;;  %v1751_v26 = vshrl.u32 %v6160_v34, 16 }
 0x188   : > { %v2829_v24 = vpop.f32.mrf.mxu2  ;;  %v6158_v41 = vadd.f32 %v3308_v63, %v3133_v23  ;;  %v5310_v63 = vld [vmem:[#allocation2 + $0x28] sm:$0xf]  ;;  %v1736_v36 = vsel %vm5555_vm4, %v1731_v9, %v1735_v35  ;;  %v1749_v8 = vrot.slane %v1747_v43, 5  ;;  %v4615_v9 = vrot.slane %v1466_v17, 9 }
 0x189   : > { %v2885_v38 = vadd.f32 %v2829_v24, %v2629_v60  ;;  %v1544_v54 = vrot.slane %v5310_v63, 5  ;;  %v2631_v60 = vadd.f32 %v2630_v32, %v5863_v21  ;;  %v2149_v24 = vrot.slane %v6144_v13, 5 }
 0x18a   : > { %5013 = vmatmul.msk.bf16.vlgmr.msra.gmra.mxu3 %vm2317_vm5, %v3901_v5  ;;  %v1547_v5 = vrot.slane %v5311_v22, 5  ;;  %v1753_v63 = vrot.slane %v1751_v26, 4  ;;  %v3871_v21 = vunpack.c.l.b16 %v1726_v61  ;;  %v3872_v32 = vunpack.c.l.b16 %v1736_v36 }
 0x18b   : > { %v1546_v35 = vrot.slane %v1544_v54, 4  ;;  %v2147_v13 = vsel %vm5750_vm8, %v4630_v62, %v2146_v52  ;;  %v1545_v43 = vsel %vm5750_vm8, %v4615_v9, %v1544_v54  ;;  %v1757_v22 = vshll.u32 %v6177_v46, 16  ;;  %v6193_v9 = vld [vmem:[#allocation2 + $0x40] sm:$0xf] }
 0x18c   : > { %v1754_v26 = vor.u32 %v1753_v63, %v1749_v8  ;;  %v3902_v61 = vpack.c.b16 %v3872_v32, %v3871_v21  ;;  %v4104_v17 = vunpack.c.l.b16 %v2147_v13  ;;  %v2075_v13 = vld [vmem:[#allocation2 + $0x30] sm:$0xe] }
 0x18d   : > { %v3311_v20 = vpop.f32.mrf.mxu0  ;;  %v3078_v14 = vpop.f32.mrf.mxu3 }
 0x18e   : > { %v3134_v23 = vadd.f32 %v3078_v14, %v2885_v38  ;;  %v2633_v29 = vpop.f32.mrf.mxu1  ;;  %v1743_v38 = vrot.slane %v1741_v55, 5 }
 0x18f   : > { %v2634_v36 = vadd.f32 %v2633_v29, %v5878_v57  ;;  %v2153_v29 = vrot.slane %v6160_v34, 5 }
 0x190   : > { %5037 = vmatmul.msk.bf16.vlgmr.msra.gmra.mxu0 %vm2317_vm5, %v4134_v0  ;;  %v2831_v16 = vpop.f32.mrf.mxu2  ;;  %4902 = vmatmul.msk.bf16.gmra.mxu1 %vm2317_vm5, %v3420_v59  ;;  %v6175_v14 = vadd.f32 %v3311_v20, %v3134_v23  ;;  %v2150_v0 = vsel %vm5750_vm8, %v2148_v56, %v2149_v24  ;;  %v1744_v59 = vor.u32 %v1743_v38, %v1740_v50  ;;  %v3391_v56 = vunpack.c.l.b16 %v1545_v43 }
 0x191   : > { %v2886_v19 = vadd.f32 %v2831_v16, %v2631_v60  ;;  %v1548_v20 = vsel %vm5750_vm8, %v1546_v35, %v1547_v5  ;;  %v4105_v60 = vunpack.c.l.b16 %v2150_v0  ;;  %v1755_v38 = vrot.slane %v1754_v26, 4  ;;  %v1647_v5 = vld [vmem:[#allocation2 + $0x3c] sm:$0xf]  ;;  %v5312_v0 = vld [vmem:[#allocation2 + $0x34] sm:$0xf] }
 0x192   : > { %v3392_v24 = vunpack.c.l.b16 %v1548_v20  ;;  %v1745_v16 = vrot.slane %v1744_v59, 4  ;;  %v1551_v59 = vrot.slane %v5312_v0, 5  ;;  %v1467_v20 = vld [vmem:[#allocation2 + $0x30] sm:$0xe]  ;;  %v1765_v26 = vshll.u32 %v1647_v5, 16 }
 0x194   : > { %v3421_v35 = vpack.c.b16 %v3392_v24, %v3391_v56  ;;  %v1750_v57 = vsel %vm5555_vm4, %v1745_v16, %v1749_v8  ;;  %v5313_v8 = vld [vmem:[#allocation2 + $0x38] sm:$0x1]  ;;  %v2156_v56 = vrot.slane %v6177_v46, 5  ;;  %v1767_v0 = vrot.slane %v1765_v26, 5 }
 0x195   : > { %v3313_v48 = vpop.f32.mrf.mxu0  ;;  %v3080_v55 = vpop.f32.mrf.mxu3  ;;  %4990 = vmatmul.msk.bf16.gmra.mxu2 %vm2317_vm5, %v5091_v1  ;;  %v1759_v1 = vrot.slane %v1757_v22, 5  ;;  %v1771_v22 = vshll.u32 %v6193_v9, 16 }
 0x196   : > { %v3135_v23 = vadd.f32 %v3080_v55, %v2886_v19  ;;  %v2635_v52 = vpop.f32.mrf.mxu1  ;;  %v4135_v19 = vpack.c.b16 %v4105_v60, %v4104_v17  ;;  %v4631_v60 = vrot.slane %v2075_v13, 9 }
 0x197   : > { %v1760_v32 = vsel %vm5555_vm4, %v1755_v38, %v1759_v1  ;;  %v2636_v34 = vadd.f32 %v2635_v52, %v5894_v18  ;;  %v4616_v1 = vrot.slane %v1467_v20, 9  ;;  %v6208_v18 = vrot.slane %v1771_v22, 5 }
 0x198   : > { %v2834_v62 = vpop.f32.mrf.mxu2  ;;  %v6190_v50 = vadd.f32 %v3313_v48, %v3135_v23  ;;  %v1762_v48 = vshrl.u32 %v1647_v5, 16  ;;  %v1775_v23 = vshrl.u32 %v6193_v9, 16  ;;  %v3874_v38 = vunpack.c.l.b16 %v1760_v32 }
 0x199   : > { %v2887_v54 = vadd.f32 %v2834_v62, %v2634_v36  ;;  %v3873_v36 = vunpack.c.l.b16 %v1750_v57  ;;  %v2155_v62 = vrot.slane %v2153_v29, 4  ;;  %v1553_v5 = vrot.slane %v1551_v59, 4 }
 0x19a   : > { %5014 = vmatmul.msk.bf16.gmra.mxu3 %vm2317_vm5, %v3902_v61  ;;  %v1554_v61 = vrot.slane %v5313_v8, 5  ;;  %v1777_v52 = vrot.slane %v1775_v23, 4  ;;  %v1552_v13 = vsel %vm5750_vm8, %v4616_v1, %v1551_v59 }
 0x19b   : > { %v2157_v46 = vsel %vm5750_vm8, %v2155_v62, %v2156_v56  ;;  %v3903_v32 = vpack.c.b16 %v3874_v38, %v3873_v36  ;;  %v1649_v56 = vld [vmem:[#allocation2 + $0x48] sm:$0xf] }
 0x19c   : > { %v1778_v22 = vor.u32 %v1777_v52, %v6208_v18 }
 0x19d   : > { %v3316_v63 = vpop.f32.mrf.mxu0  ;;  %v3083_v21 = vpop.f32.mrf.mxu3 }
 0x19e   : > { %v3136_v55 = vadd.f32 %v3083_v21, %v2887_v54  ;;  %v2638_v43 = vpop.f32.mrf.mxu1  ;;  %v5092_v54 = vld [vmem:[#allocation2 + $0x30] sm:$0xff]  ;;  %v1764_v21 = vrot.slane %v1762_v48, 4  ;;  %v1555_v48 = vsel %vm5750_vm8, %v1553_v5, %v1554_v61  ;;  %v2160_v5 = vrot.slane %v6193_v9, 5 }
 0x19f   : > { %v2639_v23 = vadd.f32 %v2638_v43, %v5909_v49  ;;  %v3394_v36 = vunpack.c.l.b16 %v1555_v48  ;;  %v2076_v43 = vld [vmem:[#allocation2 + $0x3c] sm:$0xe]  ;;  %v5315_v48 = vld [vmem:[#allocation2 + $0x44] sm:$0x1] }
 0x1a0   : > { %5038 = vmatmul.msk.bf16.gmra.mxu0 %vm2317_vm5, %v4135_v19  ;;  %v2836_v17 = vpop.f32.mrf.mxu2  ;;  %4903 = vmatmul.msk.bf16.gmra.mxu1 %vm2317_vm5, %v3421_v35  ;;  %v6206_v24 = vadd.f32 %v3316_v63, %v3136_v55  ;;  %v6210_v19 = vld [vmem:[#allocation2 + $0x44] sm:$0x1]  ;;  %v2154_v35 = vsel %vm5750_vm8, %v4631_v60, %v2153_v29  ;;  %v1768_v26 = vor.u32 %v1767_v0, %v1764_v21  ;;  %v3393_v60 = vunpack.c.l.b16 %v1552_v13 }
 0x1a1   : > { %v2888_v16 = vadd.f32 %v2836_v17, %v2636_v34  ;;  %v1781_v29 = vshll.u32 %v6210_v19, 16  ;;  %v4106_v8 = vunpack.c.l.b16 %v2154_v35  ;;  %v4107_v34 = vunpack.c.l.b16 %v2157_v46 }
 0x1a2   : > { %v1769_v61 = vrot.slane %v1768_v26, 4  ;;  %v3422_v49 = vpack.c.b16 %v3394_v36, %v3393_v60  ;;  %v1786_v21 = vshrl.u32 %v1649_v56, 16  ;;  %v1789_v0 = vshll.u32 %v1649_v56, 16 }
 0x1a3   : > { %v1783_v38 = vrot.slane %v1781_v29, 5  ;;  %v4136_v1 = vpack.c.b16 %v4107_v34, %v4106_v8  ;;  %v1468_v29 = vld [vmem:[#allocation2 + $0x3c] sm:$0xe]  ;;  %v4632_v8 = vrot.slane %v2076_v43, 9  ;;  %v2162_v34 = vrot.slane %v2160_v5, 4 }
 0x1a4   : > { %v1774_v9 = vsel %vm5555_vm4, %v1769_v61, %v6208_v18  ;;  %v1788_v36 = vrot.slane %v1786_v21, 4  ;;  %v5093_v61 = vld [vmem:[#allocation2 + $0x3c] sm:$0xff]  ;;  %v6243_v43 = vld [vmem:[#allocation2 + $0x50] sm:$0x1] }
 0x1a5   : > { %v3318_v57 = vpop.f32.mrf.mxu0  ;;  %v3085_v63 = vpop.f32.mrf.mxu3  ;;  %4991 = vmatmul.msk.bf16.gmra.mxu2 %vm2317_vm5, %v5092_v54  ;;  %v6226_v54 = vld [vmem:[#allocation2 + $0x4c] sm:$0xf] }
 0x1a6   : > { %v3137_v55 = vadd.f32 %v3085_v63, %v2888_v16  ;;  %v2640_v20 = vpop.f32.mrf.mxu1  ;;  %v1779_v16 = vrot.slane %v1778_v22, 4  ;;  %v1795_v52 = vshll.u32 %v6226_v54, 16  ;;  %v1799_v13 = vshrl.u32 %v6226_v54, 16 }
 0x1a8   : > { %v2839_v17 = vpop.f32.mrf.mxu2  ;;  %v6224_v62 = vadd.f32 %v3318_v57, %v3137_v55  ;;  %v5314_v57 = vld [vmem:[#allocation2 + $0x40] sm:$0xf]  ;;  %v1784_v22 = vsel %vm5555_vm4, %v1779_v16, %v1783_v38  ;;  %v1797_v56 = vrot.slane %v1795_v52, 5  ;;  %v4617_v16 = vrot.slane %v1468_v29, 9 }
 0x1a9   : > { %v2889_v59 = vadd.f32 %v2839_v17, %v2639_v23  ;;  %v1558_v63 = vrot.slane %v5314_v57, 5  ;;  %v2641_v23 = vadd.f32 %v2640_v20, %v5931_v28  ;;  %v2163_v17 = vrot.slane %v6210_v19, 5 }
 0x1aa   : > { %5015 = vmatmul.msk.bf16.gmra.mxu3 %vm2317_vm5, %v3903_v32  ;;  %v1561_v32 = vrot.slane %v5315_v48, 5  ;;  %v1801_v57 = vrot.slane %v1799_v13, 4  ;;  %v3875_v28 = vunpack.c.l.b16 %v1774_v9  ;;  %v3876_v20 = vunpack.c.l.b16 %v1784_v22 }
 0x1ab   : > { %v1560_v38 = vrot.slane %v1558_v63, 4  ;;  %v2161_v19 = vsel %vm5750_vm8, %v4632_v8, %v2160_v5  ;;  %v1559_v52 = vsel %vm5750_vm8, %v4617_v16, %v1558_v63  ;;  %v1805_v48 = vshll.u32 %v6243_v43, 16  ;;  %v6259_v16 = vld [vmem:[#allocation2 + $0x58] sm:$0xf] }
 0x1ac   : > { %v1802_v13 = vor.u32 %v1801_v57, %v1797_v56  ;;  %v3904_v9 = vpack.c.b16 %v3876_v20, %v3875_v28  ;;  %v4108_v29 = vunpack.c.l.b16 %v2161_v19  ;;  %v2077_v19 = vld [vmem:[#allocation2 + $0x48] sm:$0xe] }
 0x1ad   : > { %v3321_v35 = vpop.f32.mrf.mxu0  ;;  %v3088_v46 = vpop.f32.mrf.mxu3 }
 0x1ae   : > { %v3138_v55 = vadd.f32 %v3088_v46, %v2889_v59  ;;  %v2643_v26 = vpop.f32.mrf.mxu1  ;;  %v1791_v59 = vrot.slane %v1789_v0, 5 }
 0x1af   : > { %v2644_v22 = vadd.f32 %v2643_v26, %v5955_v7  ;;  %v2167_v26 = vrot.slane %v6226_v54, 5 }
 0x1b0   : > { %5039 = vmatmul.msk.bf16.gmra.mxu0 %vm2317_vm5, %v4136_v1  ;;  %v2841_v60 = vpop.f32.mrf.mxu2  ;;  %4904 = vmatmul.msk.bf16.gmra.mxu1 %vm2317_vm5, %v3422_v49  ;;  %v6241_v46 = vadd.f32 %v3321_v35, %v3138_v55  ;;  %v2164_v1 = vsel %vm5750_vm8, %v2162_v34, %v2163_v17  ;;  %v1792_v49 = vor.u32 %v1791_v59, %v1788_v36  ;;  %v3395_v34 = vunpack.c.l.b16 %v1559_v52 }
 0x1b1   : > { %v2890_v18 = vadd.f32 %v2841_v60, %v2641_v23  ;;  %v1562_v35 = vsel %vm5750_vm8, %v1560_v38, %v1561_v32  ;;  %v4109_v23 = vunpack.c.l.b16 %v2164_v1  ;;  %v1803_v59 = vrot.slane %v1802_v13, 4  ;;  %v1651_v32 = vld [vmem:[#allocation2 + $0x54] sm:$0xf]  ;;  %v5316_v1 = vld [vmem:[#allocation2 + $0x4c] sm:$0xf] }
 0x1b2   : > { %v3396_v17 = vunpack.c.l.b16 %v1562_v35  ;;  %v1793_v60 = vrot.slane %v1792_v49, 4  ;;  %v1565_v49 = vrot.slane %v5316_v1, 5  ;;  %v1469_v35 = vld [vmem:[#allocation2 + $0x48] sm:$0xe]  ;;  %v1813_v13 = vshll.u32 %v1651_v32, 16 }
 0x1b4   : > { %v3423_v38 = vpack.c.b16 %v3396_v17, %v3395_v34  ;;  %v1798_v7 = vsel %vm5555_vm4, %v1793_v60, %v1797_v56  ;;  %v5317_v56 = vld [vmem:[#allocation2 + $0x50] sm:$0x1]  ;;  %v2170_v34 = vrot.slane %v6243_v43, 5  ;;  %v1815_v1 = vrot.slane %v1813_v13, 5 }
 0x1b5   : > { %v3323_v21 = vpop.f32.mrf.mxu0  ;;  %v3090_v0 = vpop.f32.mrf.mxu3  ;;  %4992 = vmatmul.msk.bf16.gmra.mxu2 %vm2317_vm5, %v5093_v61  ;;  %v1807_v61 = vrot.slane %v1805_v48, 5  ;;  %v1819_v48 = vshll.u32 %v6259_v16, 16 }
 0x1b6   : > { %v3139_v55 = vadd.f32 %v3090_v0, %v2890_v18  ;;  %v2645_v5 = vpop.f32.mrf.mxu1  ;;  %v4137_v18 = vpack.c.b16 %v4109_v23, %v4108_v29  ;;  %v4633_v23 = vrot.slane %v2077_v19, 9 }
 0x1b7   : > { %v1808_v20 = vsel %vm5555_vm4, %v1803_v59, %v1807_v61  ;;  %v2646_v54 = vadd.f32 %v2645_v5, %v5968_v42  ;;  %v4618_v61 = vrot.slane %v1469_v35, 9  ;;  %v6274_v42 = vrot.slane %v1819_v48, 5 }
 0x1b8   : > { %v2844_v8 = vpop.f32.mrf.mxu2  ;;  %v6256_v36 = vadd.f32 %v3323_v21, %v3139_v55  ;;  %v1810_v21 = vshrl.u32 %v1651_v32, 16  ;;  %v1823_v55 = vshrl.u32 %v6259_v16, 16  ;;  %v3878_v59 = vunpack.c.l.b16 %v1808_v20 }
 0x1b9   : > { %v2891_v63 = vadd.f32 %v2844_v8, %v2644_v22  ;;  %v3877_v22 = vunpack.c.l.b16 %v1798_v7  ;;  %v2169_v8 = vrot.slane %v2167_v26, 4  ;;  %v1567_v32 = vrot.slane %v1565_v49, 4 }
 0x1ba   : > { %5016 = vmatmul.msk.bf16.gmra.mxu3 %vm2317_vm5, %v3904_v9  ;;  %v1568_v9 = vrot.slane %v5317_v56, 5  ;;  %v1825_v5 = vrot.slane %v1823_v55, 4  ;;  %v1566_v19 = vsel %vm5750_vm8, %v4618_v61, %v1565_v49 }
 0x1bb   : > { %v2171_v43 = vsel %vm5750_vm8, %v2169_v8, %v2170_v34  ;;  %v3905_v20 = vpack.c.b16 %v3878_v59, %v3877_v22  ;;  %v1653_v34 = vld [vmem:[#allocation2 + $0x60] sm:$0xf] }
 0x1bc   : > { %v1826_v48 = vor.u32 %v1825_v5, %v6274_v42 }
 0x1bd   : > { %v3326_v57 = vpop.f32.mrf.mxu0  ;;  %v3093_v28 = vpop.f32.mrf.mxu3 }
 0x1be   : > { %v3140_v0 = vadd.f32 %v3093_v28, %v2891_v63  ;;  %v2648_v52 = vpop.f32.mrf.mxu1  ;;  %v5094_v63 = vld [vmem:[#allocation2 + $0x48] sm:$0xff]  ;;  %v1812_v28 = vrot.slane %v1810_v21, 4  ;;  %v1569_v21 = vsel %vm5750_vm8, %v1567_v32, %v1568_v9  ;;  %v2174_v32 = vrot.slane %v6259_v16, 5 }
 0x1bf   : > { %v2649_v55 = vadd.f32 %v2648_v52, %v5854_v4  ;;  %v3398_v22 = vunpack.c.l.b16 %v1569_v21  ;;  %v2078_v52 = vld [vmem:[#allocation2 + $0x54] sm:$0xe]  ;;  %v5319_v21 = vld [vmem:[#allocation2 + $0x5c] sm:$0x1] }
 0x1c0   : > { %5040 = vmatmul.msk.bf16.gmra.mxu0 %vm2317_vm5, %v4137_v18  ;;  %v2846_v29 = vpop.f32.mrf.mxu2  ;;  %4905 = vmatmul.msk.bf16.gmra.mxu1 %vm2317_vm5, %v3423_v38  ;;  %v6272_v17 = vadd.f32 %v3326_v57, %v3140_v0  ;;  %v6276_v18 = vld [vmem:[#allocation2 + $0x5c] sm:$0x1]  ;;  %v2168_v38 = vsel %vm5750_vm8, %v4633_v23, %v2167_v26  ;;  %v1816_v13 = vor.u32 %v1815_v1, %v1812_v28  ;;  %v3397_v23 = vunpack.c.l.b16 %v1566_v19 }
 0x1c1   : > { %v2892_v60 = vadd.f32 %v2846_v29, %v2646_v54  ;;  %v1829_v26 = vshll.u32 %v6276_v18, 16  ;;  %v4110_v56 = vunpack.c.l.b16 %v2168_v38  ;;  %v4111_v54 = vunpack.c.l.b16 %v2171_v43 }
 0x1c2   : > { %v1817_v9 = vrot.slane %v1816_v13, 4  ;;  %v3424_v4 = vpack.c.b16 %v3398_v22, %v3397_v23  ;;  %v1834_v28 = vshrl.u32 %v1653_v34, 16  ;;  %v1837_v1 = vshll.u32 %v1653_v34, 16 }
 0x1c3   : > { %v1831_v59 = vrot.slane %v1829_v26, 5  ;;  %v4138_v61 = vpack.c.b16 %v4111_v54, %v4110_v56  ;;  %v1470_v26 = vld [vmem:[#allocation2 + $0x54] sm:$0xe]  ;;  %v4634_v56 = vrot.slane %v2078_v52, 9  ;;  %v2176_v54 = vrot.slane %v2174_v32, 4 }
 0x1c4   : > { %v1822_v16 = vsel %vm5555_vm4, %v1817_v9, %v6274_v42  ;;  %v1836_v22 = vrot.slane %v1834_v28, 4 }
 0x1c5   : > { %v3328_v7 = vpop.f32.mrf.mxu0  ;;  %v3095_v57 = vpop.f32.mrf.mxu3  ;;  %4993 = vmatmul.msk.bf16.gmra.mxu2 %vm2317_vm5, %v5094_v63  ;;  %v6292_v63 = vld [vmem:[#allocation2 + $0x64] sm:$0xf] }
 0x1c6   : > { %v3141_v0 = vadd.f32 %v3095_v57, %v2892_v60  ;;  %v2650_v35 = vpop.f32.mrf.mxu1  ;;  %v1827_v60 = vrot.slane %v1826_v48, 4  ;;  %v1843_v5 = vshll.u32 %v6292_v63, 16  ;;  %v1847_v19 = vshrl.u32 %v6292_v63, 16 }
 0x1c8   : > { %v2849_v29 = vpop.f32.mrf.mxu2  ;;  %v6290_v8 = vadd.f32 %v3328_v7, %v3141_v0  ;;  %v5318_v7 = vld [vmem:[#allocation2 + $0x58] sm:$0xf]  ;;  %v1832_v48 = vsel %vm5555_vm4, %v1827_v60, %v1831_v59  ;;  %v6307_v34 = vrot.slane %v1843_v5, 5  ;;  %v4619_v59 = vrot.slane %v1470_v26, 9 }
 0x1c9   : > { %v2893_v49 = vadd.f32 %v2849_v29, %v2649_v55  ;;  %v1572_v57 = vrot.slane %v5318_v7, 5  ;;  %v2651_v55 = vadd.f32 %v2650_v35, %v5872_v37  ;;  %v2177_v29 = vrot.slane %v6276_v18, 5  ;;  %v5095_v60 = vld [vmem:[#allocation2 + $0x54] sm:$0xff]  ;;  %v6311_v7 = vld [vmem:[#allocation2 + $0x68] sm:$0x1] }
 0x1ca   : > { %5017 = vmatmul.msk.bf16.gmra.mxu3 %vm2317_vm5, %v3905_v20  ;;  %v1575_v20 = vrot.slane %v5319_v21, 5  ;;  %v1849_v37 = vrot.slane %v1847_v19, 4  ;;  %v3879_v35 = vunpack.c.l.b16 %v1822_v16  ;;  %v3880_v52 = vunpack.c.l.b16 %v1832_v48 }
 0x1cb   : > { %v2175_v18 = vsel %vm5750_vm8, %v4634_v56, %v2174_v32  ;;  %v1573_v5 = vsel %vm5750_vm8, %v4619_v59, %v1572_v57  ;;  %v1853_v21 = vshll.u32 %v6311_v7, 16  ;;  %v1655_v59 = vld [vmem:[#allocation2 + $0x6c] sm:$0xf] }
 0x1cc   : > { %v1850_v19 = vor.u32 %v1849_v37, %v6307_v34  ;;  %v3906_v32 = vpack.c.b16 %v3880_v52, %v3879_v35  ;;  %v4112_v26 = vunpack.c.l.b16 %v2175_v18  ;;  %v5320_v37 = vld [vmem:[#allocation2 + $0x64] sm:$0xf] }
 0x1cd   : > { %v3331_v38 = vpop.f32.mrf.mxu0  ;;  %v3098_v43 = vpop.f32.mrf.mxu3  ;;  %v1579_v35 = vrot.slane %v5320_v37, 5 }
 0x1ce   : > { %v3142_v0 = vadd.f32 %v3098_v43, %v2893_v49  ;;  %v2653_v13 = vpop.f32.mrf.mxu1  ;;  %v1839_v49 = vrot.slane %v1837_v1, 5  ;;  %v1574_v43 = vrot.slane %v1572_v57, 4 }
 0x1cf   : > { %v2654_v48 = vadd.f32 %v2653_v13, %v5888_v2 }
 0x1d0   : > { %5041 = vmatmul.msk.bf16.gmra.mxu0 %vm2317_vm5, %v4138_v61  ;;  %v2851_v23 = vpop.f32.mrf.mxu2  ;;  %4906 = vmatmul.msk.bf16.gmra.mxu1 %vm2317_vm5, %v3424_v4  ;;  %v6309_v42 = vadd.f32 %v3331_v38, %v3142_v0  ;;  %v2178_v61 = vsel %vm5750_vm8, %v2176_v54, %v2177_v29  ;;  %v1840_v4 = vor.u32 %v1839_v49, %v1836_v22  ;;  %v3399_v54 = vunpack.c.l.b16 %v1573_v5 }
 0x1d1   : > { %v2894_v9 = vadd.f32 %v2851_v23, %v2651_v55  ;;  %v1576_v38 = vsel %vm5750_vm8, %v1574_v43, %v1575_v20  ;;  %v4113_v55 = vunpack.c.l.b16 %v2178_v61  ;;  %v1851_v49 = vrot.slane %v1850_v19, 4  ;;  %v6329_v43 = vld [vmem:[#allocation2 + $0x70] sm:$0xf] }
 0x1d2   : > { %v3400_v29 = vunpack.c.l.b16 %v1576_v38  ;;  %v1841_v22 = vrot.slane %v1840_v4, 4  ;;  %v1855_v20 = vrot.slane %v1853_v21, 5  ;;  %v1858_v5 = vshrl.u32 %v1655_v59, 16 }
 0x1d3   : > { %v4139_v2 = vpack.c.b16 %v4113_v55, %v4112_v26  ;;  %v1861_v19 = vshll.u32 %v1655_v59, 16  ;;  %v1867_v21 = vshll.u32 %v6329_v43, 16 }
 0x1d4   : > { %v3425_v13 = vpack.c.b16 %v3400_v29, %v3399_v54  ;;  %v1846_v61 = vsel %vm5555_vm4, %v1841_v22, %v6307_v34  ;;  %v1856_v4 = vsel %vm5555_vm4, %v1851_v49, %v1855_v20  ;;  %v1581_v29 = vrot.slane %v1579_v35, 4  ;;  %v5096_v49 = vld [vmem:[#allocation2 + $0x60] sm:$0xff] }
 0x1d5   : > { %v3333_v28 = vpop.f32.mrf.mxu0  ;;  %v3100_v1 = vpop.f32.mrf.mxu3  ;;  %4994 = vmatmul.msk.bf16.gmra.mxu2 %vm2317_vm5, %v5095_v60  ;;  %v2079_v60 = vld [vmem:[#allocation2 + $0x60] sm:$0xe]  ;;  %v3881_v20 = vunpack.c.l.b16 %v1846_v61  ;;  %v6346_v37 = vrot.slane %v1867_v21, 5 }
 0x1d6   : > { %v3143_v0 = vadd.f32 %v3100_v1, %v2894_v9  ;;  %v2655_v16 = vpop.f32.mrf.mxu1  ;;  %v2181_v9 = vrot.slane %v6292_v63, 5  ;;  %v1471_v1 = vld [vmem:[#allocation2 + $0x60] sm:$0xe] }
 0x1d7   : > { %v2656_v26 = vadd.f32 %v2655_v16, %v5902_v33  ;;  %v4620_v54 = vrot.slane %v1471_v1, 9  ;;  %v1860_v33 = vrot.slane %v1858_v5, 4  ;;  %v1863_v16 = vrot.slane %v1861_v19, 5 }
 0x1d8   : > { %v2854_v56 = vpop.f32.mrf.mxu2  ;;  %v6325_v23 = vadd.f32 %v3333_v28, %v3143_v0  ;;  %v4635_v28 = vrot.slane %v2079_v60, 9  ;;  %v1871_v0 = vshrl.u32 %v6329_v43, 16  ;;  %v2183_v55 = vrot.slane %v2181_v9, 4 }
 0x1d9   : > { %v2895_v57 = vadd.f32 %v2854_v56, %v2654_v48  ;;  %v2184_v56 = vrot.slane %v6311_v7, 5  ;;  %v3882_v60 = vunpack.c.l.b16 %v1856_v4 }
 0x1da   : > { %5018 = vmatmul.msk.bf16.gmra.mxu3 %vm2317_vm5, %v3906_v32  ;;  %v5321_v32 = vld [vmem:[#allocation2 + $0x68] sm:$0x1]  ;;  %v2182_v59 = vsel %vm5750_vm8, %v4635_v28, %v2181_v9 }
 0x1db   : > { %v1582_v48 = vrot.slane %v5321_v32, 5  ;;  %v2185_v7 = vsel %vm5750_vm8, %v2183_v55, %v2184_v56  ;;  %v3907_v9 = vpack.c.b16 %v3882_v60, %v3881_v20  ;;  %v4114_v28 = vunpack.c.l.b16 %v2182_v59  ;;  %v6360_v56 = vld [vmem:[#allocation2 + $0x7c] sm:$0xf]  ;;  %v2080_v60 = vld [vmem:[#allocation2 + $0x6c] sm:$0xe] }
 0x1dc   : > { %v4115_v32 = vunpack.c.l.b16 %v2185_v7  ;;  %v2188_v59 = vrot.slane %v6329_v43, 5 }
 0x1dd   : > { %v3336_v52 = vpop.f32.mrf.mxu0  ;;  %v3103_v18 = vpop.f32.mrf.mxu3 }
 0x1de   : > { %v3144_v38 = vadd.f32 %v3103_v18, %v2895_v57  ;;  %v2658_v63 = vpop.f32.mrf.mxu1  ;;  %v6348_v18 = vld [vmem:[#allocation2 + $0x74] sm:$0x1] }
 0x1df   : > { %v1877_v21 = vshll.u32 %v6348_v18, 16 }
 0x1e0   : > { %5042 = vmatmul.msk.bf16.gmra.mxu0 %vm2317_vm5, %v4139_v2  ;;  %v2856_v34 = vpop.f32.mrf.mxu2  ;;  %4907 = vmatmul.msk.bf16.gmra.mxu1 %vm2317_vm5, %v3425_v13  ;;  %v6342_v57 = vadd.f32 %v3336_v52, %v3144_v38  ;;  %v1873_v2 = vrot.slane %v1871_v0, 4  ;;  %v1580_v13 = vsel %vm5750_vm8, %v4620_v54, %v1579_v35  ;;  %v1583_v52 = vsel %vm5750_vm8, %v1581_v29, %v1582_v48  ;;  %v1657_v48 = vld [vmem:[#allocation2 + $0x78] sm:$0xf] }
 0x1e1   : > { %v2896_v22 = vadd.f32 %v2856_v34, %v2656_v26  ;;  %v1864_v38 = vor.u32 %v1863_v16, %v1860_v33  ;;  %v2659_v0 = vadd.f32 %v2658_v63, %v5919_v15  ;;  %v3401_v35 = vunpack.c.l.b16 %v1580_v13 }
 0x1e2   : > { %v1874_v19 = vor.u32 %v1873_v2, %v6346_v37  ;;  %v3402_v26 = vunpack.c.l.b16 %v1583_v52  ;;  %v1882_v33 = vshrl.u32 %v1657_v48, 16  ;;  %v1885_v15 = vshll.u32 %v1657_v48, 16  ;;  %v5322_v52 = vld [vmem:[#allocation2 + $0x70] sm:$0xf] }
 0x1e3   : > { %v1865_v54 = vrot.slane %v1864_v38, 4  ;;  %v1891_v63 = vshll.u32 %v6360_v56, 16  ;;  %v1895_v16 = vshrl.u32 %v6360_v56, 16 }
 0x1e4   : > { %v1875_v29 = vrot.slane %v1874_v19, 4  ;;  %v3426_v20 = vpack.c.b16 %v3402_v26, %v3401_v35  ;;  %v4636_v19 = vrot.slane %v2080_v60, 9  ;;  %v1887_v26 = vrot.slane %v1885_v15, 5 }
 0x1e5   : > { %v3338_v61 = vpop.f32.mrf.mxu0  ;;  %v3105_v4 = vpop.f32.mrf.mxu3  ;;  %4995 = vmatmul.msk.bf16.gmra.mxu2 %vm2317_vm5, %v5096_v49  ;;  %v4140_v49 = vpack.c.b16 %v4115_v32, %v4114_v28  ;;  %v1870_v28 = vsel %vm5555_vm4, %v1865_v54, %v6346_v37  ;;  %v2190_v32 = vrot.slane %v2188_v59, 4  ;;  %v1897_v37 = vrot.slane %v1895_v16, 4  ;;  %v5097_v54 = vld [vmem:[#allocation2 + $0x6c] sm:$0xff] }
 0x1e6   : > { %v3145_v1 = vadd.f32 %v3105_v4, %v2896_v22  ;;  %v2660_v5 = vpop.f32.mrf.mxu1  ;;  %v1879_v22 = vrot.slane %v1877_v21, 5  ;;  %v1586_v4 = vrot.slane %v5322_v52, 5  ;;  %v1472_v21 = vld [vmem:[#allocation2 + $0x6c] sm:$0xe]  ;;  %v3883_v60 = vunpack.c.l.b16 %v1870_v28 }
 0x1e8   : > { %v2859_v55 = vpop.f32.mrf.mxu2  ;;  %v6366_v2 = vadd.f32 %v3338_v61, %v3145_v1  ;;  %v1880_v43 = vsel %vm5555_vm4, %v1875_v29, %v1879_v22  ;;  %v2191_v61 = vrot.slane %v6348_v18, 5  ;;  %v1884_v1 = vrot.slane %v1882_v33, 4  ;;  %v6381_v33 = vld [vmem:[#allocation2 + $0x80] sm:$0x1] }
 0x1e9   : > { %v2897_v34 = vadd.f32 %v2859_v55, %v2659_v0  ;;  %v2661_v0 = vadd.f32 %v2660_v5, %v5943_v47  ;;  %v6377_v55 = vrot.slane %v1891_v63, 5  ;;  %v4621_v29 = vrot.slane %v1472_v21, 9  ;;  %v5323_v47 = vld [vmem:[#allocation2 + $0x74] sm:$0x1] }
 0x1ea   : > { %5019 = vmatmul.msk.bf16.gmra.mxu3 %vm2317_vm5, %v3907_v9  ;;  %v1588_v22 = vrot.slane %v1586_v4, 4  ;;  %v1589_v5 = vrot.slane %v5323_v47, 5  ;;  %v3884_v18 = vunpack.c.l.b16 %v1880_v43  ;;  %v1888_v15 = vor.u32 %v1887_v26, %v1884_v1 }
 0x1eb   : > { %v1898_v52 = vor.u32 %v1897_v37, %v6377_v55  ;;  %v1659_v37 = vld [vmem:[#allocation2 + $0x84] sm:$0xf] }
 0x1ec   : > { %v1889_v26 = vrot.slane %v1888_v15, 4 }
 0x1ed   : > { %v3341_v7 = vpop.f32.mrf.mxu0  ;;  %v3108_v13 = vpop.f32.mrf.mxu3 }
 0x1ee   : > { %v3146_v9 = vadd.f32 %v3108_v13, %v2897_v34  ;;  %v2663_v38 = vpop.f32.mrf.mxu1  ;;  %v1590_v13 = vsel %vm5750_vm8, %v1588_v22, %v1589_v5  ;;  %v2195_v22 = vrot.slane %v6360_v56, 5  ;;  %v1906_v56 = vshrl.u32 %v1659_v37, 16 }
 0x1ef   : > { %v3404_v1 = vunpack.c.l.b16 %v1590_v13 }
 0x1f0   : > { %5043 = vmatmul.msk.bf16.gmra.mxu0 %vm2317_vm5, %v4140_v49  ;;  %v2861_v35 = vpop.f32.mrf.mxu2  ;;  %4908 = vmatmul.msk.bf16.gmra.mxu1 %vm2317_vm5, %v3426_v20  ;;  %v6379_v48 = vadd.f32 %v3341_v7, %v3146_v9  ;;  %v2189_v49 = vsel %vm5750_vm8, %v4636_v19, %v2188_v59  ;;  %v2192_v20 = vsel %vm5750_vm8, %v2190_v32, %v2191_v61  ;;  %v1901_v9 = vshll.u32 %v6381_v33, 16 }
 0x1f1   : > { %v2898_v34 = vadd.f32 %v2861_v35, %v2661_v0  ;;  %v1587_v7 = vsel %vm5750_vm8, %v4621_v29, %v1586_v4  ;;  %v3908_v59 = vpack.c.b16 %v3884_v18, %v3883_v60  ;;  %v2664_v19 = vadd.f32 %v2663_v38, %v5964_v30  ;;  %v2081_v29 = vld [vmem:[#allocation2 + $0x78] sm:$0xe]  ;;  %v5324_v30 = vld [vmem:[#allocation2 + $0x7c] sm:$0xf] }
 0x1f2   : > { %v4116_v21 = vunpack.c.l.b16 %v2189_v49  ;;  %v4117_v0 = vunpack.c.l.b16 %v2192_v20  ;;  %v3403_v61 = vunpack.c.l.b16 %v1587_v7  ;;  %v1899_v4 = vrot.slane %v1898_v52, 4  ;;  %v1473_v7 = vld [vmem:[#allocation2 + $0x78] sm:$0xe] }
 0x1f3   : > { %v1593_v38 = vrot.slane %v5324_v30, 5  ;;  %v1894_v20 = vsel %vm5555_vm4, %v1889_v26, %v6377_v55 }
 0x1f4   : > { %v4141_v47 = vpack.c.b16 %v4117_v0, %v4116_v21  ;;  %v3427_v5 = vpack.c.b16 %v3404_v1, %v3403_v61  ;;  %v2198_v21 = vrot.slane %v6381_v33, 5  ;;  %v4622_v0 = vrot.slane %v1473_v7, 9  ;;  %v5325_v61 = vld [vmem:[#allocation2 + $0x80] sm:$0x1] }
 0x1f5   : > { %v3343_v63 = vpop.f32.mrf.mxu0  ;;  %v3110_v16 = vpop.f32.mrf.mxu3  ;;  %4996 = vmatmul.msk.bf16.gmra.mxu2 %vm2317_vm5, %v5097_v54  ;;  %v1903_v54 = vrot.slane %v1901_v9, 5  ;;  %v1909_v9 = vshll.u32 %v1659_v37, 16  ;;  %v1596_v1 = vrot.slane %v5325_v61, 5 }
 0x1f6   : > { %v3147_v28 = vadd.f32 %v3110_v16, %v2898_v34  ;;  %v2665_v43 = vpop.f32.mrf.mxu1  ;;  %v6397_v34 = vld [vmem:[#allocation2 + $0x88] sm:$0xf]  ;;  %v4637_v16 = vrot.slane %v2081_v29, 9  ;;  %v1594_v30 = vsel %vm5750_vm8, %v4622_v0, %v1593_v38 }
 0x1f7   : > { %v1904_v15 = vsel %vm5555_vm4, %v1899_v4, %v1903_v54  ;;  %v5098_v4 = vld [vmem:[#allocation2 + $0x78] sm:$0xff]  ;;  %v3885_v54 = vunpack.c.l.b16 %v1894_v20  ;;  %v1911_v33 = vrot.slane %v1909_v9, 5 }
 0x1f8   : > { %v2864_v32 = vpop.f32.mrf.mxu2  ;;  %v6399_v60 = vadd.f32 %v3343_v63, %v3147_v28  ;;  %v1919_v63 = vshrl.u32 %v6397_v34, 16  ;;  %v2666_v28 = vadd.f32 %v2665_v43, %v5973_v3  ;;  %v3886_v29 = vunpack.c.l.b16 %v1904_v15 }
 0x1f9   : > { %v2899_v35 = vadd.f32 %v2864_v32, %v2664_v19  ;;  %v2197_v19 = vrot.slane %v2195_v22, 4  ;;  %v1595_v32 = vrot.slane %v1593_v38, 4  ;;  %v2196_v3 = vsel %vm5750_vm8, %v4637_v16, %v2195_v22 }
 0x1fa   : > { %5020 = vmatmul.msk.bf16.gmra.mxu3 %vm2317_vm5, %v3908_v59  ;;  %v1915_v59 = vshll.u32 %v6397_v34, 16  ;;  %v1908_v43 = vrot.slane %v1906_v56, 4  ;;  %v3909_v22 = vpack.c.b16 %v3886_v29, %v3885_v54  ;;  %v4118_v16 = vunpack.c.l.b16 %v2196_v3  ;;  %v2082_v54 = vld [vmem:[#allocation2 + $0x84] sm:$0xe] }
 0x1fb   : > { %v2202_v29 = vrot.slane %v6397_v34, 5 }
 0x1fc   : > { %v6416_v37 = vrot.slane %v1915_v59, 5  ;;  %v1912_v9 = vor.u32 %v1911_v33, %v1908_v43 }
 0x1fd   : > { %v3346_v18 = vpop.f32.mrf.mxu0  ;;  %v3113_v49 = vpop.f32.mrf.mxu3 }
 0x1fe   : > { %v3148_v13 = vadd.f32 %v3113_v49, %v2899_v35  ;;  %v3504_v52 = vpop.f32.mrf.mxu1  ;;  %v6424_v49 = vld [vmem:[#allocation2 + $0x8c] sm:$0x1] }
 0x1ff   : > { %v1925_v38 = vshll.u32 %v6424_v49, 16 }
 0x200   : > { %5044 = vmatmul.msk.bf16.gmra.mxu0 %vm2317_vm5, %v4141_v47  ;;  %v2866_v55 = vpop.f32.mrf.mxu2  ;;  %4909 = vmatmul.msk.bf16.gmra.mxu1 %vm2317_vm5, %v3427_v5  ;;  %v6412_v35 = vadd.f32 %v3346_v18, %v3148_v13  ;;  %v1921_v47 = vrot.slane %v1919_v63, 4  ;;  %v2199_v5 = vsel %vm5750_vm8, %v2197_v19, %v2198_v21  ;;  %v1597_v18 = vsel %vm5750_vm8, %v1595_v32, %v1596_v1  ;;  %v1661_v21 = vld [vmem:[#allocation2 + $0x90] sm:$0xf] }
 0x201   : > { %v2900_v26 = vadd.f32 %v2866_v55, %v2666_v28  ;;  %v4119_v56 = vunpack.c.l.b16 %v2199_v5  ;;  %v3405_v63 = vunpack.c.l.b16 %v1594_v30  ;;  %v3406_v28 = vunpack.c.l.b16 %v1597_v18  ;;  %v6429_v55 = vld [vmem:[#allocation2 + $0x94] sm:$0xf]  ;;  %v5326_v18 = vld [vmem:[#allocation2 + $0x88] sm:$0xf] }
 0x202   : > { %v1922_v59 = vor.u32 %v1921_v47, %v6416_v37  ;;  %v1913_v32 = vrot.slane %v1912_v9, 4  ;;  %v3584_v1 = vadd.f32 %v3504_v52, %v5989_v12  ;;  %v1930_v3 = vshrl.u32 %v1661_v21, 16  ;;  %v1474_v52 = vld [vmem:[#allocation2 + $0x84] sm:$0xe] }
 0x203   : > { %v4142_v0 = vpack.c.b16 %v4119_v56, %v4118_v16  ;;  %v1933_v43 = vshll.u32 %v1661_v21, 16  ;;  %v1939_v33 = vshll.u32 %v6429_v55, 16  ;;  %v4638_v12 = vrot.slane %v2082_v54, 9  ;;  %v5099_v21 = vld [vmem:[#allocation2 + $0x84] sm:$0xff] }
 0x204   : > { %v1923_v61 = vrot.slane %v1922_v59, 4  ;;  %v1918_v34 = vsel %vm5555_vm4, %v1913_v32, %v6416_v37  ;;  %v4623_v37 = vrot.slane %v1474_v52, 9 }
 0x205   : > { %v3348_v20 = vpop.f32.mrf.mxu0  ;;  %v3115_v15 = vpop.f32.mrf.mxu3  ;;  %4997 = vmatmul.msk.bf16.gmra.mxu2 %vm2317_vm5, %v5098_v4  ;;  %v1927_v4 = vrot.slane %v1925_v38, 5  ;;  %v1935_v38 = vrot.slane %v1933_v43, 5 }
 0x206   : > { %v3149_v7 = vadd.f32 %v3115_v15, %v2900_v26  ;;  %v3506_v13 = vpop.f32.mrf.mxu1  ;;  %v3428_v26 = vpack.c.b16 %v3406_v28, %v3405_v63  ;;  %v1600_v15 = vrot.slane %v5326_v18, 5  ;;  %v1932_v28 = vrot.slane %v1930_v3, 4 }
 0x207   : > { %v1928_v9 = vsel %vm5555_vm4, %v1923_v61, %v1927_v4  ;;  %v3585_v59 = vadd.f32 %v3506_v13, %v5997_v10  ;;  %v3887_v18 = vunpack.c.l.b16 %v1918_v34  ;;  %v2203_v10 = vsel %vm5750_vm8, %v4638_v12, %v2202_v29  ;;  %v6468_v12 = vld [vmem:[%s6760_s3] ss:$0 sm:$0xff] }
 0x208   : > { %v3753_v19 = vpop.f32.mrf.mxu2  ;;  %v6435_v47 = vadd.f32 %v3348_v20, %v3149_v7  ;;  %v2204_v20 = vrot.slane %v2202_v29, 4  ;;  %v2205_v7 = vrot.slane %v6424_v49, 5  ;;  %v1602_v32 = vrot.slane %v1600_v15, 4 }
 0x209   : > { %v3833_v16 = vadd.f32 %v3753_v19, %v3584_v1  ;;  %v6449_v19 = vrot.slane %v1939_v33, 5  ;;  %v5327_v1 = vld [vmem:[#allocation2 + $0x8c] sm:$0x1]  ;;  %v1601_v33 = vsel %vm5750_vm8, %v4623_v37, %v1600_v15 }
 0x20a   : > { %5021 = vmatmul.msk.bf16.gmra.mxu3 %vm2317_vm5, %v3909_v22  ;;  %6771 = vst [vmem:[#allocation9_spill] sm:$0xff] %v6435_v47  ;;  %v1943_v22 = vshrl.u32 %v6429_v55, 16  ;;  %v1603_v61 = vrot.slane %v5327_v1, 5  ;;  %v6451_v47 = vld [vmem:[#allocation2 + $0x98] sm:$0x1]  ;;  %v2206_v13 = vsel %vm5750_vm8, %v2204_v20, %v2205_v7  ;;  %v4120_v20 = vunpack.c.l.b16 %v2203_v10 }
 0x20b   : > { %v1949_v29 = vshll.u32 %v6451_v47, 16  ;;  %v4121_v7 = vunpack.c.l.b16 %v2206_v13 }
 0x20c   : > { %v1945_v4 = vrot.slane %v1943_v22, 4 }
 0x20d   : > { %v4219_v5 = vpop.f32.mrf.mxu0  ;;  %v3986_v30 = vpop.f32.mrf.mxu3 }
 0x20e   : > { %v6438_v56 = vpop.f32.mrf.mxu1  ;;  %v4066_v54 = vadd.f32 %v3986_v30, %v3833_v16  ;;  %v1604_v30 = vsel %vm5750_vm8, %v1602_v32, %v1603_v61  ;;  %v1946_v22 = vor.u32 %v1945_v4, %v6449_v19  ;;  %v1951_v32 = vrot.slane %v1949_v29, 5  ;;  %v2083_v4 = vld [vmem:[#allocation2 + $0x90] sm:$0xe] }
 0x210   : > { %5045 = vmatmul.msk.bf16.gmra.mxu0 %vm2317_vm5, %v4142_v0  ;;  %v3755_v63 = vpop.f32.mrf.mxu2  ;;  %4910 = vmatmul.msk.bf16.gmra.mxu1 %vm2317_vm5, %v3428_v26  ;;  %v3888_v0 = vunpack.c.l.b16 %v1928_v9  ;;  %v1936_v26 = vor.u32 %v1935_v38, %v1932_v28  ;;  %v4299_v16 = vadd.f32 %v4219_v5, %v4066_v54  ;;  %v3407_v28 = vunpack.c.l.b16 %v1601_v33  ;;  %v5328_v33 = vld [vmem:[#allocation2 + $0x94] sm:$0xf] }
 0x211   : > { %v3834_v49 = vadd.f32 %v3755_v63, %v3585_v59  ;;  %v1663_v59 = vld [vmem:[#allocation2 + $0x9c] sm:$0xf]  ;;  %v3408_v38 = vunpack.c.l.b16 %v1604_v30  ;;  %v1947_v37 = vrot.slane %v1946_v22, 4  ;;  %v1607_v30 = vrot.slane %v5328_v33, 5 }
 0x212   : > { %v3910_v34 = vpack.c.b16 %v3888_v0, %v3887_v18  ;;  %v1937_v5 = vrot.slane %v1936_v26, 4  ;;  %v4335_v1 = vadd.f32 %v6468_v12, %v4299_v16  ;;  %v1954_v54 = vshrl.u32 %v1663_v59, 16 }
 0x213   : > { %v4143_v18 = vpack.c.b16 %v4121_v7, %v4120_v20  ;;  %v2209_v0 = vrot.slane %v6429_v55, 5  ;;  %v3586_v26 = vadd.f32 %v6438_v56, %v6007_v53  ;;  %v1952_v53 = vsel %vm5555_vm4, %v1947_v37, %v1951_v32  ;;  %v6496_v37 = vld [vmem:[#allocation2 + $0xa4] sm:$0x1]  ;;  %v5100_v32 = vld [vmem:[#allocation2 + $0x90] sm:$0xff] }
 0x214   : > { %v1942_v16 = vsel %vm5555_vm4, %v1937_v5, %v6449_v19  ;;  %v1956_v56 = vrot.slane %v1954_v54, 4 }
 0x215   : > { %v4221_v3 = vpop.f32.mrf.mxu0  ;;  %v3988_v43 = vpop.f32.mrf.mxu3  ;;  %4998 = vmatmul.msk.bf16.gmra.mxu2 %vm2317_vm5, %v5099_v21  ;;  %v6472_v21 = vld [vmem:[#allocation2 + $0xa0] sm:$0xf]  ;;  %v3889_v54 = vunpack.c.l.b16 %v1942_v16 }
 0x216   : > { %v4067_v52 = vadd.f32 %v3988_v43, %v3834_v49  ;;  %v3511_v9 = vpop.f32.mrf.mxu1  ;;  %v1957_v49 = vshll.u32 %v1663_v59, 16  ;;  %v1963_v10 = vshll.u32 %v6472_v21, 16  ;;  %v1967_v13 = vshrl.u32 %v6472_v21, 16 }
 0x217   : > { %v3429_v43 = vpack.c.b16 %v3408_v38, %v3407_v28  ;;  %v2211_v59 = vrot.slane %v2209_v0, 4  ;;  %v3587_v19 = vadd.f32 %v3511_v9, %v6015_v51 }
 0x218   : > { %v4300_v15 = vadd.f32 %v4221_v3, %v4067_v52  ;;  %v3758_v63 = vpop.f32.mrf.mxu2  ;;  %v4639_v52 = vrot.slane %v2083_v4, 9  ;;  %v1959_v7 = vrot.slane %v1957_v49, 5  ;;  %v6491_v28 = vrot.slane %v1963_v10, 5 }
 0x219   : > { %v3835_v55 = vadd.f32 %v3758_v63, %v3586_v26  ;;  %v1969_v38 = vrot.slane %v1967_v13, 4  ;;  %v3890_v49 = vunpack.c.l.b16 %v1952_v53 }
 0x21a   : > { %v4336_v61 = vadd.f32 %v6468_v12, %v4300_v15  ;;  %5022 = vmatmul.msk.bf16.gmra.mxu3 %vm2317_vm5, %v3910_v34  ;;  %v1475_v34 = vld [vmem:[#allocation2 + $0x90] sm:$0xe]  ;;  %v2212_v15 = vrot.slane %v6451_v47, 5  ;;  %v2210_v13 = vsel %vm5750_vm8, %v4639_v52, %v2209_v0 }
 0x21b   : > { %v4624_v63 = vrot.slane %v1475_v34, 9  ;;  %v1970_v9 = vor.u32 %v1969_v38, %v6491_v28  ;;  %v3911_v16 = vpack.c.b16 %v3890_v49, %v3889_v54  ;;  %v4122_v0 = vunpack.c.l.b16 %v2210_v13 }
 0x21c   : > { %v5128_v3 = vpack.c.bf16 %v4336_v61, %v4335_v1  ;;  %v1609_v1 = vrot.slane %v1607_v30, 4  ;;  %v5329_v61 = vld [vmem:[#allocation2 + $0x98] sm:$0x1]  ;;  %v2213_v51 = vsel %vm5750_vm8, %v2211_v59, %v2212_v15 }
 0x21d   : > { %v4224_v22 = vpop.f32.mrf.mxu0  ;;  %v3991_v29 = vpop.f32.mrf.mxu3  ;;  %v1610_v4 = vrot.slane %v5329_v61, 5  ;;  %v1608_v26 = vsel %vm5750_vm8, %v4624_v63, %v1607_v30  ;;  %v1971_v15 = vrot.slane %v1970_v9, 4  ;;  %v2216_v63 = vrot.slane %v6472_v21, 5 }
 0x21e   : > { %5129 = vst [vmem:[%s6485_s7] sm:$0xff] %v5128_v3   ;;  %v3514_v20 = vpop.f32.mrf.mxu1  ;;  %v4068_v47 = vadd.f32 %v3991_v29, %v3835_v55  ;;  %v1973_v3 = vshll.u32 %v6496_v37, 16  ;;  %v4123_v55 = vunpack.c.l.b16 %v2213_v51  ;;  %v2219_v21 = vrot.slane %v6496_v37, 5 }
 0x21f   : > { %v2218_v51 = vrot.slane %v2216_v63, 4 }
 0x220   : > { %5046 = vmatmul.msk.bf16.gmra.mxu0 %vm2317_vm5, %v4143_v18  ;;  %v3760_v5 = vpop.f32.mrf.mxu2  ;;  %4911 = vmatmul.msk.bf16.gmra.mxu1 %vm2317_vm5, %v3429_v43  ;;  %v1960_v18 = vor.u32 %v1959_v7, %v1956_v56  ;;  %v1611_v43 = vsel %vm5750_vm8, %v1609_v1, %v1610_v4  ;;  %v4301_v52 = vadd.f32 %v4224_v22, %v4068_v47  ;;  %v3409_v7 = vunpack.c.l.b16 %v1608_v26  ;;  %v1665_v1 = vld [vmem:[#allocation2 + $0xa8] sm:$0xf] }
 0x221   : > { %v3836_v10 = vadd.f32 %v3760_v5, %v3587_v19  ;;  %v3410_v59 = vunpack.c.l.b16 %v1611_v43  ;;  %v1975_v38 = vrot.slane %v1973_v3, 5  ;;  %v2084_v19 = vld [vmem:[#allocation2 + $0x9c] sm:$0xe]  ;;  %v4144_v22 = vpack.c.b16 %v4123_v55, %v4122_v0  ;;  %v5330_v43 = vld [vmem:[#allocation2 + $0xa0] sm:$0xf] }
 0x222   : > { %v1961_v56 = vrot.slane %v1960_v18, 4  ;;  %v4337_v61 = vadd.f32 %v6468_v12, %v4301_v52  ;;  %v3588_v18 = vadd.f32 %v3514_v20, %v6025_v31  ;;  %v1978_v9 = vshrl.u32 %v1665_v1, 16  ;;  %v1476_v0 = vld [vmem:[#allocation2 + $0x9c] sm:$0xe] }
 0x223   : > { %v3430_v54 = vpack.c.b16 %v3410_v59, %v3409_v7  ;;  %v1976_v47 = vsel %vm5555_vm4, %v1971_v15, %v1975_v38  ;;  %v2220_v7 = vsel %vm5750_vm8, %v2218_v51, %v2219_v21  ;;  %v5101_v15 = vld [vmem:[#allocation2 + $0x9c] sm:$0xff]  ;;  %v4625_v38 = vrot.slane %v1476_v0, 9 }
 0x224   : > { %v1966_v49 = vsel %vm5555_vm4, %v1961_v56, %v6491_v28  ;;  %v3892_v55 = vunpack.c.l.b16 %v1976_v47  ;;  %v1980_v59 = vrot.slane %v1978_v9, 4  ;;  %v4125_v47 = vunpack.c.l.b16 %v2220_v7 }
 0x225   : > { %v4226_v33 = vpop.f32.mrf.mxu0  ;;  %v3993_v29 = vpop.f32.mrf.mxu3  ;;  %4999 = vmatmul.msk.bf16.gmra.mxu2 %vm2317_vm5, %v5100_v32  ;;  %v4640_v32 = vrot.slane %v2084_v19, 9 }
 0x226   : > { %v4069_v34 = vadd.f32 %v3993_v29, %v3836_v10  ;;  %v3516_v53 = vpop.f32.mrf.mxu1  ;;  %v6519_v10 = vld [vmem:[#allocation2 + $0xac] sm:$0xf]  ;;  %v1981_v29 = vshll.u32 %v1665_v1, 16 }
 0x227   : > { %v1987_v52 = vshll.u32 %v6519_v10, 16  ;;  %v1991_v37 = vshrl.u32 %v6519_v10, 16  ;;  %v3589_v31 = vadd.f32 %v3516_v53, %v6033_v27  ;;  %v2217_v56 = vsel %vm5750_vm8, %v4640_v32, %v2216_v63  ;;  %v6534_v53 = vld [vmem:[#allocation2 + $0xb0] sm:$0x1] }
 0x228   : > { %v4302_v30 = vadd.f32 %v4226_v33, %v4069_v34  ;;  %v3763_v5 = vpop.f32.mrf.mxu2  ;;  %v1614_v33 = vrot.slane %v5330_v43, 5  ;;  %v3891_v34 = vunpack.c.l.b16 %v1966_v49  ;;  %v1983_v1 = vrot.slane %v1981_v29, 5 }
 0x229   : > { %v1993_v27 = vrot.slane %v1991_v37, 4  ;;  %v4124_v49 = vunpack.c.l.b16 %v2217_v56  ;;  %v1997_v29 = vshll.u32 %v6534_v53, 16 }
 0x22a   : > { %v4338_v4 = vadd.f32 %v6468_v12, %v4302_v30  ;;  %5023 = vmatmul.msk.bf16.gmra.mxu3 %vm2317_vm5, %v3911_v16  ;;  %v3837_v16 = vadd.f32 %v3763_v5, %v3588_v18  ;;  %v1616_v19 = vrot.slane %v1614_v33, 4  ;;  %v5331_v30 = vld [vmem:[#allocation2 + $0xa4] sm:$0x1]  ;;  %v1615_v21 = vsel %vm5750_vm8, %v4625_v38, %v1614_v33 }
 0x22b   : > { %v1617_v5 = vrot.slane %v5331_v30, 5  ;;  %v1984_v18 = vor.u32 %v1983_v1, %v1980_v59  ;;  %v1999_v7 = vrot.slane %v1997_v29, 5 }
 0x22c   : > { %v5133_v13 = vpack.c.bf16 %v4338_v4, %v4337_v61 }
 0x22d   : > { %v4229_v3 = vpop.f32.mrf.mxu0  ;;  %v3996_v26 = vpop.f32.mrf.mxu3  ;;  %v1985_v33 = vrot.slane %v1984_v18, 4  ;;  %v1477_v18 = vld [vmem:[#allocation2 + $0xa8] sm:$0xe] }
 0x22e   : > { %5205 = vst [vmem:[%s6485_s7 + $0x8] sm:$0xff] %v5133_v13   ;;  %v3519_v28 = vpop.f32.mrf.mxu1  ;;  %v4070_v61 = vadd.f32 %v3996_v26, %v3837_v16  ;;  %v1618_v13 = vsel %vm5750_vm8, %v1616_v19, %v1617_v5 }
 0x22f   : > { %v3412_v37 = vunpack.c.l.b16 %v1618_v13  ;;  %v3590_v5 = vadd.f32 %v3519_v28, %v6042_v6 }
 0x230   : > { %5047 = vmatmul.msk.bf16.gmra.mxu0 %vm2317_vm5, %v4144_v22  ;;  %v3765_v20 = vpop.f32.mrf.mxu2  ;;  %4912 = vmatmul.msk.bf16.gmra.mxu1 %vm2317_vm5, %v3430_v54  ;;  %v6532_v22 = vrot.slane %v1987_v52, 5  ;;  %v3912_v54 = vpack.c.b16 %v3892_v55, %v3891_v34  ;;  %v4303_v51 = vadd.f32 %v4229_v3, %v4070_v61  ;;  %v3411_v52 = vunpack.c.l.b16 %v1615_v21  ;;  %v1667_v34 = vld [vmem:[#allocation2 + $0xb4] sm:$0xf]  ;;  %v6543_v55 = vld [vmem:[#allocation2 + $0xb8] sm:$0xf] }
 0x231   : > { %v3838_v4 = vadd.f32 %v3765_v20, %v3589_v31  ;;  %v4145_v31 = vpack.c.b16 %v4125_v47, %v4124_v49  ;;  %v2002_v59 = vshrl.u32 %v1667_v34, 16  ;;  %v2011_v38 = vshll.u32 %v6543_v55, 16  ;;  %v2085_v49 = vld [vmem:[#allocation2 + $0xa8] sm:$0xe] }
 0x232   : > { %v1994_v43 = vor.u32 %v1993_v27, %v6532_v22  ;;  %v4339_v20 = vadd.f32 %v6468_v12, %v4303_v51  ;;  %v2015_v19 = vshrl.u32 %v6543_v55, 16  ;;  %v3431_v1 = vpack.c.b16 %v3412_v37, %v3411_v52 }
 0x233   : > { %v2223_v61 = vrot.slane %v6519_v10, 5  ;;  %v1990_v21 = vsel %vm5555_vm4, %v1985_v33, %v6532_v22  ;;  %v2004_v6 = vrot.slane %v2002_v59, 4  ;;  %v6558_v51 = vrot.slane %v2011_v38, 5 }
 0x234   : > { %v1995_v3 = vrot.slane %v1994_v43, 4  ;;  %v2017_v10 = vrot.slane %v2015_v19, 4  ;;  %v4641_v29 = vrot.slane %v2085_v49, 9  ;;  %v2226_v22 = vrot.slane %v6534_v53, 5 }
 0x235   : > { %v4231_v63 = vpop.f32.mrf.mxu0  ;;  %v3998_v32 = vpop.f32.mrf.mxu3  ;;  %5000 = vmatmul.msk.bf16.gmra.mxu2 %vm2317_vm5, %v5101_v15  ;;  %v2005_v15 = vshll.u32 %v1667_v34, 16  ;;  %v4626_v52 = vrot.slane %v1477_v18, 9  ;;  %v5333_v34 = vld [vmem:[#allocation2 + $0xb0] sm:$0x1] }
 0x236   : > { %v4071_v9 = vadd.f32 %v3998_v32, %v3838_v4  ;;  %v3521_v26 = vpop.f32.mrf.mxu1  ;;  %v2000_v13 = vsel %vm5555_vm4, %v1995_v3, %v1999_v7  ;;  %v1624_v33 = vrot.slane %v5333_v34, 5  ;;  %v3893_v7 = vunpack.c.l.b16 %v1990_v21 }
 0x237   : > { %v2007_v28 = vrot.slane %v2005_v15, 5 }
 0x238   : > { %v4304_v16 = vadd.f32 %v4231_v63, %v4071_v9  ;;  %v3768_v0 = vpop.f32.mrf.mxu2  ;;  %v5332_v63 = vld [vmem:[#allocation2 + $0xac] sm:$0xf]  ;;  %v3591_v9 = vadd.f32 %v3521_v26, %v6050_v45  ;;  %v2018_v45 = vor.u32 %v2017_v10, %v6558_v51  ;;  %v2224_v26 = vsel %vm5750_vm8, %v4641_v29, %v2223_v61  ;;  %v4595_v29 = vld [vmem:[%s5531_s24 + $0x10] sm:$0xf] }
 0x239   : > { %v3839_v32 = vadd.f32 %v3768_v0, %v3590_v5  ;;  %v5102_v0 = vld [vmem:[#allocation2 + $0xa8] sm:$0xff]  ;;  %v2008_v59 = vor.u32 %v2007_v28, %v2004_v6  ;;  %416 = vst.msk [vmem:[#allocation2 + $0xd0] sm:$0xf] %vm308_vm0, %v4595_v29 }
 0x23a   : > { %v4340_v56 = vadd.f32 %v6468_v12, %v4304_v16  ;;  %5024 = vmatmul.msk.bf16.gmra.mxu3 %vm2317_vm5, %v3912_v54  ;;  %v1621_v54 = vrot.slane %v5332_v63, 5  ;;  %v2225_v16 = vrot.slane %v2223_v61, 4  ;;  %v4126_v63 = vunpack.c.l.b16 %v2224_v26 }
 0x23b   : > { %v2009_v21 = vrot.slane %v2008_v59, 4  ;;  %v4596_v59 = vld [vmem:[%s5531_s24 + $0x14] sm:$0x1] }
 0x23c   : > { %v5138_v30 = vpack.c.bf16 %v4340_v56, %v4339_v20  ;;  %v1623_v37 = vrot.slane %v1621_v54, 4  ;;  %v6564_v20 = vld [vmem:[#allocation2 + $0xbc] sm:$0x1]  ;;  %v2227_v53 = vsel %vm5750_vm8, %v2225_v16, %v2226_v22  ;;  %417 = vst.msk [vmem:[#allocation2 + $0xd4] sm:$0x1] %vm311_vm1, %v4596_v59 }
 0x23d   : > { %v4234_v4 = vpop.f32.mrf.mxu0  ;;  %v4001_v27 = vpop.f32.mrf.mxu3  ;;  %v2021_v15 = vshll.u32 %v6564_v20, 16 }
 0x23e   : > { %5206 = vst [vmem:[%s6485_s7 + $0x10] sm:$0xff] %v5138_v30   ;;  %v3524_v47 = vpop.f32.mrf.mxu1  ;;  %v4072_v56 = vadd.f32 %v4001_v27, %v3839_v32  ;;  %v1622_v30 = vsel %vm5750_vm8, %v4626_v52, %v1621_v54  ;;  %v1625_v5 = vsel %vm5750_vm8, %v1623_v37, %v1624_v33  ;;  %v4127_v32 = vunpack.c.l.b16 %v2227_v53  ;;  %v4594_v54 = vld [vmem:[%s5531_s24 + $0xc] sm:$0xf]  ;;  %v6587_v37 = vld [vmem:[#allocation2 + $0xc4] sm:$0xf]  ;;  %v6772_v33 = vld [vmem:[#allocation6_spill] sm:$0xff] }
 0x23f   : > { %v3413_v28 = vunpack.c.l.b16 %v1622_v30  ;;  %v3414_v10 = vunpack.c.l.b16 %v1625_v5  ;;  %415 = vst.msk [vmem:[#allocation2 + $0xcc] sm:$0xf] %vm308_vm0, %v4594_v54  ;;  %v2230_v52 = vrot.slane %v6543_v55, 5  ;;  %v1478_v30 = vld [vmem:[#allocation2 + $0xb4] sm:$0xe]  ;;  %v2039_v5 = vshrl.u32 %v6587_v37, 16 }
 0x240   : > { %5048 = vmatmul.msk.bf16.gmra.mxu0 %vm2317_vm5, %v4145_v31  ;;  %v3770_v43 = vpop.f32.mrf.mxu2  ;;  %4913 = vmatmul.msk.bf16.gmra.mxu1 %vm2317_vm5, %v3431_v1  ;;  %v3894_v31 = vunpack.c.l.b16 %v2000_v13  ;;  %v4305_v1 = vadd.f32 %v4234_v4, %v4072_v56  ;;  %v2019_v13 = vrot.slane %v2018_v45, 4  ;;  %v4146_v22 = vpack.c.b16 %v4127_v32, %v4126_v63  ;;  %v6773_v63 = vld [vmem:[#allocation7_spill] sm:$0xff] }
 0x241   : > { %v3840_v3 = vadd.f32 %v3770_v43, %v3591_v9  ;;  %v2023_v9 = vrot.slane %v2021_v15, 5  ;;  %v1669_v43 = vld [vmem:[#allocation2 + $0xc0] sm:$0xf]  ;;  %v3592_v56 = vadd.f32 %v3524_v47, %v6772_v33  ;;  %v2035_v47 = vshll.u32 %v6587_v37, 16 }
 0x242   : > { %v3913_v61 = vpack.c.b16 %v3894_v31, %v3893_v7  ;;  %v4341_v16 = vadd.f32 %v6468_v12, %v4305_v1  ;;  %v2086_v7 = vld [vmem:[#allocation2 + $0xb4] sm:$0xe]  ;;  %v2026_v31 = vshrl.u32 %v1669_v43, 16  ;;  %v2029_v55 = vshll.u32 %v1669_v43, 16  ;;  %v5335_v43 = vld [vmem:[#allocation2 + $0xbc] sm:$0x1] }
 0x243   : > { %v2024_v53 = vsel %vm5555_vm4, %v2019_v13, %v2023_v9  ;;  %v1631_v54 = vrot.slane %v5335_v43, 5 }
 0x244   : > { %v3896_v13 = vunpack.c.l.b16 %v2024_v53  ;;  %v2031_v29 = vrot.slane %v2029_v55, 5 }
 0x245   : > { %v4236_v38 = vpop.f32.mrf.mxu0  ;;  %v4003_v19 = vpop.f32.mrf.mxu3  ;;  %5001 = vmatmul.msk.bf16.gmra.mxu2 %vm2317_vm5, %v5102_v0  ;;  %v2014_v0 = vsel %vm5555_vm4, %v2009_v21, %v6558_v51  ;;  %v5334_v51 = vld [vmem:[#allocation2 + $0xb8] sm:$0xf] }
 0x246   : > { %v4073_v27 = vadd.f32 %v4003_v19, %v3840_v3  ;;  %v3526_v49 = vpop.f32.mrf.mxu1  ;;  %v3432_v3 = vpack.c.b16 %v3414_v10, %v3413_v28  ;;  %v1628_v15 = vrot.slane %v5334_v51, 5  ;;  %v3895_v1 = vunpack.c.l.b16 %v2014_v0  ;;  %v5103_v28 = vld [vmem:[#allocation2 + $0xb4] sm:$0xff] }
 0x247   : > { %v3593_v32 = vadd.f32 %v3526_v49, %v6773_v63  ;;  %v4627_v10 = vrot.slane %v1478_v30, 9  ;;  %v6602_v0 = vrot.slane %v2035_v47, 5 }
 0x248   : > { %v4306_v18 = vadd.f32 %v4236_v38, %v4073_v27  ;;  %v3773_v6 = vpop.f32.mrf.mxu2  ;;  %v4642_v27 = vrot.slane %v2086_v7, 9  ;;  %v1630_v9 = vrot.slane %v1628_v15, 4  ;;  %v3914_v49 = vpack.c.b16 %v3896_v13, %v3895_v1  ;;  %v6774_v13 = vld [vmem:[#allocation8_spill] sm:$0xff] }
 0x249   : > { %v3841_v38 = vadd.f32 %v3773_v6, %v3592_v56  ;;  %v2028_v6 = vrot.slane %v2026_v31, 4  ;;  %v1629_v7 = vsel %vm5750_vm8, %v4627_v10, %v1628_v15  ;;  %v1671_v10 = vld [vmem:[#allocation2 + $0xcc] sm:$0xf] }
 0x24a   : > { %v4342_v4 = vadd.f32 %v6468_v12, %v4306_v18  ;;  %5025 = vmatmul.msk.bf16.gmra.mxu3 %vm2317_vm5, %v3913_v61  ;;  %v2233_v61 = vrot.slane %v6564_v20, 5  ;;  %v2232_v18 = vrot.slane %v2230_v52, 4  ;;  %v2041_v20 = vrot.slane %v2039_v5, 4 }
 0x24b   : > { %v1632_v31 = vsel %vm5750_vm8, %v1630_v9, %v1631_v54  ;;  %v2032_v59 = vor.u32 %v2031_v29, %v2028_v6  ;;  %v3415_v1 = vunpack.c.l.b16 %v1629_v7  ;;  %v6621_v9 = vld [vmem:[#allocation2 + $0xd0] sm:$0xf]  ;;  %v2087_v29 = vld [vmem:[#allocation2 + $0xc0] sm:$0xe]  ;;  %v2053_v7 = vshll.u32 %v1671_v10, 16 }
 0x24c   : > { %v5143_v34 = vpack.c.bf16 %v4342_v4, %v4341_v16  ;;  %v2042_v55 = vor.u32 %v2041_v20, %v6602_v0 }
 0x24d   : > { %v4239_v45 = vpop.f32.mrf.mxu0  ;;  %v4006_v26 = vpop.f32.mrf.mxu3 }
 0x24e   : > { %5207 = vst [vmem:[%s6485_s7 + $0x18] sm:$0xff] %v5143_v34   ;;  %v3529_v19 = vpop.f32.mrf.mxu1  ;;  %v4074_v16 = vadd.f32 %v4006_v26, %v3841_v38  ;;  %v2231_v34 = vsel %vm5750_vm8, %v4642_v27, %v2230_v52  ;;  %v3416_v27 = vunpack.c.l.b16 %v1632_v31  ;;  %v2059_v31 = vshll.u32 %v6621_v9, 16 }
 0x24f   : > { %v4128_v38 = vunpack.c.l.b16 %v2231_v34 }
 0x250   : > { %5049 = vmatmul.msk.bf16.gmra.mxu0 %vm2317_vm5, %v4146_v22  ;;  %v3775_v21 = vpop.f32.mrf.mxu2  ;;  %4914 = vmatmul.msk.bf16.gmra.mxu1 %vm2317_vm5, %v3432_v3  ;;  %v6604_v22 = vld [vmem:[#allocation2 + $0xc8] sm:$0x1]  ;;  %v2234_v3 = vsel %vm5750_vm8, %v2232_v18, %v2233_v61  ;;  %v4307_v26 = vadd.f32 %v4239_v45, %v4074_v16  ;;  %v2033_v61 = vrot.slane %v2032_v59, 4  ;;  %v2043_v45 = vrot.slane %v2042_v55, 4  ;;  %v5104_v55 = vld [vmem:[#allocation2 + $0xc0] sm:$0xff] }
 0x251   : > { %v3842_v4 = vadd.f32 %v3775_v21, %v3593_v32  ;;  %v2045_v52 = vshll.u32 %v6604_v22, 16  ;;  %v4129_v47 = vunpack.c.l.b16 %v2234_v3  ;;  %v3594_v18 = vadd.f32 %v3529_v19, %v6774_v13 }
 0x252   : > { %v4343_v15 = vadd.f32 %v6468_v12, %v4307_v26  ;;  %v2237_v16 = vrot.slane %v6587_v37, 5  ;;  %v2050_v3 = vshrl.u32 %v1671_v10, 16  ;;  %v2063_v59 = vshrl.u32 %v6621_v9, 16 }
 0x253   : > { %v2047_v32 = vrot.slane %v2045_v52, 5  ;;  %v4147_v6 = vpack.c.b16 %v4129_v47, %v4128_v38  ;;  %v5337_v47 = vld [vmem:[#allocation2 + $0xc8] sm:$0x1] }
 0x254   : > { %v2239_v52 = vrot.slane %v2237_v16, 4 }
 0x255   : > { %v4241_v33 = vpop.f32.mrf.mxu0  ;;  %v4008_v56 = vpop.f32.mrf.mxu3  ;;  %5002 = vmatmul.msk.bf16.gmra.mxu2 %vm2317_vm5, %v5103_v28  ;;  %v3433_v28 = vpack.c.b16 %v3416_v27, %v3415_v1  ;;  %v2048_v19 = vsel %vm5555_vm4, %v2043_v45, %v2047_v32  ;;  %v2055_v45 = vrot.slane %v2053_v7, 5  ;;  %v2061_v32 = vrot.slane %v2059_v31, 5 }
 0x256   : > { %v4075_v53 = vadd.f32 %v4008_v56, %v3842_v4  ;;  %v3531_v51 = vpop.f32.mrf.mxu1  ;;  %v5336_v4 = vld [vmem:[#allocation2 + $0xc4] sm:$0xf]  ;;  %v1479_v56 = vld [vmem:[#allocation2 + $0xc0] sm:$0xe] }
 0x257   : > { %v1635_v20 = vrot.slane %v5336_v4, 5  ;;  %v3595_v37 = vadd.f32 %v3531_v51, %v6092_v40  ;;  %v4628_v38 = vrot.slane %v1479_v56, 9  ;;  %v2065_v40 = vrot.slane %v2063_v59, 4 }
 0x258   : > { %v4308_v30 = vadd.f32 %v4241_v33, %v4075_v53  ;;  %v3778_v5 = vpop.f32.mrf.mxu2  ;;  %v2038_v33 = vsel %vm5555_vm4, %v2033_v61, %v6602_v0  ;;  %v4643_v53 = vrot.slane %v2087_v29, 9  ;;  %v2240_v0 = vrot.slane %v6604_v22, 5 }
 0x259   : > { %v3843_v34 = vadd.f32 %v3778_v5, %v3594_v18  ;;  %v1638_v5 = vrot.slane %v5337_v47, 5  ;;  %v3897_v61 = vunpack.c.l.b16 %v2038_v33  ;;  %v2066_v33 = vor.u32 %v2065_v40, %v2061_v32 }
 0x25a   : > { %v4344_v63 = vadd.f32 %v6468_v12, %v4308_v30  ;;  %5026 = vmatmul.msk.bf16.gmra.mxu3 %vm2317_vm5, %v3914_v49  ;;  %v1637_v30 = vrot.slane %v1635_v20, 4  ;;  %v2238_v51 = vsel %vm5750_vm8, %v4643_v53, %v2237_v16  ;;  %v2241_v18 = vsel %vm5750_vm8, %v2239_v52, %v2240_v0 }
 0x25c   : > { %v5148_v21 = vpack.c.bf16 %v4344_v63, %v4343_v15  ;;  %v3898_v15 = vunpack.c.l.b16 %v2048_v19  ;;  %v2052_v63 = vrot.slane %v2050_v3, 4  ;;  %v4131_v3 = vunpack.c.l.b16 %v2241_v18 }
 0x25d   : > { %v4244_v43 = vpop.f32.mrf.mxu0  ;;  %v4011_v54 = vpop.f32.mrf.mxu3 }
 0x25e   : > { %5208 = vst [vmem:[%s6485_s7 + $0x20] sm:$0xff] %v5148_v21   ;;  %v3534_v49 = vpop.f32.mrf.mxu1  ;;  %v4076_v1 = vadd.f32 %v4011_v54, %v3843_v34  ;;  %v1688_v21 = vld [vmem:[#allocation2 + $0xd4] sm:$0x1]  ;;  %v3915_v29 = vpack.c.b16 %v3898_v15, %v3897_v61  ;;  %v4130_v34 = vunpack.c.l.b16 %v2238_v51  ;;  %v2056_v16 = vor.u32 %v2055_v45, %v2052_v63  ;;  %v2088_v61 = vld [vmem:[#allocation2 + $0xcc] sm:$0xe] }
 0x25f   : > { %v2069_v19 = vshll.u32 %v1688_v21, 16  ;;  %v5105_v45 = vld [vmem:[#allocation2 + $0xcc] sm:$0xff]  ;;  %v4644_v40 = vrot.slane %v2088_v61, 9  ;;  %v2247_v51 = vrot.slane %v1688_v21, 5 }
 0x260   : > { %5050 = vmatmul.msk.bf16.gmra.mxu0 %vm2317_vm5, %v4147_v6  ;;  %v3780_v26 = vpop.f32.mrf.mxu2  ;;  %4915 = vmatmul.msk.bf16.gmra.mxu1 %vm2317_vm5, %v3433_v28  ;;  %v1636_v6 = vsel %vm5750_vm8, %v4628_v38, %v1635_v20  ;;  %v1639_v28 = vsel %vm5750_vm8, %v1637_v30, %v1638_v5  ;;  %v4309_v10 = vadd.f32 %v4244_v43, %v4076_v1  ;;  %v2057_v43 = vrot.slane %v2056_v16, 4 }
 0x261   : > { %v3844_v27 = vadd.f32 %v3780_v26, %v3595_v37  ;;  %v3417_v31 = vunpack.c.l.b16 %v1636_v6  ;;  %v3418_v59 = vunpack.c.l.b16 %v1639_v28  ;;  %v2067_v26 = vrot.slane %v2066_v33, 4 }
 0x262   : > { %v4345_v37 = vadd.f32 %v6468_v12, %v4309_v10  ;;  %v2071_v53 = vrot.slane %v2069_v19, 5  ;;  %v4148_v52 = vpack.c.b16 %v4131_v3, %v4130_v34  ;;  %v2244_v5 = vrot.slane %v6621_v9, 5 }
 0x263   : > { %v3434_v38 = vpack.c.b16 %v3418_v59, %v3417_v31  ;;  %v2062_v15 = vsel %vm5555_vm4, %v2057_v43, %v2061_v32 }
 0x264   : > { %v2072_v63 = vsel %vm5555_vm4, %v2067_v26, %v2071_v53  ;;  %v2246_v9 = vrot.slane %v2244_v5, 4  ;;  %v3899_v18 = vunpack.c.l.b16 %v2062_v15  ;;  %v2245_v39 = vsel %vm5750_vm8, %v4644_v40, %v2244_v5 }
 0x265   : > { %v4246_v13 = vpop.f32.mrf.mxu0  ;;  %v4013_v22 = vpop.f32.mrf.mxu3  ;;  %5003 = vmatmul.msk.bf16.gmra.mxu2 %vm2317_vm5, %v5104_v55  ;;  %v3596_v55 = vadd.f32 %v3534_v49, %v6112_v58  ;;  %v3900_v6 = vunpack.c.l.b16 %v2072_v63  ;;  %v4132_v34 = vunpack.c.l.b16 %v2245_v39 }
 0x266   : > { %v4077_v54 = vadd.f32 %v4013_v22, %v3844_v27  ;;  %v3536_v4 = vpop.f32.mrf.mxu1 }
 0x267   : > { %v3597_v58 = vadd.f32 %v3536_v4, %v6123_v44  ;;  %v2248_v44 = vsel %vm5750_vm8, %v2246_v9, %v2247_v51 }
 0x268   : > { %v4310_v56 = vadd.f32 %v4246_v13, %v4077_v54  ;;  %v3783_v7 = vpop.f32.mrf.mxu2  ;;  %v4133_v16 = vunpack.c.l.b16 %v2248_v44 }
 0x269   : > { %v3845_v1 = vadd.f32 %v3783_v7, %v3596_v55 }
 0x26a   : > { %v4346_v20 = vadd.f32 %v6468_v12, %v4310_v56  ;;  %5027 = vmatmul.msk.bf16.gmra.mxu3 %vm2317_vm5, %v3915_v29  ;;  %v3916_v29 = vpack.c.b16 %v3900_v6, %v3899_v18  ;;  %v4149_v11 = vpack.c.b16 %v4133_v16, %v4132_v34 }
 0x26c   : > { %v5153_v0 = vpack.c.bf16 %v4346_v20, %v4345_v37 }
 0x26d   : > { %v4249_v30 = vpop.f32.mrf.mxu0  ;;  %v4016_v47 = vpop.f32.mrf.mxu3 }
 0x26e   : > { %5209 = vst [vmem:[%s6485_s7 + $0x28] sm:$0xff] %v5153_v0   ;;  %v3539_v27 = vpop.f32.mrf.mxu1  ;;  %v4078_v13 = vadd.f32 %v4016_v47, %v3845_v1 }
 0x26f   : > { %v3598_v7 = vadd.f32 %v3539_v27, %v6140_v25 }
 0x270   : > { %5051 = vmatmul.msk.bf16.gmra.mxu0 %vm2317_vm5, %v4148_v52  ;;  %v3785_v49 = vpop.f32.mrf.mxu2  ;;  %4916 = vmatmul.msk.bf16.gmra.mxu1 %vm2317_vm5, %v3434_v38  ;;  %v4311_v10 = vadd.f32 %v4249_v30, %v4078_v13 }
 0x271   : > { %v3846_v22 = vadd.f32 %v3785_v49, %v3597_v58 }
 0x272   : > { %v4347_v19 = vadd.f32 %v6468_v12, %v4311_v10 }
 0x275   : > { %v4251_v28 = vpop.f32.mrf.mxu0  ;;  %v4018_v32 = vpop.f32.mrf.mxu3  ;;  %5004 = vmatmul.msk.bf16.gmra.mxu2 %vm2317_vm5, %v5105_v45 }
 0x276   : > { %v4079_v54 = vadd.f32 %v4018_v32, %v3846_v22  ;;  %v3541_v4 = vpop.f32.mrf.mxu1 }
 0x277   : > { %v3599_v43 = vadd.f32 %v3541_v4, %v6158_v41 }
 0x278   : > { %v4312_v21 = vadd.f32 %v4251_v28, %v4079_v54  ;;  %v3788_v33 = vpop.f32.mrf.mxu2 }
 0x279   : > { %v3847_v37 = vadd.f32 %v3788_v33, %v3598_v7 }
 0x27a   : > { %v4348_v56 = vadd.f32 %v6468_v12, %v4312_v21  ;;  %5028 = vmatmul.msk.bf16.gmra.mxu3 %vm2317_vm5, %v3916_v29 }
 0x27c   : > { %v5158_v3 = vpack.c.bf16 %v4348_v56, %v4347_v19 }
 0x27d   : > { %v4254_v31 = vpop.f32.mrf.mxu0  ;;  %v4021_v59 = vpop.f32.mrf.mxu3 }
 0x27e   : > { %5210 = vst [vmem:[%s6485_s7 + $0x30] sm:$0xff] %v5158_v3   ;;  %v3544_v20 = vpop.f32.mrf.mxu1  ;;  %v4080_v53 = vadd.f32 %v4021_v59, %v3847_v37 }
 0x27f   : > { %v3600_v15 = vadd.f32 %v3544_v20, %v6175_v14 }
 0x280   : > { %5052 = vmatmul.msk.bf16.gmra.mxu0 %vm2317_vm5, %v4149_v11  ;;  %v3790_v26 = vpop.f32.mrf.mxu2  ;;  %v4313_v38 = vadd.f32 %v4254_v31, %v4080_v53 }
 0x281   : > { %v3848_v0 = vadd.f32 %v3790_v26, %v3599_v43 }
 0x282   : > { %v4349_v1 = vadd.f32 %v6468_v12, %v4313_v38 }
 0x285   : > { %v4256_v55 = vpop.f32.mrf.mxu0  ;;  %v4023_v52 = vpop.f32.mrf.mxu3 }
 0x286   : > { %v4081_v30 = vadd.f32 %v4023_v52, %v3848_v0  ;;  %v3546_v47 = vpop.f32.mrf.mxu1 }
 0x287   : > { %v3601_v45 = vadd.f32 %v3546_v47, %v6190_v50 }
 0x288   : > { %v4314_v25 = vadd.f32 %v4256_v55, %v4081_v30  ;;  %v3793_v5 = vpop.f32.mrf.mxu2 }
 0x289   : > { %v3849_v58 = vadd.f32 %v3793_v5, %v3600_v15 }
 0x28a   : > { %v4350_v27 = vadd.f32 %v6468_v12, %v4314_v25 }
 0x28c   : > { %v5163_v61 = vpack.c.bf16 %v4350_v27, %v4349_v1 }
 0x28d   : > { %v4259_v63 = vpop.f32.mrf.mxu0  ;;  %v4026_v41 = vpop.f32.mrf.mxu3 }
 0x28e   : > { %5211 = vst [vmem:[%s6485_s7 + $0x38] sm:$0xff] %v5163_v61   ;;  %v3549_v49 = vpop.f32.mrf.mxu1  ;;  %v4082_v9 = vadd.f32 %v4026_v41, %v3849_v58 }
 0x28f   : > { %v3602_v54 = vadd.f32 %v3549_v49, %v6206_v24 }
 0x290   : > { %v3795_v40 = vpop.f32.mrf.mxu2  ;;  %v4315_v18 = vadd.f32 %v4259_v63, %v4082_v9 }
 0x291   : > { %v3850_v51 = vadd.f32 %v3795_v40, %v3601_v45 }
 0x292   : > { %v4351_v14 = vadd.f32 %v6468_v12, %v4315_v18 }
 0x295   : > { %v4261_v13 = vpop.f32.mrf.mxu0  ;;  %v4028_v22 = vpop.f32.mrf.mxu3 }
 0x296   : > { %v4083_v6 = vadd.f32 %v4028_v22, %v3850_v51  ;;  %v3551_v28 = vpop.f32.mrf.mxu1 }
 0x297   : > { %v3603_v34 = vadd.f32 %v3551_v28, %v6224_v62 }
 0x298   : > { %v4316_v32 = vadd.f32 %v4261_v13, %v4083_v6  ;;  %v3798_v39 = vpop.f32.mrf.mxu2 }
 0x299   : > { %v3851_v4 = vadd.f32 %v3798_v39, %v3602_v54 }
 0x29a   : > { %v4352_v44 = vadd.f32 %v6468_v12, %v4316_v32 }
 0x29c   : > { %v5168_v10 = vpack.c.bf16 %v4352_v44, %v4351_v14 }
 0x29d   : > { %v4264_v29 = vpop.f32.mrf.mxu0  ;;  %v4031_v50 = vpop.f32.mrf.mxu3 }
 0x29e   : > { %5212 = vst [vmem:[%s6485_s7 + $0x40] sm:$0xff] %v5168_v10   ;;  %v3554_v21 = vpop.f32.mrf.mxu1  ;;  %v4084_v33 = vadd.f32 %v4031_v50, %v3851_v4 }
 0x29f   : > { %v3604_v26 = vadd.f32 %v3554_v21, %v6241_v46 }
 0x2a0   : > { %v3800_v16 = vpop.f32.mrf.mxu2  ;;  %v4317_v7 = vadd.f32 %v4264_v29, %v4084_v33 }
 0x2a1   : > { %v3852_v19 = vadd.f32 %v3800_v16, %v3603_v34 }
 0x2a2   : > { %v4353_v24 = vadd.f32 %v6468_v12, %v4317_v7 }
 0x2a5   : > { %v4266_v56 = vpop.f32.mrf.mxu0  ;;  %v4033_v3 = vpop.f32.mrf.mxu3 }
 0x2a6   : > { %v4085_v11 = vadd.f32 %v4033_v3, %v3852_v19  ;;  %v3556_v31 = vpop.f32.mrf.mxu1 }
 0x2a7   : > { %v3605_v52 = vadd.f32 %v3556_v31, %v6256_v36 }
 0x2a8   : > { %v4318_v59 = vadd.f32 %v4266_v56, %v4085_v11  ;;  %v3803_v37 = vpop.f32.mrf.mxu2 }
 0x2a9   : > { %v3853_v0 = vadd.f32 %v3803_v37, %v3604_v26 }
 0x2aa   : > { %v4354_v20 = vadd.f32 %v6468_v12, %v4318_v59 }
 0x2ac   : > { %v5173_v43 = vpack.c.bf16 %v4354_v20, %v4353_v24 }
 0x2ad   : > { %v4269_v53 = vpop.f32.mrf.mxu0  ;;  %v4036_v62 = vpop.f32.mrf.mxu3 }
 0x2ae   : > { %5213 = vst [vmem:[%s6485_s7 + $0x48] sm:$0xff] %v5173_v43   ;;  %v3559_v55 = vpop.f32.mrf.mxu1  ;;  %v4086_v30 = vadd.f32 %v4036_v62, %v3853_v0 }
 0x2af   : > { %v3606_v49 = vadd.f32 %v3559_v55, %v6272_v17 }
 0x2b0   : > { %v3805_v38 = vpop.f32.mrf.mxu2  ;;  %v4319_v1 = vadd.f32 %v4269_v53, %v4086_v30 }
 0x2b1   : > { %v3854_v47 = vadd.f32 %v3805_v38, %v3605_v52 }
 0x2b2   : > { %v4355_v46 = vadd.f32 %v6468_v12, %v4319_v1 }
 0x2b5   : > { %v4271_v25 = vpop.f32.mrf.mxu0  ;;  %v4038_v5 = vpop.f32.mrf.mxu3 }
 0x2b6   : > { %v4087_v27 = vadd.f32 %v4038_v5, %v3854_v47  ;;  %v3561_v61 = vpop.f32.mrf.mxu1 }
 0x2b7   : > { %v3607_v51 = vadd.f32 %v3561_v61, %v6290_v8 }
 0x2b8   : > { %v4320_v15 = vadd.f32 %v4271_v25, %v4087_v27  ;;  %v3808_v63 = vpop.f32.mrf.mxu2 }
 0x2b9   : > { %v3855_v40 = vadd.f32 %v3808_v63, %v3606_v49 }
 0x2ba   : > { %v4356_v41 = vadd.f32 %v6468_v12, %v4320_v15 }
 0x2bc   : > { %v5178_v58 = vpack.c.bf16 %v4356_v41, %v4355_v46 }
 0x2bd   : > { %v4274_v45 = vpop.f32.mrf.mxu0  ;;  %v4041_v36 = vpop.f32.mrf.mxu3 }
 0x2be   : > { %5214 = vst [vmem:[%s6485_s7 + $0x50] sm:$0xff] %v5178_v58   ;;  %v3564_v9 = vpop.f32.mrf.mxu1  ;;  %v4088_v22 = vadd.f32 %v4041_v36, %v3855_v40 }
 0x2bf   : > { %v3608_v50 = vadd.f32 %v3564_v9, %v6309_v42  ;;  %v6698_v42 = vld [vmem:[%s6760_s3] ss:$0 sm:$0xff] }
 0x2c0   : > { %v3810_v13 = vpop.f32.mrf.mxu2  ;;  %v4321_v32 = vadd.f32 %v4274_v45, %v4088_v22 }
 0x2c1   : > { %v3856_v18 = vadd.f32 %v3810_v13, %v3607_v51 }
 0x2c2   : > { %v4357_v17 = vadd.f32 %v6468_v12, %v4321_v32 }
 0x2c5   : > { %v4276_v6 = vpop.f32.mrf.mxu0  ;;  %v4043_v28 = vpop.f32.mrf.mxu3 }
 0x2c6   : > { %v4089_v39 = vadd.f32 %v4043_v28, %v3856_v18  ;;  %v3566_v14 = vpop.f32.mrf.mxu1 }
 0x2c7   : > { %v3609_v16 = vadd.f32 %v3566_v14, %v6325_v23 }
 0x2c8   : > { %v4322_v44 = vadd.f32 %v4276_v6, %v4089_v39  ;;  %v3813_v10 = vpop.f32.mrf.mxu2 }
 0x2c9   : > { %v3857_v21 = vadd.f32 %v3813_v10, %v3608_v50 }
 0x2ca   : > { %v4358_v54 = vadd.f32 %v6468_v12, %v4322_v44 }
 0x2cc   : > { %v5183_v29 = vpack.c.bf16 %v4358_v54, %v4357_v17 }
 0x2cd   : > { %v4279_v4 = vpop.f32.mrf.mxu0  ;;  %v4046_v8 = vpop.f32.mrf.mxu3 }
 0x2ce   : > { %5215 = vst [vmem:[%s6485_s7 + $0x58] sm:$0xff] %v5183_v29   ;;  %v3569_v34 = vpop.f32.mrf.mxu1  ;;  %v4090_v19 = vadd.f32 %v4046_v8, %v3857_v21  ;;  %v6775_v29 = vld [vmem:[#allocation9_spill] sm:$0xff] }
 0x2cf   : > { %v3610_v43 = vadd.f32 %v3569_v34, %v6342_v57 }
 0x2d0   : > { %v3815_v33 = vpop.f32.mrf.mxu2  ;;  %v4323_v11 = vadd.f32 %v4279_v4, %v4090_v19 }
 0x2d1   : > { %v3858_v56 = vadd.f32 %v3815_v33, %v3609_v16 }
 0x2d2   : > { %v4359_v24 = vadd.f32 %v6698_v42, %v4323_v11 }
 0x2d5   : > { %v4281_v3 = vpop.f32.mrf.mxu0  ;;  %v4048_v7 = vpop.f32.mrf.mxu3 }
 0x2d6   : > { %v4091_v31 = vadd.f32 %v4048_v7, %v3858_v56  ;;  %v3571_v59 = vpop.f32.mrf.mxu1 }
 0x2d7   : > { %v3611_v55 = vadd.f32 %v3571_v59, %v6366_v2 }
 0x2d8   : > { %v4324_v12 = vadd.f32 %v4281_v3, %v4091_v31  ;;  %v3818_v37 = vpop.f32.mrf.mxu2 }
 0x2d9   : > { %v3859_v62 = vadd.f32 %v3818_v37, %v3610_v43 }
 0x2da   : > { %v4360_v23 = vadd.f32 %v6698_v42, %v4324_v12 }
 0x2dc   : > { %v5188_v20 = vpack.c.bf16 %v4360_v23, %v4359_v24 }
 0x2dd   : > { %v4284_v26 = vpop.f32.mrf.mxu0  ;;  %v4051_v53 = vpop.f32.mrf.mxu3 }
 0x2de   : > { %5216 = vst [vmem:[%s6485_s7 + $0x60] sm:$0xff] %v5188_v20   ;;  %v3574_v0 = vpop.f32.mrf.mxu1  ;;  %v4092_v38 = vadd.f32 %v4051_v53, %v3859_v62 }
 0x2df   : > { %v3612_v41 = vadd.f32 %v3574_v0, %v6379_v48 }
 0x2e0   : > { %v3820_v52 = vpop.f32.mrf.mxu2  ;;  %v4325_v5 = vadd.f32 %v4284_v26, %v4092_v38 }
 0x2e1   : > { %v3860_v30 = vadd.f32 %v3820_v52, %v3611_v55 }
 0x2e2   : > { %v4361_v57 = vadd.f32 %v6698_v42, %v4325_v5 }
 0x2e5   : > { %v4286_v47 = vpop.f32.mrf.mxu0  ;;  %v4053_v25 = vpop.f32.mrf.mxu3 }
 0x2e6   : > { %v4093_v1 = vadd.f32 %v4053_v25, %v3860_v30  ;;  %v3576_v15 = vpop.f32.mrf.mxu1 }
 0x2e7   : > { %v3613_v45 = vadd.f32 %v3576_v15, %v6399_v60 }
 0x2e8   : > { %v4326_v27 = vadd.f32 %v4286_v47, %v4093_v1  ;;  %v3823_v61 = vpop.f32.mrf.mxu2 }
 0x2e9   : > { %v3861_v49 = vadd.f32 %v3823_v61, %v3612_v41 }
 0x2ea   : > { %v4362_v63 = vadd.f32 %v6698_v42, %v4326_v27 }
 0x2ec   : > { %v5193_v46 = vpack.c.bf16 %v4362_v63, %v4361_v57 }
 0x2ed   : > { %v4289_v58 = vpop.f32.mrf.mxu0  ;;  %v4056_v2 = vpop.f32.mrf.mxu3 }
 0x2ee   : > { %5217 = vst [vmem:[%s6485_s7 + $0x68] sm:$0xff] %v5193_v46   ;;  %v4094_v40 = vadd.f32 %v4056_v2, %v3861_v49  ;;  %v3579_v51 = vpop.f32.mrf.mxu1 }
 0x2ef   : > { %v3614_v44 = vadd.f32 %v3579_v51, %v6412_v35 }
 0x2f0   : > { %v3825_v36 = vpop.f32.mrf.mxu2  ;;  %v4327_v18 = vadd.f32 %v4289_v58, %v4094_v40 }
 0x2f1   : > { %v3862_v9 = vadd.f32 %v3825_v36, %v3613_v45 }
 0x2f2   : > { %v4363_v48 = vadd.f32 %v6698_v42, %v4327_v18 }
 0x2f5   : > { %v4291_v13 = vpop.f32.mrf.mxu0  ;;  %v4058_v22 = vpop.f32.mrf.mxu3 }
 0x2f6   : > { %v4095_v6 = vadd.f32 %v4058_v22, %v3862_v9  ;;  %v3581_v60 = vpop.f32.mrf.mxu1 }
 0x2f7   : > { %v3615_v50 = vadd.f32 %v3581_v60, %v6775_v29 }
 0x2f8   : > { %v4328_v28 = vadd.f32 %v4291_v13, %v4095_v6  ;;  %v3828_v32 = vpop.f32.mrf.mxu2 }
 0x2f9   : > { %v3863_v54 = vadd.f32 %v3828_v32, %v3614_v44 }
 0x2fa   : > { %v4364_v39 = vadd.f32 %v6698_v42, %v4328_v28 }
 0x2fc   : > { %v5198_v14 = vpack.c.bf16 %v4364_v39, %v4363_v48 }
 0x2fd   : > { %v4294_v10 = vpop.f32.mrf.mxu0  ;;  %v4061_v17 = vpop.f32.mrf.mxu3 }
 0x2fe   : > { %5218 = vst [vmem:[%s6485_s7 + $0x70] sm:$0xff] %v5198_v14   ;;  %v4096_v8 = vadd.f32 %v4061_v17, %v3863_v54 }
 0x300   : > { %v3830_v4 = vpop.f32.mrf.mxu2  ;;  %v4329_v16 = vadd.f32 %v4294_v10, %v4096_v8 }
 0x301   : > { %v3864_v21 = vadd.f32 %v3830_v4, %v3615_v50 }
 0x302   : > { %v4365_v56 = vadd.f32 %v6698_v42, %v4329_v16 }
 0x305   : > { %v4063_v34 = vpop.f32.mrf.mxu3  ;;  %v4296_v35 = vpop.f32.mrf.mxu0 }
 0x306   : > { %v4097_v33 = vadd.f32 %v4063_v34, %v3864_v21 }
 0x308   : > { %v4330_v19 = vadd.f32 %v4296_v35, %v4097_v33 }
 0x30a   : > { %v4366_v3 = vadd.f32 %v6698_v42, %v4330_v19 }
 0x30c   : > { %v5203_v7 = vpack.c.bf16 %v4366_v3, %v4365_v56 }
 0x30e   : > { %5219 = vst [vmem:[%s6485_s7 + $0x78] sm:$0xff] %v5203_v7  }
 0x30f   : > { %5366 = shalt.err (!%p5363_p5)
}
 0x310   : > { %s5419_s11 = smov 64   ;;  %s5420_s7 = smov 4  }
 0x311   : > { %5228 = dma.vmem_to_hbm [thread:$0]  (%p5486_p4), %s4448_s14, 2048, %s4450_s21, %s4432_s18, %s5419_s11, %s5419_s11, %s5420_s7  }
 0x312 PF: > { %p5234_p6 = scmp.ge.s32.totalorder %s5417_s20, 2  ;;  %s4464_s8 = sand.u32 1, %s5397_s15  }
 0x313   : > { %s4465_s9 = scalar_lea.sflag [#allocation4], %s4464_s8 }
 0x314   : > { %p5231_p7 = pnand %p5234_p6, %p5493_p8 }
 0x316   : > { %p5232_p9 = pneg %p5231_p7 }
 0x318   : > { %5392 = dma.done.wait (%p5232_p9), %s4465_s9, 2048  }
 0x319   : > { %5394 = vsyncadd (%p5232_p9), %s4465_s9, 4294965248  ;;  %s17_s20 = sadd.s32 1, %s5417_s20   ;;  %s6776_s15 = smov %s5401_s16 }
 0x31a   : > { %p14_p10 = scmp.ge.s32.totalorder %s17_s20, 4   ;;  %s6777_s16 = smov %s5405_s17 }
 0x31b   : > { %s6778_s17 = smov %s5499_s28  ;;  %s6779_s18 = smov %s5413_s19 }
 0x31c   : > { %s6780_s19 = smov %s6782_s23  ;;  %16 = sbr.rel (!%p14_p10) target bundleno = 4 (0x4), region = 84 }
 0x321   :  { %4471 = vsyncpa [#allocation4], 1 }
 0x322   :  { %4473 = vsyncpa [#allocation4 + $0x1], 1 }

</bundles_post_ra>
